<compile_context>
chip_gen: v6e
topology: v6e:2x2x1
jax: 0.10.0
libtpu: 0.0.40
codegen_flags: <defaults>
</compile_context>

<pallas_src>
import math

import jax
import jax.numpy as jnp
from jax.experimental import pallas as pl
from jax.experimental.pallas import tpu as pltpu


# Supported candidate ops: (kernel_size, dilation); skip/none are param-free.
OP_SPECS = {
    'skip_connect': None,
    'none': None,
    'conv1x1': dict(k=1, dil=1),
    'conv3x3': dict(k=3, dil=1),
    'dil_conv3x3': dict(k=3, dil=2),
}


# ---------------------------------------------------------------------------
# Fused Cell kernel (built per genotype / shape at trace time)
# ---------------------------------------------------------------------------

def _make_cell_kernel(op_descs, H, W, C, maxpad, flag):
    """Build the fused Cell kernel.

    op_descs: list of dicts {'kind': 'conv'|'skip'|'none', 'index', 'k', 'dil',
    'pad'}; each 'conv' op consumes two kernel inputs (w_flat, bias) in order.
    """
    has_spatial = any(d['kind'] == 'conv' and d['k'] > 1 for d in op_descs)
    n_conv = sum(1 for d in op_descs if d['kind'] == 'conv')

    def kernel(*args):
        # ---- unpack: inputs..., output, scratch... -----------------------
        x_ref = args[0]
        pos = 1
        wb_refs = []
        for _ in range(n_conv):
            wb_refs.append((args[pos], args[pos + 1]))
            pos += 2
        out_ref = args[pos]
        pos += 1
        pad_ref = None
        up_ref = None
        if has_spatial:
            pad_ref = args[pos]
            pos += 1
        if flag == 1:
            up_ref = args[pos]
            pos += 1

        if has_spatial:
            # Zero once per grid step: the untouched halo region then provides
            # the zero-padding for every spatial conv below.
            pad_ref[...] = jnp.zeros_like(pad_ref)

        # ---- candidate ops ------------------------------------------------
        x = x_ref[0].astype(jnp.float32)                       # (H, W, C)
        states = [x]                                           # 'none' -> None
        conv_i = 0
        for d in op_descs:
            h = states[d['index']]
            if d['kind'] == 'none':
                states.append(None)
                continue
            if d['kind'] == 'skip':
                states.append(h)                               # alias, no copy
                continue
            if h is None:                                      # op fed by a 'none'
                h = jnp.zeros((H, W, C), jnp.float32)
            w_ref, b_ref = wb_refs[conv_i]
            conv_i += 1
            K, dil, p = d['k'], d['dil'], d['pad']
            if K == 1:
                cols = h.reshape(H * W, C)
            else:
                # Write state into the center of the zero-haloed scratch, then
                # gather the K*K taps and form the im2col matrix once.
                pad_ref[maxpad:maxpad + H, maxpad:maxpad + W, :] = h
                xp = pad_ref[...]                              # (Hp, Wp, C)
                taps = []
                for ky in range(K):
                    for kx in range(K):
                        y0 = maxpad - p + ky * dil
                        x0 = maxpad - p + kx * dil
                        taps.append(xp[y0:y0 + H, x0:x0 + W, :].reshape(H * W, C))
                cols = jnp.concatenate(taps, axis=-1)          # (H*W, K*K*C)
            # Single MXU matmul per conv: bf16 operands, f32 accumulation.
            acc = jnp.dot(cols.astype(jnp.bfloat16), w_ref[...],
                          preferred_element_type=jnp.float32)
            y = jnp.maximum(acc + b_ref[...], 0.0)             # f32 epilogue
            states.append(y.reshape(H, W, C))

        # ---- sum over concat = range(0, steps+1) ---------------------------
        s = None
        for st in states:
            if st is None:
                continue
            s = st if s is None else s + st

        if flag == 0:
            out_ref[0] = s.astype(out_ref.dtype)
            return

        # ---- 2x bilinear upsample (align_corners=False), in VMEM -----------
        # Edge-clamped copy of s in scratch (corners handled by write order).
        up_ref[1:H + 1, 1:W + 1, :] = s
        up_ref[0:1, 1:W + 1, :] = s[0:1, :, :]
        up_ref[H + 1:H + 2, 1:W + 1, :] = s[H - 1:H, :, :]
        up_ref[:, 0:1, :] = up_ref[:, 1:2, :]
        up_ref[:, W + 1:W + 2, :] = up_ref[:, W:W + 1, :]
        xp = up_ref[...]                                       # (H+2, W+2, C)
        r0 = 0.25 * xp[0:H, :, :] + 0.75 * xp[1:H + 1, :, :]   # even out rows
        r1 = 0.75 * xp[1:H + 1, :, :] + 0.25 * xp[2:H + 2, :, :]  # odd rows
        e00 = 0.25 * r0[:, 0:W, :] + 0.75 * r0[:, 1:W + 1, :]
        e01 = 0.75 * r0[:, 1:W + 1, :] + 0.25 * r0[:, 2:W + 2, :]
        e10 = 0.25 * r1[:, 0:W, :] + 0.75 * r1[:, 1:W + 1, :]
        e11 = 0.75 * r1[:, 1:W + 1, :] + 0.25 * r1[:, 2:W + 2, :]
        # Interleaved output layout (H, 2, W, 2*C): the host reshape to
        # (2H, 2W, C) is a free contiguous view.
        out_ref[0, :, 0, :, :] = jnp.concatenate([e00, e01], axis=-1).astype(out_ref.dtype)
        out_ref[0, :, 1, :, :] = jnp.concatenate([e10, e11], axis=-1).astype(out_ref.dtype)

    return kernel


# ---------------------------------------------------------------------------
# Cell (mirrors Ada_LSN/model.py::Cell)
# ---------------------------------------------------------------------------

class CellPallas:
    def __init__(self, genotype, C_prev, C_curr, flag=0, key=None):
        self.flag = flag
        self.C_prev = C_prev
        self.C_curr = C_curr
        op_names, indices = zip(*genotype)
        assert len(op_names) == len(indices)
        self._steps = len(op_names)
        self._concat = range(0, len(op_names) + 1)       # matches PyTorch Cell

        if key is None:
            key = jax.random.PRNGKey(0)
        keys = jax.random.split(key, self._steps)

        self.op_descs = []
        self.weights = []   # per conv op, in order: (w_flat bf16 (K*K*C, C), b f32 (1, C))
        for name, index, k in zip(op_names, indices, keys):
            spec = OP_SPECS[name]
            if spec is None:
                kind = 'skip' if name == 'skip_connect' else 'none'
                self.op_descs.append(dict(kind=kind, index=index, k=0, dil=0, pad=0))
                continue
            K, dil = spec['k'], spec['dil']
            pad = dil * (K // 2)
            fan_in = C_prev * K * K
            bound = 1.0 / math.sqrt(fan_in)              # PyTorch Conv2d default init range
            kw, kb = jax.random.split(k)
            w = jax.random.uniform(kw, (K, K, C_prev, C_prev), jnp.float32, -bound, bound)
            b = jax.random.uniform(kb, (C_prev,), jnp.float32, -bound, bound)
            # im2col row order = (ky, kx, cin); bf16 operands for the MXU,
            # accumulation stays f32 in the kernel.
            w_flat = w.reshape(K * K * C_prev, C_prev).astype(jnp.bfloat16)
            self.weights.append((w_flat, b.reshape(1, C_prev)))
            self.op_descs.append(dict(kind='conv', index=index, k=K, dil=dil, pad=pad))
        self.maxpad = max([d['pad'] for d in self.op_descs] + [0])

    def __call__(self, x_nchw):
        N, C, H, W = x_nchw.shape
        assert C == self.C_prev
        x = jnp.transpose(x_nchw, (0, 2, 3, 1)).astype(jnp.float32)   # NCHW -> NHWC

        has_spatial = any(d['kind'] == 'conv' and d['k'] > 1 for d in self.op_descs)
        kernel = _make_cell_kernel(self.op_descs, H, W, C, self.maxpad, self.flag)

        flat_inputs = [x]
        in_specs = [pl.BlockSpec((1, H, W, C), lambda n: (n, 0, 0, 0))]
        for (w_flat, b) in self.weights:
            flat_inputs += [w_flat, b]
            in_specs += [pl.BlockSpec(w_flat.shape, lambda n: (0, 0)),
                         pl.BlockSpec(b.shape, lambda n: (0, 0))]

        scratch = []
        if has_spatial:
            Hp, Wp = H + 2 * self.maxpad, W + 2 * self.maxpad
            scratch.append(pltpu.VMEM((Hp, Wp, C), jnp.float32))      # zero-haloed states
        if self.flag == 1:
            scratch.append(pltpu.VMEM((H + 2, W + 2, C), jnp.float32))  # edge-clamped sum
            out_shape = jax.ShapeDtypeStruct((N, H, 2, W, 2 * C), jnp.float32)
            out_spec = pl.BlockSpec((1, H, 2, W, 2 * C), lambda n: (n, 0, 0, 0, 0))
        else:
            out_shape = jax.ShapeDtypeStruct((N, H, W, C), jnp.float32)
            out_spec = pl.BlockSpec((1, H, W, C), lambda n: (n, 0, 0, 0))

        out = pl.pallas_call(
            kernel,
            out_shape=out_shape,
            grid=(N,),
            in_specs=in_specs,
            out_specs=out_spec,
            scratch_shapes=scratch,
            compiler_params=pltpu.CompilerParams(
                dimension_semantics=("parallel",),        # N grid steps -> both v7x TCs
            ),
        )(*flat_inputs)

        if self.flag == 1:
            out = out.reshape(N, 2 * H, 2 * W, C)         # free view of interleaved layout
        return jnp.transpose(out, (0, 3, 1, 2))           # NHWC -> NCHW


# ---------------------------------------------------------------------------
# Example run
# ---------------------------------------------------------------------------

if __name__ == "__main__":
    key = jax.random.PRNGKey(0)
    kx, kp = jax.random.split(key)

    N, C, H, W = 2, 8, 16, 16
    genotype = [('conv1x1', 0), ('conv3x3', 1), ('skip_connect', 0), ('dil_conv3x3', 2)]

    x = jax.random.normal(kx, (N, C, H, W), dtype=jnp.float32)

    # flag=1 path: ops + sum + 2x bilinear upsample, fully fused.
    cell_up = CellPallas(genotype, C_prev=C, C_curr=C, flag=1, key=kp)
    out_up = jax.block_until_ready(cell_up(x))
    assert out_up.shape == (N, C, 2 * H, 2 * W), out_up.shape
    assert bool(jnp.all(jnp.isfinite(out_up)))

    # flag=0 path: ops + sum only.
    cell = CellPallas(genotype, C_prev=C, C_curr=C, flag=0, key=kp)
    out = jax.block_until_ready(cell(x))
    assert out.shape == (N, C, H, W), out.shape
    assert bool(jnp.all(jnp.isfinite(out)))

    print("KERNEL_OK")
</pallas_src>

<mosaic_0001>
module attributes {stable_mosaic.version = 11 : i64} {
  func.func @kernel(%arg0: i32, %arg1: memref<1x16x16x8xf32, #tpu.memory_space<vmem>>, %arg2: memref<8x8xbf16, #tpu.memory_space<vmem>>, %arg3: memref<1x8xf32, #tpu.memory_space<vmem>>, %arg4: memref<72x8xbf16, #tpu.memory_space<vmem>>, %arg5: memref<1x8xf32, #tpu.memory_space<vmem>>, %arg6: memref<72x8xbf16, #tpu.memory_space<vmem>>, %arg7: memref<1x8xf32, #tpu.memory_space<vmem>>, %arg8: memref<1x16x2x16x16xf32, #tpu.memory_space<vmem>>, %arg9: memref<20x20x8xf32, #tpu.memory_space<vmem>>, %arg10: memref<18x18x8xf32, #tpu.memory_space<vmem>>) attributes {dimension_semantics = [#tpu.dimension_semantics<parallel>], iteration_bounds = array<i64: 2>, scalar_prefetch = 0 : i64, scratch_operands = 2 : i64, tpu.core_type = #tpu.core_type<tc>, window_params = [{transform_indices = @transform_0, window_bounds = array<i64: 1, 16, 16, 8>}, {pipeline_mode = #tpu.pipeline_mode<synchronous>, transform_indices = @transform_1, window_bounds = array<i64: 8, 8>}, {pipeline_mode = #tpu.pipeline_mode<synchronous>, transform_indices = @transform_2, window_bounds = array<i64: 1, 8>}, {pipeline_mode = #tpu.pipeline_mode<synchronous>, transform_indices = @transform_3, window_bounds = array<i64: 72, 8>}, {pipeline_mode = #tpu.pipeline_mode<synchronous>, transform_indices = @transform_4, window_bounds = array<i64: 1, 8>}, {pipeline_mode = #tpu.pipeline_mode<synchronous>, transform_indices = @transform_5, window_bounds = array<i64: 72, 8>}, {pipeline_mode = #tpu.pipeline_mode<synchronous>, transform_indices = @transform_6, window_bounds = array<i64: 1, 8>}, {transform_indices = @transform_7, window_bounds = array<i64: 1, 16, 2, 16, 16>}]} {
    %cst = arith.constant 0.000000e+00 : f32
    %0 = vector.broadcast %cst : f32 to vector<20x20x8xf32>
    %c0 = arith.constant 0 : index
    %c0_0 = arith.constant 0 : index
    %c0_1 = arith.constant 0 : index
    %1 = vector.load %arg9[%c0, %c0_0, %c0_1] : memref<20x20x8xf32, #tpu.memory_space<vmem>>, vector<20x20x8xf32>
    tpu.vector_store %arg9[%c0, %c0_0, %c0_1], %0 {strides = array<i32>} : memref<20x20x8xf32, #tpu.memory_space<vmem>>, vector<20x20x8xf32>,
    %c0_2 = arith.constant 0 : index
    %c0_3 = arith.constant 0 : index
    %c0_4 = arith.constant 0 : index
    %c0_5 = arith.constant 0 : index
    %2 = vector.load %arg1[%c0_2, %c0_3, %c0_4, %c0_5] : memref<1x16x16x8xf32, #tpu.memory_space<vmem>>, vector<1x16x16x8xf32>
    %3 = vector.shape_cast %2 : vector<1x16x16x8xf32> to vector<16x16x8xf32>
    %4 = vector.shape_cast %3 : vector<16x16x8xf32> to vector<256x8xf32>
    %5 = arith.truncf %4 : vector<256x8xf32> to vector<256x8xbf16>
    %c0_6 = arith.constant 0 : index
    %c0_7 = arith.constant 0 : index
    %6 = vector.load %arg2[%c0_6, %c0_7] : memref<8x8xbf16, #tpu.memory_space<vmem>>, vector<8x8xbf16>
    %cst_8 = arith.constant dense<0.000000e+00> : vector<256x8xf32>
    %7 = tpu.matmul %5, %6, %cst_8 {dimension_numbers = #tpu.dot_dimension_numbers<[1], [0], [0], [1], [0, 0, 1, 1], [], []>} : vector<256x8xbf16>, vector<8x8xbf16>, vector<256x8xf32> -> vector<256x8xf32>
    %c0_9 = arith.constant 0 : index
    %c0_10 = arith.constant 0 : index
    %8 = vector.load %arg3[%c0_9, %c0_10] : memref<1x8xf32, #tpu.memory_space<vmem>>, vector<1x8xf32>
    %9 = vector.broadcast %8 : vector<1x8xf32> to vector<256x8xf32>
    %10 = arith.addf %7, %9 : vector<256x8xf32>
    %cst_11 = arith.constant 0.000000e+00 : f32
    %11 = vector.broadcast %cst_11 : f32 to vector<256x8xf32>
    %12 = arith.maximumf %10, %11 : vector<256x8xf32>
    %13 = vector.shape_cast %12 : vector<256x8xf32> to vector<16x16x8xf32>
    %c2 = arith.constant 2 : index
    %c2_12 = arith.constant 2 : index
    %c0_13 = arith.constant 0 : index
    %14 = vector.load %arg9[%c2, %c2_12, %c0_13] : memref<20x20x8xf32, #tpu.memory_space<vmem>>, vector<16x16x8xf32>
    tpu.vector_store %arg9[%c2, %c2_12, %c0_13], %13 {strides = array<i32>} : memref<20x20x8xf32, #tpu.memory_space<vmem>>, vector<16x16x8xf32>,
    %c0_14 = arith.constant 0 : index
    %c0_15 = arith.constant 0 : index
    %c0_16 = arith.constant 0 : index
    %15 = vector.load %arg9[%c0_14, %c0_15, %c0_16] : memref<20x20x8xf32, #tpu.memory_space<vmem>>, vector<20x20x8xf32>
    %16 = vector.extract_strided_slice %15 {offsets = [1, 1, 0], sizes = [16, 16, 8], strides = [1, 1, 1]} : vector<20x20x8xf32> to vector<16x16x8xf32>
    %17 = vector.shape_cast %16 : vector<16x16x8xf32> to vector<256x8xf32>
    %18 = vector.extract_strided_slice %15 {offsets = [1, 2, 0], sizes = [16, 16, 8], strides = [1, 1, 1]} : vector<20x20x8xf32> to vector<16x16x8xf32>
    %19 = vector.shape_cast %18 : vector<16x16x8xf32> to vector<256x8xf32>
    %20 = vector.extract_strided_slice %15 {offsets = [1, 3, 0], sizes = [16, 16, 8], strides = [1, 1, 1]} : vector<20x20x8xf32> to vector<16x16x8xf32>
    %21 = vector.shape_cast %20 : vector<16x16x8xf32> to vector<256x8xf32>
    %22 = vector.extract_strided_slice %15 {offsets = [2, 1, 0], sizes = [16, 16, 8], strides = [1, 1, 1]} : vector<20x20x8xf32> to vector<16x16x8xf32>
    %23 = vector.shape_cast %22 : vector<16x16x8xf32> to vector<256x8xf32>
    %24 = vector.extract_strided_slice %15 {offsets = [2, 2, 0], sizes = [16, 16, 8], strides = [1, 1, 1]} : vector<20x20x8xf32> to vector<16x16x8xf32>
    %25 = vector.shape_cast %24 : vector<16x16x8xf32> to vector<256x8xf32>
    %26 = vector.extract_strided_slice %15 {offsets = [2, 3, 0], sizes = [16, 16, 8], strides = [1, 1, 1]} : vector<20x20x8xf32> to vector<16x16x8xf32>
    %27 = vector.shape_cast %26 : vector<16x16x8xf32> to vector<256x8xf32>
    %28 = vector.extract_strided_slice %15 {offsets = [3, 1, 0], sizes = [16, 16, 8], strides = [1, 1, 1]} : vector<20x20x8xf32> to vector<16x16x8xf32>
    %29 = vector.shape_cast %28 : vector<16x16x8xf32> to vector<256x8xf32>
    %30 = vector.extract_strided_slice %15 {offsets = [3, 2, 0], sizes = [16, 16, 8], strides = [1, 1, 1]} : vector<20x20x8xf32> to vector<16x16x8xf32>
    %31 = vector.shape_cast %30 : vector<16x16x8xf32> to vector<256x8xf32>
    %32 = vector.extract_strided_slice %15 {offsets = [3, 3, 0], sizes = [16, 16, 8], strides = [1, 1, 1]} : vector<20x20x8xf32> to vector<16x16x8xf32>
    %33 = vector.shape_cast %32 : vector<16x16x8xf32> to vector<256x8xf32>
    %34 = tpu.concatenate %17, %19, %21, %23, %25, %27, %29, %31, %33 in 1 : vector<256x8xf32>, vector<256x8xf32>, vector<256x8xf32>, vector<256x8xf32>, vector<256x8xf32>, vector<256x8xf32>, vector<256x8xf32>, vector<256x8xf32>, vector<256x8xf32> -> vector<256x72xf32>
    %35 = arith.truncf %34 : vector<256x72xf32> to vector<256x72xbf16>
    %c0_17 = arith.constant 0 : index
    %c0_18 = arith.constant 0 : index
    %36 = vector.load %arg4[%c0_17, %c0_18] : memref<72x8xbf16, #tpu.memory_space<vmem>>, vector<72x8xbf16>
    %cst_19 = arith.constant dense<0.000000e+00> : vector<256x8xf32>
    %37 = tpu.matmul %35, %36, %cst_19 {dimension_numbers = #tpu.dot_dimension_numbers<[1], [0], [0], [1], [0, 0, 1, 1], [], []>} : vector<256x72xbf16>, vector<72x8xbf16>, vector<256x8xf32> -> vector<256x8xf32>
    %c0_20 = arith.constant 0 : index
    %c0_21 = arith.constant 0 : index
    %38 = vector.load %arg5[%c0_20, %c0_21] : memref<1x8xf32, #tpu.memory_space<vmem>>, vector<1x8xf32>
    %39 = vector.broadcast %38 : vector<1x8xf32> to vector<256x8xf32>
    %40 = arith.addf %37, %39 : vector<256x8xf32>
    %cst_22 = arith.constant 0.000000e+00 : f32
    %41 = vector.broadcast %cst_22 : f32 to vector<256x8xf32>
    %42 = arith.maximumf %40, %41 : vector<256x8xf32>
    %43 = vector.shape_cast %42 : vector<256x8xf32> to vector<16x16x8xf32>
    %c2_23 = arith.constant 2 : index
    %c2_24 = arith.constant 2 : index
    %c0_25 = arith.constant 0 : index
    %44 = vector.load %arg9[%c2_23, %c2_24, %c0_25] : memref<20x20x8xf32, #tpu.memory_space<vmem>>, vector<16x16x8xf32>
    tpu.vector_store %arg9[%c2_23, %c2_24, %c0_25], %43 {strides = array<i32>} : memref<20x20x8xf32, #tpu.memory_space<vmem>>, vector<16x16x8xf32>,
    %c0_26 = arith.constant 0 : index
    %c0_27 = arith.constant 0 : index
    %c0_28 = arith.constant 0 : index
    %45 = vector.load %arg9[%c0_26, %c0_27, %c0_28] : memref<20x20x8xf32, #tpu.memory_space<vmem>>, vector<20x20x8xf32>
    %46 = vector.extract_strided_slice %45 {offsets = [0, 0, 0], sizes = [16, 16, 8], strides = [1, 1, 1]} : vector<20x20x8xf32> to vector<16x16x8xf32>
    %47 = vector.shape_cast %46 : vector<16x16x8xf32> to vector<256x8xf32>
    %48 = vector.extract_strided_slice %45 {offsets = [0, 2, 0], sizes = [16, 16, 8], strides = [1, 1, 1]} : vector<20x20x8xf32> to vector<16x16x8xf32>
    %49 = vector.shape_cast %48 : vector<16x16x8xf32> to vector<256x8xf32>
    %50 = vector.extract_strided_slice %45 {offsets = [0, 4, 0], sizes = [16, 16, 8], strides = [1, 1, 1]} : vector<20x20x8xf32> to vector<16x16x8xf32>
    %51 = vector.shape_cast %50 : vector<16x16x8xf32> to vector<256x8xf32>
    %52 = vector.extract_strided_slice %45 {offsets = [2, 0, 0], sizes = [16, 16, 8], strides = [1, 1, 1]} : vector<20x20x8xf32> to vector<16x16x8xf32>
    %53 = vector.shape_cast %52 : vector<16x16x8xf32> to vector<256x8xf32>
    %54 = vector.extract_strided_slice %45 {offsets = [2, 2, 0], sizes = [16, 16, 8], strides = [1, 1, 1]} : vector<20x20x8xf32> to vector<16x16x8xf32>
    %55 = vector.shape_cast %54 : vector<16x16x8xf32> to vector<256x8xf32>
    %56 = vector.extract_strided_slice %45 {offsets = [2, 4, 0], sizes = [16, 16, 8], strides = [1, 1, 1]} : vector<20x20x8xf32> to vector<16x16x8xf32>
    %57 = vector.shape_cast %56 : vector<16x16x8xf32> to vector<256x8xf32>
    %58 = vector.extract_strided_slice %45 {offsets = [4, 0, 0], sizes = [16, 16, 8], strides = [1, 1, 1]} : vector<20x20x8xf32> to vector<16x16x8xf32>
    %59 = vector.shape_cast %58 : vector<16x16x8xf32> to vector<256x8xf32>
    %60 = vector.extract_strided_slice %45 {offsets = [4, 2, 0], sizes = [16, 16, 8], strides = [1, 1, 1]} : vector<20x20x8xf32> to vector<16x16x8xf32>
    %61 = vector.shape_cast %60 : vector<16x16x8xf32> to vector<256x8xf32>
    %62 = vector.extract_strided_slice %45 {offsets = [4, 4, 0], sizes = [16, 16, 8], strides = [1, 1, 1]} : vector<20x20x8xf32> to vector<16x16x8xf32>
    %63 = vector.shape_cast %62 : vector<16x16x8xf32> to vector<256x8xf32>
    %64 = tpu.concatenate %47, %49, %51, %53, %55, %57, %59, %61, %63 in 1 : vector<256x8xf32>, vector<256x8xf32>, vector<256x8xf32>, vector<256x8xf32>, vector<256x8xf32>, vector<256x8xf32>, vector<256x8xf32>, vector<256x8xf32>, vector<256x8xf32> -> vector<256x72xf32>
    %65 = arith.truncf %64 : vector<256x72xf32> to vector<256x72xbf16>
    %c0_29 = arith.constant 0 : index
    %c0_30 = arith.constant 0 : index
    %66 = vector.load %arg6[%c0_29, %c0_30] : memref<72x8xbf16, #tpu.memory_space<vmem>>, vector<72x8xbf16>
    %cst_31 = arith.constant dense<0.000000e+00> : vector<256x8xf32>
    %67 = tpu.matmul %65, %66, %cst_31 {dimension_numbers = #tpu.dot_dimension_numbers<[1], [0], [0], [1], [0, 0, 1, 1], [], []>} : vector<256x72xbf16>, vector<72x8xbf16>, vector<256x8xf32> -> vector<256x8xf32>
    %c0_32 = arith.constant 0 : index
    %c0_33 = arith.constant 0 : index
    %68 = vector.load %arg7[%c0_32, %c0_33] : memref<1x8xf32, #tpu.memory_space<vmem>>, vector<1x8xf32>
    %69 = vector.broadcast %68 : vector<1x8xf32> to vector<256x8xf32>
    %70 = arith.addf %67, %69 : vector<256x8xf32>
    %cst_34 = arith.constant 0.000000e+00 : f32
    %71 = vector.broadcast %cst_34 : f32 to vector<256x8xf32>
    %72 = arith.maximumf %70, %71 : vector<256x8xf32>
    %73 = vector.shape_cast %72 : vector<256x8xf32> to vector<16x16x8xf32>
    %74 = arith.addf %3, %13 : vector<16x16x8xf32>
    %75 = arith.addf %74, %43 : vector<16x16x8xf32>
    %76 = arith.addf %75, %3 : vector<16x16x8xf32>
    %77 = arith.addf %76, %73 : vector<16x16x8xf32>
    %c1 = arith.constant 1 : index
    %c1_35 = arith.constant 1 : index
    %c0_36 = arith.constant 0 : index
    %78 = vector.load %arg10[%c1, %c1_35, %c0_36] : memref<18x18x8xf32, #tpu.memory_space<vmem>>, vector<16x16x8xf32>
    tpu.vector_store %arg10[%c1, %c1_35, %c0_36], %77 {strides = array<i32>} : memref<18x18x8xf32, #tpu.memory_space<vmem>>, vector<16x16x8xf32>,
    %79 = vector.extract_strided_slice %77 {offsets = [0, 0, 0], sizes = [1, 16, 8], strides = [1, 1, 1]} : vector<16x16x8xf32> to vector<1x16x8xf32>
    %c0_37 = arith.constant 0 : index
    %c1_38 = arith.constant 1 : index
    %c0_39 = arith.constant 0 : index
    %80 = vector.load %arg10[%c0_37, %c1_38, %c0_39] : memref<18x18x8xf32, #tpu.memory_space<vmem>>, vector<1x16x8xf32>
    tpu.vector_store %arg10[%c0_37, %c1_38, %c0_39], %79 {strides = array<i32>} : memref<18x18x8xf32, #tpu.memory_space<vmem>>, vector<1x16x8xf32>,
    %81 = vector.extract_strided_slice %77 {offsets = [15, 0, 0], sizes = [1, 16, 8], strides = [1, 1, 1]} : vector<16x16x8xf32> to vector<1x16x8xf32>
    %c17 = arith.constant 17 : index
    %c1_40 = arith.constant 1 : index
    %c0_41 = arith.constant 0 : index
    %82 = vector.load %arg10[%c17, %c1_40, %c0_41] : memref<18x18x8xf32, #tpu.memory_space<vmem>>, vector<1x16x8xf32>
    tpu.vector_store %arg10[%c17, %c1_40, %c0_41], %81 {strides = array<i32>} : memref<18x18x8xf32, #tpu.memory_space<vmem>>, vector<1x16x8xf32>,
    %c0_42 = arith.constant 0 : index
    %c1_43 = arith.constant 1 : index
    %c0_44 = arith.constant 0 : index
    %83 = vector.load %arg10[%c0_42, %c1_43, %c0_44] : memref<18x18x8xf32, #tpu.memory_space<vmem>>, vector<18x1x8xf32>
    %c0_45 = arith.constant 0 : index
    %c0_46 = arith.constant 0 : index
    %c0_47 = arith.constant 0 : index
    %84 = vector.load %arg10[%c0_45, %c0_46, %c0_47] : memref<18x18x8xf32, #tpu.memory_space<vmem>>, vector<18x1x8xf32>
    tpu.vector_store %arg10[%c0_45, %c0_46, %c0_47], %83 {strides = array<i32>} : memref<18x18x8xf32, #tpu.memory_space<vmem>>, vector<18x1x8xf32>,
    %c0_48 = arith.constant 0 : index
    %c16 = arith.constant 16 : index
    %c0_49 = arith.constant 0 : index
    %85 = vector.load %arg10[%c0_48, %c16, %c0_49] : memref<18x18x8xf32, #tpu.memory_space<vmem>>, vector<18x1x8xf32>
    %c0_50 = arith.constant 0 : index
    %c17_51 = arith.constant 17 : index
    %c0_52 = arith.constant 0 : index
    %86 = vector.load %arg10[%c0_50, %c17_51, %c0_52] : memref<18x18x8xf32, #tpu.memory_space<vmem>>, vector<18x1x8xf32>
    tpu.vector_store %arg10[%c0_50, %c17_51, %c0_52], %85 {strides = array<i32>} : memref<18x18x8xf32, #tpu.memory_space<vmem>>, vector<18x1x8xf32>,
    %c0_53 = arith.constant 0 : index
    %c0_54 = arith.constant 0 : index
    %c0_55 = arith.constant 0 : index
    %87 = vector.load %arg10[%c0_53, %c0_54, %c0_55] : memref<18x18x8xf32, #tpu.memory_space<vmem>>, vector<18x18x8xf32>
    %88 = vector.extract_strided_slice %87 {offsets = [0, 0, 0], sizes = [16, 18, 8], strides = [1, 1, 1]} : vector<18x18x8xf32> to vector<16x18x8xf32>
    %cst_56 = arith.constant 2.500000e-01 : f32
    %89 = vector.broadcast %cst_56 : f32 to vector<16x18x8xf32>
    %90 = arith.mulf %89, %88 : vector<16x18x8xf32>
    %91 = vector.extract_strided_slice %87 {offsets = [1, 0, 0], sizes = [16, 18, 8], strides = [1, 1, 1]} : vector<18x18x8xf32> to vector<16x18x8xf32>
    %cst_57 = arith.constant 7.500000e-01 : f32
    %92 = vector.broadcast %cst_57 : f32 to vector<16x18x8xf32>
    %93 = arith.mulf %92, %91 : vector<16x18x8xf32>
    %94 = arith.addf %90, %93 : vector<16x18x8xf32>
    %95 = vector.extract_strided_slice %87 {offsets = [1, 0, 0], sizes = [16, 18, 8], strides = [1, 1, 1]} : vector<18x18x8xf32> to vector<16x18x8xf32>
    %cst_58 = arith.constant 7.500000e-01 : f32
    %96 = vector.broadcast %cst_58 : f32 to vector<16x18x8xf32>
    %97 = arith.mulf %96, %95 : vector<16x18x8xf32>
    %98 = vector.extract_strided_slice %87 {offsets = [2, 0, 0], sizes = [16, 18, 8], strides = [1, 1, 1]} : vector<18x18x8xf32> to vector<16x18x8xf32>
    %cst_59 = arith.constant 2.500000e-01 : f32
    %99 = vector.broadcast %cst_59 : f32 to vector<16x18x8xf32>
    %100 = arith.mulf %99, %98 : vector<16x18x8xf32>
    %101 = arith.addf %97, %100 : vector<16x18x8xf32>
    %102 = vector.extract_strided_slice %94 {offsets = [0, 0, 0], sizes = [16, 16, 8], strides = [1, 1, 1]} : vector<16x18x8xf32> to vector<16x16x8xf32>
    %cst_60 = arith.constant 2.500000e-01 : f32
    %103 = vector.broadcast %cst_60 : f32 to vector<16x16x8xf32>
    %104 = arith.mulf %103, %102 : vector<16x16x8xf32>
    %105 = vector.extract_strided_slice %94 {offsets = [0, 1, 0], sizes = [16, 16, 8], strides = [1, 1, 1]} : vector<16x18x8xf32> to vector<16x16x8xf32>
    %cst_61 = arith.constant 7.500000e-01 : f32
    %106 = vector.broadcast %cst_61 : f32 to vector<16x16x8xf32>
    %107 = arith.mulf %106, %105 : vector<16x16x8xf32>
    %108 = arith.addf %104, %107 : vector<16x16x8xf32>
    %109 = vector.extract_strided_slice %94 {offsets = [0, 1, 0], sizes = [16, 16, 8], strides = [1, 1, 1]} : vector<16x18x8xf32> to vector<16x16x8xf32>
    %cst_62 = arith.constant 7.500000e-01 : f32
    %110 = vector.broadcast %cst_62 : f32 to vector<16x16x8xf32>
    %111 = arith.mulf %110, %109 : vector<16x16x8xf32>
    %112 = vector.extract_strided_slice %94 {offsets = [0, 2, 0], sizes = [16, 16, 8], strides = [1, 1, 1]} : vector<16x18x8xf32> to vector<16x16x8xf32>
    %cst_63 = arith.constant 2.500000e-01 : f32
    %113 = vector.broadcast %cst_63 : f32 to vector<16x16x8xf32>
    %114 = arith.mulf %113, %112 : vector<16x16x8xf32>
    %115 = arith.addf %111, %114 : vector<16x16x8xf32>
    %116 = vector.extract_strided_slice %101 {offsets = [0, 0, 0], sizes = [16, 16, 8], strides = [1, 1, 1]} : vector<16x18x8xf32> to vector<16x16x8xf32>
    %cst_64 = arith.constant 2.500000e-01 : f32
    %117 = vector.broadcast %cst_64 : f32 to vector<16x16x8xf32>
    %118 = arith.mulf %117, %116 : vector<16x16x8xf32>
    %119 = vector.extract_strided_slice %101 {offsets = [0, 1, 0], sizes = [16, 16, 8], strides = [1, 1, 1]} : vector<16x18x8xf32> to vector<16x16x8xf32>
    %cst_65 = arith.constant 7.500000e-01 : f32
    %120 = vector.broadcast %cst_65 : f32 to vector<16x16x8xf32>
    %121 = arith.mulf %120, %119 : vector<16x16x8xf32>
    %122 = arith.addf %118, %121 : vector<16x16x8xf32>
    %123 = vector.extract_strided_slice %101 {offsets = [0, 1, 0], sizes = [16, 16, 8], strides = [1, 1, 1]} : vector<16x18x8xf32> to vector<16x16x8xf32>
    %cst_66 = arith.constant 7.500000e-01 : f32
    %124 = vector.broadcast %cst_66 : f32 to vector<16x16x8xf32>
    %125 = arith.mulf %124, %123 : vector<16x16x8xf32>
    %126 = vector.extract_strided_slice %101 {offsets = [0, 2, 0], sizes = [16, 16, 8], strides = [1, 1, 1]} : vector<16x18x8xf32> to vector<16x16x8xf32>
    %cst_67 = arith.constant 2.500000e-01 : f32
    %127 = vector.broadcast %cst_67 : f32 to vector<16x16x8xf32>
    %128 = arith.mulf %127, %126 : vector<16x16x8xf32>
    %129 = arith.addf %125, %128 : vector<16x16x8xf32>
    %130 = tpu.concatenate %108, %115 in 2 : vector<16x16x8xf32>, vector<16x16x8xf32> -> vector<16x16x16xf32>
    %c0_68 = arith.constant 0 : index
    %c0_69 = arith.constant 0 : index
    %c0_70 = arith.constant 0 : index
    %c0_71 = arith.constant 0 : index
    %c0_72 = arith.constant 0 : index
    %131 = vector.load %arg8[%c0_68, %c0_69, %c0_70, %c0_71, %c0_72] : memref<1x16x2x16x16xf32, #tpu.memory_space<vmem>>, vector<1x16x1x16x16xf32>
    %132 = vector.shape_cast %131 : vector<1x16x1x16x16xf32> to vector<16x16x16xf32>
    %133 = vector.shape_cast %130 : vector<16x16x16xf32> to vector<1x16x1x16x16xf32>
    tpu.vector_store %arg8[%c0_68, %c0_69, %c0_70, %c0_71, %c0_72], %133 {strides = array<i32>} : memref<1x16x2x16x16xf32, #tpu.memory_space<vmem>>, vector<1x16x1x16x16xf32>,
    %134 = tpu.concatenate %122, %129 in 2 : vector<16x16x8xf32>, vector<16x16x8xf32> -> vector<16x16x16xf32>
    %c0_73 = arith.constant 0 : index
    %c0_74 = arith.constant 0 : index
    %c1_75 = arith.constant 1 : index
    %c0_76 = arith.constant 0 : index
    %c0_77 = arith.constant 0 : index
    %135 = vector.load %arg8[%c0_73, %c0_74, %c1_75, %c0_76, %c0_77] : memref<1x16x2x16x16xf32, #tpu.memory_space<vmem>>, vector<1x16x1x16x16xf32>
    %136 = vector.shape_cast %135 : vector<1x16x1x16x16xf32> to vector<16x16x16xf32>
    %137 = vector.shape_cast %134 : vector<16x16x16xf32> to vector<1x16x1x16x16xf32>
    tpu.vector_store %arg8[%c0_73, %c0_74, %c1_75, %c0_76, %c0_77], %137 {strides = array<i32>} : memref<1x16x2x16x16xf32, #tpu.memory_space<vmem>>, vector<1x16x1x16x16xf32>,
    return
  }
  func.func @transform_0(%arg0: i32) -> (i32, i32, i32, i32) {
    %c0_i32 = arith.constant 0 : i32
    %c0_i32_0 = arith.constant 0 : i32
    %c0_i32_1 = arith.constant 0 : i32
    %c0_i32_2 = arith.constant 0 : i32
    return %arg0, %c0_i32, %c0_i32_0, %c0_i32_1 : i32, i32, i32, i32
  }
  func.func @transform_1(%arg0: i32) -> (i32, i32) {
    %c0_i32 = arith.constant 0 : i32
    %c0_i32_0 = arith.constant 0 : i32
    %c0_i32_1 = arith.constant 0 : i32
    return %c0_i32, %c0_i32_0 : i32, i32
  }
  func.func @transform_2(%arg0: i32) -> (i32, i32) {
    %c0_i32 = arith.constant 0 : i32
    %c0_i32_0 = arith.constant 0 : i32
    %c0_i32_1 = arith.constant 0 : i32
    return %c0_i32, %c0_i32_0 : i32, i32
  }
  func.func @transform_3(%arg0: i32) -> (i32, i32) {
    %c0_i32 = arith.constant 0 : i32
    %c0_i32_0 = arith.constant 0 : i32
    %c0_i32_1 = arith.constant 0 : i32
    return %c0_i32, %c0_i32_0 : i32, i32
  }
  func.func @transform_4(%arg0: i32) -> (i32, i32) {
    %c0_i32 = arith.constant 0 : i32
    %c0_i32_0 = arith.constant 0 : i32
    %c0_i32_1 = arith.constant 0 : i32
    return %c0_i32, %c0_i32_0 : i32, i32
  }
  func.func @transform_5(%arg0: i32) -> (i32, i32) {
    %c0_i32 = arith.constant 0 : i32
    %c0_i32_0 = arith.constant 0 : i32
    %c0_i32_1 = arith.constant 0 : i32
    return %c0_i32, %c0_i32_0 : i32, i32
  }
  func.func @transform_6(%arg0: i32) -> (i32, i32) {
    %c0_i32 = arith.constant 0 : i32
    %c0_i32_0 = arith.constant 0 : i32
    %c0_i32_1 = arith.constant 0 : i32
    return %c0_i32, %c0_i32_0 : i32, i32
  }
  func.func @transform_7(%arg0: i32) -> (i32, i32, i32, i32, i32) {
    %c0_i32 = arith.constant 0 : i32
    %c0_i32_0 = arith.constant 0 : i32
    %c0_i32_1 = arith.constant 0 : i32
    %c0_i32_2 = arith.constant 0 : i32
    %c0_i32_3 = arith.constant 0 : i32
    return %arg0, %c0_i32, %c0_i32_0, %c0_i32_1, %c0_i32_2 : i32, i32, i32, i32, i32
  }
}

</mosaic_0001>

<bundles_post_ra>
// kernel: tpu_custom_call.1
= control target key start
LH: loop header
LB: loop body
LE: loop exit
PB: predicated region body
PF: predicated region fallthrough
CT: control target
= control target key end

     0   :  { %12 = vsyncpa [#allocation5], 0  ;;  %s13112_s0 = inlined_call_operand.vmem [shape: f32[2,16,16,8], index: 0, kind: input, shape index: {}]   ;;  %s13113_s1 = inlined_call_operand.vmem [shape: bf16[8,8], index: 1, kind: input, shape index: {}]   ;;  %s13114_s2 = inlined_call_operand.vmem [shape: f32[1,8], index: 2, kind: input, shape index: {}]   ;;  %s13115_s3 = inlined_call_operand.vmem [shape: bf16[72,8], index: 3, kind: input, shape index: {}]   ;;  %s13116_s4 = inlined_call_operand.vmem [shape: f32[1,8], index: 4, kind: input, shape index: {}]   ;;  %s13117_s5 = inlined_call_operand.vmem [shape: bf16[72,8], index: 5, kind: input, shape index: {}]   ;;  %s13118_s6 = inlined_call_operand.vmem [shape: f32[1,8], index: 6, kind: input, shape index: {}]   ;;  %s13119_s7 = inlined_call_operand.hbm [shape: f32[2,16,2,16,16], index: 7, kind: output, shape index: {}]  }
   0x1   :  { %14 = vsyncpa [#allocation5 + $0x1], 0  ;;  %s8115_s24 = smov 0   ;;  %s8117_s25 = smov 0  }
   0x2   :  { %s8119_s26 = smov 0   ;;  %s8121_s27 = smov 0  }
   0x3 LB: > { %s8136_s28 = sadd.s32 4294967295, %s8062_s27   ;;  %s6269_s29 = sadd.s32 4294967294, %s8062_s27   ;;  %s8062_s27 = sphi %s8121_s27, %s13804_s27   ;;  %s8058_s26 = sphi %s8119_s26, %s13803_s26   ;;  %s8054_s25 = sphi %s8117_s25, %s13802_s25   ;;  %s8050_s24 = sphi %s8115_s24, %s13801_s24  }
   0x4   : > { %s8140_s30 = sadd.s32 1, %s8062_s27   ;;  %s179_s8 = sadd.s32 1, %s8058_s26 }
   0x5   : > { %s176_s9 = ssub.s32 %s8062_s27, %s8140_s30  ;;  %p189_p0 = scmp.ne.s32.totalorder %s8058_s26, %s8054_s25 }
   0x6   : > { %p177_p1 = scmp.eq.s32.totalorder %s176_s9, 0  ;;  %p190_p2 = scmp.eq.s32.totalorder %s8136_s28, 1 }
   0x7   : > { %p195_p3 = scmp.ne.s32.totalorder %s8054_s25, %s8050_s24  ;;  %p196_p4 = scmp.eq.s32.totalorder %s6269_s29, 1 }
   0x8   : > { %s8151_s10 = scalar_select %p177_p1, %s8058_s26, %s179_s8  }
   0x9   : > { %p8153_p5 = por %p190_p2, %p189_p0  ;;  %p8157_p6 = por %p196_p4, %p195_p3 }
   0xa   : > { %p6272_p7 = scmp.ge.s32.totalorder %s8062_s27, 1  ;;  %p240_p8 = scmp.lt.s32.totalorder %s8062_s27, 3 }
   0xc   : > { %p241_p9 = pnand %p6272_p7, %p240_p8 }
   0xe   : > { %244 = sbr.rel (%p241_p9) target bundleno = 1533 (0x5fd), region = 48 }
  0x13   : > { %v388_v0 = vld [vmem:[%s13113_s1] sm:$0xf]  ;;  %vm444_vm0 = vcmask 1043456   ;;  %p272_p10 = scmp.lt.s32.totalorder %s8136_s28, 1  ;;  %vm278_vm1 = vcmask 64512   ;;  %v8064_v2 = vmov 0.0  }
  0x14   : > { %6555 = vmatprep.subr.msk.bf16.mxu0 %vm444_vm0, %v388_v0  ;;  %6556 = vmatprep.subr.msk.bf16.mxu1 %vm444_vm0, %v388_v0  ;;  %v446_v1 = vsel %vm444_vm0, %v388_v0, 0  ;;  %289 = vst.msk [vmem:[#allocation2 + $0x48] sm:$0xff] %vm278_vm1, %v8064_v2  ;;  %290 = vst.msk [vmem:[#allocation2 + $0x50] sm:$0xff] %vm278_vm1, %v8064_v2  ;;  %vm281_vm2 = vcmask 60416   ;;  %vm776_vm3 = vcmask 1046528   ;;  %vm889_vm4 = vcmask 1045504  }
  0x15   : > { %279 = vst.msk [vmem:[#allocation2] sm:$0xff] %vm278_vm1, %v8064_v2  ;;  %280 = vst.msk [vmem:[#allocation2 + $0x8] sm:$0xff] %vm278_vm1, %v8064_v2  ;;  %6436 = vmatpush3.bf16.msra.mxu0 %v446_v1  ;;  %6554 = vmatpush3.bf16.msra.mxu1 %v446_v1  ;;  %s273_s15 = scalar_select %p272_p10, %s8136_s28, 1  ;;  %vm970_vm5 = vcmask 1044480   ;;  %vm1887_vm6 = vcmask 130048   ;;  %vm1920_vm7 = vcmask 195584  }
  0x16   : > { %283 = vst.msk [vmem:[#allocation2 + $0x18] sm:$0xff] %vm278_vm1, %v8064_v2  ;;  %284 = vst.msk [vmem:[#allocation2 + $0x20] sm:$0xff] %vm278_vm1, %v8064_v2  ;;  %s8065_s20 = smov 48   ;;  %s8066_s21 = smov 8   ;;  %vm1953_vm8 = vcmask 261120   ;;  %vm1986_vm9 = vcmask 326656  }
  0x17   : > { %286 = vst.msk [vmem:[#allocation2 + $0x30] sm:$0xff] %vm278_vm1, %v8064_v2  ;;  %287 = vst.msk [vmem:[#allocation2 + $0x38] sm:$0xff] %vm278_vm1, %v8064_v2  ;;  %s6374_s16 = sshll.u32 %s273_s15, 8  ;;  %s8067_s22 = smov 56   ;;  %vm2019_vm10 = vcmask 392192   ;;  %vm2052_vm11 = vcmask 457728  }
  0x18   : > { %292 = vst.msk [vmem:[#allocation2 + $0x60] sm:$0xff] %vm278_vm1, %v8064_v2  ;;  %293 = vst.msk [vmem:[#allocation2 + $0x68] sm:$0xff] %vm278_vm1, %v8064_v2  ;;  %s8256_s19 = scalar_lea.vmem %s13112_s0, %s6374_s16  ;;  %s8068_s23 = smov 16   ;;  %vm2085_vm12 = vcmask 523264   ;;  %vm2177_vm13 = vcmask 588800   ;;  %vm4285_vm14 = vcmask 57344  }
  0x19   : > { %295 = vst.msk [vmem:[#allocation2 + $0x78] sm:$0xff] %vm278_vm1, %v8064_v2  ;;  %296 = vst.msk [vmem:[#allocation2 + $0x80] sm:$0xff] %vm278_vm1, %v8064_v2  ;;  %v340_v3 = vld [vmem:[%s8256_s19] sm:$0xff]  ;;  %v341_v4 = vld [vmem:[%s8256_s19 + $0x8] sm:$0xff]  ;;  %s8069_s9 = smov 24   ;;  %s8070_s13 = smov 32  }
  0x1a   : > { %298 = vst.msk [vmem:[#allocation2 + $0x90] sm:$0xff] %vm278_vm1, %v8064_v2  ;;  %299 = vst.msk [vmem:[#allocation2 + $0x98] sm:$0xff] %vm278_vm1, %v8064_v2  ;;  %v356_v5 = vld [vmem:[%s8256_s19 + $0x80] sm:$0xff]  ;;  %v372_v6 = vpack.c.bf16 %v341_v4, %v340_v3  ;;  %v357_v7 = vld [vmem:[%s8256_s19 + $0x88] sm:$0xff]  ;;  %s8071_s14 = smov 40   ;;  %s8072_s15 = smov 64  }
  0x1b   : > { %301 = vst.msk [vmem:[#allocation2 + $0xa8] sm:$0xff] %vm278_vm1, %v8064_v2  ;;  %302 = vst.msk [vmem:[#allocation2 + $0xb0] sm:$0xff] %vm278_vm1, %v8064_v2  ;;  %v342_v8 = vld [vmem:[%s8256_s19 + $0x10] sm:$0xff]  ;;  %v343_v9 = vld [vmem:[%s8256_s19 + $0x18] sm:$0xff]  ;;  %v380_v10 = vpack.c.bf16 %v357_v7, %v356_v5  ;;  %s6375_s29 = sshll.u32 %s8136_s28, 13 }
  0x1c   : > { %304 = vst.msk [vmem:[#allocation2 + $0xc0] sm:$0xff] %vm278_vm1, %v8064_v2  ;;  %305 = vst.msk [vmem:[#allocation2 + $0xc8] sm:$0xff] %vm278_vm1, %v8064_v2  ;;  %v373_v11 = vpack.c.bf16 %v343_v9, %v342_v8  ;;  %v358_v12 = vld [vmem:[%s8256_s19 + $0x90] sm:$0xff]  ;;  %v359_v13 = vld [vmem:[%s8256_s19 + $0x98] sm:$0xff]  ;;  %6437 = vmatprep.mubr.msk.bf16.mxu0 %vm278_vm1, %v372_v6 }
  0x1d   : > { %307 = vst.msk [vmem:[#allocation2 + $0xd8] sm:$0xff] %vm278_vm1, %v8064_v2  ;;  %308 = vst.msk [vmem:[#allocation2 + $0xe0] sm:$0xff] %vm278_vm1, %v8064_v2  ;;  %v344_v14 = vld [vmem:[%s8256_s19 + $0x20] sm:$0xff]  ;;  %v381_v15 = vpack.c.bf16 %v359_v13, %v358_v12  ;;  %v345_v16 = vld [vmem:[%s8256_s19 + $0x28] sm:$0xff]  ;;  %6453 = vmatprep.mubr.msk.bf16.mxu1 %vm278_vm1, %v380_v10 }
  0x1e   : > { %310 = vst.msk [vmem:[#allocation2 + $0xf0] sm:$0xff] %vm278_vm1, %v8064_v2  ;;  %311 = vst.msk [vmem:[#allocation2 + $0xf8] sm:$0xff] %vm278_vm1, %v8064_v2  ;;  %6438 = vmatmul.mubr.msk.bf16.vlgmr.msra.gmra.mxu0 %vm278_vm1, %v373_v11  ;;  %v374_v17 = vpack.c.bf16 %v345_v16, %v344_v14  ;;  %v360_v18 = vld [vmem:[%s8256_s19 + $0xa0] sm:$0xff]  ;;  %v361_v19 = vld [vmem:[%s8256_s19 + $0xa8] sm:$0xff] }
  0x1f   : > { %313 = vst.msk [vmem:[#allocation2 + $0x108] sm:$0xff] %vm278_vm1, %v8064_v2  ;;  %314 = vst.msk [vmem:[#allocation2 + $0x110] sm:$0xff] %vm278_vm1, %v8064_v2  ;;  %6454 = vmatmul.mubr.msk.bf16.vlgmr.msra.gmra.mxu1 %vm278_vm1, %v381_v15  ;;  %v346_v20 = vld [vmem:[%s8256_s19 + $0x30] sm:$0xff]  ;;  %v347_v21 = vld [vmem:[%s8256_s19 + $0x38] sm:$0xff]  ;;  %v382_v22 = vpack.c.bf16 %v361_v19, %v360_v18 }
  0x20   : > { %316 = vst.msk [vmem:[#allocation2 + $0x120] sm:$0xff] %vm278_vm1, %v8064_v2  ;;  %317 = vst.msk [vmem:[#allocation2 + $0x128] sm:$0xff] %vm278_vm1, %v8064_v2  ;;  %v362_v23 = vld [vmem:[%s8256_s19 + $0xb0] sm:$0xff]  ;;  %6441 = vmatprep.mubr.msk.bf16.mxu0 %vm278_vm1, %v374_v17  ;;  %v363_v24 = vld [vmem:[%s8256_s19 + $0xb8] sm:$0xff]  ;;  %v375_v29 = vpack.c.bf16 %v347_v21, %v346_v20 }
  0x21   : > { %319 = vst.msk [vmem:[#allocation2 + $0x138] sm:$0xff] %vm278_vm1, %v8064_v2  ;;  %320 = vst.msk [vmem:[#allocation2 + $0x140] sm:$0xff] %vm278_vm1, %v8064_v2  ;;  %v348_v25 = vld [vmem:[%s8256_s19 + $0x40] sm:$0xff]  ;;  %v349_v26 = vld [vmem:[%s8256_s19 + $0x48] sm:$0xff]  ;;  %6457 = vmatprep.mubr.msk.bf16.mxu1 %vm278_vm1, %v382_v22  ;;  %v383_v30 = vpack.c.bf16 %v363_v24, %v362_v23 }
  0x22   : > { %322 = vst.msk [vmem:[#allocation2 + $0x150] sm:$0xff] %vm278_vm1, %v8064_v2  ;;  %323 = vst.msk [vmem:[#allocation2 + $0x158] sm:$0xff] %vm278_vm1, %v8064_v2  ;;  %v364_v27 = vld [vmem:[%s8256_s19 + $0xc0] sm:$0xff]  ;;  %v365_v28 = vld [vmem:[%s8256_s19 + $0xc8] sm:$0xff]  ;;  %v376_v31 = vpack.c.bf16 %v349_v26, %v348_v25 }
  0x23   : > { %325 = vst.msk [vmem:[#allocation2 + $0x168] sm:$0xff] %vm278_vm1, %v8064_v2  ;;  %326 = vst.msk [vmem:[#allocation2 + $0x170] sm:$0xff] %vm278_vm1, %v8064_v2  ;;  %v384_v32 = vpack.c.bf16 %v365_v28, %v364_v27  ;;  %v350_v33 = vld [vmem:[%s8256_s19 + $0x50] sm:$0xff]  ;;  %v351_v34 = vld [vmem:[%s8256_s19 + $0x58] sm:$0xff] }
  0x24   : > { %328 = vst.msk [vmem:[#allocation2 + $0x180] sm:$0xff] %vm278_vm1, %v8064_v2  ;;  %329 = vst.msk [vmem:[#allocation2 + $0x188] sm:$0xff] %vm278_vm1, %v8064_v2  ;;  %v366_v35 = vld [vmem:[%s8256_s19 + $0xd0] sm:$0xff]  ;;  %v367_v36 = vld [vmem:[%s8256_s19 + $0xd8] sm:$0xff]  ;;  %v377_v41 = vpack.c.bf16 %v351_v34, %v350_v33 }
  0x25   : > { %331 = vst.msk [vmem:[#allocation2 + $0x198] sm:$0xff] %vm278_vm1, %v8064_v2  ;;  %332 = vst.msk [vmem:[#allocation2 + $0x1a0] sm:$0xff] %vm278_vm1, %v8064_v2  ;;  %v352_v37 = vld [vmem:[%s8256_s19 + $0x60] sm:$0xff]  ;;  %v353_v38 = vld [vmem:[%s8256_s19 + $0x68] sm:$0xff]  ;;  %v385_v42 = vpack.c.bf16 %v367_v36, %v366_v35 }
  0x26   : > { %334 = vst.msk [vmem:[#allocation2 + $0x1b0] sm:$0xff] %vm278_vm1, %v8064_v2  ;;  %335 = vst.msk [vmem:[#allocation2 + $0x1b8] sm:$0xff] %vm278_vm1, %v8064_v2  ;;  %6442 = vmatmul.mubr.msk.bf16.gmra.mxu0 %vm278_vm1, %v375_v29  ;;  %v368_v39 = vld [vmem:[%s8256_s19 + $0xe0] sm:$0xff]  ;;  %v369_v40 = vld [vmem:[%s8256_s19 + $0xe8] sm:$0xff]  ;;  %v378_v43 = vpack.c.bf16 %v353_v38, %v352_v37 }
  0x27   : > { %337 = vst.msk [vmem:[#allocation2 + $0x1c8] sm:$0xff] %vm278_vm1, %v8064_v2  ;;  %338 = vst.msk [vmem:[#allocation2 + $0x1d0] sm:$0xff] %vm278_vm1, %v8064_v2  ;;  %6458 = vmatmul.mubr.msk.bf16.gmra.mxu1 %vm278_vm1, %v383_v30  ;;  %6445 = vmatprep.mubr.msk.bf16.mxu0 %vm278_vm1, %v376_v31  ;;  %v386_v44 = vpack.c.bf16 %v369_v40, %v368_v39  ;;  %v354_v45 = vld [vmem:[%s8256_s19 + $0x70] sm:$0xff]  ;;  %v355_v46 = vld [vmem:[%s8256_s19 + $0x78] sm:$0xff] }
  0x28   : > { %6461 = vmatprep.mubr.msk.bf16.mxu1 %vm278_vm1, %v384_v32  ;;  %v370_v47 = vld [vmem:[%s8256_s19 + $0xf0] sm:$0xff]  ;;  %v371_v48 = vld [vmem:[%s8256_s19 + $0xf8] sm:$0xff]  ;;  %v379_v49 = vpack.c.bf16 %v355_v46, %v354_v45  ;;  %291 = vst.msk [vmem:[#allocation2 + $0x58] sm:$0xf] %vm281_vm2, %v8064_v2  ;;  %282 = vst.msk [vmem:[#allocation2 + $0x10] sm:$0xf] %vm281_vm2, %v8064_v2 }
  0x29   : > { %v387_v50 = vpack.c.bf16 %v371_v48, %v370_v47  ;;  %285 = vst.msk [vmem:[#allocation2 + $0x28] sm:$0xf] %vm281_vm2, %v8064_v2  ;;  %288 = vst.msk [vmem:[#allocation2 + $0x40] sm:$0xf] %vm281_vm2, %v8064_v2  ;;  %v674_v57 = vld [vmem:[#allocation2 + $0x18] sm:$0xff]  ;;  %v675_v58 = vld [vmem:[#allocation2 + $0x20] sm:$0xff] }
  0x2a   : > { %294 = vst.msk [vmem:[#allocation2 + $0x70] sm:$0xf] %vm281_vm2, %v8064_v2  ;;  %297 = vst.msk [vmem:[#allocation2 + $0x88] sm:$0xf] %vm281_vm2, %v8064_v2  ;;  %v890_v60 = vrot.slane %v674_v57, 2  ;;  %v891_v61 = vrot.slane %v675_v58, 2 }
  0x2b   : > { %300 = vst.msk [vmem:[#allocation2 + $0xa0] sm:$0xf] %vm281_vm2, %v8064_v2  ;;  %303 = vst.msk [vmem:[#allocation2 + $0xb8] sm:$0xf] %vm281_vm2, %v8064_v2  ;;  %v971_v6 = vrot.slane %v674_v57, 3  ;;  %v972_v8 = vrot.slane %v675_v58, 3 }
  0x2c   : > { %306 = vst.msk [vmem:[#allocation2 + $0xd0] sm:$0xf] %vm281_vm2, %v8064_v2  ;;  %309 = vst.msk [vmem:[#allocation2 + $0xe8] sm:$0xf] %vm281_vm2, %v8064_v2  ;;  %v892_v1 = vsel %vm889_vm4, %v890_v60, %v891_v61  ;;  %v778_v17 = vrot.slane %v675_v58, 1  ;;  %v777_v19 = vrot.slane %v674_v57, 1 }
  0x2d   : > { %312 = vst.msk [vmem:[#allocation2 + $0x100] sm:$0xf] %vm281_vm2, %v8064_v2  ;;  %315 = vst.msk [vmem:[#allocation2 + $0x118] sm:$0xf] %vm281_vm2, %v8064_v2  ;;  %v8346_v51 = vld [vmem:[#allocation2 + $0x1b0] sm:$0xff]  ;;  %v8348_v52 = vld [vmem:[#allocation2 + $0x1b8] sm:$0xff]  ;;  %v973_v14 = vsel %vm970_vm5, %v971_v6, %v972_v8 }
  0x2e   : > { %6446 = vmatmul.mubr.msk.bf16.gmra.mxu0 %vm278_vm1, %v377_v41  ;;  %318 = vst.msk [vmem:[#allocation2 + $0x130] sm:$0xf] %vm281_vm2, %v8064_v2  ;;  %321 = vst.msk [vmem:[#allocation2 + $0x148] sm:$0xf] %vm281_vm2, %v8064_v2  ;;  %v1072_v54 = vrot.slane %v8346_v51, 1  ;;  %v1073_v55 = vrot.slane %v8348_v52, 1  ;;  %v8379_v22 = vsel %vm776_vm3, %v777_v19, %v778_v17 }
  0x2f   : > { %6462 = vmatmul.mubr.msk.bf16.gmra.mxu1 %vm278_vm1, %v385_v42  ;;  %6449 = vmatprep.mubr.msk.bf16.mxu0 %vm278_vm1, %v378_v43  ;;  %324 = vst.msk [vmem:[#allocation2 + $0x160] sm:$0xf] %vm281_vm2, %v8064_v2  ;;  %327 = vst.msk [vmem:[#allocation2 + $0x178] sm:$0xf] %vm281_vm2, %v8064_v2  ;;  %v1077_v3 = vrot.slane %v8346_v51, 2  ;;  %v1078_v4 = vrot.slane %v8348_v52, 2 }
  0x30   : > { %6465 = vmatprep.mubr.msk.bf16.mxu1 %vm278_vm1, %v386_v44  ;;  %330 = vst.msk [vmem:[#allocation2 + $0x190] sm:$0xf] %vm281_vm2, %v8064_v2  ;;  %333 = vst.msk [vmem:[#allocation2 + $0x1a8] sm:$0xf] %vm281_vm2, %v8064_v2  ;;  %v676_v59 = vld [vmem:[#allocation2 + $0x28] sm:$0xf]  ;;  %v1074_v62 = vsel %vm776_vm3, %v1072_v54, %v1073_v55 }
  0x31   : > { %336 = vst.msk [vmem:[#allocation2 + $0x1c0] sm:$0xf] %vm281_vm2, %v8064_v2  ;;  %339 = vst.msk [vmem:[#allocation2 + $0x1d8] sm:$0xf] %vm281_vm2, %v8064_v2  ;;  %v893_v2 = vrot.slane %v676_v59, 2  ;;  %v974_v9 = vrot.slane %v676_v59, 3  ;;  %v1079_v11 = vsel %vm889_vm4, %v1077_v3, %v1078_v4 }
  0x32   : > { %v780_v18 = vrot.slane %v676_v59, 1  ;;  %v8373_v20 = vld [vmem:[%s13114_s2] ss:$0 sm:$0xff] }
  0x33   : > { %v894_v7 = vsel %vm889_vm4, %v891_v61, %v893_v2  ;;  %v975_v15 = vsel %vm970_vm5, %v972_v8, %v974_v9 }
  0x34   : > { %v6608_v10 = vpack.i.bf16 %v894_v7, %v892_v1  ;;  %v6613_v16 = vpack.i.bf16 %v975_v15, %v973_v14  ;;  %v8376_v21 = vsel %vm776_vm3, %v778_v17, %v780_v18 }
  0x36   : > { %6450 = vmatmul.mubr.msk.bf16.gmra.mxu0 %vm278_vm1, %v379_v49  ;;  %6609 = vrot.lane.b32.xlu0 %v6608_v10, %s8066_s21 }
  0x37   : > { %6466 = vmatmul.mubr.msk.bf16.gmra.mxu1 %vm278_vm1, %v387_v50 }
  0x38   : > { %v8350_v53 = vld [vmem:[#allocation2 + $0x1c0] sm:$0xf] }
  0x39   : > { %v1075_v56 = vrot.slane %v8350_v53, 1  ;;  %v1080_v5 = vrot.slane %v8350_v53, 2 }
  0x3a   : > { %6614 = vrot.lane.b32.xlu0 %v6613_v16, %s8068_s23 }
  0x3b   : > { %v1076_v63 = vsel %vm776_vm3, %v1073_v55, %v1075_v56  ;;  %v1081_v12 = vsel %vm889_vm4, %v1078_v4, %v1080_v5 }
  0x3c   : > { %v6618_v0 = vpack.i.bf16 %v1076_v63, %v1074_v62  ;;  %v6623_v13 = vpack.i.bf16 %v1081_v12, %v1079_v11 }
  0x3e   : > { %6619 = vrot.lane.b32.xlu1 %v6618_v0, %s8065_s20 }
  0x42   : > { %6624 = vrot.lane.b32.xlu1 %v6623_v13, %s8067_s22 }
  0xde   : > { %v6439_v23 = vpop.f32.mrf.mxu0 }
  0xdf   : > { %v8382_v24 = vadd.f32 %v6439_v23, %v8373_v20  ;;  %v6455_v25 = vpop.f32.mrf.mxu1 }
  0xe0   : > { %v8385_v26 = vadd.f32 %v6455_v25, %v8373_v20  ;;  %v482_v27 = vpop.f32.mrf.mxu0 }
  0xe1   : > { %13309 = vst [vmem:[#allocation7_spill] sm:$0xff] %v8382_v24  ;;  %v13143_v28 = vmax.f32 %v8382_v24, 0.0  ;;  %v8389_v29 = vadd.f32 %v8373_v20, %v482_v27  ;;  %v546_v30 = vpop.f32.mrf.mxu1 }
  0xe2   : > { %13310 = vst [vmem:[#allocation8_spill] sm:$0xff] %v8385_v26  ;;  %v13127_v31 = vmax.f32 %v8385_v26, 0.0  ;;  %v8393_v32 = vadd.f32 %v8373_v20, %v546_v30  ;;  %v6440_v33 = vpop.f32.mrf.mxu0 }
  0xe3   : > { %13311 = vst [vmem:[#allocation9_spill] sm:$0xff] %v8389_v29  ;;  %644 = vst.msk [vmem:[#allocation2 + $0x4a] sm:$0xff] %vm278_vm1, %v13143_v28  ;;  %v13142_v34 = vmax.f32 %v8389_v29, 0.0  ;;  %v8400_v35 = vadd.f32 %v6440_v33, %v8373_v20  ;;  %v6456_v36 = vpop.f32.mrf.mxu1 }
  0xe4   : > { %13312 = vst [vmem:[#allocation10_spill] sm:$0xff] %v8393_v32  ;;  %660 = vst.msk [vmem:[#allocation2 + $0x10a] sm:$0xff] %vm278_vm1, %v13127_v31  ;;  %v13126_v37 = vmax.f32 %v8393_v32, 0.0  ;;  %v8407_v38 = vadd.f32 %v6456_v36, %v8373_v20  ;;  %v485_v39 = vpop.f32.mrf.mxu0 }
  0xe5   : > { %13313 = vst [vmem:[#allocation11_spill] sm:$0xff] %v8400_v35  ;;  %642 = vst.msk [vmem:[#allocation2 + $0x32] sm:$0xff] %vm278_vm1, %v13142_v34  ;;  %v13141_v40 = vmax.f32 %v8400_v35, 0.0  ;;  %v8414_v41 = vadd.f32 %v8373_v20, %v485_v39  ;;  %v549_v42 = vpop.f32.mrf.mxu1 }
  0xe6   : > { %13314 = vst [vmem:[#allocation12_spill] sm:$0xff] %v8407_v38  ;;  %658 = vst.msk [vmem:[#allocation2 + $0xf2] sm:$0xff] %vm278_vm1, %v13126_v37  ;;  %v13125_v43 = vmax.f32 %v8407_v38, 0.0  ;;  %v8421_v44 = vadd.f32 %v8373_v20, %v549_v42  ;;  %v6443_v45 = vpop.f32.mrf.mxu0 }
  0xe7   : > { %13315 = vst [vmem:[#allocation13_spill] sm:$0xff] %v8414_v41  ;;  %645 = vst.msk [vmem:[#allocation2 + $0x52] sm:$0xff] %vm278_vm1, %v13141_v40  ;;  %v13137_v46 = vmax.f32 %v8414_v41, 0.0  ;;  %v8428_v47 = vadd.f32 %v6443_v45, %v8373_v20  ;;  %v6459_v48 = vpop.f32.mrf.mxu1 }
  0xe8   : > { %13316 = vst [vmem:[#allocation14_spill] sm:$0xff] %v8421_v44  ;;  %661 = vst.msk [vmem:[#allocation2 + $0x112] sm:$0xff] %vm278_vm1, %v13125_v43  ;;  %v13124_v49 = vmax.f32 %v8421_v44, 0.0  ;;  %v498_v50 = vpop.f32.mrf.mxu0  ;;  %v8435_v54 = vadd.f32 %v6459_v48, %v8373_v20 }
  0xe9   : > { %13317 = vst [vmem:[#allocation15_spill] sm:$0xff] %v8428_v47  ;;  %643 = vst.msk [vmem:[#allocation2 + $0x3a] sm:$0xff] %vm278_vm1, %v13137_v46  ;;  %v13136_v55 = vmax.f32 %v8428_v47, 0.0  ;;  %v8442_v56 = vadd.f32 %v8373_v20, %v498_v50  ;;  %v562_v57 = vpop.f32.mrf.mxu1 }
  0xea   : > { %13318 = vst [vmem:[#allocation16_spill] sm:$0xff] %v8435_v54  ;;  %659 = vst.msk [vmem:[#allocation2 + $0xfa] sm:$0xff] %vm278_vm1, %v13124_v49  ;;  %v680_v58 = vld [vmem:[#allocation2 + $0x48] sm:$0xff]  ;;  %v13123_v59 = vmax.f32 %v8435_v54, 0.0  ;;  %v8449_v60 = vadd.f32 %v8373_v20, %v562_v57  ;;  %v6444_v7 = vpop.f32.mrf.mxu0 }
  0xeb   : > { %13319 = vst [vmem:[#allocation17_spill] sm:$0xff] %v8442_v56  ;;  %v704_v61 = vld [vmem:[#allocation2 + $0x108] sm:$0xff]  ;;  %648 = vst.msk [vmem:[#allocation2 + $0x7a] sm:$0xff] %vm278_vm1, %v13136_v55  ;;  %v13135_v62 = vmax.f32 %v8442_v56, 0.0  ;;  %v900_v63 = vrot.slane %v680_v58, 2  ;;  %v981_v0 = vrot.slane %v680_v58, 3  ;;  %v6460_v13 = vpop.f32.mrf.mxu1  ;;  %v8470_v36 = vadd.f32 %v6444_v7, %v8373_v20 }
  0xec   : > { %13320 = vst [vmem:[#allocation18_spill] sm:$0xff] %v8449_v60  ;;  %664 = vst.msk [vmem:[#allocation2 + $0x13a] sm:$0xff] %vm278_vm1, %v13123_v59  ;;  %v13122_v1 = vmax.f32 %v8449_v60, 0.0  ;;  %v940_v2 = vrot.slane %v704_v61, 2  ;;  %v787_v5 = vrot.slane %v680_v58, 1  ;;  %v1021_v6 = vrot.slane %v704_v61, 3  ;;  %v501_v39 = vpop.f32.mrf.mxu0 }
  0xed   : > { %646 = vst.msk [vmem:[#allocation2 + $0x62] sm:$0xff] %vm278_vm1, %v13135_v62  ;;  %v827_v25 = vrot.slane %v704_v61, 1  ;;  %13321 = vst [vmem:[#allocation19_spill] sm:$0xff] %v8470_v36  ;;  %v565_v57 = vpop.f32.mrf.mxu1 }
  0xee   : > { %v681_v3 = vld [vmem:[#allocation2 + $0x50] sm:$0xff]  ;;  %v682_v4 = vld [vmem:[#allocation2 + $0x58] sm:$0xf]  ;;  %662 = vst.msk [vmem:[#allocation2 + $0x122] sm:$0xff] %vm278_vm1, %v13122_v1  ;;  %v8494_v7 = vadd.f32 %v8373_v20, %v565_v57 }
  0xef   : > { %v705_v8 = vld [vmem:[#allocation2 + $0x110] sm:$0xff]  ;;  %v706_v9 = vld [vmem:[#allocation2 + $0x118] sm:$0xf]  ;;  %v901_v10 = vrot.slane %v681_v3, 2  ;;  %v903_v11 = vrot.slane %v682_v4, 2  ;;  %v982_v12 = vrot.slane %v681_v3, 3 }
  0xf0   : > { %v941_v14 = vrot.slane %v705_v8, 2  ;;  %v943_v15 = vrot.slane %v706_v9, 2  ;;  %v984_v16 = vrot.slane %v682_v4, 3  ;;  %v788_v17 = vrot.slane %v681_v3, 1  ;;  %13324 = vst [vmem:[#allocation22_spill] sm:$0xff] %v8494_v7  ;;  %v677_v57 = vld [vmem:[#allocation2 + $0x30] sm:$0xff] }
  0xf1   : > { %v902_v18 = vsel %vm889_vm4, %v900_v63, %v901_v10  ;;  %v904_v19 = vsel %vm889_vm4, %v901_v10, %v903_v11  ;;  %v790_v23 = vrot.slane %v682_v4, 1  ;;  %v983_v45 = vsel %vm970_vm5, %v981_v0, %v982_v12 }
  0xf2   : > { %v942_v27 = vsel %vm889_vm4, %v940_v2, %v941_v14  ;;  %v944_v30 = vsel %vm889_vm4, %v941_v14, %v943_v15  ;;  %v6628_v33 = vpack.i.bf16 %v904_v19, %v902_v18  ;;  %v8476_v48 = vsel %vm776_vm3, %v787_v5, %v788_v17  ;;  %v8534_v18 = vld [vmem:[#allocation2 + $0xf0] sm:$0xff]  ;;  %v8536_v19 = vld [vmem:[#allocation2 + $0xf8] sm:$0xff] }
  0xf3   : > { %v8472_v42 = vpack.i.bf16 %v944_v30, %v942_v27  ;;  %v8479_v50 = vsel %vm776_vm3, %v788_v17, %v790_v23  ;;  %v985_v58 = vsel %vm970_vm5, %v982_v12, %v984_v16  ;;  %v1022_v61 = vrot.slane %v705_v8, 3  ;;  %v8538_v23 = vld [vmem:[#allocation2 + $0x100] sm:$0xf] }
  0xf4   : > { %6629 = vrot.lane.b32.xlu1 %v6628_v33, %s8066_s21  ;;  %v1024_v63 = vrot.slane %v706_v9, 3  ;;  %v828_v2 = vrot.slane %v705_v8, 1  ;;  %v830_v3 = vrot.slane %v706_v9, 1  ;;  %v8486_v0 = vadd.f32 %v8373_v20, %v501_v39  ;;  %v678_v39 = vld [vmem:[#allocation2 + $0x38] sm:$0xff] }
  0xf5   : > { %6634 = vrot.lane.b32.xlu0 %v8472_v42, %s8066_s21  ;;  %v8489_v4 = vadd.f32 %v6460_v13, %v8373_v20  ;;  %v6648_v5 = vpack.i.bf16 %v8479_v50, %v8476_v48  ;;  %v8496_v10 = vpack.i.bf16 %v985_v58, %v983_v45  ;;  %v1023_v9 = vsel %vm970_vm5, %v1021_v6, %v1022_v61  ;;  %v679_v45 = vld [vmem:[#allocation2 + $0x40] sm:$0xf]  ;;  %v6447_v58 = vpop.f32.mrf.mxu0 }
  0xf6   : > { %13322 = vst [vmem:[#allocation20_spill] sm:$0xff] %v8486_v0  ;;  %v8499_v8 = vsel %vm776_vm3, %v827_v25, %v828_v2  ;;  %v8502_v11 = vsel %vm776_vm3, %v828_v2, %v830_v3  ;;  %v1025_v12 = vsel %vm970_vm5, %v1022_v61, %v1024_v63  ;;  %v13134_v13 = vmax.f32 %v8470_v36, 0.0 }
  0xf7   : > { %13323 = vst [vmem:[#allocation21_spill] sm:$0xff] %v8489_v4  ;;  %v13132_v14 = vmax.f32 %v8486_v0, 0.0  ;;  %v13121_v15 = vmax.f32 %v8489_v4, 0.0  ;;  %v6653_v16 = vpack.i.bf16 %v8502_v11, %v8499_v8  ;;  %v13120_v6 = vmax.f32 %v8494_v7, 0.0 }
  0xf8   : > { %6649 = vrot.lane.b32.xlu1 %v6648_v5, %s8069_s9  ;;  %649 = vst.msk [vmem:[#allocation2 + $0x82] sm:$0xff] %vm278_vm1, %v13134_v13  ;;  %v8518_v17 = vpack.i.bf16 %v1025_v12, %v1023_v9  ;;  %v935_v25 = vrot.slane %v8534_v18, 2  ;;  %v936_v27 = vrot.slane %v8536_v19, 2  ;;  %v938_v30 = vrot.slane %v8538_v23, 2 }
  0xf9   : > { %6639 = vrot.lane.b32.xlu0 %v8496_v10, %s8068_s23  ;;  %647 = vst.msk [vmem:[#allocation2 + $0x6a] sm:$0xff] %vm278_vm1, %v13132_v14  ;;  %665 = vst.msk [vmem:[#allocation2 + $0x142] sm:$0xff] %vm278_vm1, %v13121_v15  ;;  %v977_v61 = vrot.slane %v678_v39, 3  ;;  %v979_v3 = vrot.slane %v679_v45, 3  ;;  %v896_v9 = vrot.slane %v678_v39, 2  ;;  %v898_v12 = vrot.slane %v679_v45, 2 }
  0xfa   : > { %663 = vst.msk [vmem:[#allocation2 + $0x12a] sm:$0xff] %vm278_vm1, %v13120_v6  ;;  %v937_v63 = vsel %vm889_vm4, %v935_v25, %v936_v27  ;;  %v939_v2 = vsel %vm889_vm4, %v936_v27, %v938_v30  ;;  %v6463_v6 = vpop.f32.mrf.mxu1  ;;  %v895_v1 = vrot.slane %v677_v57, 2  ;;  %v1016_v27 = vrot.slane %v8534_v18, 3 }
  0xfb   : > { %v8555_v15 = vpack.i.bf16 %v939_v2, %v937_v63  ;;  %v980_v25 = vsel %vm970_vm5, %v977_v61, %v979_v3  ;;  %v1017_v30 = vrot.slane %v8536_v19, 3  ;;  %v1019_v59 = vrot.slane %v8538_v23, 3 }
  0xfc   : > { %6654 = vrot.lane.b32.xlu1 %v6653_v16, %s8069_s9  ;;  %v897_v49 = vsel %vm889_vm4, %v895_v1, %v896_v9  ;;  %v899_v43 = vsel %vm889_vm4, %v896_v9, %v898_v12  ;;  %v783_v37 = vrot.slane %v678_v39, 1  ;;  %v578_v2 = vpop.f32.mrf.mxu1  ;;  %v782_v3 = vrot.slane %v677_v57, 1 }
  0xfd   : > { %6644 = vrot.lane.b32.xlu0 %v8518_v17, %s8068_s23  ;;  %v6703_v1 = vpack.i.bf16 %v899_v43, %v897_v49  ;;  %v1018_v9 = vsel %vm970_vm5, %v1016_v27, %v1017_v30  ;;  %v1020_v39 = vsel %vm970_vm5, %v1017_v30, %v1019_v59  ;;  %v822_v12 = vrot.slane %v8534_v18, 1  ;;  %v8613_v30 = vld [vmem:[#allocation2 + $0x78] sm:$0xff] }
  0xfe   : > { %v823_v31 = vrot.slane %v8536_v19, 1  ;;  %v8594_v18 = vadd.f32 %v6463_v6, %v8373_v20  ;;  %v1083_v36 = vrot.slane %v8348_v52, 3 }
 0x100   : > { %6659 = vrot.lane.b32.xlu1 %v6628_v33, %s8070_s13  ;;  %13328 = vst [vmem:[#allocation26_spill] sm:$0xff] %v8594_v18  ;;  %v712_v14 = vld [vmem:[#allocation2 + $0x148] sm:$0xf] }
 0x101   : > { %6679 = vrot.lane.b32.xlu0 %v6648_v5, %s8065_s20  ;;  %v976_v5 = vrot.slane %v677_v57, 3  ;;  %v6464_v57 = vpop.f32.mrf.mxu1  ;;  %v840_v46 = vrot.slane %v712_v14, 1  ;;  %v953_v34 = vrot.slane %v712_v14, 2 }
 0x104   : > { %6664 = vrot.lane.b32.xlu1 %v8472_v42, %s8070_s13 }
 0x105   : > { %6684 = vrot.lane.b32.xlu0 %v6653_v16, %s8065_s20  ;;  %v514_v16 = vpop.f32.mrf.mxu0 }
 0x106   : > { %v8588_v49 = vadd.f32 %v8373_v20, %v514_v16  ;;  %v13129_v16 = vmax.f32 %v8594_v18, 0.0  ;;  %v8713_v18 = vld [vmem:[#allocation2 + $0x60] sm:$0xff] }
 0x107   : > { %v6448_v63 = vpop.f32.mrf.mxu0 }
 0x108   : > { %6669 = vrot.lane.b32.xlu1 %v8496_v10, %s8071_s14  ;;  %13326 = vst [vmem:[#allocation24_spill] sm:$0xff] %v8588_v49  ;;  %v8591_v59 = vadd.f32 %v6448_v63, %v8373_v20  ;;  %668 = vst.msk [vmem:[#allocation2 + $0x16a] sm:$0xff] %vm278_vm1, %v13129_v16 }
 0x109   : > { %6689 = vrot.lane.b32.xlu0 %v6628_v33, %s8067_s22  ;;  %v978_v33 = vsel %vm970_vm5, %v976_v5, %v977_v61  ;;  %v8571_v5 = vadd.f32 %v6447_v58, %v8373_v20  ;;  %v517_v19 = vpop.f32.mrf.mxu0 }
 0x10a   : > { %v8568_v61 = vpack.i.bf16 %v980_v25, %v978_v33  ;;  %13327 = vst [vmem:[#allocation25_spill] sm:$0xff] %v8591_v59  ;;  %v13128_v58 = vmax.f32 %v8591_v59, 0.0  ;;  %v8608_v25 = vsel %vm776_vm3, %v822_v12, %v823_v31  ;;  %v8618_v63 = vadd.f32 %v8373_v20, %v517_v19 }
 0x10b   : > { %13325 = vst [vmem:[#allocation23_spill] sm:$0xff] %v8571_v5  ;;  %v13131_v33 = vmax.f32 %v8571_v5, 0.0  ;;  %v8639_v12 = vadd.f32 %v6464_v57, %v8373_v20  ;;  %v797_v19 = vrot.slane %v8613_v30, 1 }
 0x10c   : > { %6674 = vrot.lane.b32.xlu1 %v8518_v17, %s8071_s14  ;;  %13329 = vst [vmem:[#allocation27_spill] sm:$0xff] %v8618_v63  ;;  %653 = vst.msk [vmem:[#allocation2 + $0xb2] sm:$0xff] %vm278_vm1, %v13128_v58 }
 0x10d   : > { %6694 = vrot.lane.b32.xlu0 %v8472_v42, %s8067_s22  ;;  %v785_v42 = vrot.slane %v679_v45, 1  ;;  %v8577_v45 = vsel %vm776_vm3, %v782_v3, %v783_v37  ;;  %652 = vst.msk [vmem:[#allocation2 + $0xaa] sm:$0xff] %vm278_vm1, %v13131_v33  ;;  %v8622_v3 = vld [vmem:[#allocation2 + $0x88] sm:$0xf]  ;;  %13331 = vst [vmem:[#allocation29_spill] sm:$0xff] %v8639_v12  ;;  %v711_v33 = vld [vmem:[#allocation2 + $0x140] sm:$0xff] }
 0x10e   : > { %v838_v55 = vrot.slane %v711_v33, 1 }
 0x10f   : > { %v8585_v43 = vsel %vm776_vm3, %v783_v37, %v785_v42  ;;  %v13130_v37 = vmax.f32 %v8588_v49, 0.0  ;;  %v8615_v42 = vld [vmem:[#allocation2 + $0x80] sm:$0xff] }
 0x110   : > { %6709 = vrot.lane.b32.xlu1 %v8555_v15, %s8066_s21  ;;  %v6723_v6 = vpack.i.bf16 %v8585_v43, %v8577_v45  ;;  %v798_v58 = vrot.slane %v8615_v42, 1 }
 0x111   : > { %6699 = vrot.lane.b32.xlu0 %v8496_v10, %s8072_s15  ;;  %v825_v10 = vrot.slane %v8538_v23, 1  ;;  %v8600_v23 = vpack.i.bf16 %v1020_v39, %v1018_v9  ;;  %650 = vst.msk [vmem:[#allocation2 + $0x92] sm:$0xff] %vm278_vm1, %v13130_v37  ;;  %v581_v9 = vpop.f32.mrf.mxu1  ;;  %v13133_v39 = vmax.f32 %v8618_v63, 0.0  ;;  %v710_v37 = vld [vmem:[#allocation2 + $0x138] sm:$0xff] }
 0x112   : > { %v8652_v57 = vadd.f32 %v8373_v20, %v581_v9  ;;  %v8664_v9 = vsel %vm776_vm3, %v797_v19, %v798_v58  ;;  %v837_v62 = vrot.slane %v710_v37, 1  ;;  %v910_v19 = vrot.slane %v8613_v30, 2 }
 0x113   : > { %v8611_v27 = vsel %vm776_vm3, %v823_v31, %v825_v10  ;;  %v8634_v31 = vadd.f32 %v8373_v20, %v578_v2  ;;  %v800_v2 = vrot.slane %v8622_v3, 1  ;;  %651 = vst.msk [vmem:[#allocation2 + $0x9a] sm:$0xff] %vm278_vm1, %v13133_v39  ;;  %13333 = vst [vmem:[#allocation31_spill] sm:$0xff] %v8664_v9  ;;  %v6467_v28 = vpop.f32.mrf.mxu1 }
 0x114   : > { %6714 = vrot.lane.b32.xlu1 %v8568_v61, %s8068_s23  ;;  %v6753_v10 = vpack.i.bf16 %v8611_v27, %v8608_v25  ;;  %13332 = vst [vmem:[#allocation30_spill] sm:$0xff] %v8652_v57  ;;  %v13139_v39 = vmax.f32 %v8652_v57, 0.0  ;;  %v991_v57 = vrot.slane %v8613_v30, 3 }
 0x115   : > { %6704 = vrot.lane.b32.xlu0 %v6703_v1, %s8066_s21  ;;  %13330 = vst [vmem:[#allocation28_spill] sm:$0xff] %v8634_v31  ;;  %v13140_v16 = vmax.f32 %v8634_v31, 0.0  ;;  %v8667_v13 = vsel %vm776_vm3, %v798_v58, %v800_v2  ;;  %v8681_v58 = vsel %vm776_vm3, %v837_v62, %v838_v55  ;;  %v8684_v2 = vsel %vm776_vm3, %v838_v55, %v840_v46  ;;  %v6451_v62 = vpop.f32.mrf.mxu0  ;;  %v594_v30 = vpop.f32.mrf.mxu1 }
 0x116   : > { %13334 = vst [vmem:[#allocation32_spill] sm:$0xff] %v8667_v13  ;;  %667 = vst.msk [vmem:[#allocation2 + $0x15a] sm:$0xff] %vm278_vm1, %v13139_v39  ;;  %v913_v39 = vrot.slane %v8622_v3, 2  ;;  %v951_v55 = vrot.slane %v711_v33, 2  ;;  %v994_v31 = vrot.slane %v8622_v3, 3 }
 0x117   : > { %666 = vst.msk [vmem:[#allocation2 + $0x152] sm:$0xff] %vm278_vm1, %v13140_v16  ;;  %13335 = vst [vmem:[#allocation33_spill] sm:$0xff] %v8681_v58  ;;  %v950_v16 = vrot.slane %v710_v37, 2 }
 0x118   : > { %6719 = vrot.lane.b32.xlu1 %v8600_v23, %s8068_s23  ;;  %13336 = vst [vmem:[#allocation34_spill] sm:$0xff] %v8684_v2 }
 0x119   : > { %6724 = vrot.lane.b32.xlu0 %v6723_v6, %s8069_s9  ;;  %v13138_v6 = vmax.f32 %v8639_v12, 0.0  ;;  %v992_v12 = vrot.slane %v8615_v42, 3 }
 0x11b   : > { %669 = vst.msk [vmem:[#allocation2 + $0x172] sm:$0xff] %vm278_vm1, %v13138_v6  ;;  %v911_v6 = vrot.slane %v8615_v42, 2  ;;  %v993_v3 = vsel %vm970_vm5, %v991_v57, %v992_v12 }
 0x11c   : > { %6754 = vrot.lane.b32.xlu1 %v6753_v10, %s8065_s20 }
 0x11d   : > { %6729 = vrot.lane.b32.xlu0 %v6753_v10, %s8069_s9  ;;  %v8677_v10 = vpack.i.bf16 %v8667_v13, %v8664_v9  ;;  %v912_v40 = vsel %vm889_vm4, %v910_v19, %v911_v6  ;;  %v914_v46 = vsel %vm889_vm4, %v911_v6, %v913_v39  ;;  %v530_v19 = vpop.f32.mrf.mxu0  ;;  %v952_v39 = vsel %vm889_vm4, %v950_v16, %v951_v55 }
 0x11e   : > { %v954_v6 = vsel %vm889_vm4, %v951_v55, %v953_v34  ;;  %v995_v16 = vsel %vm970_vm5, %v992_v12, %v994_v31  ;;  %v8719_v34 = vld [vmem:[#allocation2 + $0x68] sm:$0xff]  ;;  %v8722_v55 = vadd.f32 %v6451_v62, %v8373_v20 }
 0x11f   : > { %v8715_v42 = vpack.i.bf16 %v954_v6, %v952_v39  ;;  %v6452_v7 = vpop.f32.mrf.mxu0  ;;  %v8734_v31 = vpack.i.bf16 %v995_v16, %v993_v3  ;;  %v6468_v39 = vpop.f32.mrf.mxu1  ;;  %v906_v6 = vrot.slane %v8719_v34, 2  ;;  %v8748_v16 = vld [vmem:[#allocation2 + $0x120] sm:$0xff] }
 0x120   : > { %6759 = vrot.lane.b32.xlu1 %v8555_v15, %s8067_s22  ;;  %13337 = vst [vmem:[#allocation35_spill] sm:$0xff] %v8722_v55  ;;  %v13153_v62 = vmax.f32 %v8722_v55, 0.0  ;;  %v8742_v60 = vadd.f32 %v6452_v7, %v8373_v20 }
 0x121   : > { %6734 = vrot.lane.b32.xlu0 %v6703_v1, %s8070_s13  ;;  %v8694_v1 = vpack.i.bf16 %v8684_v2, %v8681_v58  ;;  %v533_v54 = vpop.f32.mrf.mxu0  ;;  %v597_v38 = vpop.f32.mrf.mxu1 }
 0x122   : > { %13339 = vst [vmem:[#allocation37_spill] sm:$0xff] %v8742_v60  ;;  %656 = vst.msk [vmem:[#allocation2 + $0xda] sm:$0xff] %vm278_vm1, %v13153_v62  ;;  %v8769_v44 = vadd.f32 %v8373_v20, %v533_v54  ;;  %v8772_v62 = vadd.f32 %v8373_v20, %v594_v30  ;;  %v13343_v26 = vmax.f32 %v8742_v60, 0.0  ;;  %v8793_v60 = vadd.f32 %v8373_v20, %v597_v38 }
 0x124   : > { %6784 = vrot.lane.b32.xlu1 %v8677_v10, %s8069_s9  ;;  %13341 = vst [vmem:[#allocation39_spill] sm:$0xff] %v8769_v44  ;;  %13342 = vst [vmem:[#allocation40_spill] sm:$0xff] %v8772_v62  ;;  %v13159_v30 = vmax.f32 %v8769_v44, 0.0  ;;  %v13161_v38 = vmax.f32 %v8793_v60, 0.0 }
 0x125   : > { %6739 = vrot.lane.b32.xlu0 %v8555_v15, %s8070_s13  ;;  %v8702_v15 = vpack.i.bf16 %v914_v46, %v912_v40  ;;  %v1032_v40 = vrot.slane %v711_v33, 3  ;;  %v1034_v46 = vrot.slane %v712_v14, 3  ;;  %v8726_v33 = vld [vmem:[#allocation2 + $0x70] sm:$0xf]  ;;  %v905_v14 = vrot.slane %v8713_v18, 2  ;;  %657 = vst.msk [vmem:[#allocation2 + $0xe2] sm:$0xff] %vm278_vm1, %v13343_v26 }
 0x126   : > { %v908_v3 = vrot.slane %v8726_v33, 2  ;;  %13346 = vst [vmem:[#allocation42_spill] sm:$0xff] %v8793_v60  ;;  %655 = vst.msk [vmem:[#allocation2 + $0xca] sm:$0xff] %vm278_vm1, %v13159_v30  ;;  %v989_v30 = vrot.slane %v8726_v33, 3 }
 0x127   : > { %v1035_v57 = vsel %vm970_vm5, %v1032_v40, %v1034_v46  ;;  %v907_v32 = vsel %vm889_vm4, %v905_v14, %v906_v6  ;;  %v13162_v14 = vmax.f32 %v8772_v62, 0.0  ;;  %671 = vst.msk [vmem:[#allocation2 + $0x18a] sm:$0xff] %vm278_vm1, %v13161_v38  ;;  %v8903_v62 = vld [vmem:[#allocation2 + $0xb0] sm:$0xff] }
 0x128   : > { %6789 = vrot.lane.b32.xlu1 %v8694_v1, %s8069_s9  ;;  %v909_v54 = vsel %vm889_vm4, %v906_v6, %v908_v3  ;;  %v986_v6 = vrot.slane %v8713_v18, 3  ;;  %v808_v63 = vrot.slane %v8903_v62, 1 }
 0x129   : > { %6744 = vrot.lane.b32.xlu0 %v8568_v61, %s8071_s14  ;;  %v1031_v61 = vrot.slane %v710_v37, 3  ;;  %v8730_v37 = vadd.f32 %v8373_v20, %v530_v19  ;;  %v8745_v19 = vadd.f32 %v6467_v28, %v8373_v20  ;;  %670 = vst.msk [vmem:[#allocation2 + $0x182] sm:$0xff] %vm278_vm1, %v13162_v14  ;;  %v795_v14 = vrot.slane %v8726_v33, 1 }
 0x12b   : > { %13338 = vst [vmem:[#allocation36_spill] sm:$0xff] %v8730_v37  ;;  %v1033_v12 = vsel %vm970_vm5, %v1031_v61, %v1032_v40  ;;  %v13156_v4 = vmax.f32 %v8730_v37, 0.0  ;;  %13340 = vst [vmem:[#allocation38_spill] sm:$0xff] %v8745_v19  ;;  %v8750_v61 = vld [vmem:[#allocation2 + $0x128] sm:$0xff]  ;;  %v8752_v40 = vld [vmem:[#allocation2 + $0x130] sm:$0xf] }
 0x12c   : > { %6794 = vrot.lane.b32.xlu1 %v8702_v15, %s8070_s13  ;;  %v8766_v46 = vpack.i.bf16 %v1035_v57, %v1033_v12  ;;  %v946_v28 = vrot.slane %v8750_v61, 2  ;;  %v948_v7 = vrot.slane %v8752_v40, 2  ;;  %v13344_v12 = vmax.f32 %v8745_v19, 0.0  ;;  %v7890_v19 = vld [vmem:[%s13115_s3 + $0x10] sm:$0xff]  }
 0x12d   : > { %6749 = vrot.lane.b32.xlu0 %v8600_v23, %s8071_s14  ;;  %654 = vst.msk [vmem:[#allocation2 + $0xc2] sm:$0xff] %vm278_vm1, %v13156_v4  ;;  %v945_v4 = vrot.slane %v8748_v16, 2  ;;  %v8788_v57 = vadd.f32 %v6468_v39, %v8373_v20  ;;  %v8804_v39 = vpack.i.bf16 %v909_v54, %v907_v32  ;;  %v987_v20 = vrot.slane %v8719_v34, 3 }
 0x12e   : > { %672 = vst.msk [vmem:[#allocation2 + $0x19a] sm:$0xff] %vm278_vm1, %v13344_v12  ;;  %v949_v12 = vsel %vm889_vm4, %v946_v28, %v948_v7  ;;  %v1026_v7 = vrot.slane %v8748_v16, 3  ;;  %v1027_v54 = vrot.slane %v8750_v61, 3  ;;  %v833_v33 = vrot.slane %v8750_v61, 1  ;;  %v8876_v61 = vld [vmem:[#allocation2 + $0x158] sm:$0xff] }
 0x12f   : > { %13345 = vst [vmem:[#allocation41_spill] sm:$0xff] %v8788_v57  ;;  %v13160_v26 = vmax.f32 %v8788_v57, 0.0  ;;  %v947_v3 = vsel %vm889_vm4, %v945_v4, %v946_v28  ;;  %v988_v4 = vsel %vm970_vm5, %v986_v6, %v987_v20  ;;  %v990_v28 = vsel %vm970_vm5, %v987_v20, %v989_v30  ;;  %v8901_v57 = vld [vmem:[#allocation2 + $0xa8] sm:$0xff] }
 0x130   : > { %6799 = vrot.lane.b32.xlu1 %v8715_v42, %s8070_s13  ;;  %v8822_v32 = vpack.i.bf16 %v949_v12, %v947_v3  ;;  %v7888_v3 = vld [vmem:[%s13115_s3 + $0x20] ss:$0 sps:$4 sm:$0xff]   ;;  %v8836_v12 = vpack.i.bf16 %v990_v28, %v988_v4  ;;  %v792_v30 = vrot.slane %v8713_v18, 1  ;;  %v793_v6 = vrot.slane %v8719_v34, 1  ;;  %v8882_v28 = vld [vmem:[#allocation2 + $0x168] sm:$0xff] }
 0x131   : > { %6764 = vrot.lane.b32.xlu0 %v8702_v15, %s8066_s21  ;;  %673 = vst.msk [vmem:[#allocation2 + $0x1a2] sm:$0xff] %vm278_vm1, %v13160_v26  ;;  %v1029_v26 = vrot.slane %v8752_v40, 3  ;;  %v1028_v20 = vsel %vm970_vm5, %v1026_v7, %v1027_v54  ;;  %6557 = vmatprep.subr.msk.bf16.mxu1 %vm444_vm0, %v7888_v3  ;;  %v835_v4 = vrot.slane %v8752_v40, 1  ;;  %v8878_v40 = vld [vmem:[#allocation2 + $0x160] sm:$0xf]  ;;  %v8884_v7 = vld [vmem:[#allocation2 + $0x170] sm:$0xff] }
 0x132   : > { %v8851_v18 = vsel %vm776_vm3, %v792_v30, %v793_v6  ;;  %v8854_v34 = vsel %vm776_vm3, %v793_v6, %v795_v14  ;;  %v7889_v30 = vld [vmem:[%s13115_s3 + $0x18] sm:$0xff]   ;;  %v1037_v6 = vrot.slane %v8876_v61, 3  ;;  %v2227_v60 = vsel %vm444_vm0, %v7888_v3, 0 }
 0x133   : > { %v1030_v38 = vsel %vm970_vm5, %v1027_v54, %v1029_v26  ;;  %13347 = vst [vmem:[#allocation43_spill] sm:$0xff] %v8851_v18  ;;  %13348 = vst [vmem:[#allocation44_spill] sm:$0xff] %v8854_v34  ;;  %v832_v26 = vrot.slane %v8748_v16, 1  ;;  %v8869_v14 = vsel %vm776_vm3, %v833_v33, %v835_v4  ;;  %v8874_v16 = vld [vmem:[#allocation2 + $0x150] sm:$0xff]  ;;  %v8886_v54 = vld [vmem:[#allocation2 + $0x178] sm:$0xf]  ;;  %6470 = vmatpush3.bf16.msra.mxu1 %v2227_v60 }
 0x134   : > { %6804 = vrot.lane.b32.xlu1 %v8734_v31, %s8071_s14  ;;  %13350 = vst [vmem:[#allocation46_spill] sm:$0xff] %v8869_v14  ;;  %v1044_v4 = vrot.slane %v8886_v54, 3  ;;  %6471 = vmatprep.subr.bf16.mxu1 %v7889_v30  ;;  %v807_v55 = vrot.slane %v8901_v57, 1  ;;  %v961_v5 = vrot.slane %v8884_v7, 2  ;;  %v963_v0 = vrot.slane %v8886_v54, 2 }
 0x135   : > { %6769 = vrot.lane.b32.xlu0 %v8715_v42, %s8066_s21  ;;  %v958_v41 = vrot.slane %v8878_v40, 2 }
 0x137   : > { %6472 = vmatpush3.bf16.msra.mxu1 %v7889_v30  ;;  %v8933_v30 = vsel %vm776_vm3, %v807_v55, %v808_v63  ;;  %v921_v55 = vrot.slane %v8903_v62, 2 }
 0x138   : > { %6809 = vrot.lane.b32.xlu1 %v8766_v46, %s8071_s14  ;;  %6473 = vmatprep.subr.bf16.mxu1 %v7890_v19  ;;  %13352 = vst [vmem:[#allocation48_spill] sm:$0xff] %v8933_v30 }
 0x139   : > { %6774 = vrot.lane.b32.xlu0 %v8734_v31, %s8068_s23 }
 0x13b   : > { %6474 = vmatpush3.bf16.msra.mxu1 %v7890_v19 }
 0x13c   : > { %6839 = vrot.lane.b32.xlu1 %v8804_v39, %s8066_s21 }
 0x13d   : > { %6779 = vrot.lane.b32.xlu0 %v8766_v46, %s8068_s23 }
 0x140   : > { %6844 = vrot.lane.b32.xlu1 %v8822_v32, %s8066_s21 }
 0x141   : > { %6814 = vrot.lane.b32.xlu0 %v8677_v10, %s8065_s20  ;;  %v8848_v10 = vpack.i.bf16 %v1030_v38, %v1028_v20  ;;  %v8866_v38 = vsel %vm776_vm3, %v832_v26, %v833_v33  ;;  %v1039_v20 = vrot.slane %v8878_v40, 3  ;;  %v1041_v26 = vrot.slane %v8882_v28, 3 }
 0x142   : > { %13349 = vst [vmem:[#allocation45_spill] sm:$0xff] %v8866_v38  ;;  %v1042_v33 = vrot.slane %v8884_v7, 3 }
 0x143   : > { %v1040_v37 = vsel %vm970_vm5, %v1037_v6, %v1039_v20  ;;  %v8935_v20 = vpop.permute.xlu0 %6609 }
 0x144   : > { %6849 = vrot.lane.b32.xlu1 %v8836_v12, %s8068_s23  ;;  %v1043_v60 = vsel %vm970_vm5, %v1041_v26, %v1042_v33  ;;  %v1045_v3 = vsel %vm970_vm5, %v1042_v33, %v1044_v4  ;;  %v850_v33 = vrot.slane %v8886_v54, 1 }
 0x145   : > { %6819 = vrot.lane.b32.xlu0 %v8694_v1, %s8065_s20  ;;  %v6888_v1 = vpack.i.bf16 %v8854_v34, %v8851_v18 }
 0x148   : > { %6854 = vrot.lane.b32.xlu1 %v8848_v10, %s8068_s23 }
 0x149   : > { %6824 = vrot.lane.b32.xlu0 %v8702_v15, %s8067_s22  ;;  %v6893_v15 = vpack.i.bf16 %v8869_v14, %v8866_v38 }
 0x14c   : > { %6889 = vrot.lane.b32.xlu1 %v6888_v1, %s8065_s20 }
 0x14d   : > { %6829 = vrot.lane.b32.xlu0 %v8715_v42, %s8067_s22  ;;  %v1036_v42 = vrot.slane %v8874_v16, 3 }
 0x14f   : > { %v1038_v44 = vsel %vm970_vm5, %v1036_v42, %v1037_v6  ;;  %v7891_v42 = vld [vmem:[%s13115_s3 + $0x8] sm:$0xff]   ;;  %v8930_v6 = vpop.permute.xlu1 %6619 }
 0x150   : > { %6894 = vrot.lane.b32.xlu1 %v6893_v15, %s8065_s20  ;;  %v8923_v49 = vpack.i.bf16 %v1040_v37, %v1038_v44  ;;  %13351 = vst [vmem:[#allocation47_spill] sm:$0xff] %v8930_v6  ;;  %v847_v44 = vrot.slane %v8882_v28, 1  ;;  %v848_v37 = vrot.slane %v8884_v7, 1  ;;  %6475 = vmatprep.subr.bf16.mxu1 %v7891_v42 }
 0x151   : > { %6834 = vrot.lane.b32.xlu0 %v8734_v31, %s8072_s15  ;;  %v8910_v31 = vld [vmem:[#allocation2 + $0xb8] sm:$0xf]  ;;  %6476 = vmatpush3.bf16.msra.mxu1 %v7891_v42 }
 0x152   : > { %v810_v59 = vrot.slane %v8910_v31, 1  ;;  %v8957_v19 = vsel %vm776_vm3, %v847_v44, %v848_v37  ;;  %v8960_v4 = vsel %vm776_vm3, %v848_v37, %v850_v33  ;;  %v960_v33 = vrot.slane %v8882_v28, 2 }
 0x153   : > { %13354 = vst [vmem:[#allocation50_spill] sm:$0xff] %v8957_v19  ;;  %13355 = vst [vmem:[#allocation51_spill] sm:$0xff] %v8960_v4  ;;  %v8973_v42 = vpack.i.bf16 %v8960_v4, %v8957_v19  ;;  %v1001_v28 = vrot.slane %v8901_v57, 3  ;;  %v1004_v52 = vrot.slane %v8910_v31, 3 }
 0x154   : > { %6899 = vrot.lane.b32.xlu1 %v8804_v39, %s8067_s22  ;;  %v8938_v26 = vsel %vm776_vm3, %v808_v63, %v810_v59  ;;  %v920_v63 = vrot.slane %v8901_v57, 2  ;;  %v962_v54 = vsel %vm889_vm4, %v960_v33, %v961_v5  ;;  %v690_v33 = vld [vmem:[#allocation2 + $0x98] sm:$0xff] }
 0x155   : > { %6859 = vrot.lane.b32.xlu0 %v6888_v1, %s8069_s9  ;;  %v8927_v1 = vpack.i.bf16 %v1045_v3, %v1043_v60  ;;  %13353 = vst [vmem:[#allocation49_spill] sm:$0xff] %v8938_v26  ;;  %v8952_v59 = vpack.i.bf16 %v8938_v26, %v8933_v30  ;;  %v923_v60 = vrot.slane %v8910_v31, 2  ;;  %v8969_v3 = vpop.permute.xlu0 %6614  ;;  %v955_v31 = vrot.slane %v8874_v16, 2 }
 0x156   : > { %v922_v44 = vsel %vm889_vm4, %v920_v63, %v921_v55 }
 0x157   : > { %v924_v37 = vsel %vm889_vm4, %v921_v55, %v923_v60  ;;  %v964_v60 = vsel %vm889_vm4, %v961_v5, %v963_v0 }
 0x158   : > { %6904 = vrot.lane.b32.xlu1 %v8822_v32, %s8067_s22  ;;  %v8989_v55 = vpack.i.bf16 %v924_v37, %v922_v44  ;;  %v689_v37 = vld [vmem:[#allocation2 + $0x90] sm:$0xff] }
 0x159   : > { %6864 = vrot.lane.b32.xlu0 %v6893_v15, %s8069_s9  ;;  %v7892_v15 = vld [vmem:[%s13115_s3] sm:$0xff]   ;;  %v996_v24 = vrot.slane %v689_v37, 3 }
 0x15a   : > { %6477 = vmatprep.subr.bf16.mxu1 %v7892_v15 }
 0x15b   : > { %6478 = vmatpush3.bf16.msra.mxu1 %v7892_v15  ;;  %v1085_v15 = vrot.slane %v8350_v53, 3 }
 0x15c   : > { %6909 = vrot.lane.b32.xlu1 %v8836_v12, %s8072_s15 }
 0x15d   : > { %6869 = vrot.lane.b32.xlu0 %v8804_v39, %s8070_s13  ;;  %v8965_v39 = vpop.permute.xlu1 %6624  ;;  %v9010_v44 = vsel %vm970_vm5, %v1083_v36, %v1085_v15 }
 0x15e   : > { %13356 = vst [vmem:[#allocation52_spill] sm:$0xff] %v8965_v39 }
 0x160   : > { %6934 = vrot.lane.b32.xlu1 %v8952_v59, %s8069_s9 }
 0x161   : > { %6874 = vrot.lane.b32.xlu0 %v8822_v32, %s8070_s13  ;;  %v1082_v32 = vrot.slane %v8346_v51, 3  ;;  %v1002_v51 = vrot.slane %v8903_v62, 3 }
 0x163   : > { %v9007_v57 = vsel %vm970_vm5, %v1082_v32, %v1083_v36  ;;  %v1003_v5 = vsel %vm970_vm5, %v1001_v28, %v1002_v51  ;;  %v1005_v62 = vsel %vm970_vm5, %v1002_v51, %v1004_v52  ;;  %v915_v28 = vrot.slane %v689_v37, 2 }
 0x164   : > { %6939 = vrot.lane.b32.xlu1 %v8973_v42, %s8069_s9  ;;  %v6953_v32 = vpack.i.bf16 %v1005_v62, %v1003_v5  ;;  %v956_v62 = vrot.slane %v8876_v61, 2 }
 0x165   : > { %6879 = vrot.lane.b32.xlu0 %v8836_v12, %s8071_s14  ;;  %v9004_v12 = vpack.i.bf16 %v964_v60, %v962_v54  ;;  %v691_v54 = vld [vmem:[#allocation2 + $0xa0] sm:$0xf]  ;;  %v916_v60 = vrot.slane %v690_v33, 2 }
 0x166   : > { %v8987_v63 = vpop.permute.xlu1 %6629  ;;  %v918_v51 = vrot.slane %v691_v54, 2  ;;  %v999_v6 = vrot.slane %v691_v54, 3  ;;  %v805_v26 = vrot.slane %v691_v54, 1 }
 0x167   : > { %v8992_v7 = vpop.permute.xlu0 %6634  ;;  %v917_v47 = vsel %vm889_vm4, %v915_v28, %v916_v60  ;;  %v957_v28 = vsel %vm889_vm4, %v955_v31, %v956_v62 }
 0x168   : > { %6944 = vrot.lane.b32.xlu1 %v8989_v55, %s8070_s13  ;;  %v919_v5 = vsel %vm889_vm4, %v916_v60, %v918_v51  ;;  %v959_v60 = vsel %vm889_vm4, %v956_v62, %v958_v41  ;;  %v997_v51 = vrot.slane %v690_v33, 3 }
 0x169   : > { %6884 = vrot.lane.b32.xlu0 %v8848_v10, %s8071_s14  ;;  %v9043_v29 = vpack.i.bf16 %v919_v5, %v917_v47  ;;  %v9055_v4 = vpack.i.bf16 %v959_v60, %v957_v28  ;;  %v802_v28 = vrot.slane %v689_v37, 1  ;;  %v803_v60 = vrot.slane %v690_v33, 1 }
 0x16a   : > { %v9002_v53 = vpop.permute.xlu1 %6649  ;;  %v998_v5 = vsel %vm970_vm5, %v996_v24, %v997_v51  ;;  %v1000_v31 = vsel %vm970_vm5, %v997_v51, %v999_v6  ;;  %v842_v6 = vrot.slane %v8874_v16, 1  ;;  %v843_v37 = vrot.slane %v8876_v61, 1 }
 0x16b   : > { %v9012_v0 = vpop.permute.xlu0 %6639  ;;  %v9067_v62 = vpack.i.bf16 %v1000_v31, %v998_v5  ;;  %v9081_v51 = vsel %vm776_vm3, %v802_v28, %v803_v60  ;;  %v9084_v5 = vsel %vm776_vm3, %v803_v60, %v805_v26  ;;  %v845_v33 = vrot.slane %v8878_v40, 1 }
 0x16c   : > { %6949 = vrot.lane.b32.xlu1 %v9004_v12, %s8070_s13  ;;  %13360 = vst [vmem:[#allocation56_spill] sm:$0xff] %v9081_v51  ;;  %13361 = vst [vmem:[#allocation57_spill] sm:$0xff] %v9084_v5  ;;  %v7038_v16 = vpack.i.bf16 %v9084_v5, %v9081_v51  ;;  %v9099_v26 = vsel %vm776_vm3, %v842_v6, %v843_v37  ;;  %v6612_v31 = vunpack.i.h.bf16 %v8935_v20  ;;  %v6611_v60 = vunpack.i.l.bf16 %v8935_v20  ;;  %v9129_v51 = vld [vmem:[#allocation2 + $0xe0] sm:$0xff]  ;;  %v9131_v20 = vld [vmem:[#allocation2 + $0xe8] sm:$0xf] }
 0x16d   : > { %6914 = vrot.lane.b32.xlu0 %v8989_v55, %s8066_s21  ;;  %13362 = vst [vmem:[#allocation58_spill] sm:$0xff] %v9099_v26  ;;  %v9102_v61 = vsel %vm776_vm3, %v843_v37, %v845_v33  ;;  %v6617_v6 = vunpack.i.h.bf16 %v8969_v3  ;;  %v818_v13 = vrot.slane %v9129_v51, 1  ;;  %v933_v18 = vrot.slane %v9131_v20, 2 }
 0x16e   : > { %v9022_v36 = vpop.permute.xlu1 %6654  ;;  %13363 = vst [vmem:[#allocation59_spill] sm:$0xff] %v9102_v61 }
 0x16f   : > { %v9024_v15 = vpop.permute.xlu0 %6644 }
 0x170   : > { %6954 = vrot.lane.b32.xlu1 %v6953_v32, %s8071_s14 }
 0x171   : > { %6919 = vrot.lane.b32.xlu0 %v9004_v12, %s8066_s21 }
 0x172   : > { %v9029_v52 = vpop.permute.xlu1 %6659 }
 0x173   : > { %v9032_v56 = vpop.permute.xlu0 %6679 }
 0x174   : > { %6959 = vrot.lane.b32.xlu1 %v8927_v1, %s8071_s14 }
 0x175   : > { %6924 = vrot.lane.b32.xlu0 %v6953_v32, %s8068_s23 }
 0x176   : > { %v9041_v35 = vpop.permute.xlu1 %6664 }
 0x177   : > { %v9045_v39 = vpop.permute.xlu0 %6684 }
 0x178   : > { %13357 = vst [vmem:[#allocation53_spill] sm:$0xff] %v9045_v39  ;;  %6989 = vrot.lane.b32.xlu1 %v9043_v29, %s8066_s21 }
 0x179   : > { %6929 = vrot.lane.b32.xlu0 %v8927_v1, %s8068_s23 }
 0x17a   : > { %v9053_v19 = vpop.permute.xlu1 %6669 }
 0x17b   : > { %v9057_v47 = vpop.permute.xlu0 %6689 }
 0x17c   : > { %6994 = vrot.lane.b32.xlu1 %v9055_v4, %s8066_s21 }
 0x17d   : > { %6964 = vrot.lane.b32.xlu0 %v8952_v59, %s8065_s20 }
 0x17e   : > { %v9065_v41 = vpop.permute.xlu1 %6674 }
 0x17f   : > { %13358 = vst [vmem:[#allocation54_spill] sm:$0xff] %v9065_v41  ;;  %v9069_v30 = vpop.permute.xlu0 %6694 }
 0x180   : > { %13359 = vst [vmem:[#allocation55_spill] sm:$0xff] %v9069_v30  ;;  %6999 = vrot.lane.b32.xlu1 %v9067_v62, %s8068_s23 }
 0x181   : > { %6969 = vrot.lane.b32.xlu0 %v8973_v42, %s8065_s20 }
 0x182   : > { %v9075_v24 = vpop.permute.xlu1 %6709 }
 0x183   : > { %v9078_v59 = vpop.permute.xlu0 %6699 }
 0x184   : > { %7004 = vrot.lane.b32.xlu1 %v8923_v49, %s8068_s23 }
 0x185   : > { %6974 = vrot.lane.b32.xlu0 %v8989_v55, %s8067_s22  ;;  %v7043_v55 = vpack.i.bf16 %v9102_v61, %v9099_v26  ;;  %v6616_v26 = vunpack.i.l.bf16 %v8969_v3  ;;  %v9127_v61 = vld [vmem:[#allocation2 + $0xd8] sm:$0xff]  ;;  %v9140_v3 = vld [vmem:[#allocation2 + $0x1a8] sm:$0xf] }
 0x186   : > { %v9092_v42 = vpop.permute.xlu1 %6714  ;;  %v817_v9 = vrot.slane %v9127_v61, 1  ;;  %v930_v14 = vrot.slane %v9127_v61, 2 }
 0x187   : > { %v9096_v54 = vpop.permute.xlu0 %6704 }
 0x188   : > { %7039 = vrot.lane.b32.xlu1 %v7038_v16, %s8065_s20 }
 0x189   : > { %6979 = vrot.lane.b32.xlu0 %v9004_v12, %s8067_s22  ;;  %v1856_v12 = vsel %vm278_vm1, %v8376_v21, %v6612_v31  ;;  %v9136_v21 = vld [vmem:[#allocation2 + $0x198] sm:$0xff]  ;;  %v9138_v31 = vld [vmem:[#allocation2 + $0x1a0] sm:$0xff] }
 0x18a   : > { %v9107_v40 = vpop.permute.xlu1 %6719  ;;  %v1889_v5 = vsel %vm1887_vm6, %v1856_v12, %v6617_v6  ;;  %v1055_v38 = vrot.slane %v9138_v31, 1  ;;  %v1057_v6 = vrot.slane %v9140_v3, 1 }
 0x18b   : > { %v9112_v28 = vpop.permute.xlu0 %6724 }
 0x18c   : > { %7044 = vrot.lane.b32.xlu1 %v7043_v55, %s8065_s20 }
 0x18d   : > { %6984 = vrot.lane.b32.xlu0 %v6953_v32, %s8072_s15  ;;  %v1855_v32 = vsel %vm278_vm1, %v8379_v22, %v6611_v60  ;;  %v820_v22 = vrot.slane %v9131_v20, 1 }
 0x18e   : > { %v9118_v37 = vpop.permute.xlu1 %6754  ;;  %v1888_v60 = vsel %vm1887_vm6, %v1855_v32, %v6616_v26  ;;  %v931_v26 = vrot.slane %v9129_v51, 2 }
 0x18f   : > { %13364 = vst [vmem:[#allocation60_spill] sm:$0xff] %v9118_v37  ;;  %v9122_v33 = vpop.permute.xlu0 %6729  ;;  %v1058_v37 = vsel %vm776_vm3, %v1055_v38, %v1057_v6 }
 0x190   : > { %13365 = vst [vmem:[#allocation61_spill] sm:$0xff] %v9122_v33  ;;  %7049 = vrot.lane.b32.xlu1 %v9043_v29, %s8067_s22  ;;  %v9165_v33 = vsel %vm776_vm3, %v818_v13, %v820_v22  ;;  %v1059_v22 = vrot.slane %v9136_v21, 2 }
 0x191   : > { %7009 = vrot.lane.b32.xlu0 %v7038_v16, %s8069_s9  ;;  %v1054_v16 = vrot.slane %v9136_v21, 1  ;;  %13370 = vst [vmem:[#allocation66_spill] sm:$0xff] %v9165_v33 }
 0x192   : > { %v9143_v58 = vpop.permute.xlu1 %6759 }
 0x193   : > { %13366 = vst [vmem:[#allocation62_spill] sm:$0xff] %v9143_v58  ;;  %v6735_v2 = vpop.permute.xlu0 %6734  ;;  %v9162_v58 = vsel %vm776_vm3, %v817_v9, %v818_v13  ;;  %v1056_v34 = vsel %vm776_vm3, %v1054_v16, %v1055_v38  ;;  %v1060_v38 = vrot.slane %v9138_v31, 2 }
 0x194   : > { %7054 = vrot.lane.b32.xlu1 %v9055_v4, %s8067_s22  ;;  %13369 = vst [vmem:[#allocation65_spill] sm:$0xff] %v9162_v58  ;;  %v6736_v30 = vunpack.i.l.bf16 %v6735_v2  ;;  %v9180_v9 = vpack.i.bf16 %v9165_v33, %v9162_v58  ;;  %v9184_v41 = vpack.i.bf16 %v1058_v37, %v1056_v34  ;;  %v6681_v34 = vunpack.i.l.bf16 %v9032_v56 }
 0x195   : > { %7014 = vrot.lane.b32.xlu0 %v7043_v55, %s8069_s9  ;;  %v6727_v55 = vunpack.i.h.bf16 %v9112_v28 }
 0x196   : > { %v9155_v12 = vpop.permute.xlu1 %6784 }
 0x197   : > { %13367 = vst [vmem:[#allocation63_spill] sm:$0xff] %v9155_v12  ;;  %v9159_v32 = vpop.permute.xlu0 %6739  ;;  %v6726_v12 = vunpack.i.l.bf16 %v9112_v28  ;;  %v932_v28 = vsel %vm889_vm4, %v930_v14, %v931_v26  ;;  %v1922_v6 = vsel %vm1920_vm7, %v1889_v5, %v6727_v55  ;;  %v6682_v14 = vunpack.i.h.bf16 %v9032_v56 }
 0x198   : > { %13368 = vst [vmem:[#allocation64_spill] sm:$0xff] %v9159_v32  ;;  %7059 = vrot.lane.b32.xlu1 %v9067_v62, %s8072_s15  ;;  %v6737_v32 = vunpack.i.h.bf16 %v6735_v2  ;;  %v934_v2 = vsel %vm889_vm4, %v931_v26, %v933_v18  ;;  %v6692_v5 = vunpack.i.h.bf16 %v9057_v47  ;;  %v6701_v56 = vunpack.i.l.bf16 %v9078_v59 }
 0x199   : > { %7019 = vrot.lane.b32.xlu0 %v9043_v29, %s8070_s13  ;;  %v1062_v29 = vrot.slane %v9140_v3, 2 }
 0x19a   : > { %v9176_v13 = vpop.permute.xlu1 %6789  ;;  %v1955_v18 = vsel %vm1953_vm8, %v1922_v6, %v6737_v32 }
 0x19b   : > { %13371 = vst [vmem:[#allocation67_spill] sm:$0xff] %v9176_v13  ;;  %v6745_v16 = vpop.permute.xlu0 %6744  ;;  %v1921_v13 = vsel %vm1920_vm7, %v1888_v60, %v6726_v12  ;;  %v6691_v60 = vunpack.i.l.bf16 %v9057_v47 }
 0x19c   : > { %v6747_v33 = vunpack.i.h.bf16 %v6745_v16  ;;  %v6746_v58 = vunpack.i.l.bf16 %v6745_v16  ;;  %7074 = vrot.lane.b32.xlu1 %v9180_v9, %s8069_s9  ;;  %v1954_v37 = vsel %vm1953_vm8, %v1921_v13, %v6736_v30  ;;  %v6702_v16 = vunpack.i.h.bf16 %v9078_v59 }
 0x19d   : > { %7024 = vrot.lane.b32.xlu0 %v9055_v4, %s8070_s13 }
 0x19e   : > { %v1987_v12 = vsel %vm1986_vm9, %v1954_v37, %v6746_v58  ;;  %v1988_v26 = vsel %vm1986_vm9, %v1955_v18, %v6747_v33  ;;  %v9203_v55 = vpop.permute.xlu1 %6794  ;;  %v1063_v18 = vsel %vm889_vm4, %v1060_v38, %v1062_v29  ;;  %v1067_v29 = vrot.slane %v9140_v3, 3 }
 0x19f   : > { %v2020_v30 = vsel %vm2019_vm10, %v1987_v12, %v6681_v34  ;;  %v2021_v32 = vsel %vm2019_vm10, %v1988_v26, %v6682_v14  ;;  %v9209_v13 = vpop.permute.xlu0 %6749  ;;  %v9221_v14 = vpack.i.bf16 %v934_v2, %v932_v28  ;;  %v1061_v34 = vsel %vm889_vm4, %v1059_v22, %v1060_v38  ;;  %v695_v12 = vld [vmem:[#allocation2 + $0xc0] sm:$0xff]  ;;  %v696_v26 = vld [vmem:[#allocation2 + $0xc8] sm:$0xff] }
 0x1a0   : > { %13372 = vst [vmem:[#allocation68_spill] sm:$0xff] %v9209_v13  ;;  %7079 = vrot.lane.b32.xlu1 %v9184_v41, %s8069_s9  ;;  %v2053_v4 = vsel %vm2052_vm11, %v2020_v30, %v6691_v60  ;;  %v2054_v58 = vsel %vm2052_vm11, %v2021_v32, %v6692_v5  ;;  %v1011_v5 = vrot.slane %v9127_v61, 3  ;;  %v1014_v60 = vrot.slane %v9131_v20, 3 }
 0x1a1   : > { %7029 = vrot.lane.b32.xlu0 %v9067_v62, %s8071_s14  ;;  %v2086_v47 = vsel %vm2085_vm12, %v2053_v4, %v6701_v56  ;;  %v2087_v59 = vsel %vm2085_vm12, %v2054_v58, %v6702_v16  ;;  %v1012_v62 = vrot.slane %v9129_v51, 3  ;;  %v9237_v22 = vpack.i.bf16 %v1063_v18, %v1061_v34  ;;  %v697_v16 = vld [vmem:[#allocation2 + $0xd0] sm:$0xf] }
 0x1a2   : > { %v9219_v33 = vpop.permute.xlu1 %6799  ;;  %v2118_v6 = vpack.c.bf16 %v2087_v59, %v2086_v47  ;;  %v1064_v2 = vrot.slane %v9136_v21, 3  ;;  %v1065_v20 = vrot.slane %v9138_v31, 3  ;;  %v925_v30 = vrot.slane %v695_v12, 2  ;;  %v719_v47 = vld [vmem:[#allocation2 + $0x180] sm:$0xff]  ;;  %v720_v59 = vld [vmem:[#allocation2 + $0x188] sm:$0xff] }
 0x1a3   : > { %v9224_v37 = vpop.permute.xlu0 %6764  ;;  %v1013_v51 = vsel %vm970_vm5, %v1011_v5, %v1012_v62  ;;  %v1015_v61 = vsel %vm970_vm5, %v1012_v62, %v1014_v60  ;;  %v926_v32 = vrot.slane %v696_v26, 2  ;;  %v928_v58 = vrot.slane %v697_v16, 2 }
 0x1a4   : > { %13373 = vst [vmem:[#allocation69_spill] sm:$0xff] %v9224_v37  ;;  %6479 = vmatprep.mubr.msk.bf16.mxu1 %vm2177_vm13, %v2118_v6  ;;  %7084 = vrot.lane.b32.xlu1 %v9221_v14, %s8070_s13  ;;  %v9252_v56 = vpack.i.bf16 %v1015_v61, %v1013_v51  ;;  %v1066_v31 = vsel %vm970_vm5, %v1064_v2, %v1065_v20  ;;  %v721_v6 = vld [vmem:[#allocation2 + $0x190] sm:$0xf]  ;;  %v965_v2 = vrot.slane %v719_v47, 2  ;;  %v966_v51 = vrot.slane %v720_v59, 2 }
 0x1a5   : > { %7034 = vrot.lane.b32.xlu0 %v8923_v49, %s8071_s14  ;;  %v1068_v3 = vsel %vm970_vm5, %v1065_v20, %v1067_v29  ;;  %v927_v5 = vsel %vm889_vm4, %v925_v30, %v926_v32  ;;  %v929_v60 = vsel %vm889_vm4, %v926_v32, %v928_v58  ;;  %v968_v61 = vrot.slane %v721_v6, 2 }
 0x1a6   : > { %v9235_v28 = vpop.permute.xlu1 %6804  ;;  %v9264_v18 = vpack.i.bf16 %v1068_v3, %v1066_v31  ;;  %v9276_v29 = vpack.i.bf16 %v929_v60, %v927_v5  ;;  %v1006_v31 = vrot.slane %v695_v12, 3  ;;  %v1007_v3 = vrot.slane %v696_v26, 3 }
 0x1a7   : > { %v9240_v38 = vpop.permute.xlu0 %6769  ;;  %v969_v32 = vsel %vm889_vm4, %v966_v51, %v968_v61  ;;  %v1009_v58 = vrot.slane %v697_v16, 3  ;;  %v1046_v60 = vrot.slane %v719_v47, 3  ;;  %v812_v61 = vrot.slane %v695_v12, 1 }
 0x1a8   : > { %13374 = vst [vmem:[#allocation70_spill] sm:$0xff] %v9240_v38  ;;  %7089 = vrot.lane.b32.xlu1 %v9237_v22, %s8070_s13  ;;  %v1008_v5 = vsel %vm970_vm5, %v1006_v31, %v1007_v3  ;;  %v813_v37 = vrot.slane %v696_v26, 1 }
 0x1a9   : > { %7064 = vrot.lane.b32.xlu0 %v9221_v14, %s8066_s21 }
 0x1aa   : > { %v9250_v21 = vpop.permute.xlu1 %6809  ;;  %v9307_v12 = vsel %vm776_vm3, %v812_v61, %v813_v37 }
 0x1ab   : > { %13375 = vst [vmem:[#allocation71_spill] sm:$0xff] %v9250_v21  ;;  %v9254_v4 = vpop.permute.xlu0 %6774  ;;  %v967_v21 = vsel %vm889_vm4, %v965_v2, %v966_v51  ;;  %v1010_v2 = vsel %vm970_vm5, %v1007_v3, %v1009_v58  ;;  %v1049_v51 = vrot.slane %v721_v6, 3  ;;  %13379 = vst [vmem:[#allocation75_spill] sm:$0xff] %v9307_v12  ;;  %v855_v58 = vrot.slane %v721_v6, 1 }
 0x1ac   : > { %13376 = vst [vmem:[#allocation72_spill] sm:$0xff] %v9254_v4  ;;  %7094 = vrot.lane.b32.xlu1 %v9252_v56, %s8071_s14  ;;  %v1047_v4 = vrot.slane %v720_v59, 3 }
 0x1ad   : > { %7069 = vrot.lane.b32.xlu0 %v9252_v56, %s8068_s23 }
 0x1ae   : > { %v9262_v34 = vpop.permute.xlu1 %6839  ;;  %v1050_v3 = vsel %vm970_vm5, %v1047_v4, %v1049_v51 }
 0x1af   : > { %v9267_v62 = vpop.permute.xlu0 %6779 }
 0x1b0   : > { %13377 = vst [vmem:[#allocation73_spill] sm:$0xff] %v9267_v62  ;;  %7099 = vrot.lane.b32.xlu1 %v9264_v18, %s8071_s14  ;;  %v9288_v62 = vpack.i.bf16 %v969_v32, %v967_v21  ;;  %v9300_v21 = vpack.i.bf16 %v1010_v2, %v1008_v5  ;;  %v1048_v32 = vsel %vm970_vm5, %v1046_v60, %v1047_v4  ;;  %v6707_v5 = vunpack.i.h.bf16 %v9096_v54 }
 0x1b1   : > { %7104 = vrot.lane.b32.xlu0 %v9180_v9, %s8065_s20  ;;  %v6706_v60 = vunpack.i.l.bf16 %v9096_v54  ;;  %v9318_v2 = vpack.i.bf16 %v1050_v3, %v1048_v32  ;;  %v6716_v54 = vunpack.i.l.bf16 %v9092_v42 }
 0x1b2   : > { %v9274_v20 = vpop.permute.xlu1 %6844 }
 0x1b3   : > { %13378 = vst [vmem:[#allocation74_spill] sm:$0xff] %v9274_v20  ;;  %v9278_v30 = vpop.permute.xlu0 %6814  ;;  %v815_v20 = vrot.slane %v697_v16, 1  ;;  %v853_v16 = vrot.slane %v720_v59, 1  ;;  %v1858_v59 = vsel %vm278_vm1, %v8585_v43, %v6707_v5  ;;  %v1857_v6 = vsel %vm278_vm1, %v8577_v45, %v6706_v60 }
 0x1b4   : > { %7124 = vrot.lane.b32.xlu1 %v9276_v29, %s8066_s21  ;;  %v6652_v43 = vunpack.i.h.bf16 %v9002_v53 }
 0x1b5   : > { %7109 = vrot.lane.b32.xlu0 %v9184_v41, %s8065_s20  ;;  %v9312_v26 = vsel %vm776_vm3, %v813_v37, %v815_v20 }
 0x1b6   : > { %v9286_v9 = vpop.permute.xlu1 %6849  ;;  %13380 = vst [vmem:[#allocation76_spill] sm:$0xff] %v9312_v26  ;;  %v7143_v61 = vpack.i.bf16 %v9312_v26, %v9307_v12 }
 0x1b7   : > { %v9291_v38 = vpop.permute.xlu0 %6819 }
 0x1b8   : > { %7129 = vrot.lane.b32.xlu1 %v9288_v62, %s8066_s21 }
 0x1b9   : > { %7114 = vrot.lane.b32.xlu0 %v9221_v14, %s8067_s22  ;;  %v852_v14 = vrot.slane %v719_v47, 1  ;;  %v6717_v47 = vunpack.i.h.bf16 %v9092_v42  ;;  %v1890_v42 = vsel %vm1887_vm6, %v1857_v6, %v6716_v54 }
 0x1ba   : > { %v9298_v41 = vpop.permute.xlu1 %6854 }
 0x1bb   : > { %v9302_v31 = vpop.permute.xlu0 %6824  ;;  %v9327_v37 = vsel %vm776_vm3, %v852_v14, %v853_v16  ;;  %v1891_v14 = vsel %vm1887_vm6, %v1858_v59, %v6717_v47  ;;  %v6661_v47 = vunpack.i.l.bf16 %v9029_v52  ;;  %v6857_v39 = vunpack.i.h.bf16 %v9298_v41 }
 0x1bc   : > { %7134 = vrot.lane.b32.xlu1 %v9300_v21, %s8068_s23  ;;  %13381 = vst [vmem:[#allocation77_spill] sm:$0xff] %v9327_v37  ;;  %v1924_v5 = vsel %vm1920_vm7, %v1891_v14, %v6652_v43 }
 0x1bd   : > { %7119 = vrot.lane.b32.xlu0 %v9237_v22, %s8067_s22  ;;  %v9330_v22 = vsel %vm776_vm3, %v853_v16, %v855_v58  ;;  %v6651_v16 = vunpack.i.l.bf16 %v9002_v53 }
 0x1be   : > { %v6890_v4 = vpop.permute.xlu1 %6889  ;;  %13382 = vst [vmem:[#allocation78_spill] sm:$0xff] %v9330_v22  ;;  %v7148_v3 = vpack.i.bf16 %v9330_v22, %v9327_v37 }
 0x1bf   : > { %v9320_v51 = vpop.permute.xlu0 %6829  ;;  %v1923_v60 = vsel %vm1920_vm7, %v1890_v42, %v6651_v16  ;;  %v6892_v59 = vunpack.i.h.bf16 %v6890_v4  ;;  %v6891_v6 = vunpack.i.l.bf16 %v6890_v4  ;;  %v6672_v42 = vunpack.i.h.bf16 %v9053_v19 }
 0x1c0   : > { %7139 = vrot.lane.b32.xlu1 %v9318_v2, %s8068_s23  ;;  %v1956_v53 = vsel %vm1953_vm8, %v1923_v60, %v6661_v47 }
 0x1c1   : > { %7144 = vrot.lane.b32.xlu0 %v7143_v61, %s8069_s9 }
 0x1c2   : > { %v9339_v20 = vpop.permute.xlu1 %6894 }
 0x1c3   : > { %v9341_v32 = vpop.permute.xlu0 %6834 }
 0x1c4   : > { %7174 = vrot.lane.b32.xlu1 %v7143_v61, %s8065_s20  ;;  %v6662_v61 = vunpack.i.h.bf16 %v9029_v52 }
 0x1c5   : > { %7149 = vrot.lane.b32.xlu0 %v7148_v3, %s8069_s9 }
 0x1c6   : > { %v6900_v45 = vpop.permute.xlu1 %6899  ;;  %v1957_v22 = vsel %vm1953_vm8, %v1924_v5, %v6662_v61 }
 0x1c7   : > { %v6860_v58 = vpop.permute.xlu0 %6859  ;;  %v6902_v43 = vunpack.i.h.bf16 %v6900_v45  ;;  %v6901_v16 = vunpack.i.l.bf16 %v6900_v45  ;;  %v1990_v4 = vsel %vm1986_vm9, %v1957_v22, %v6672_v42  ;;  %v6632_v22 = vunpack.i.h.bf16 %v8987_v63 }
 0x1c8   : > { %7179 = vrot.lane.b32.xlu1 %v7148_v3, %s8065_s20  ;;  %v6671_v3 = vunpack.i.l.bf16 %v9053_v19  ;;  %v2023_v61 = vsel %vm2019_vm10, %v1990_v4, %v6892_v59  ;;  %v6631_v59 = vunpack.i.l.bf16 %v8987_v63 }
 0x1c9   : > { %7154 = vrot.lane.b32.xlu0 %v9276_v29, %s8070_s13  ;;  %v2056_v12 = vsel %vm2052_vm11, %v2023_v61, %v6902_v43  ;;  %v6641_v43 = vunpack.i.l.bf16 %v9012_v0 }
 0x1ca   : > { %v9358_v54 = vpop.permute.xlu1 %6904  ;;  %v1989_v52 = vsel %vm1986_vm9, %v1956_v53, %v6671_v3  ;;  %v6642_v3 = vunpack.i.h.bf16 %v9012_v0  ;;  %v1859_v63 = vsel %vm278_vm1, %v8476_v48, %v6631_v59  ;;  %v1860_v0 = vsel %vm278_vm1, %v8479_v50, %v6632_v22 }
 0x1cb   : > { %v9362_v14 = vpop.permute.xlu0 %6864  ;;  %v2022_v5 = vsel %vm2019_vm10, %v1989_v52, %v6891_v6  ;;  %v6817_v48 = vunpack.i.h.bf16 %v9278_v30  ;;  %v6816_v50 = vunpack.i.l.bf16 %v9278_v30  ;;  %v6826_v22 = vunpack.i.l.bf16 %v9302_v31 }
 0x1cc   : > { %7184 = vrot.lane.b32.xlu1 %v9276_v29, %s8067_s22  ;;  %v2055_v45 = vsel %vm2052_vm11, %v2022_v5, %v6901_v16  ;;  %v6836_v30 = vunpack.i.l.bf16 %v9341_v32 }
 0x1cd   : > { %7159 = vrot.lane.b32.xlu0 %v9288_v62, %s8070_s13 }
 0x1ce   : > { %v6910_v60 = vpop.permute.xlu1 %6909 }
 0x1cf   : > { %v6912_v47 = vunpack.i.h.bf16 %v6910_v60  ;;  %v6911_v37 = vunpack.i.l.bf16 %v6910_v60  ;;  %v6870_v19 = vpop.permute.xlu0 %6869  ;;  %v1893_v60 = vsel %vm1887_vm6, %v1860_v0, %v6642_v3  ;;  %v6837_v3 = vunpack.i.h.bf16 %v9341_v32 }
 0x1d0   : > { %7189 = vrot.lane.b32.xlu1 %v9288_v62, %s8067_s22  ;;  %v6862_v62 = vunpack.i.h.bf16 %v6860_v58  ;;  %v6871_v52 = vunpack.i.l.bf16 %v6870_v19 }
 0x1d1   : > { %v2088_v29 = vsel %vm2085_vm12, %v2055_v45, %v6911_v37  ;;  %v2089_v53 = vsel %vm2085_vm12, %v2056_v12, %v6912_v47  ;;  %7164 = vrot.lane.b32.xlu0 %v9300_v21, %s8071_s14  ;;  %v6861_v37 = vunpack.i.l.bf16 %v6860_v58  ;;  %v6872_v12 = vunpack.i.h.bf16 %v6870_v19 }
 0x1d2   : > { %v2119_v6 = vpack.c.bf16 %v2089_v53, %v2088_v29  ;;  %v9384_v42 = vpop.permute.xlu1 %6934  ;;  %v1892_v58 = vsel %vm1887_vm6, %v1859_v63, %v6641_v43  ;;  %v1926_v5 = vsel %vm1920_vm7, %v1893_v60, %v6862_v62  ;;  %v6827_v53 = vunpack.i.h.bf16 %v9302_v31 }
 0x1d3   : > { %v9388_v16 = vpop.permute.xlu0 %6874  ;;  %v1925_v61 = vsel %vm1920_vm7, %v1892_v58, %v6861_v37  ;;  %v1959_v29 = vsel %vm1953_vm8, %v1926_v5, %v6872_v12 }
 0x1d4   : > { %7194 = vrot.lane.b32.xlu1 %v9300_v21, %s8072_s15  ;;  %6480 = vmatmul.mubr.msk.bf16.vlgmr.msra.gmra.mxu1 %vm2177_vm13, %v2119_v6  ;;  %v1958_v45 = vsel %vm1953_vm8, %v1925_v61, %v6871_v52 }
 0x1d5   : > { %7169 = vrot.lane.b32.xlu0 %v9318_v2, %s8071_s14 }
 0x1d6   : > { %v9399_v4 = vpop.permute.xlu1 %6939 }
 0x1d7   : > { %v6880_v21 = vpop.permute.xlu0 %6879 }
 0x1d8   : > { %v6882_v47 = vunpack.i.h.bf16 %v6880_v21  ;;  %v6881_v19 = vunpack.i.l.bf16 %v6880_v21  ;;  %7204 = vrot.lane.b32.xlu1 %v8600_v23, %s8072_s15 }
 0x1d9   : > { %7199 = vrot.lane.b32.xlu0 %v9252_v56, %s8072_s15 }
 0x1da   : > { %v1991_v59 = vsel %vm1986_vm9, %v1958_v45, %v6881_v19  ;;  %v1992_v6 = vsel %vm1986_vm9, %v1959_v29, %v6882_v47  ;;  %v9417_v23 = vpop.permute.xlu1 %6944  ;;  %v6711_v47 = vunpack.i.l.bf16 %v9075_v24  ;;  %v6722_v19 = vunpack.i.h.bf16 %v9107_v40 }
 0x1db   : > { %v2024_v43 = vsel %vm2019_vm10, %v1991_v59, %v6816_v50  ;;  %v2025_v62 = vsel %vm2019_vm10, %v1992_v6, %v6817_v48  ;;  %v9423_v37 = vpop.permute.xlu0 %6884  ;;  %v6636_v50 = vunpack.i.l.bf16 %v8992_v7  ;;  %v6647_v45 = vunpack.i.h.bf16 %v9024_v15 }
 0x1dc   : > { %7214 = vrot.lane.b32.xlu1 %v8848_v10, %s8072_s15  ;;  %v2057_v56 = vsel %vm2052_vm11, %v2024_v43, %v6826_v22  ;;  %v2058_v31 = vsel %vm2052_vm11, %v2025_v62, %v6827_v53  ;;  %v6646_v53 = vunpack.i.l.bf16 %v9024_v15  ;;  %v1873_v22 = vsel %vm278_vm1, %v8608_v25, %v6711_v47  ;;  %v13384_v47 = vld [vmem:[#allocation54_spill] sm:$0xff] }
 0x1dd   : > { %7209 = vrot.lane.b32.xlu0 %v8518_v17, %s8072_s15  ;;  %v2090_v12 = vsel %vm2085_vm12, %v2057_v56, %v6836_v30  ;;  %v2091_v32 = vsel %vm2085_vm12, %v2058_v31, %v6837_v3  ;;  %v6656_v6 = vunpack.i.l.bf16 %v9022_v36  ;;  %v1875_v15 = vsel %vm278_vm1, %v8499_v8, %v6636_v50 }
 0x1de   : > { %v9433_v52 = vpop.permute.xlu1 %6949  ;;  %v2120_v63 = vpack.c.bf16 %v2091_v32, %v2090_v12  ;;  %v6657_v25 = vunpack.i.h.bf16 %v9022_v36  ;;  %v9504_v43 = vsel %vm1887_vm6, %v1875_v15, %v6646_v53  ;;  %v6842_v62 = vunpack.i.h.bf16 %v9262_v34  ;;  %v13399_v15 = vld [vmem:[#allocation46_spill] sm:$0xff] }
 0x1df   : > { %v9435_v0 = vpop.permute.xlu0 %6914  ;;  %v6841_v56 = vunpack.i.l.bf16 %v9262_v34  ;;  %v6666_v31 = vunpack.i.l.bf16 %v9041_v35  ;;  %v6852_v12 = vunpack.i.h.bf16 %v9286_v9  ;;  %v6851_v32 = vunpack.i.l.bf16 %v9286_v9  ;;  %v13390_v34 = vld [vmem:[#allocation63_spill] sm:$0xff]  ;;  %v13398_v9 = vld [vmem:[#allocation70_spill] sm:$0xff] }
 0x1e0   : > { %6483 = vmatprep.mubr.msk.bf16.mxu1 %vm2177_vm13, %v2120_v63  ;;  %7224 = vrot.lane.b32.xlu1 %v8923_v49, %s8072_s15  ;;  %v13383_v49 = vpack.i.bf16 %v9010_v44, %v9007_v57  ;;  %v6712_v57 = vunpack.i.h.bf16 %v9075_v24  ;;  %v6721_v44 = vunpack.i.l.bf16 %v9107_v40  ;;  %v6676_v50 = vunpack.i.l.bf16 %v13384_v47 }
 0x1e1   : > { %7219 = vrot.lane.b32.xlu0 %v8766_v46, %s8072_s15  ;;  %v6786_v36 = vunpack.i.l.bf16 %v13390_v34  ;;  %v6807_v63 = vunpack.i.h.bf16 %v9235_v28 }
 0x1e2   : > { %v9442_v10 = vpop.permute.xlu1 %6954  ;;  %v1874_v24 = vsel %vm278_vm1, %v8611_v27, %v6712_v57  ;;  %v1906_v59 = vsel %vm1887_vm6, %v1873_v22, %v6721_v44  ;;  %v6677_v57 = vunpack.i.h.bf16 %v13384_v47 }
 0x1e3   : > { %v9444_v17 = vpop.permute.xlu0 %6919 }
 0x1e4   : > { %7234 = vrot.lane.b32.xlu1 %v9318_v2, %s8072_s15 }
 0x1e5   : > { %7229 = vrot.lane.b32.xlu0 %v8927_v1, %s8072_s15 }
 0x1e6   : > { %v9450_v58 = vpop.permute.xlu1 %6959 }
 0x1e7   : > { %v9452_v60 = vpop.permute.xlu0 %6924 }
 0x1e8   : > { %7244 = vrot.lane.b32.xlu1 %v13383_v49, %s8072_s15  ;;  %v6667_v49 = vunpack.i.h.bf16 %v9041_v35  ;;  %v13388_v35 = vld [vmem:[#allocation43_spill] sm:$0xff] }
 0x1e9   : > { %7239 = vrot.lane.b32.xlu0 %v9264_v18, %s8072_s15  ;;  %v6637_v18 = vunpack.i.h.bf16 %v8992_v7  ;;  %v1907_v7 = vsel %vm1887_vm6, %v1874_v24, %v6722_v19  ;;  %v13387_v24 = vld [vmem:[#allocation44_spill] sm:$0xff]  ;;  %v6787_v19 = vunpack.i.h.bf16 %v13390_v34 }
 0x1ea   : > { %v9460_v46 = vpop.permute.xlu1 %6989  ;;  %v1940_v8 = vsel %vm1920_vm7, %v1907_v7, %v6657_v25 }
 0x1eb   : > { %v9462_v21 = vpop.permute.xlu0 %6929  ;;  %v1876_v40 = vsel %vm278_vm1, %v8502_v11, %v6637_v18  ;;  %v1939_v11 = vsel %vm1920_vm7, %v1906_v59, %v6656_v6  ;;  %v1862_v59 = vsel %vm278_vm1, %v13387_v24, %v6842_v62  ;;  %v1973_v6 = vsel %vm1953_vm8, %v1940_v8, %v6667_v49  ;;  %v13397_v18 = vld [vmem:[#allocation69_spill] sm:$0xff] }
 0x1ec   : > { %v9498_v30 = vsel %vm1887_vm6, %v1876_v40, %v6647_v45  ;;  %v1972_v45 = vsel %vm1953_vm8, %v1939_v11, %v6666_v31  ;;  %v1861_v40 = vsel %vm278_vm1, %v13388_v35, %v6841_v56  ;;  %v1895_v11 = vsel %vm1887_vm6, %v1862_v59, %v6852_v12 }
 0x1ed   : > { %v1894_v47 = vsel %vm1887_vm6, %v1861_v40, %v6851_v32  ;;  %v9539_v62 = vsel %vm1986_vm9, %v1972_v45, %v6676_v50  ;;  %v9545_v32 = vsel %vm1986_vm9, %v1973_v6, %v6677_v57  ;;  %v13393_v40 = vld [vmem:[#allocation67_spill] sm:$0xff]  ;;  %v1928_v50 = vsel %vm1920_vm7, %v1895_v11, %v6787_v19 }
 0x1ee   : > { %v9464_v2 = vpop.permute.xlu1 %6994  ;;  %v6792_v22 = vunpack.i.h.bf16 %v13393_v40  ;;  %v1927_v34 = vsel %vm1920_vm7, %v1894_v47, %v6786_v36  ;;  %v6791_v45 = vunpack.i.l.bf16 %v13393_v40  ;;  %v6797_v8 = vunpack.i.h.bf16 %v9203_v55  ;;  %v13396_v40 = vld [vmem:[#allocation74_spill] sm:$0xff] }
 0x1ef   : > { %v9466_v5 = vpop.permute.xlu0 %6964  ;;  %v6796_v49 = vunpack.i.l.bf16 %v9203_v55  ;;  %v6806_v59 = vunpack.i.l.bf16 %v9235_v28  ;;  %v6847_v7 = vunpack.i.h.bf16 %v13396_v40  ;;  %v6846_v57 = vunpack.i.l.bf16 %v13396_v40 }
 0x1f0   : > { %v1961_v55 = vsel %vm1953_vm8, %v1928_v50, %v6797_v8  ;;  %v6767_v28 = vunpack.i.h.bf16 %v13397_v18  ;;  %v6766_v24 = vunpack.i.l.bf16 %v13397_v18  ;;  %v6771_v8 = vunpack.i.l.bf16 %v13398_v9 }
 0x1f1   : > { %v1960_v47 = vsel %vm1953_vm8, %v1927_v34, %v6796_v49  ;;  %v6772_v49 = vunpack.i.h.bf16 %v13398_v9  ;;  %v1994_v50 = vsel %vm1986_vm9, %v1961_v55, %v6807_v63  ;;  %v13401_v55 = vld [vmem:[#allocation72_spill] sm:$0xff] }
 0x1f2   : > { %v9468_v1 = vpop.permute.xlu1 %6999  ;;  %v1993_v34 = vsel %vm1986_vm9, %v1960_v47, %v6806_v59 }
 0x1f3   : > { %v9470_v61 = vpop.permute.xlu0 %6969 }
 0x1f6   : > { %v9477_v48 = vpop.permute.xlu1 %7004 }
 0x1f7   : > { %v9481_v29 = vpop.permute.xlu0 %6974 }
 0x1fa   : > { %v9493_v3 = vpop.permute.xlu1 %7039 }
 0x1fb   : > { %v9501_v27 = vpop.permute.xlu0 %6979  ;;  %v7042_v36 = vunpack.i.h.bf16 %v9493_v3  ;;  %v7041_v19 = vunpack.i.l.bf16 %v9493_v3  ;;  %v6856_v3 = vunpack.i.l.bf16 %v9298_v41  ;;  %v13400_v41 = vld [vmem:[#allocation45_spill] sm:$0xff] }
 0x1fd   : > { %v2026_v40 = vsel %vm2019_vm10, %v1993_v34, %v7041_v19  ;;  %v6777_v34 = vunpack.i.h.bf16 %v13401_v55 }
 0x1fe   : > { %v9517_v44 = vpop.permute.xlu1 %7044 }
 0x1ff   : > { %v9523_v53 = vpop.permute.xlu0 %6984 }
 0x202   : > { %v7050_v56 = vpop.permute.xlu1 %7049 }
 0x203   : > { %v9547_v12 = vpop.permute.xlu0 %7009  ;;  %v7052_v31 = vunpack.i.h.bf16 %v7050_v56  ;;  %v7051_v6 = vunpack.i.l.bf16 %v7050_v56  ;;  %v2027_v56 = vsel %vm2019_vm10, %v1994_v50, %v7042_v36  ;;  %v13403_v50 = vld [vmem:[#allocation31_spill] sm:$0xff] }
 0x205   : > { %v2059_v9 = vsel %vm2052_vm11, %v2026_v40, %v7051_v6  ;;  %v2060_v59 = vsel %vm2052_vm11, %v2027_v56, %v7052_v31  ;;  %v13402_v6 = vld [vmem:[#allocation32_spill] sm:$0xff]  ;;  %v7012_v56 = vunpack.i.h.bf16 %v9547_v12 }
 0x206   : > { %v9561_v25 = vpop.permute.xlu1 %7054  ;;  %v1864_v31 = vsel %vm278_vm1, %v13402_v6, %v6767_v28  ;;  %v13405_v28 = vld [vmem:[#allocation34_spill] sm:$0xff] }
 0x207   : > { %13394 = vst [vmem:[#allocation54_spill] sm:$0xff] %v9561_v25  ;;  %v9567_v11 = vpop.permute.xlu0 %7014  ;;  %v1877_v25 = vsel %vm278_vm1, %v13400_v41, %v6846_v57  ;;  %v7011_v41 = vunpack.i.l.bf16 %v9547_v12 }
 0x208   : > { %13395 = vst [vmem:[#allocation44_spill] sm:$0xff] %v9567_v11  ;;  %v1878_v11 = vsel %vm278_vm1, %v13399_v15, %v6847_v7  ;;  %v1910_v63 = vsel %vm1887_vm6, %v1877_v25, %v6856_v3  ;;  %v6776_v7 = vunpack.i.l.bf16 %v13401_v55  ;;  %v1863_v25 = vsel %vm278_vm1, %v13403_v50, %v6766_v24  ;;  %v13406_v24 = vld [vmem:[#allocation33_spill] sm:$0xff]  ;;  %v13407_v55 = vld [vmem:[#allocation71_spill] sm:$0xff] }
 0x209   : > { %v1911_v47 = vsel %vm1887_vm6, %v1878_v11, %v6857_v39  ;;  %v13404_v39 = vld [vmem:[#allocation73_spill] sm:$0xff]  ;;  %v1943_v3 = vsel %vm1920_vm7, %v1910_v63, %v6791_v45  ;;  %v6812_v6 = vunpack.i.h.bf16 %v13407_v55  ;;  %v6811_v45 = vunpack.i.l.bf16 %v13407_v55 }
 0x20a   : > { %v7060_v13 = vpop.permute.xlu1 %7059  ;;  %v6782_v11 = vunpack.i.h.bf16 %v13404_v39  ;;  %v1944_v40 = vsel %vm1920_vm7, %v1911_v47, %v6792_v22  ;;  %v1896_v22 = vsel %vm1887_vm6, %v1863_v25, %v6776_v7  ;;  %v1897_v63 = vsel %vm1887_vm6, %v1864_v31, %v6777_v34 }
 0x20b   : > { %v7062_v35 = vunpack.i.h.bf16 %v7060_v13  ;;  %v7061_v26 = vunpack.i.l.bf16 %v7060_v13  ;;  %v7020_v18 = vpop.permute.xlu0 %7019  ;;  %v6801_v13 = vunpack.i.l.bf16 %v9219_v33  ;;  %v1930_v7 = vsel %vm1920_vm7, %v1897_v63, %v7012_v56 }
 0x20c   : > { %v6967_v25 = vunpack.i.h.bf16 %v9466_v5  ;;  %v6987_v56 = vunpack.i.h.bf16 %v9523_v53  ;;  %v6821_v63 = vunpack.i.l.bf16 %v9291_v38 }
 0x20d   : > { %v2092_v19 = vsel %vm2085_vm12, %v2059_v9, %v7061_v26  ;;  %v2093_v36 = vsel %vm2085_vm12, %v2060_v59, %v7062_v35  ;;  %v6781_v26 = vunpack.i.l.bf16 %v13404_v39  ;;  %v1880_v9 = vsel %vm278_vm1, %v13405_v28, %v6772_v49 }
 0x20e   : > { %v9594_v15 = vpop.permute.xlu1 %7074  ;;  %v2121_v57 = vpack.c.bf16 %v2093_v36, %v2092_v19  ;;  %v1879_v59 = vsel %vm278_vm1, %v13406_v24, %v6771_v8  ;;  %v7022_v19 = vunpack.i.h.bf16 %v7020_v18  ;;  %v7021_v36 = vunpack.i.l.bf16 %v7020_v18 }
 0x20f   : > { %v9602_v35 = vpop.permute.xlu0 %7024  ;;  %v9620_v12 = vsel %vm1887_vm6, %v1879_v59, %v6781_v26  ;;  %v9623_v49 = vsel %vm1887_vm6, %v1880_v9, %v6782_v11  ;;  %v1976_v8 = vsel %vm1953_vm8, %v1943_v3, %v6801_v13  ;;  %v13408_v18 = vunpack.i.h.bf16 %v9219_v33 }
 0x210   : > { %6484 = vmatmul.mubr.msk.bf16.gmra.mxu1 %vm2177_vm13, %v2121_v57  ;;  %v1929_v39 = vsel %vm1920_vm7, %v1896_v22, %v7011_v41  ;;  %v6966_v26 = vunpack.i.l.bf16 %v9466_v5  ;;  %v1963_v28 = vsel %vm1953_vm8, %v1930_v7, %v7022_v19  ;;  %v6977_v13 = vunpack.i.h.bf16 %v9481_v29 }
 0x211   : > { %v1977_v57 = vsel %vm1953_vm8, %v1944_v40, %v13408_v18  ;;  %v1962_v11 = vsel %vm1953_vm8, %v1929_v39, %v7021_v36  ;;  %v6976_v33 = vunpack.i.l.bf16 %v9481_v29  ;;  %v6986_v9 = vunpack.i.l.bf16 %v9523_v53 }
 0x212   : > { %v9617_v47 = vpop.permute.xlu1 %7079  ;;  %v6896_v19 = vunpack.i.l.bf16 %v9339_v20  ;;  %v6866_v29 = vunpack.i.l.bf16 %v9362_v14  ;;  %v6822_v22 = vunpack.i.h.bf16 %v9291_v38  ;;  %v6867_v39 = vunpack.i.h.bf16 %v9362_v14  ;;  %v2459_v14 = vld [vmem:[#allocation2 + $0x28] sm:$0xf] }
 0x213   : > { %v7030_v50 = vpop.permute.xlu0 %7029  ;;  %v6876_v7 = vunpack.i.l.bf16 %v9388_v16  ;;  %v9666_v38 = vsel %vm1986_vm9, %v1977_v57, %v6812_v6  ;;  %v6887_v6 = vunpack.i.h.bf16 %v9423_v37  ;;  %v2570_v57 = vrot.slane %v2459_v14, 2 }
 0x214   : > { %v7032_v34 = vunpack.i.h.bf16 %v7030_v50  ;;  %v7031_v31 = vunpack.i.l.bf16 %v7030_v50 }
 0x216   : > { %v1995_v3 = vsel %vm1986_vm9, %v1962_v11, %v7031_v31  ;;  %v1996_v40 = vsel %vm1986_vm9, %v1963_v28, %v7032_v34  ;;  %v9639_v41 = vpop.permute.xlu1 %7084  ;;  %v9663_v11 = vsel %vm1986_vm9, %v1976_v8, %v6811_v45 }
 0x217   : > { %v2028_v5 = vsel %vm2019_vm10, %v1995_v3, %v6966_v26  ;;  %v2029_v24 = vsel %vm2019_vm10, %v1996_v40, %v6967_v25  ;;  %v9645_v59 = vpop.permute.xlu0 %7034  ;;  %v6897_v26 = vunpack.i.h.bf16 %v9339_v20  ;;  %v2038_v3 = vsel %vm2019_vm10, %v9539_v62, %v6896_v19 }
 0x218   : > { %v2061_v36 = vsel %vm2052_vm11, %v2028_v5, %v6976_v33  ;;  %v2062_v55 = vsel %vm2052_vm11, %v2029_v24, %v6977_v13  ;;  %v2457_v13 = vld [vmem:[#allocation2 + $0x18] sm:$0xff]  ;;  %v2458_v33 = vld [vmem:[#allocation2 + $0x20] sm:$0xff]  ;;  %v1941_v40 = vsel %vm1920_vm7, %v9504_v43, %v6866_v29  ;;  %v6886_v20 = vunpack.i.l.bf16 %v9423_v37  ;;  %v9678_v5 = vld [vmem:[#allocation2 + $0x8] sm:$0xff] }
 0x219   : > { %v2094_v53 = vsel %vm2085_vm12, %v2061_v36, %v6986_v9  ;;  %v2095_v18 = vsel %vm2085_vm12, %v2062_v55, %v6987_v56  ;;  %v6877_v56 = vunpack.i.h.bf16 %v9388_v16  ;;  %v2567_v45 = vrot.slane %v2457_v13, 2  ;;  %v2454_v9 = vld [vmem:[#allocation2] sm:$0xff]  ;;  %v9687_v29 = vld [vmem:[#allocation2 + $0x10] sm:$0xf] }
 0x21a   : > { %v9658_v34 = vpop.permute.xlu1 %7089  ;;  %v2122_v31 = vpack.c.bf16 %v2095_v18, %v2094_v53  ;;  %v2568_v8 = vrot.slane %v2458_v33, 2  ;;  %v6907_v24 = vunpack.i.h.bf16 %v9358_v54  ;;  %v6906_v62 = vunpack.i.l.bf16 %v9358_v54 }
 0x21b   : > { %v9668_v28 = vpop.permute.xlu0 %7064  ;;  %v1942_v43 = vsel %vm1920_vm7, %v9498_v30, %v6867_v39  ;;  %v1974_v16 = vsel %vm1953_vm8, %v1941_v40, %v6876_v7  ;;  %v2562_v53 = vrot.slane %v2454_v9, 2  ;;  %v2563_v18 = vrot.slane %v9678_v5, 2 }
 0x21c   : > { %6487 = vmatprep.mubr.msk.bf16.mxu1 %vm2177_vm13, %v2122_v31  ;;  %v2569_v36 = vsel %vm889_vm4, %v2567_v45, %v2568_v8  ;;  %v2571_v55 = vsel %vm889_vm4, %v2568_v8, %v2570_v57  ;;  %v2039_v54 = vsel %vm2019_vm10, %v9545_v32, %v6897_v26  ;;  %v1975_v30 = vsel %vm1953_vm8, %v1942_v43, %v6877_v56  ;;  %v13416_v57 = vld [vmem:[#allocation56_spill] sm:$0xff] }
 0x21d   : > { %v2007_v39 = vsel %vm1986_vm9, %v1974_v16, %v6886_v20  ;;  %v7253_v7 = vpack.i.bf16 %v2571_v55, %v2569_v36  ;;  %v2008_v31 = vsel %vm1986_vm9, %v1975_v30, %v6887_v6  ;;  %v2565_v40 = vrot.slane %v9687_v29, 2  ;;  %v2510_v30 = vld [vmem:[#allocation2 + $0x1c0] sm:$0xf] }
 0x21e   : > { %v9685_v19 = vpop.permute.xlu1 %7094  ;;  %v2647_v50 = vrot.slane %v2457_v13, 4  ;;  %v2648_v25 = vrot.slane %v2458_v33, 4  ;;  %v9701_v45 = vsel %vm2052_vm11, %v2038_v3, %v6906_v62  ;;  %v9704_v8 = vsel %vm2052_vm11, %v2039_v54, %v6907_v24  ;;  %v13414_v54 = vld [vmem:[#allocation48_spill] sm:$0xff] }
 0x21f   : > { %v9689_v37 = vpop.permute.xlu0 %7069  ;;  %7254 = vrot.lane.b32.xlu1 %v7253_v7, %s8066_s21  ;;  %v2650_v26 = vrot.slane %v2459_v14, 4  ;;  %v2564_v3 = vsel %vm889_vm4, %v2562_v53, %v2563_v18  ;;  %v2040_v6 = vsel %vm2019_vm10, %v2007_v39, %v6821_v63  ;;  %v2041_v24 = vsel %vm2019_vm10, %v2008_v31, %v6822_v22  ;;  %v2512_v31 = vld [vmem:[#allocation2 + $0x1d0] sm:$0xff]  ;;  %v2513_v13 = vld [vmem:[#allocation2 + $0x1d8] sm:$0xf] }
 0x220   : > { %v6917_v62 = vunpack.i.h.bf16 %v9435_v0  ;;  %v6916_v43 = vunpack.i.l.bf16 %v9435_v0  ;;  %v2566_v14 = vsel %vm889_vm4, %v2563_v18, %v2565_v40  ;;  %v2649_v16 = vsel %vm444_vm0, %v2647_v50, %v2648_v25  ;;  %v13412_v40 = vld [vmem:[#allocation49_spill] sm:$0xff]  ;;  %v2509_v0 = vld [vmem:[#allocation2 + $0x1b8] sm:$0xff] }
 0x221   : > { %v2642_v36 = vrot.slane %v2454_v9, 4  ;;  %v2643_v55 = vrot.slane %v9678_v5, 4  ;;  %v7248_v63 = vpack.i.bf16 %v2566_v14, %v2564_v3  ;;  %v2651_v22 = vsel %vm444_vm0, %v2648_v25, %v2650_v26  ;;  %v2511_v5 = vld [vmem:[#allocation2 + $0x1c8] sm:$0xff] }
 0x222   : > { %v9707_v32 = vpop.permute.xlu1 %7099  ;;  %v6992_v18 = vunpack.i.h.bf16 %v9460_v46  ;;  %v13411_v50 = vunpack.i.l.bf16 %v9320_v51  ;;  %v9740_v3 = vsel %vm278_vm1, %v13412_v40, %v6917_v62  ;;  %v6991_v25 = vunpack.i.l.bf16 %v9460_v46 }
 0x223   : > { %13409 = vst [vmem:[#allocation43_spill] sm:$0xff] %v9707_v32  ;;  %v9713_v33 = vpop.permute.xlu0 %7104  ;;  %v13413_v26 = vunpack.i.h.bf16 %v9320_v51  ;;  %7249 = vrot.lane.b32.xlu0 %v7248_v63, %s8066_s21  ;;  %v7263_v39 = vpack.i.bf16 %v2651_v22, %v2649_v16  ;;  %v2644_v62 = vsel %vm444_vm0, %v2642_v36, %v2643_v55  ;;  %v2645_v40 = vrot.slane %v9687_v29, 4  ;;  %v2508_v22 = vld [vmem:[#allocation2 + $0x1b0] sm:$0xff] }
 0x224   : > { %v9736_v9 = vsel %vm2052_vm11, %v2040_v6, %v13411_v50  ;;  %v9751_v6 = vsel %vm278_vm1, %v13414_v54, %v6916_v43  ;;  %v7001_v50 = vunpack.i.l.bf16 %v9468_v1  ;;  %v6922_v46 = vunpack.i.h.bf16 %v9444_v17 }
 0x225   : > { %v9746_v14 = vsel %vm2052_vm11, %v2041_v24, %v13413_v26  ;;  %7264 = vrot.lane.b32.xlu1 %v7263_v39, %s8068_s23  ;;  %v2760_v24 = vrot.slane %v2512_v31, 2  ;;  %v7273_v63 = vpack.i.bf16 %v2512_v31, %v2511_v5  ;;  %v2759_v16 = vrot.slane %v2511_v5, 2  ;;  %v13415_v26 = vld [vmem:[#allocation57_spill] sm:$0xff] }
 0x226   : > { %v9725_v53 = vpop.permute.xlu1 %7124  ;;  %v1866_v43 = vsel %vm278_vm1, %v13415_v26, %v6992_v18  ;;  %v7002_v54 = vunpack.i.h.bf16 %v9468_v1  ;;  %v2646_v36 = vsel %vm444_vm0, %v2643_v55, %v2645_v40  ;;  %v2755_v29 = vrot.slane %v2509_v0, 2 }
 0x227   : > { %v9731_v7 = vpop.permute.xlu0 %7109  ;;  %v1865_v56 = vsel %vm278_vm1, %v13416_v57, %v6991_v25  ;;  %v6997_v39 = vunpack.i.h.bf16 %v9464_v2  ;;  %v6996_v5 = vunpack.i.l.bf16 %v9464_v2  ;;  %v7258_v31 = vpack.i.bf16 %v2646_v36, %v2644_v62 }
 0x228   : > { %13410 = vst [vmem:[#allocation63_spill] sm:$0xff] %v9731_v7  ;;  %v1898_v7 = vsel %vm1887_vm6, %v1865_v56, %v7001_v50  ;;  %v7007_v18 = vunpack.i.h.bf16 %v9477_v48  ;;  %v7006_v1 = vunpack.i.l.bf16 %v9477_v48  ;;  %v2754_v26 = vrot.slane %v2508_v22, 2 }
 0x229   : > { %7259 = vrot.lane.b32.xlu0 %v7258_v31, %s8068_s23  ;;  %7274 = vrot.lane.b32.xlu1 %v7273_v63, %s8065_s20  ;;  %v7268_v55 = vpack.i.bf16 %v2509_v0, %v2508_v22  ;;  %v2761_v57 = vsel %vm889_vm4, %v2759_v16, %v2760_v24  ;;  %v2762_v25 = vrot.slane %v2513_v13, 2  ;;  %v2757_v40 = vrot.slane %v2510_v30, 2  ;;  %v13418_v13 = vld [vmem:[#allocation59_spill] sm:$0xff] }
 0x22a   : > { %v9757_v51 = vpop.permute.xlu1 %7129  ;;  %v6921_v2 = vunpack.i.l.bf16 %v9444_v17  ;;  %v6927_v56 = vunpack.i.h.bf16 %v9452_v60  ;;  %v1899_v50 = vsel %vm1887_vm6, %v1866_v43, %v7002_v54  ;;  %v2756_v48 = vsel %vm889_vm4, %v2754_v26, %v2755_v29  ;;  %v13419_v17 = vld [vmem:[#allocation58_spill] sm:$0xff] }
 0x22b   : > { %v9763_v20 = vpop.permute.xlu0 %7114  ;;  %v6926_v36 = vunpack.i.l.bf16 %v9452_v60  ;;  %v6931_v31 = vunpack.i.l.bf16 %v9462_v21  ;;  %v2763_v0 = vsel %vm889_vm4, %v2760_v24, %v2762_v25  ;;  %v2758_v63 = vsel %vm889_vm4, %v2755_v29, %v2757_v40  ;;  %v13422_v40 = vld [vmem:[#allocation51_spill] sm:$0xff] }
 0x22c   : > { %v1882_v30 = vsel %vm278_vm1, %v13418_v13, %v6997_v39  ;;  %v1881_v16 = vsel %vm278_vm1, %v13419_v17, %v6996_v5  ;;  %v13420_v22 = vunpack.i.l.bf16 %v9384_v42  ;;  %v7283_v54 = vpack.i.bf16 %v2763_v0, %v2761_v57 }
 0x22d   : > { %v13421_v26 = vunpack.i.h.bf16 %v9384_v42  ;;  %v1915_v24 = vsel %vm1887_vm6, %v1882_v30, %v7007_v18  ;;  %7269 = vrot.lane.b32.xlu0 %v7268_v55, %s8065_s20  ;;  %v7278_v39 = vpack.i.bf16 %v2758_v63, %v2756_v48  ;;  %v6957_v5 = vunpack.i.h.bf16 %v9442_v10 }
 0x22e   : > { %v9773_v32 = vpop.permute.xlu1 %7134  ;;  %v1931_v43 = vsel %vm1920_vm7, %v1898_v7, %v13420_v22  ;;  %v6956_v25 = vunpack.i.l.bf16 %v9442_v10  ;;  %v1884_v7 = vsel %vm278_vm1, %v13422_v40, %v6922_v46  ;;  %v6932_v42 = vunpack.i.h.bf16 %v9462_v21  ;;  %7284 = vrot.lane.b32.xlu1 %v7283_v54, %s8067_s22 }
 0x22f   : > { %v9781_v62 = vpop.permute.xlu0 %7119  ;;  %v1932_v60 = vsel %vm1920_vm7, %v1899_v50, %v13421_v26  ;;  %v6961_v55 = vunpack.i.l.bf16 %v9450_v58  ;;  %v13424_v48 = vunpack.i.l.bf16 %v9417_v23  ;;  %v13425_v0 = vunpack.i.l.bf16 %v9399_v4 }
 0x230   : > { %13417 = vst [vmem:[#allocation67_spill] sm:$0xff] %v9781_v62  ;;  %v1914_v62 = vsel %vm1887_vm6, %v1881_v16, %v7006_v1  ;;  %v13423_v1 = vld [vmem:[#allocation50_spill] sm:$0xff]  ;;  %v13426_v21 = vunpack.i.h.bf16 %v9399_v4  ;;  %v7066_v13 = vunpack.i.l.bf16 %v9668_v28  ;;  %v9830_v17 = vsel %vm1887_vm6, %v9751_v6, %v6926_v36 }
 0x231   : > { %v1883_v18 = vsel %vm278_vm1, %v13423_v1, %v6921_v2  ;;  %v1964_v10 = vsel %vm1953_vm8, %v1931_v43, %v13424_v48  ;;  %v1947_v46 = vsel %vm1920_vm7, %v1914_v62, %v13425_v0  ;;  %v13427_v2 = vunpack.i.h.bf16 %v9417_v23  ;;  %7279 = vrot.lane.b32.xlu0 %v7278_v39, %s8067_s22  ;;  %v13430_v39 = vld [vmem:[#allocation65_spill] sm:$0xff] }
 0x232   : > { %v9800_v29 = vpop.permute.xlu1 %7139  ;;  %v1948_v63 = vsel %vm1920_vm7, %v1915_v24, %v13426_v21  ;;  %v9834_v16 = vsel %vm1887_vm6, %v9740_v3, %v6927_v56  ;;  %v9837_v62 = vsel %vm1887_vm6, %v1883_v18, %v6931_v31  ;;  %v7071_v4 = vunpack.i.l.bf16 %v9689_v37 }
 0x233   : > { %v9808_v57 = vpop.permute.xlu0 %7144  ;;  %v1965_v30 = vsel %vm1953_vm8, %v1932_v60, %v13427_v2  ;;  %v9844_v23 = vsel %vm1887_vm6, %v1884_v7, %v6932_v42  ;;  %v9849_v36 = vsel %vm1986_vm9, %v1964_v10, %v6956_v25  ;;  %v7067_v56 = vunpack.i.h.bf16 %v9668_v28 }
 0x234   : > { %v9855_v31 = vsel %vm1986_vm9, %v1965_v30, %v6957_v5  ;;  %v13428_v54 = vunpack.i.l.bf16 %v9433_v52  ;;  %v13429_v60 = vunpack.i.h.bf16 %v9433_v52  ;;  %v1871_v25 = vsel %vm278_vm1, %v13430_v39, %v7066_v13  ;;  %v13432_v13 = vld [vmem:[#allocation44_spill] sm:$0xff]  ;;  %v13433_v30 = vld [vmem:[#allocation66_spill] sm:$0xff] }
 0x235   : > { %v7072_v40 = vunpack.i.h.bf16 %v9689_v37  ;;  %v7127_v7 = vunpack.i.h.bf16 %v9725_v53  ;;  %v7126_v28 = vunpack.i.l.bf16 %v9725_v53  ;;  %v1904_v42 = vsel %vm1887_vm6, %v1871_v25, %v7071_v4  ;;  %v13436_v25 = vld [vmem:[#allocation76_spill] sm:$0xff] }
 0x236   : > { %v9840_v22 = vpop.permute.xlu1 %7174  ;;  %v1980_v26 = vsel %vm1953_vm8, %v1947_v46, %v13428_v54  ;;  %v9863_v24 = vsel %vm1953_vm8, %v1948_v63, %v13429_v60  ;;  %v7137_v1 = vunpack.i.h.bf16 %v9773_v32  ;;  %v7136_v52 = vunpack.i.l.bf16 %v9773_v32  ;;  %v13431_v46 = vld [vmem:[#allocation54_spill] sm:$0xff]  ;;  %v13434_v54 = vld [vmem:[#allocation61_spill] sm:$0xff] }
 0x237   : > { %v9851_v3 = vpop.permute.xlu0 %7149  ;;  %v9880_v0 = vsel %vm1986_vm9, %v1980_v26, %v6961_v55  ;;  %v1872_v32 = vsel %vm278_vm1, %v13433_v30, %v7067_v56  ;;  %v13435_v60 = vunpack.i.l.bf16 %v13434_v54  ;;  %v1870_v55 = vsel %vm278_vm1, %v13436_v25, %v7127_v7  ;;  %v13437_v26 = vld [vmem:[#allocation75_spill] sm:$0xff] }
 0x238   : > { %v1905_v4 = vsel %vm1887_vm6, %v1872_v32, %v7072_v40  ;;  %v1869_v5 = vsel %vm278_vm1, %v13437_v26, %v7126_v28  ;;  %v7077_v43 = vunpack.i.h.bf16 %v9594_v15  ;;  %v1903_v56 = vsel %vm1887_vm6, %v1870_v55, %v7137_v1  ;;  %v13439_v1 = vld [vmem:[#allocation64_spill] sm:$0xff] }
 0x239   : > { %v1937_v39 = vsel %vm1920_vm7, %v1904_v42, %v13435_v60  ;;  %v1902_v21 = vsel %vm1887_vm6, %v1869_v5, %v7136_v52  ;;  %v7076_v40 = vunpack.i.l.bf16 %v9594_v15  ;;  %v7087_v42 = vunpack.i.h.bf16 %v9639_v41 }
 0x23a   : > { %v9874_v18 = vpop.permute.xlu1 %7179  ;;  %v7086_v7 = vunpack.i.l.bf16 %v9639_v41  ;;  %v7097_v28 = vunpack.i.h.bf16 %v9685_v19  ;;  %v7096_v25 = vunpack.i.l.bf16 %v9685_v19  ;;  %v13438_v26 = vunpack.i.h.bf16 %v13434_v54 }
 0x23b   : > { %v7155_v53 = vpop.permute.xlu0 %7154  ;;  %v13440_v52 = vunpack.i.l.bf16 %v13439_v1  ;;  %v1935_v55 = vsel %vm1920_vm7, %v1902_v21, %v7076_v40  ;;  %v1936_v6 = vsel %vm1920_vm7, %v1903_v56, %v7077_v43  ;;  %v7147_v41 = vunpack.i.h.bf16 %v9808_v57  ;;  %v13442_v40 = vld [vmem:[#allocation68_spill] sm:$0xff] }
 0x23c   : > { %v1938_v5 = vsel %vm1920_vm7, %v1905_v4, %v13438_v26  ;;  %v7146_v63 = vunpack.i.l.bf16 %v9808_v57  ;;  %v7177_v10 = vunpack.i.h.bf16 %v9840_v22  ;;  %v7176_v19 = vunpack.i.l.bf16 %v9840_v22 }
 0x23d   : > { %v1970_v15 = vsel %vm1953_vm8, %v1937_v39, %v13440_v52  ;;  %v7157_v50 = vunpack.i.h.bf16 %v7155_v53  ;;  %v7156_v54 = vunpack.i.l.bf16 %v7155_v53  ;;  %v13441_v4 = vunpack.i.h.bf16 %v13439_v1 }
 0x23e   : > { %v7185_v30 = vpop.permute.xlu1 %7184  ;;  %v7107_v21 = vunpack.i.h.bf16 %v9713_v33  ;;  %v7106_v43 = vunpack.i.l.bf16 %v9713_v33  ;;  %v13443_v26 = vunpack.i.l.bf16 %v13442_v40  ;;  %v1968_v53 = vsel %vm1953_vm8, %v1935_v55, %v7086_v7 }
 0x23f   : > { %v9903_v60 = vpop.permute.xlu0 %7159  ;;  %v1971_v39 = vsel %vm1953_vm8, %v1938_v5, %v13441_v4  ;;  %v7187_v52 = vunpack.i.h.bf16 %v7185_v30  ;;  %v7186_v32 = vunpack.i.l.bf16 %v7185_v30  ;;  %v1969_v48 = vsel %vm1953_vm8, %v1936_v6, %v7087_v42 }
 0x240   : > { %v2003_v57 = vsel %vm1986_vm9, %v1970_v15, %v13443_v26  ;;  %v1933_v5 = vsel %vm1920_vm7, %v9830_v17, %v7146_v63  ;;  %v1934_v1 = vsel %vm1920_vm7, %v9834_v16, %v7147_v41  ;;  %v2030_v33 = vsel %vm2019_vm10, %v9849_v36, %v7176_v19 }
 0x241   : > { %v2031_v15 = vsel %vm2019_vm10, %v9855_v31, %v7177_v10  ;;  %v1966_v30 = vsel %vm1953_vm8, %v1933_v5, %v7156_v54  ;;  %v1967_v4 = vsel %vm1953_vm8, %v1934_v1, %v7157_v50  ;;  %v2063_v16 = vsel %vm2052_vm11, %v2030_v33, %v7186_v32 }
 0x242   : > { %v9919_v37 = vpop.permute.xlu1 %7189  ;;  %v2064_v36 = vsel %vm2052_vm11, %v2031_v15, %v7187_v52  ;;  %v2001_v55 = vsel %vm1986_vm9, %v1968_v53, %v7096_v25  ;;  %v2002_v31 = vsel %vm1986_vm9, %v1969_v48, %v7097_v28  ;;  %v7117_v10 = vunpack.i.h.bf16 %v9763_v20  ;;  %v13445_v28 = vld [vmem:[#allocation60_spill] sm:$0xff] }
 0x243   : > { %v7165_v56 = vpop.permute.xlu0 %7164  ;;  %v13444_v41 = vunpack.i.h.bf16 %v13442_v40  ;;  %v7116_v54 = vunpack.i.l.bf16 %v9763_v20  ;;  %v13446_v53 = vunpack.i.l.bf16 %v13445_v28  ;;  %v13447_v1 = vunpack.i.h.bf16 %v13445_v28 }
 0x244   : > { %v7167_v22 = vunpack.i.h.bf16 %v7165_v56  ;;  %v7166_v2 = vunpack.i.l.bf16 %v7165_v56  ;;  %v7036_v20 = vunpack.i.l.bf16 %v9645_v59 }
 0x245   : > { %v2004_v19 = vsel %vm1986_vm9, %v1971_v39, %v13444_v41  ;;  %v2034_v5 = vsel %vm2019_vm10, %v2001_v55, %v13446_v53  ;;  %v2035_v40 = vsel %vm2019_vm10, %v2002_v31, %v13447_v1  ;;  %v7026_v39 = vunpack.i.l.bf16 %v9602_v35  ;;  %v13457_v1 = vld [vmem:[#allocation55_spill] sm:$0xff] }
 0x246   : > { %v7195_v56 = vpop.permute.xlu1 %7194  ;;  %v1999_v7 = vsel %vm1986_vm9, %v1966_v30, %v7166_v2  ;;  %v2000_v6 = vsel %vm1986_vm9, %v1967_v4, %v7167_v22  ;;  %v13448_v4 = vld [vmem:[#allocation53_spill] sm:$0xff] }
 0x247   : > { %v7197_v42 = vunpack.i.h.bf16 %v7195_v56  ;;  %v7196_v17 = vunpack.i.l.bf16 %v7195_v56  ;;  %v9943_v63 = vpop.permute.xlu0 %7169  ;;  %v2032_v32 = vsel %vm2019_vm10, %v1999_v7, %v7106_v43  ;;  %v2033_v26 = vsel %vm2019_vm10, %v2000_v6, %v7107_v21 }
 0x248   : > { %v2065_v21 = vsel %vm2052_vm11, %v2032_v32, %v7116_v54  ;;  %v2066_v30 = vsel %vm2052_vm11, %v2033_v26, %v7117_v10  ;;  %v13449_v56 = vunpack.i.l.bf16 %v13448_v4  ;;  %v13450_v6 = vunpack.i.h.bf16 %v13448_v4 }
 0x249   : > { %v2096_v50 = vsel %vm2085_vm12, %v2063_v16, %v7196_v17  ;;  %v2097_v2 = vsel %vm2085_vm12, %v2064_v36, %v7197_v42  ;;  %v13451_v17 = vld [vmem:[#allocation62_spill] sm:$0xff]  ;;  %v13454_v32 = vunpack.i.l.bf16 %v13432_v13 }
 0x24a   : > { %v7205_v52 = vpop.permute.xlu1 %7204  ;;  %v2123_v25 = vpack.c.bf16 %v2097_v2, %v2096_v50  ;;  %v2036_v7 = vsel %vm2019_vm10, %v2003_v57, %v13449_v56  ;;  %v2037_v42 = vsel %vm2019_vm10, %v2004_v19, %v13450_v6  ;;  %v13452_v16 = vunpack.i.l.bf16 %v13451_v17 }
 0x24b   : > { %v7207_v22 = vunpack.i.h.bf16 %v7205_v52  ;;  %v7206_v48 = vunpack.i.l.bf16 %v7205_v52  ;;  %v7200_v33 = vpop.permute.xlu0 %7199  ;;  %v13453_v55 = vunpack.i.h.bf16 %v13451_v17  ;;  %v7037_v2 = vunpack.i.h.bf16 %v9645_v59 }
 0x24c   : > { %v7202_v43 = vunpack.i.h.bf16 %v7200_v33  ;;  %v7201_v15 = vunpack.i.l.bf16 %v7200_v33  ;;  %6488 = vmatmul.mubr.msk.bf16.gmra.mxu1 %vm2177_vm13, %v2123_v25  ;;  %v2067_v36 = vsel %vm2052_vm11, %v2034_v5, %v13452_v16  ;;  %v1945_v26 = vsel %vm1920_vm7, %v9620_v12, %v13454_v32 }
 0x24d   : > { %v2068_v31 = vsel %vm2052_vm11, %v2035_v40, %v13453_v55  ;;  %v2100_v57 = vsel %vm2085_vm12, %v2067_v36, %v7206_v48  ;;  %v13455_v52 = vunpack.i.h.bf16 %v13432_v13  ;;  %v1978_v59 = vsel %vm1953_vm8, %v1945_v26, %v7026_v39 }
 0x24e   : > { %v2098_v50 = vsel %vm2085_vm12, %v2065_v21, %v7201_v15  ;;  %v2099_v10 = vsel %vm2085_vm12, %v2066_v30, %v7202_v43  ;;  %v2101_v41 = vsel %vm2085_vm12, %v2068_v31, %v7207_v22  ;;  %v7215_v28 = vpop.permute.xlu1 %7214  ;;  %v13456_v48 = vunpack.i.h.bf16 %v9602_v35 }
 0x24f   : > { %v7210_v54 = vpop.permute.xlu0 %7209  ;;  %v2124_v19 = vpack.c.bf16 %v2099_v10, %v2098_v50  ;;  %v1946_v25 = vsel %vm1920_vm7, %v9623_v49, %v13455_v52  ;;  %v13458_v40 = vunpack.i.l.bf16 %v13457_v1  ;;  %v13459_v12 = vunpack.i.h.bf16 %v13457_v1 }
 0x250   : > { %v7212_v53 = vunpack.i.h.bf16 %v7210_v54  ;;  %v7211_v5 = vunpack.i.l.bf16 %v7210_v54  ;;  %v1979_v22 = vsel %vm1953_vm8, %v1946_v25, %v13456_v48  ;;  %v2011_v49 = vsel %vm1986_vm9, %v1978_v59, %v7036_v20  ;;  %v13469_v59 = vld [vmem:[#allocation77_spill] sm:$0xff] }
 0x251   : > { %v2069_v33 = vsel %vm2052_vm11, %v2036_v7, %v13458_v40  ;;  %v2070_v13 = vsel %vm2052_vm11, %v2037_v42, %v13459_v12  ;;  %6491 = vmatprep.mubr.msk.bf16.mxu1 %vm2177_vm13, %v2124_v19  ;;  %v2125_v15 = vpack.c.bf16 %v2101_v41, %v2100_v57  ;;  %v2012_v35 = vsel %vm1986_vm9, %v1979_v22, %v7037_v2 }
 0x252   : > { %v2102_v43 = vsel %vm2085_vm12, %v2069_v33, %v7211_v5  ;;  %v2103_v39 = vsel %vm2085_vm12, %v2070_v13, %v7212_v53  ;;  %v7217_v21 = vunpack.i.h.bf16 %v7215_v28  ;;  %v7216_v30 = vunpack.i.l.bf16 %v7215_v28  ;;  %v7225_v52 = vpop.permute.xlu1 %7224  ;;  %v13468_v53 = vld [vmem:[#allocation43_spill] sm:$0xff] }
 0x253   : > { %v7220_v4 = vpop.permute.xlu0 %7219  ;;  %v2126_v56 = vpack.c.bf16 %v2103_v39, %v2102_v43  ;;  %v13460_v7 = vunpack.i.l.bf16 %v9517_v44  ;;  %v13461_v42 = vunpack.i.h.bf16 %v9450_v58  ;;  %v13462_v36 = vunpack.i.h.bf16 %v9517_v44 }
 0x254   : > { %v7222_v17 = vunpack.i.h.bf16 %v7220_v4  ;;  %v7221_v16 = vunpack.i.l.bf16 %v7220_v4  ;;  %6492 = vmatmul.mubr.msk.bf16.gmra.mxu1 %vm2177_vm13, %v2125_v15  ;;  %v13463_v31 = vunpack.i.l.bf16 %v13431_v46  ;;  %v13465_v10 = vunpack.i.h.bf16 %v13431_v46 }
 0x255   : > { %v2042_v6 = vsel %vm2019_vm10, %v9663_v11, %v13460_v7  ;;  %v10017_v20 = vsel %vm1986_vm9, %v9863_v24, %v13461_v42  ;;  %v2043_v55 = vsel %vm2019_vm10, %v9666_v38, %v13462_v36  ;;  %v13464_v11 = vunpack.i.l.bf16 %v9470_v61  ;;  %6495 = vmatprep.mubr.msk.bf16.mxu1 %vm2177_vm13, %v2126_v56  ;;  %v13473_v7 = vld [vmem:[#allocation67_spill] sm:$0xff] }
 0x256   : > { %v2075_v50 = vsel %vm2052_vm11, %v2042_v6, %v13463_v31  ;;  %v7131_v24 = vunpack.i.l.bf16 %v9757_v51  ;;  %v2076_v2 = vsel %vm2052_vm11, %v2043_v55, %v13465_v10  ;;  %v7082_v44 = vunpack.i.h.bf16 %v9617_v47 }
 0x257   : > { %v2044_v58 = vsel %vm2019_vm10, %v2011_v49, %v13464_v11  ;;  %v13466_v38 = vunpack.i.h.bf16 %v9470_v61  ;;  %v7141_v41 = vunpack.i.l.bf16 %v9800_v29  ;;  %v7081_v54 = vunpack.i.l.bf16 %v9617_v47  ;;  %v7230_v48 = vpop.permute.xlu0 %7229  ;;  %v7235_v11 = vpop.permute.xlu1 %7234 }
 0x258   : > { %v7092_v19 = vunpack.i.h.bf16 %v9658_v34  ;;  %v2104_v32 = vsel %vm2085_vm12, %v9701_v45, %v7216_v30  ;;  %v2105_v46 = vsel %vm2085_vm12, %v9704_v8, %v7217_v21  ;;  %v7091_v26 = vunpack.i.l.bf16 %v9658_v34  ;;  %v13472_v21 = vld [vmem:[#allocation78_spill] sm:$0xff] }
 0x259   : > { %v2045_v57 = vsel %vm2019_vm10, %v2012_v35, %v13466_v38  ;;  %v2106_v61 = vsel %vm2085_vm12, %v9736_v9, %v7221_v16  ;;  %v2107_v25 = vsel %vm2085_vm12, %v9746_v14, %v7222_v17  ;;  %v13467_v28 = vunpack.i.l.bf16 %v9501_v27  ;;  %v13471_v35 = vld [vmem:[#allocation63_spill] sm:$0xff] }
 0x25a   : > { %v7101_v5 = vunpack.i.l.bf16 %v13468_v53  ;;  %v7132_v45 = vunpack.i.h.bf16 %v9757_v51  ;;  %v1885_v8 = vsel %vm278_vm1, %v13469_v59, %v7131_v24  ;;  %v13470_v22 = vunpack.i.h.bf16 %v9501_v27 }
 0x25b   : > { %v2077_v47 = vsel %vm2052_vm11, %v2044_v58, %v13467_v28  ;;  %v7142_v9 = vunpack.i.h.bf16 %v9800_v29  ;;  %v1918_v14 = vsel %vm1887_vm6, %v1885_v8, %v7141_v41  ;;  %v7152_v40 = vunpack.i.h.bf16 %v9851_v3 }
 0x25c   : > { %v2078_v1 = vsel %vm2052_vm11, %v2045_v57, %v13470_v22  ;;  %v2127_v33 = vpack.c.bf16 %v2105_v46, %v2104_v32  ;;  %v7151_v12 = vunpack.i.l.bf16 %v9851_v3  ;;  %v7227_v13 = vunpack.i.h.bf16 %v7225_v52 }
 0x25d   : > { %v7226_v49 = vunpack.i.l.bf16 %v7225_v52  ;;  %v2128_v51 = vpack.c.bf16 %v2107_v25, %v2106_v61  ;;  %v7162_v43 = vunpack.i.h.bf16 %v9903_v60  ;;  %v7161_v39 = vunpack.i.l.bf16 %v9903_v60 }
 0x25e   : > { %v7232_v15 = vunpack.i.h.bf16 %v7230_v48  ;;  %v7231_v27 = vunpack.i.l.bf16 %v7230_v48  ;;  %6496 = vmatmul.mubr.msk.bf16.gmra.mxu1 %vm2177_vm13, %v2127_v33  ;;  %v7112_v29 = vunpack.i.h.bf16 %v13471_v35  ;;  %v1886_v30 = vsel %vm278_vm1, %v13472_v21, %v7132_v45 }
 0x25f   : > { %v7172_v4 = vunpack.i.h.bf16 %v9943_v63  ;;  %v7171_v3 = vunpack.i.l.bf16 %v9943_v63  ;;  %6499 = vmatprep.mubr.msk.bf16.mxu1 %vm2177_vm13, %v2128_v51  ;;  %v7111_v56 = vunpack.i.l.bf16 %v13471_v35  ;;  %v7122_v6 = vunpack.i.h.bf16 %v13473_v7 }
 0x260   : > { %v1919_v60 = vsel %vm1887_vm6, %v1886_v30, %v7142_v9  ;;  %v1951_v42 = vsel %vm1920_vm7, %v1918_v14, %v7081_v54  ;;  %v1949_v17 = vsel %vm1920_vm7, %v9837_v62, %v7151_v12  ;;  %v1950_v16 = vsel %vm1920_vm7, %v9844_v23, %v7152_v40  ;;  %v7245_v14 = vpop.permute.xlu1 %7244 }
 0x261   : > { %v2108_v36 = vsel %vm2085_vm12, %v2075_v50, %v7226_v49  ;;  %v2109_v63 = vsel %vm2085_vm12, %v2076_v2, %v7227_v13  ;;  %v1982_v55 = vsel %vm1953_vm8, %v1949_v17, %v7161_v39  ;;  %v1983_v31 = vsel %vm1953_vm8, %v1950_v16, %v7162_v43  ;;  %v7240_v50 = vpop.permute.xlu0 %7239  ;;  %v13476_v17 = vld [vmem:[#allocation7_spill] sm:$0xff] }
 0x262   : > { %v2110_v58 = vsel %vm2085_vm12, %v2077_v47, %v7231_v27  ;;  %v2111_v24 = vsel %vm2085_vm12, %v2078_v1, %v7232_v15  ;;  %v7182_v10 = vunpack.i.h.bf16 %v9874_v18  ;;  %v7181_v62 = vunpack.i.l.bf16 %v9874_v18  ;;  %v13474_v1 = vld [vmem:[#allocation47_spill] sm:$0xff]  ;;  %v13475_v15 = vld [vmem:[#allocation52_spill] sm:$0xff] }
 0x263   : > { %v2015_v38 = vsel %vm1986_vm9, %v1982_v55, %v7171_v3  ;;  %v2016_v23 = vsel %vm1986_vm9, %v1983_v31, %v7172_v4  ;;  %v1952_v2 = vsel %vm1920_vm7, %v1919_v60, %v7082_v44  ;;  %v7192_v57 = vunpack.i.h.bf16 %v9919_v37 }
 0x264   : > { %v7191_v41 = vunpack.i.l.bf16 %v9919_v37  ;;  %v2129_v54 = vpack.c.bf16 %v2109_v63, %v2108_v36  ;;  %v1984_v32 = vsel %vm1953_vm8, %v1951_v42, %v7091_v26  ;;  %v7237_v46 = vunpack.i.h.bf16 %v7235_v11  ;;  %v7898_v42 = vld [vmem:[%s8256_s19 + $0x10] sm:$0xff] }
 0x265   : > { %v7236_v52 = vunpack.i.l.bf16 %v7235_v11  ;;  %v2130_v61 = vpack.c.bf16 %v2111_v24, %v2110_v58  ;;  %v2048_v25 = vsel %vm2019_vm10, %v2015_v38, %v7111_v56  ;;  %v2049_v18 = vsel %vm2019_vm10, %v2016_v23, %v7112_v29  ;;  %v10137_v56 = vld [vmem:[%s13116_s4] ss:$0 sm:$0xff] }
 0x266   : > { %v7242_v28 = vunpack.i.h.bf16 %v7240_v50  ;;  %v7241_v47 = vunpack.i.l.bf16 %v7240_v50  ;;  %6500 = vmatmul.mubr.msk.bf16.gmra.mxu1 %vm2177_vm13, %v2129_v54  ;;  %v7121_v44 = vunpack.i.l.bf16 %v13473_v7  ;;  %v1985_v37 = vsel %vm1953_vm8, %v1952_v2, %v7092_v19  ;;  %v7899_v11 = vld [vmem:[%s8256_s19] sm:$0xff]  ;;  %v7900_v2 = vld [vmem:[%s8256_s19 + $0x18] sm:$0xff] }
 0x267   : > { %v2046_v26 = vsel %vm2019_vm10, %v9880_v0, %v7181_v62  ;;  %v2047_v45 = vsel %vm2019_vm10, %v10017_v20, %v7182_v10  ;;  %6503 = vmatprep.mubr.msk.bf16.mxu1 %vm2177_vm13, %v2130_v61  ;;  %v7102_v59 = vunpack.i.h.bf16 %v13468_v53  ;;  %v2017_v34 = vsel %vm1986_vm9, %v1984_v32, %v7101_v5  ;;  %v13478_v58 = vld [vmem:[#allocation9_spill] sm:$0xff]  ;;  %v7901_v61 = vld [vmem:[%s8256_s19 + $0x8] sm:$0xff] }
 0x268   : > { %v2079_v8 = vsel %vm2052_vm11, %v2046_v26, %v7191_v41  ;;  %v2080_v48 = vsel %vm2052_vm11, %v2047_v45, %v7192_v57  ;;  %v2081_v0 = vsel %vm2052_vm11, %v2048_v25, %v7121_v44  ;;  %v2082_v20 = vsel %vm2052_vm11, %v2049_v18, %v7122_v6  ;;  %v13480_v57 = vld [vmem:[#allocation11_spill] sm:$0xff]  ;;  %v13482_v25 = vld [vmem:[#allocation13_spill] sm:$0xff] }
 0x269   : > { %v2112_v19 = vsel %vm2085_vm12, %v2079_v8, %v7236_v52  ;;  %v2113_v22 = vsel %vm2085_vm12, %v2080_v48, %v7237_v46  ;;  %v6621_v9 = vunpack.i.l.bf16 %v13474_v1  ;;  %v2018_v40 = vsel %vm1986_vm9, %v1985_v37, %v7102_v59 }
 0x26a   : > { %v2114_v33 = vsel %vm2085_vm12, %v2081_v0, %v7241_v47  ;;  %v2115_v12 = vsel %vm2085_vm12, %v2082_v20, %v7242_v28  ;;  %v6622_v53 = vunpack.i.h.bf16 %v13474_v1  ;;  %v2131_v13 = vpack.c.bf16 %v2113_v22, %v2112_v19 }
 0x26b   : > { %v2050_v5 = vsel %vm2019_vm10, %v2017_v34, %v6621_v9  ;;  %v7247_v49 = vunpack.i.h.bf16 %v7245_v14  ;;  %v7246_v51 = vunpack.i.l.bf16 %v7245_v14  ;;  %v2132_v39 = vpack.c.bf16 %v2115_v12, %v2114_v33 }
 0x26c   : > { %v2051_v43 = vsel %vm2019_vm10, %v2018_v40, %v6622_v53  ;;  %v6627_v27 = vunpack.i.h.bf16 %v13475_v15  ;;  %v6626_v35 = vunpack.i.l.bf16 %v13475_v15  ;;  %v13477_v16 = vmax.f32 %v13476_v17, 0.0  ;;  %v7902_v17 = vld [vmem:[%s8256_s19 + $0x30] sm:$0xff] }
 0x26d   : > { %v13479_v24 = vmax.f32 %v13478_v58, 0.0  ;;  %v13481_v41 = vmax.f32 %v13480_v57, 0.0  ;;  %v13483_v18 = vmax.f32 %v13482_v25, 0.0  ;;  %v7903_v58 = vld [vmem:[%s8256_s19 + $0x20] sm:$0xff] }
 0x26e   : > { %6504 = vmatmul.mubr.msk.bf16.gmra.mxu1 %vm2177_vm13, %v2131_v13  ;;  %v2083_v29 = vsel %vm2052_vm11, %v2050_v5, %v6626_v35  ;;  %v2084_v21 = vsel %vm2052_vm11, %v2051_v43, %v6627_v27  ;;  %v4103_v36 = vadd.f32 %v7898_v42, %v13477_v16  ;;  %v13484_v16 = vld [vmem:[#allocation15_spill] sm:$0xff] }
 0x26f   : > { %6507 = vmatprep.mubr.msk.bf16.mxu1 %vm2177_vm13, %v2132_v39  ;;  %v2116_v30 = vsel %vm2085_vm12, %v2083_v29, %v7246_v51  ;;  %v2117_v4 = vsel %vm2085_vm12, %v2084_v21, %v7247_v49  ;;  %v4101_v10 = vadd.f32 %v7899_v11, %v13479_v24  ;;  %v4104_v54 = vadd.f32 %v7900_v2, %v13481_v41  ;;  %v13486_v24 = vld [vmem:[#allocation17_spill] sm:$0xff]  ;;  %v7904_v41 = vld [vmem:[%s8256_s19 + $0x38] sm:$0xff] }
 0x270   : > { %v2133_v3 = vpack.c.bf16 %v2117_v4, %v2116_v30  ;;  %v4102_v28 = vadd.f32 %v7901_v61, %v13483_v18 }
 0x276   : > { %6508 = vmatmul.mubr.msk.bf16.gmra.mxu1 %vm2177_vm13, %v2133_v3 }
 0x294   : > { %v6481_v7 = vpop.f32.mrf.mxu1 }
 0x295   : > { %v2272_v6 = vadd.f32 %v6481_v7, %v10137_v56 }
 0x296   : > { %v2263_v60 = vpop.f32.mrf.mxu1 }
 0x297   : > { %v2392_v63 = vmax.f32 %v2272_v6, 0.0  ;;  %v2264_v55 = vadd.f32 %v10137_v56, %v2263_v60 }
 0x298   : > { %v6482_v31 = vpop.f32.mrf.mxu1 }
 0x299   : > { %2424 = vst.msk [vmem:[#allocation2 + $0x4a] sm:$0xff] %vm278_vm1, %v2392_v63  ;;  %v10148_v62 = vadd.f32 %v4103_v36, %v2392_v63  ;;  %v2390_v38 = vmax.f32 %v2264_v55, 0.0  ;;  %v2275_v23 = vadd.f32 %v6482_v31, %v10137_v56  ;;  %v13485_v36 = vmax.f32 %v13484_v16, 0.0 }
 0x29a   : > { %v2266_v50 = vpop.f32.mrf.mxu1 }
 0x29b   : > { %2422 = vst.msk [vmem:[#allocation2 + $0x32] sm:$0xff] %vm278_vm1, %v2390_v38  ;;  %v10155_v32 = vadd.f32 %v4101_v10, %v2390_v38  ;;  %v2393_v46 = vmax.f32 %v2275_v23, 0.0  ;;  %v2267_v52 = vadd.f32 %v10137_v56, %v2266_v50  ;;  %v4107_v63 = vadd.f32 %v7902_v17, %v13485_v36 }
 0x29c   : > { %v13487_v10 = vmax.f32 %v13486_v24, 0.0 }
 0x29d   : > { %2425 = vst.msk [vmem:[#allocation2 + $0x52] sm:$0xff] %vm278_vm1, %v2393_v46  ;;  %v10162_v47 = vadd.f32 %v4104_v54, %v2393_v46  ;;  %v2391_v44 = vmax.f32 %v2267_v52, 0.0  ;;  %v13488_v54 = vld [vmem:[#allocation19_spill] sm:$0xff] }
 0x29e   : > { %v4105_v38 = vadd.f32 %v7903_v58, %v13487_v10  ;;  %v13489_v46 = vmax.f32 %v13488_v54, 0.0  ;;  %v7897_v58 = vld [vmem:[%s13117_s5] sm:$0xff]  }
 0x29f   : > { %2423 = vst.msk [vmem:[#allocation2 + $0x3a] sm:$0xff] %vm278_vm1, %v2391_v44  ;;  %v10165_v37 = vadd.f32 %v4102_v28, %v2391_v44  ;;  %v7905_v28 = vld [vmem:[%s8256_s19 + $0x28] sm:$0xff]  ;;  %v13490_v44 = vld [vmem:[#allocation20_spill] sm:$0xff] }
 0x2a0   : > { %v2463_v26 = vld [vmem:[#allocation2 + $0x48] sm:$0xff]  ;;  %v4108_v52 = vadd.f32 %v7904_v41, %v13489_v46 }
 0x2a1   : > { %v2577_v34 = vrot.slane %v2463_v26, 2  ;;  %v2657_v49 = vrot.slane %v2463_v26, 4 }
 0x2a2   : > { %v2460_v45 = vld [vmem:[#allocation2 + $0x30] sm:$0xff] }
 0x2a3   : > { %v2572_v1 = vrot.slane %v2460_v45, 2  ;;  %v2652_v29 = vrot.slane %v2460_v45, 4 }
 0x2a4   : > { %v2464_v59 = vld [vmem:[#allocation2 + $0x50] sm:$0xff]  ;;  %v2465_v8 = vld [vmem:[#allocation2 + $0x58] sm:$0xf] }
 0x2a5   : > { %v7288_v48 = vpack.i.bf16 %v2464_v59, %v2463_v26  ;;  %v2578_v19 = vrot.slane %v2464_v59, 2  ;;  %v2580_v22 = vrot.slane %v2465_v8, 2  ;;  %v2658_v9 = vrot.slane %v2464_v59, 4 }
 0x2a6   : > { %v2461_v0 = vld [vmem:[#allocation2 + $0x38] sm:$0xff]  ;;  %v2462_v20 = vld [vmem:[#allocation2 + $0x40] sm:$0xf]  ;;  %v2660_v14 = vrot.slane %v2465_v8, 4  ;;  %v13491_v26 = vmax.f32 %v13490_v44, 0.0 }
 0x2a7   : > { %7289 = vrot.lane.b32.xlu1 %v7288_v48, %s8069_s9  ;;  %v7293_v40 = vpack.i.bf16 %v2461_v0, %v2460_v45  ;;  %v2579_v33 = vsel %vm889_vm4, %v2577_v34, %v2578_v19  ;;  %v2581_v12 = vsel %vm889_vm4, %v2578_v19, %v2580_v22  ;;  %v2573_v53 = vrot.slane %v2461_v0, 2 }
 0x2a8   : > { %v7298_v5 = vpack.i.bf16 %v2581_v12, %v2579_v33  ;;  %v2575_v13 = vrot.slane %v2462_v20, 2  ;;  %v2653_v43 = vrot.slane %v2461_v0, 4  ;;  %v2655_v39 = vrot.slane %v2462_v20, 4 }
 0x2a9   : > { %7294 = vrot.lane.b32.xlu0 %v7293_v40, %s8069_s9  ;;  %v2574_v51 = vsel %vm889_vm4, %v2572_v1, %v2573_v53  ;;  %v2659_v27 = vsel %vm444_vm0, %v2657_v49, %v2658_v9  ;;  %v2661_v35 = vsel %vm444_vm0, %v2658_v9, %v2660_v14  ;;  %v4106_v45 = vadd.f32 %v7905_v28, %v13491_v26 }
 0x2aa   : > { %v2576_v15 = vsel %vm889_vm4, %v2573_v53, %v2575_v13  ;;  %v2654_v30 = vsel %vm444_vm0, %v2652_v29, %v2653_v43  ;;  %v2656_v4 = vsel %vm444_vm0, %v2653_v43, %v2655_v39  ;;  %v7303_v3 = vpack.i.bf16 %v2661_v35, %v2659_v27 }
 0x2ab   : > { %7299 = vrot.lane.b32.xlu1 %v7298_v5, %s8066_s21  ;;  %v7318_v21 = vpack.i.bf16 %v2576_v15, %v2574_v51  ;;  %v7323_v7 = vpack.i.bf16 %v2656_v4, %v2654_v30 }
 0x2ad   : > { %7319 = vrot.lane.b32.xlu0 %v7318_v21, %s8066_s21 }
 0x2af   : > { %7304 = vrot.lane.b32.xlu1 %v7303_v3, %s8068_s23 }
 0x2b1   : > { %7324 = vrot.lane.b32.xlu0 %v7323_v7, %s8068_s23 }
 0x2b3   : > { %7309 = vrot.lane.b32.xlu1 %v7298_v5, %s8070_s13 }
 0x2b5   : > { %7329 = vrot.lane.b32.xlu0 %v7318_v21, %s8070_s13 }
 0x2b7   : > { %7314 = vrot.lane.b32.xlu1 %v7303_v3, %s8071_s14 }
 0x2b9   : > { %7334 = vrot.lane.b32.xlu0 %v7323_v7, %s8071_s14 }
 0x2d0   : > { %v6485_v6 = vpop.f32.mrf.mxu1 }
 0x2d1   : > { %v2288_v60 = vadd.f32 %v6485_v6, %v10137_v56  ;;  %v7893_v6 = vld [vmem:[%s13117_s5 + $0x20] ss:$0 sps:$4 sm:$0xff]  }
 0x2d2   : > { %v2279_v42 = vpop.f32.mrf.mxu1  ;;  %6558 = vmatprep.subr.msk.bf16.mxu0 %vm444_vm0, %v7893_v6  ;;  %v3906_v16 = vsel %vm444_vm0, %v7893_v6, 0 }
 0x2d3   : > { %v2396_v55 = vmax.f32 %v2288_v60, 0.0  ;;  %v2280_v31 = vadd.f32 %v10137_v56, %v2279_v42  ;;  %6512 = vmatpush3.bf16.msra.mxu0 %v3906_v16 }
 0x2d4   : > { %v6486_v11 = vpop.f32.mrf.mxu1 }
 0x2d5   : > { %2428 = vst.msk [vmem:[#allocation2 + $0x7a] sm:$0xff] %vm278_vm1, %v2396_v55  ;;  %v10194_v23 = vadd.f32 %v4107_v63, %v2396_v55  ;;  %v2394_v50 = vmax.f32 %v2280_v31, 0.0  ;;  %v2291_v2 = vadd.f32 %v6486_v11, %v10137_v56  ;;  %v7894_v63 = vld [vmem:[%s13117_s5 + $0x18] sm:$0xff]   ;;  %v7895_v31 = vld [vmem:[%s13117_s5 + $0x10] sm:$0xff]   ;;  %v7896_v11 = vld [vmem:[%s13117_s5 + $0x8] sm:$0xff]  }
 0x2d6   : > { %v2282_v57 = vpop.f32.mrf.mxu1  ;;  %6513 = vmatprep.subr.bf16.mxu0 %v7894_v63 }
 0x2d7   : > { %2426 = vst.msk [vmem:[#allocation2 + $0x62] sm:$0xff] %vm278_vm1, %v2394_v50  ;;  %v10201_v61 = vadd.f32 %v4105_v38, %v2394_v50  ;;  %v2397_v25 = vmax.f32 %v2291_v2, 0.0  ;;  %v2283_v18 = vadd.f32 %v10137_v56, %v2282_v57  ;;  %6514 = vmatpush3.bf16.msra.mxu0 %v7894_v63  ;;  %v7906_v50 = vld [vmem:[%s8256_s19 + $0x50] sm:$0xff]  ;;  %v7912_v63 = vld [vmem:[%s8256_s19 + $0x78] sm:$0xff] }
 0x2d8   : > { %6515 = vmatprep.subr.bf16.mxu0 %v7895_v31  ;;  %v13494_v2 = vld [vmem:[#allocation23_spill] sm:$0xff] }
 0x2d9   : > { %2429 = vst.msk [vmem:[#allocation2 + $0x82] sm:$0xff] %vm278_vm1, %v2397_v25  ;;  %v10208_v59 = vadd.f32 %v4108_v52, %v2397_v25  ;;  %v2395_v8 = vmax.f32 %v2283_v18, 0.0  ;;  %v13495_v57 = vmax.f32 %v13494_v2, 0.0  ;;  %v7907_v25 = vld [vmem:[%s8256_s19 + $0x40] sm:$0xff]  ;;  %v13496_v18 = vld [vmem:[#allocation24_spill] sm:$0xff] }
 0x2da   : > { %v13497_v28 = vmax.f32 %v13496_v18, 0.0 }
 0x2db   : > { %13492 = vst [vmem:[#allocation74_spill] sm:$0xff] %v10208_v59  ;;  %2427 = vst.msk [vmem:[#allocation2 + $0x6a] sm:$0xff] %vm278_vm1, %v2395_v8  ;;  %v10211_v48 = vadd.f32 %v4106_v45, %v2395_v8  ;;  %6516 = vmatpush3.bf16.msra.mxu0 %v7895_v31  ;;  %v4111_v41 = vadd.f32 %v7906_v50, %v13495_v57  ;;  %v13514_v50 = vld [vmem:[#allocation39_spill] sm:$0xff] }
 0x2dc   : > { %v2469_v34 = vld [vmem:[#allocation2 + $0x78] sm:$0xff]  ;;  %6517 = vmatprep.subr.bf16.mxu0 %v7896_v11  ;;  %v4109_v44 = vadd.f32 %v7907_v25, %v13497_v28  ;;  %v13515_v2 = vmax.f32 %v13514_v50, 0.0 }
 0x2dd   : > { %13493 = vst [vmem:[#allocation69_spill] sm:$0xff] %v10211_v48  ;;  %v2587_v12 = vrot.slane %v2469_v34, 2  ;;  %v2667_v15 = vrot.slane %v2469_v34, 4 }
 0x2de   : > { %v2466_v20 = vld [vmem:[#allocation2 + $0x60] sm:$0xff] }
 0x2df   : > { %v2582_v13 = vrot.slane %v2466_v20, 2  ;;  %v2662_v7 = vrot.slane %v2466_v20, 4  ;;  %6518 = vmatpush3.bf16.msra.mxu0 %v7896_v11 }
 0x2e0   : > { %v2470_v19 = vld [vmem:[#allocation2 + $0x80] sm:$0xff]  ;;  %v2471_v22 = vld [vmem:[#allocation2 + $0x88] sm:$0xf]  ;;  %6519 = vmatprep.subr.bf16.mxu0 %v7897_v58 }
 0x2e1   : > { %v7338_v0 = vpack.i.bf16 %v2470_v19, %v2469_v34  ;;  %v2588_v9 = vrot.slane %v2470_v19, 2  ;;  %v2590_v14 = vrot.slane %v2471_v22, 2  ;;  %v2668_v43 = vrot.slane %v2470_v19, 4  ;;  %v7908_v19 = vld [vmem:[%s8256_s19 + $0x58] sm:$0xff] }
 0x2e2   : > { %v2467_v1 = vld [vmem:[#allocation2 + $0x68] sm:$0xff]  ;;  %v2468_v40 = vld [vmem:[#allocation2 + $0x70] sm:$0xf]  ;;  %v2670_v39 = vrot.slane %v2471_v22, 4  ;;  %v13499_v22 = vld [vmem:[#allocation25_spill] sm:$0xff] }
 0x2e3   : > { %7339 = vrot.lane.b32.xlu1 %v7338_v0, %s8069_s9  ;;  %v7348_v33 = vpack.i.bf16 %v2467_v1, %v2466_v20  ;;  %v2583_v53 = vrot.slane %v2467_v1, 2  ;;  %v2585_v5 = vrot.slane %v2468_v40, 2  ;;  %v2589_v49 = vsel %vm889_vm4, %v2587_v12, %v2588_v9  ;;  %6520 = vmatpush3.bf16.msra.mxu0 %v7897_v58  ;;  %v13502_v12 = vld [vmem:[#allocation27_spill] sm:$0xff] }
 0x2e4   : > { %v2591_v51 = vsel %vm889_vm4, %v2588_v9, %v2590_v14  ;;  %v2663_v29 = vrot.slane %v2467_v1, 4  ;;  %v2665_v21 = vrot.slane %v2468_v40, 4  ;;  %v2669_v4 = vsel %vm444_vm0, %v2667_v15, %v2668_v43  ;;  %v13505_v15 = vld [vmem:[#allocation35_spill] sm:$0xff] }
 0x2e5   : > { %7349 = vrot.lane.b32.xlu0 %v7348_v33, %s8069_s9  ;;  %v2584_v27 = vsel %vm889_vm4, %v2582_v13, %v2583_v53  ;;  %v2586_v35 = vsel %vm889_vm4, %v2583_v53, %v2585_v5  ;;  %v7358_v30 = vpack.i.bf16 %v2591_v51, %v2589_v49  ;;  %v2671_v3 = vsel %vm444_vm0, %v2668_v43, %v2670_v39  ;;  %v7910_v39 = vld [vmem:[%s8256_s19 + $0x70] sm:$0xff] }
 0x2e6   : > { %v7388_v60 = vpack.i.bf16 %v2586_v35, %v2584_v27  ;;  %v2664_v42 = vsel %vm444_vm0, %v2662_v7, %v2663_v29  ;;  %v2666_v17 = vsel %vm444_vm0, %v2663_v29, %v2665_v21  ;;  %v7363_v36 = vpack.i.bf16 %v2671_v3, %v2669_v4  ;;  %v7911_v3 = vld [vmem:[%s8256_s19 + $0x60] sm:$0xff]  ;;  %v13508_v7 = vld [vmem:[#allocation36_spill] sm:$0xff] }
 0x2e7   : > { %7344 = vrot.lane.b32.xlu1 %v7338_v0, %s8065_s20  ;;  %v7393_v55 = vpack.i.bf16 %v2666_v17, %v2664_v42  ;;  %v13500_v0 = vmax.f32 %v13499_v22, 0.0  ;;  %v13503_v53 = vmax.f32 %v13502_v12, 0.0  ;;  %v13506_v27 = vmax.f32 %v13505_v15, 0.0  ;;  %v13520_v12 = vld [vmem:[#allocation10_spill] sm:$0xff] }
 0x2e8   : > { %v13509_v6 = vmax.f32 %v13508_v7, 0.0 }
 0x2e9   : > { %7354 = vrot.lane.b32.xlu0 %v7348_v33, %s8065_s20  ;;  %v4112_v20 = vadd.f32 %v7908_v19, %v13500_v0  ;;  %v7909_v33 = vld [vmem:[%s8256_s19 + $0x48] sm:$0xff]  ;;  %v4115_v35 = vadd.f32 %v7910_v39, %v13506_v27  ;;  %v7916_v27 = vld [vmem:[%s8256_s19 + $0x98] sm:$0xff] }
 0x2ea   : > { %v4110_v5 = vadd.f32 %v7909_v33, %v13503_v53  ;;  %v7915_v33 = vld [vmem:[%s8256_s19 + $0x80] sm:$0xff]  ;;  %v13521_v53 = vmax.f32 %v13520_v12, 0.0 }
 0x2eb   : > { %7359 = vrot.lane.b32.xlu1 %v7358_v30, %s8066_s21 }
 0x2ed   : > { %7389 = vrot.lane.b32.xlu0 %v7388_v60, %s8066_s21 }
 0x2ef   : > { %7364 = vrot.lane.b32.xlu1 %v7363_v36, %s8068_s23 }
 0x2f1   : > { %7394 = vrot.lane.b32.xlu0 %v7393_v55, %s8068_s23 }
 0x2f3   : > { %7369 = vrot.lane.b32.xlu1 %v7358_v30, %s8070_s13 }
 0x2f5   : > { %7399 = vrot.lane.b32.xlu0 %v7388_v60, %s8070_s13 }
 0x2f7   : > { %7374 = vrot.lane.b32.xlu1 %v7358_v30, %s8067_s22 }
 0x2f9   : > { %7404 = vrot.lane.b32.xlu0 %v7388_v60, %s8067_s22  ;;  %v4113_v60 = vadd.f32 %v7911_v3, %v13509_v6  ;;  %v10341_v3 = vpop.permute.xlu0 %7249 }
 0x2fb   : > { %7379 = vrot.lane.b32.xlu1 %v7363_v36, %s8072_s15 }
 0x2fd   : > { %7409 = vrot.lane.b32.xlu0 %v7393_v55, %s8072_s15 }
 0x2ff   : > { %7384 = vrot.lane.b32.xlu1 %v7363_v36, %s8071_s14 }
 0x301   : > { %7414 = vrot.lane.b32.xlu0 %v7393_v55, %s8071_s14  ;;  %v13511_v55 = vld [vmem:[#allocation37_spill] sm:$0xff] }
 0x302   : > { %v13512_v31 = vmax.f32 %v13511_v55, 0.0 }
 0x304   : > { %v4116_v11 = vadd.f32 %v7912_v63, %v13512_v31 }
 0x30c   : > { %v6489_v24 = vpop.f32.mrf.mxu1 }
 0x30d   : > { %v2304_v10 = vadd.f32 %v6489_v24, %v10137_v56 }
 0x30e   : > { %v2295_v38 = vpop.f32.mrf.mxu1 }
 0x30f   : > { %v2400_v54 = vmax.f32 %v2304_v10, 0.0  ;;  %v2296_v46 = vadd.f32 %v10137_v56, %v2295_v38  ;;  %v7913_v38 = vld [vmem:[%s8256_s19 + $0x68] sm:$0xff] }
 0x310   : > { %v6490_v52 = vpop.f32.mrf.mxu1  ;;  %v4114_v57 = vadd.f32 %v7913_v38, %v13515_v2 }
 0x311   : > { %2432 = vst.msk [vmem:[#allocation2 + $0xaa] sm:$0xff] %vm278_vm1, %v2400_v54  ;;  %v10263_v26 = vadd.f32 %v4111_v41, %v2400_v54  ;;  %v2398_v45 = vmax.f32 %v2296_v46, 0.0  ;;  %v2307_v8 = vadd.f32 %v6490_v52, %v10137_v56 }
 0x312   : > { %v2298_v34 = vpop.f32.mrf.mxu1 }
 0x313   : > { %13498 = vst [vmem:[#allocation70_spill] sm:$0xff] %v10263_v26  ;;  %2430 = vst.msk [vmem:[#allocation2 + $0x92] sm:$0xff] %vm278_vm1, %v2398_v45  ;;  %v10270_v1 = vadd.f32 %v4109_v44, %v2398_v45  ;;  %v2401_v9 = vmax.f32 %v2307_v8, 0.0  ;;  %v2299_v14 = vadd.f32 %v10137_v56, %v2298_v34  ;;  %v7914_v44 = vld [vmem:[%s8256_s19 + $0x90] sm:$0xff]  ;;  %v13517_v45 = vld [vmem:[#allocation8_spill] sm:$0xff] }
 0x314   : > { %v6493_v40 = vpop.f32.mrf.mxu1  ;;  %v13518_v8 = vmax.f32 %v13517_v45, 0.0 }
 0x315   : > { %13501 = vst [vmem:[#allocation46_spill] sm:$0xff] %v10270_v1  ;;  %2433 = vst.msk [vmem:[#allocation2 + $0xb2] sm:$0xff] %vm278_vm1, %v2401_v9  ;;  %v10277_v13 = vadd.f32 %v4112_v20, %v2401_v9  ;;  %v2399_v49 = vmax.f32 %v2299_v14, 0.0  ;;  %v2320_v51 = vadd.f32 %v6493_v40, %v10137_v56 }
 0x316   : > { %v2311_v43 = vpop.f32.mrf.mxu1  ;;  %v4119_v34 = vadd.f32 %v7914_v44, %v13518_v8 }
 0x317   : > { %13504 = vst [vmem:[#allocation45_spill] sm:$0xff] %v10277_v13  ;;  %2431 = vst.msk [vmem:[#allocation2 + $0x9a] sm:$0xff] %vm278_vm1, %v2399_v49  ;;  %v10284_v29 = vadd.f32 %v4110_v5, %v2399_v49  ;;  %v2404_v21 = vmax.f32 %v2320_v51, 0.0  ;;  %v2312_v30 = vadd.f32 %v10137_v56, %v2311_v43  ;;  %v4117_v5 = vadd.f32 %v7915_v33, %v13521_v53  ;;  %v10331_v51 = vpop.permute.xlu1 %7254  ;;  %v10371_v53 = vpop.permute.xlu0 %7259 }
 0x318   : > { %v6494_v4 = vpop.f32.mrf.mxu1  ;;  %v10304_v54 = vld [vmem:[#allocation2 + $0xa8] sm:$0xff] }
 0x319   : > { %13507 = vst [vmem:[#allocation72_spill] sm:$0xff] %v10284_v29  ;;  %2436 = vst.msk [vmem:[#allocation2 + $0xda] sm:$0xff] %vm278_vm1, %v2404_v21  ;;  %v10291_v42 = vadd.f32 %v4115_v35, %v2404_v21  ;;  %v2402_v17 = vmax.f32 %v2312_v30, 0.0  ;;  %v2323_v16 = vadd.f32 %v6494_v4, %v10137_v56  ;;  %v13523_v35 = vld [vmem:[#allocation12_spill] sm:$0xff]  ;;  %v2597_v2 = vrot.slane %v10304_v54, 2 }
 0x31a   : > { %v2314_v36 = vpop.f32.mrf.mxu1  ;;  %v10317_v22 = vld [vmem:[#allocation2 + $0x90] sm:$0xff]  ;;  %v13524_v21 = vmax.f32 %v13523_v35, 0.0 }
 0x31b   : > { %13510 = vst [vmem:[#allocation32_spill] sm:$0xff] %v10291_v42  ;;  %2434 = vst.msk [vmem:[#allocation2 + $0xc2] sm:$0xff] %vm278_vm1, %v2402_v17  ;;  %v10298_v58 = vadd.f32 %v4113_v60, %v2402_v17  ;;  %v2405_v24 = vmax.f32 %v2323_v16, 0.0  ;;  %v2315_v10 = vadd.f32 %v10137_v56, %v2314_v36  ;;  %v7917_v17 = vld [vmem:[%s8256_s19 + $0x88] sm:$0xff] }
 0x31c   : > { %v10306_v46 = vld [vmem:[#allocation2 + $0xb0] sm:$0xff]  ;;  %v4120_v30 = vadd.f32 %v7916_v27, %v13524_v21  ;;  %v13526_v16 = vld [vmem:[#allocation14_spill] sm:$0xff]  ;;  %v7920_v21 = vld [vmem:[%s8256_s19 + $0xb8] sm:$0xff] }
 0x31d   : > { %13513 = vst [vmem:[#allocation31_spill] sm:$0xff] %v10298_v58  ;;  %2437 = vst.msk [vmem:[#allocation2 + $0xe2] sm:$0xff] %vm278_vm1, %v2405_v24  ;;  %v10309_v52 = vadd.f32 %v4116_v11, %v2405_v24  ;;  %v2403_v25 = vmax.f32 %v2315_v10, 0.0  ;;  %v7418_v28 = vpack.i.bf16 %v10306_v46, %v10304_v54  ;;  %v13527_v36 = vmax.f32 %v13526_v16, 0.0  ;;  %v2477_v10 = vld [vmem:[#allocation2 + $0xb8] sm:$0xf] }
 0x31e   : > { %v6497_v41 = vpop.f32.mrf.mxu1  ;;  %v10319_v0 = vld [vmem:[#allocation2 + $0x98] sm:$0xff]  ;;  %v2598_v38 = vrot.slane %v10306_v46, 2 }
 0x31f   : > { %13516 = vst [vmem:[#allocation73_spill] sm:$0xff] %v10309_v52  ;;  %v2336_v18 = vadd.f32 %v6497_v41, %v10137_v56  ;;  %2435 = vst.msk [vmem:[#allocation2 + $0xca] sm:$0xff] %vm278_vm1, %v2403_v25  ;;  %v10322_v20 = vadd.f32 %v4114_v57, %v2403_v25  ;;  %7419 = vrot.lane.b32.xlu1 %v7418_v28, %s8069_s9  ;;  %v7428_v40 = vpack.i.bf16 %v10319_v0, %v10317_v22  ;;  %v7918_v57 = vld [vmem:[%s8256_s19 + $0xb0] sm:$0xff]  ;;  %v13529_v41 = vld [vmem:[#allocation16_spill] sm:$0xff] }
 0x320   : > { %v2327_v19 = vpop.f32.mrf.mxu1  ;;  %v4118_v63 = vadd.f32 %v7917_v17, %v13527_v36  ;;  %v13530_v25 = vmax.f32 %v13529_v41, 0.0  ;;  %v2592_v36 = vrot.slane %v10317_v22, 2  ;;  %v2680_v41 = vrot.slane %v2477_v10, 4 }
 0x321   : > { %13519 = vst [vmem:[#allocation34_spill] sm:$0xff] %v10322_v20  ;;  %v2408_v9 = vmax.f32 %v2336_v18, 0.0  ;;  %v2328_v14 = vadd.f32 %v10137_v56, %v2327_v19  ;;  %7429 = vrot.lane.b32.xlu0 %v7428_v40, %s8069_s9  ;;  %v2600_v19 = vrot.slane %v2477_v10, 2  ;;  %v7922_v10 = vld [vmem:[%s8256_s19 + $0xd0] sm:$0xff] }
 0x322   : > { %v6498_v49 = vpop.f32.mrf.mxu1  ;;  %v4123_v18 = vadd.f32 %v7918_v57, %v13530_v25  ;;  %v2678_v57 = vrot.slane %v10306_v46, 4  ;;  %v7921_v25 = vld [vmem:[%s8256_s19 + $0xa8] sm:$0xff] }
 0x323   : > { %2440 = vst.msk [vmem:[#allocation2 + $0x10a] sm:$0xff] %vm278_vm1, %v2408_v9  ;;  %v10334_v43 = vadd.f32 %v4119_v34, %v2408_v9  ;;  %v2406_v39 = vmax.f32 %v2328_v14, 0.0  ;;  %v2339_v15 = vadd.f32 %v6498_v49, %v10137_v56  ;;  %7424 = vrot.lane.b32.xlu1 %v7418_v28, %s8065_s20  ;;  %v10361_v28 = vpop.permute.xlu1 %7264  ;;  %v2599_v34 = vsel %vm889_vm4, %v2597_v2, %v2598_v38  ;;  %v7919_v14 = vld [vmem:[%s8256_s19 + $0xa0] sm:$0xff] }
 0x324   : > { %v2330_v4 = vpop.f32.mrf.mxu1  ;;  %v2601_v27 = vsel %vm889_vm4, %v2598_v38, %v2600_v19  ;;  %v2681_v46 = vsel %vm444_vm0, %v2678_v57, %v2680_v41 }
 0x325   : > { %13522 = vst [vmem:[#allocation33_spill] sm:$0xff] %v10334_v43  ;;  %2438 = vst.msk [vmem:[#allocation2 + $0xf2] sm:$0xff] %vm278_vm1, %v2406_v39  ;;  %v10344_v7 = vadd.f32 %v4117_v5, %v2406_v39  ;;  %v2409_v6 = vmax.f32 %v2339_v15, 0.0  ;;  %v2331_v60 = vadd.f32 %v10137_v56, %v2330_v4  ;;  %7434 = vrot.lane.b32.xlu0 %v7428_v40, %s8065_s20  ;;  %v13532_v40 = vld [vmem:[#allocation18_spill] sm:$0xff]  ;;  %v2474_v15 = vld [vmem:[#allocation2 + $0xa0] sm:$0xf] }
 0x326   : > { %v6501_v55 = vpop.f32.mrf.mxu1  ;;  %v13533_v33 = vmax.f32 %v13532_v40, 0.0  ;;  %v10384_v17 = vpack.i.bf16 %v2601_v27, %v2599_v34  ;;  %v7923_v27 = vld [vmem:[%s8256_s19 + $0xc0] sm:$0xff] }
 0x327   : > { %13525 = vst [vmem:[#allocation71_spill] sm:$0xff] %v10344_v7  ;;  %2441 = vst.msk [vmem:[#allocation2 + $0x112] sm:$0xff] %vm278_vm1, %v2409_v6  ;;  %v10352_v31 = vadd.f32 %v4120_v30, %v2409_v6  ;;  %v2407_v11 = vmax.f32 %v2331_v60, 0.0  ;;  %v2352_v24 = vadd.f32 %v6501_v55, %v10137_v56  ;;  %v13535_v30 = vld [vmem:[#allocation21_spill] sm:$0xff]  ;;  %v2595_v55 = vrot.slane %v2474_v15, 2  ;;  %v10389_v38 = vpop.permute.xlu1 %7274 }
 0x328   : > { %v2343_v50 = vpop.f32.mrf.mxu1  ;;  %v4121_v12 = vadd.f32 %v7919_v14, %v13533_v33  ;;  %v13536_v4 = vmax.f32 %v13535_v30, 0.0  ;;  %7439 = vrot.lane.b32.xlu1 %v10384_v17, %s8066_s21 }
 0x329   : > { %13528 = vst [vmem:[#allocation49_spill] sm:$0xff] %v10352_v31  ;;  %2439 = vst.msk [vmem:[#allocation2 + $0xfa] sm:$0xff] %vm278_vm1, %v2407_v11  ;;  %v10364_v44 = vadd.f32 %v4118_v63, %v2407_v11  ;;  %v2412_v45 = vmax.f32 %v2352_v24, 0.0  ;;  %v2344_v8 = vadd.f32 %v10137_v56, %v2343_v50  ;;  %v2593_v63 = vrot.slane %v10319_v0, 2 }
 0x32a   : > { %v6502_v9 = vpop.f32.mrf.mxu1  ;;  %v4124_v6 = vadd.f32 %v7920_v21, %v13536_v4  ;;  %v2677_v11 = vrot.slane %v10304_v54, 4 }
 0x32b   : > { %13531 = vst [vmem:[#allocation48_spill] sm:$0xff] %v10364_v44  ;;  %2444 = vst.msk [vmem:[#allocation2 + $0x13a] sm:$0xff] %vm278_vm1, %v2412_v45  ;;  %v10374_v5 = vadd.f32 %v4123_v18, %v2412_v45  ;;  %v2410_v49 = vmax.f32 %v2344_v8, 0.0  ;;  %v2355_v39 = vadd.f32 %v6502_v9, %v10137_v56  ;;  %v13539_v18 = vld [vmem:[#allocation22_spill] sm:$0xff]  ;;  %v2594_v8 = vsel %vm889_vm4, %v2592_v36, %v2593_v63  ;;  %v10403_v9 = vpop.permute.xlu0 %7269 }
 0x32c   : > { %v2346_v35 = vpop.f32.mrf.mxu1  ;;  %v13540_v54 = vmax.f32 %v13539_v18, 0.0  ;;  %v2596_v34 = vsel %vm889_vm4, %v2593_v63, %v2595_v55  ;;  %v2679_v33 = vsel %vm444_vm0, %v2677_v11, %v2678_v57  ;;  %v2672_v63 = vrot.slane %v10317_v22, 4  ;;  %v13546_v57 = vld [vmem:[#allocation29_spill] sm:$0xff] }
 0x32d   : > { %13534 = vst [vmem:[#allocation57_spill] sm:$0xff] %v10374_v5  ;;  %2442 = vst.msk [vmem:[#allocation2 + $0x122] sm:$0xff] %vm278_vm1, %v2410_v49  ;;  %v10382_v60 = vadd.f32 %v4121_v12, %v2410_v49  ;;  %v2413_v16 = vmax.f32 %v2355_v39, 0.0  ;;  %v2347_v2 = vadd.f32 %v10137_v56, %v2346_v35  ;;  %v10405_v14 = vpack.i.bf16 %v2596_v34, %v2594_v8  ;;  %v13541_v12 = vld [vmem:[#allocation26_spill] sm:$0xff]  ;;  %v13543_v35 = vld [vmem:[#allocation28_spill] sm:$0xff]  ;;  %v10432_v8 = vpop.permute.xlu1 %7284 }
 0x32e   : > { %v6505_v24 = vpop.f32.mrf.mxu1  ;;  %v4122_v45 = vadd.f32 %v7921_v25, %v13540_v54  ;;  %v13542_v49 = vmax.f32 %v13541_v12, 0.0  ;;  %v13544_v21 = vmax.f32 %v13543_v35, 0.0  ;;  %v10415_v4 = vpack.i.bf16 %v2681_v46, %v2679_v33  ;;  %v13549_v12 = vld [vmem:[#allocation30_spill] sm:$0xff] }
 0x32f   : > { %13537 = vst [vmem:[#allocation56_spill] sm:$0xff] %v10382_v60  ;;  %2445 = vst.msk [vmem:[#allocation2 + $0x142] sm:$0xff] %vm278_vm1, %v2413_v16  ;;  %v10394_v50 = vadd.f32 %v4124_v6, %v2413_v16  ;;  %v2411_v40 = vmax.f32 %v2347_v2, 0.0  ;;  %v2368_v6 = vadd.f32 %v6505_v24, %v10137_v56  ;;  %7469 = vrot.lane.b32.xlu0 %v10405_v14, %s8066_s21  ;;  %v2673_v55 = vrot.slane %v10319_v0, 4  ;;  %v7924_v2 = vld [vmem:[%s8256_s19 + $0xd8] sm:$0xff]  ;;  %v10443_v35 = vpop.permute.xlu0 %7279 }
 0x330   : > { %v2359_v19 = vpop.f32.mrf.mxu1  ;;  %v4127_v39 = vadd.f32 %v7922_v10, %v13542_v49  ;;  %v4125_v30 = vadd.f32 %v7923_v27, %v13544_v21  ;;  %v2675_v11 = vrot.slane %v2474_v15, 4  ;;  %v13547_v41 = vmax.f32 %v13546_v57, 0.0  ;;  %7444 = vrot.lane.b32.xlu1 %v10415_v4, %s8068_s23  ;;  %v7925_v10 = vld [vmem:[%s8256_s19 + $0xc8] sm:$0xff] }
 0x331   : > { %13538 = vst [vmem:[#allocation59_spill] sm:$0xff] %v10394_v50  ;;  %2443 = vst.msk [vmem:[#allocation2 + $0x12a] sm:$0xff] %vm278_vm1, %v2411_v40  ;;  %v10421_v36 = vadd.f32 %v4122_v45, %v2411_v40  ;;  %v2416_v24 = vmax.f32 %v2368_v6, 0.0  ;;  %v2360_v18 = vadd.f32 %v10137_v56, %v2359_v19  ;;  %v2674_v22 = vsel %vm444_vm0, %v2672_v63, %v2673_v55 }
 0x332   : > { %v6506_v16 = vpop.f32.mrf.mxu1  ;;  %v4128_v25 = vadd.f32 %v7924_v2, %v13547_v41  ;;  %v2676_v0 = vsel %vm444_vm0, %v2673_v55, %v2675_v11  ;;  %v13550_v49 = vmax.f32 %v13549_v12, 0.0  ;;  %v7926_v55 = vld [vmem:[%s8256_s19 + $0xf0] sm:$0xff]  ;;  %v13553_v11 = vld [vmem:[#allocation38_spill] sm:$0xff]  ;;  %v13559_v12 = vld [vmem:[#allocation41_spill] sm:$0xff] }
 0x333   : > { %13545 = vst [vmem:[#allocation58_spill] sm:$0xff] %v10421_v36  ;;  %v2371_v54 = vadd.f32 %v6506_v16, %v10137_v56  ;;  %2448 = vst.msk [vmem:[#allocation2 + $0x16a] sm:$0xff] %vm278_vm1, %v2416_v24  ;;  %v10438_v34 = vadd.f32 %v4127_v39, %v2416_v24  ;;  %v7473_v40 = vpack.i.bf16 %v2676_v0, %v2674_v22  ;;  %v2414_v33 = vmax.f32 %v2360_v18, 0.0  ;;  %v2484_v36 = vld [vmem:[#allocation2 + $0xf0] sm:$0xff] }
 0x334   : > { %v2362_v45 = vpop.f32.mrf.mxu1  ;;  %v4126_v27 = vadd.f32 %v7925_v10, %v13550_v49  ;;  %7449 = vrot.lane.b32.xlu1 %v10384_v17, %s8070_s13  ;;  %v13554_v2 = vmax.f32 %v13553_v11, 0.0  ;;  %v7928_v10 = vld [vmem:[%s8256_s19 + $0xf8] sm:$0xff]  ;;  %v13560_v49 = vmax.f32 %v13559_v12, 0.0  ;;  %v7929_v11 = vld [vmem:[%s8256_s19 + $0xe8] sm:$0xff]  ;;  %v2480_v12 = vld [vmem:[#allocation2 + $0xd0] sm:$0xf] }
 0x335   : > { %v2363_v15 = vadd.f32 %v10137_v56, %v2362_v45  ;;  %13548 = vst [vmem:[#allocation51_spill] sm:$0xff] %v10438_v34  ;;  %v2417_v46 = vmax.f32 %v2371_v54, 0.0  ;;  %7474 = vrot.lane.b32.xlu0 %v7473_v40, %s8068_s23  ;;  %2446 = vst.msk [vmem:[#allocation2 + $0x152] sm:$0xff] %vm278_vm1, %v2414_v33  ;;  %v10448_v39 = vadd.f32 %v4125_v30, %v2414_v33  ;;  %v7927_v54 = vld [vmem:[%s8256_s19 + $0xe0] sm:$0xff]  ;;  %v13556_v45 = vld [vmem:[#allocation40_spill] sm:$0xff]  ;;  %v2612_v44 = vrot.slane %v2484_v36, 2 }
 0x336   : > { %v6509_v19 = vpop.f32.mrf.mxu1  ;;  %v4131_v57 = vadd.f32 %v7926_v55, %v13554_v2  ;;  %v13557_v22 = vmax.f32 %v13556_v45, 0.0  ;;  %v13562_v2 = vld [vmem:[#allocation42_spill] sm:$0xff]  ;;  %v2482_v45 = vld [vmem:[#allocation2 + $0xe0] sm:$0xff] }
 0x337   : > { %v2415_v21 = vmax.f32 %v2363_v15, 0.0  ;;  %v2384_v6 = vadd.f32 %v6509_v19, %v10137_v56  ;;  %13551 = vst [vmem:[#allocation50_spill] sm:$0xff] %v10448_v39  ;;  %2449 = vst.msk [vmem:[#allocation2 + $0x172] sm:$0xff] %vm278_vm1, %v2417_v46  ;;  %v10453_v16 = vadd.f32 %v4128_v25, %v2417_v46  ;;  %v10465_v25 = vpop.permute.xlu1 %7289  ;;  %v7933_v39 = vld [vmem:[#allocation2] sm:$0xff] }
 0x338   : > { %v2375_v63 = vpop.f32.mrf.mxu1  ;;  %v4129_v0 = vadd.f32 %v7927_v54, %v13557_v22  ;;  %7454 = vrot.lane.b32.xlu1 %v10384_v17, %s8067_s22  ;;  %v2483_v22 = vld [vmem:[#allocation2 + $0xe8] sm:$0xf] }
 0x339   : > { %13552 = vst [vmem:[#allocation65_spill] sm:$0xff] %v10453_v16  ;;  %2447 = vst.msk [vmem:[#allocation2 + $0x15a] sm:$0xff] %vm278_vm1, %v2415_v21  ;;  %v10459_v41 = vadd.f32 %v4126_v27, %v2415_v21  ;;  %v2420_v24 = vmax.f32 %v2384_v6, 0.0  ;;  %v2376_v30 = vadd.f32 %v10137_v56, %v2375_v63  ;;  %7479 = vrot.lane.b32.xlu0 %v10405_v14, %s8070_s13  ;;  %v10478_v21 = vpop.permute.xlu0 %7294 }
 0x33a   : > { %v6510_v18 = vpop.f32.mrf.mxu1  ;;  %v4132_v27 = vadd.f32 %v7928_v10, %v13560_v49  ;;  %v2610_v10 = vrot.slane %v2483_v22, 2  ;;  %v7296_v34 = vunpack.i.l.bf16 %v10478_v21 }
 0x33b   : > { %13555 = vst [vmem:[#allocation54_spill] sm:$0xff] %v10459_v41  ;;  %2452 = vst.msk [vmem:[#allocation2 + $0x19a] sm:$0xff] %vm278_vm1, %v2420_v24  ;;  %v10468_v15 = vadd.f32 %v4131_v57, %v2420_v24  ;;  %v2418_v33 = vmax.f32 %v2376_v30, 0.0  ;;  %v2387_v46 = vadd.f32 %v6510_v18, %v10137_v56  ;;  %v13563_v57 = vmax.f32 %v13562_v2, 0.0  ;;  %v10494_v18 = vpop.permute.xlu1 %7299 }
 0x33c   : > { %v2378_v19 = vpop.f32.mrf.mxu1  ;;  %7459 = vrot.lane.b32.xlu1 %v10415_v4, %s8072_s15 }
 0x33d   : > { %13558 = vst [vmem:[#allocation44_spill] sm:$0xff] %v10468_v15  ;;  %2450 = vst.msk [vmem:[#allocation2 + $0x182] sm:$0xff] %vm278_vm1, %v2418_v33  ;;  %v10481_v6 = vadd.f32 %v4129_v0, %v2418_v33  ;;  %v2421_v63 = vmax.f32 %v2387_v46, 0.0  ;;  %v2379_v55 = vadd.f32 %v10137_v56, %v2378_v19  ;;  %v4130_v24 = vadd.f32 %v7929_v11, %v13563_v57  ;;  %v10499_v54 = vpop.permute.xlu0 %7319  ;;  %v2481_v0 = vld [vmem:[#allocation2 + $0xd8] sm:$0xff]  ;;  %v2479_v46 = vld [vmem:[#allocation2 + $0xc8] sm:$0xff] }
 0x33e   : > { %7484 = vrot.lane.b32.xlu0 %v10405_v14, %s8067_s22  ;;  %v7498_v14 = vpack.i.bf16 %v2482_v45, %v2481_v0  ;;  %v2608_v19 = vrot.slane %v2482_v45, 2  ;;  %v2603_v11 = vrot.slane %v2479_v46, 2 }
 0x33f   : > { %13561 = vst [vmem:[#allocation66_spill] sm:$0xff] %v10481_v6  ;;  %2453 = vst.msk [vmem:[#allocation2 + $0x1a2] sm:$0xff] %vm278_vm1, %v2421_v63  ;;  %v10488_v17 = vadd.f32 %v4132_v27, %v2421_v63  ;;  %v2419_v30 = vmax.f32 %v2379_v55, 0.0  ;;  %v10504_v33 = vpop.permute.xlu1 %7304  ;;  %v2478_v27 = vld [vmem:[#allocation2 + $0xc0] sm:$0xff]  ;;  %v2607_v63 = vrot.slane %v2481_v0, 2 }
 0x340   : > { %7464 = vrot.lane.b32.xlu1 %v10415_v4, %s8071_s14  ;;  %v7508_v55 = vpack.i.bf16 %v2479_v46, %v2478_v27  ;;  %v2605_v4 = vrot.slane %v2480_v12, 2  ;;  %v2611_v57 = vsel %vm889_vm4, %v2608_v19, %v2610_v10 }
 0x341   : > { %13564 = vst [vmem:[#allocation61_spill] sm:$0xff] %v10488_v17  ;;  %2451 = vst.msk [vmem:[#allocation2 + $0x18a] sm:$0xff] %vm278_vm1, %v2419_v30  ;;  %v10497_v56 = vadd.f32 %v4130_v24, %v2419_v30  ;;  %v10508_v49 = vpop.permute.xlu0 %7324  ;;  %v2609_v2 = vsel %vm889_vm4, %v2607_v63, %v2608_v19  ;;  %v2688_v24 = vrot.slane %v2482_v45, 4  ;;  %v2690_v30 = vrot.slane %v2483_v22, 4 }
 0x342   : > { %7489 = vrot.lane.b32.xlu0 %v7473_v40, %s8072_s15  ;;  %v2687_v17 = vrot.slane %v2481_v0, 4  ;;  %v7518_v6 = vpack.i.bf16 %v2611_v57, %v2609_v2  ;;  %v2606_v41 = vsel %vm889_vm4, %v2603_v11, %v2605_v4  ;;  %v2683_v22 = vrot.slane %v2479_v46, 4 }
 0x343   : > { %13565 = vst [vmem:[#allocation76_spill] sm:$0xff] %v10497_v56  ;;  %v10514_v56 = vpop.permute.xlu1 %7309  ;;  %v2691_v45 = vsel %vm444_vm0, %v2688_v24, %v2690_v30  ;;  %v2685_v19 = vrot.slane %v2480_v12, 4  ;;  %v7251_v4 = vunpack.i.l.bf16 %v10341_v3 }
 0x344   : > { %7499 = vrot.lane.b32.xlu1 %v7498_v14, %s8069_s9  ;;  %v2689_v63 = vsel %vm444_vm0, %v2687_v17, %v2688_v24  ;;  %v7267_v24 = vunpack.i.h.bf16 %v10361_v28 }
 0x345   : > { %v10518_v16 = vpop.permute.xlu0 %7329  ;;  %v7523_v0 = vpack.i.bf16 %v2691_v45, %v2689_v63  ;;  %v7266_v45 = vunpack.i.l.bf16 %v10361_v28 }
 0x346   : > { %7494 = vrot.lane.b32.xlu0 %v7473_v40, %s8071_s14  ;;  %v2602_v40 = vrot.slane %v2478_v27, 2 }
 0x347   : > { %v10524_v2 = vpop.permute.xlu1 %7314 }
 0x348   : > { %7504 = vrot.lane.b32.xlu1 %v7498_v14, %s8065_s20  ;;  %v2604_v15 = vsel %vm889_vm4, %v2602_v40, %v2603_v11  ;;  %v2682_v14 = vrot.slane %v2478_v27, 4  ;;  %v2686_v11 = vsel %vm444_vm0, %v2683_v22, %v2685_v19  ;;  %v7257_v27 = vunpack.i.h.bf16 %v10331_v51  ;;  %v7930_v40 = vld [vmem:[#allocation2 + $0x20] sm:$0xff] }
 0x349   : > { %v7548_v10 = vpack.i.bf16 %v2606_v41, %v2604_v15  ;;  %v10530_v17 = vpop.permute.xlu0 %7334  ;;  %v7256_v41 = vunpack.i.l.bf16 %v10331_v51  ;;  %v7931_v51 = vld [vmem:[#allocation2 + $0x18] sm:$0xff]  ;;  %v7262_v19 = vunpack.i.h.bf16 %v10371_v53 }
 0x34a   : > { %7509 = vrot.lane.b32.xlu0 %v7508_v55, %s8069_s9  ;;  %v2684_v57 = vsel %vm444_vm0, %v2682_v14, %v2683_v22  ;;  %v3545_v63 = vsel %vm278_vm1, %v7930_v40, %v7257_v27  ;;  %v3542_v27 = vsel %vm278_vm1, %v7933_v39, %v7251_v4  ;;  %v7292_v40 = vunpack.i.h.bf16 %v10465_v25 }
 0x34b   : > { %v10532_v46 = vpack.i.bf16 %v2686_v11, %v2684_v57  ;;  %v3544_v22 = vsel %vm278_vm1, %v7931_v51, %v7256_v41  ;;  %v7932_v57 = vld [vmem:[#allocation2 + $0x8] sm:$0xff]  ;;  %v3577_v28 = vsel %vm1887_vm6, %v3545_v63, %v7267_v24  ;;  %v7291_v51 = vunpack.i.l.bf16 %v10465_v25 }
 0x34c   : > { %7519 = vrot.lane.b32.xlu1 %v7518_v6, %s8066_s21  ;;  %v3576_v41 = vsel %vm1887_vm6, %v3544_v22, %v7266_v45  ;;  %v7312_v4 = vunpack.i.h.bf16 %v10514_v56  ;;  %v7311_v24 = vunpack.i.l.bf16 %v10514_v56  ;;  %v7332_v25 = vunpack.i.h.bf16 %v10518_v16  ;;  %v2488_v22 = vld [vmem:[#allocation2 + $0x110] sm:$0xff]  ;;  %v10587_v56 = vld [vmem:[#allocation2 + $0xf8] sm:$0xff] }
 0x34d   : > { %v3609_v45 = vsel %vm1920_vm7, %v3577_v28, %v7292_v40  ;;  %v7317_v40 = vunpack.i.h.bf16 %v10524_v2 }
 0x34e   : > { %7514 = vrot.lane.b32.xlu0 %v7508_v55, %s8065_s20  ;;  %v7252_v55 = vunpack.i.h.bf16 %v10341_v3  ;;  %v7261_v3 = vunpack.i.l.bf16 %v10371_v53  ;;  %v7297_v53 = vunpack.i.h.bf16 %v10478_v21  ;;  %v7331_v21 = vunpack.i.l.bf16 %v10518_v16 }
 0x34f   : > { %v3641_v16 = vsel %vm1953_vm8, %v3609_v45, %v7312_v4  ;;  %v2618_v4 = vrot.slane %v2488_v22, 2 }
 0x350   : > { %7524 = vrot.lane.b32.xlu1 %v7523_v0, %s8068_s23  ;;  %v3543_v11 = vsel %vm278_vm1, %v7932_v57, %v7252_v55  ;;  %v3574_v39 = vsel %vm1887_vm6, %v3542_v27, %v7261_v3  ;;  %v3608_v57 = vsel %vm1920_vm7, %v3576_v41, %v7291_v51  ;;  %v2489_v27 = vld [vmem:[#allocation2 + $0x118] sm:$0xf]  ;;  %v7336_v41 = vunpack.i.l.bf16 %v10530_v17  ;;  %v2487_v51 = vld [vmem:[#allocation2 + $0x108] sm:$0xff] }
 0x351   : > { %v3575_v55 = vsel %vm1887_vm6, %v3543_v11, %v7262_v19  ;;  %v3606_v19 = vsel %vm1920_vm7, %v3574_v39, %v7296_v34  ;;  %v7316_v11 = vunpack.i.l.bf16 %v10524_v2  ;;  %v3640_v28 = vsel %vm1953_vm8, %v3608_v57, %v7311_v24 }
 0x352   : > { %7549 = vrot.lane.b32.xlu0 %v7548_v10, %s8066_s21  ;;  %v3607_v3 = vsel %vm1920_vm7, %v3575_v55, %v7297_v53  ;;  %v2486_v53 = vld [vmem:[#allocation2 + $0x100] sm:$0xf]  ;;  %v7337_v55 = vunpack.i.h.bf16 %v10530_v17  ;;  %v3638_v50 = vsel %vm1953_vm8, %v3606_v19, %v7331_v21  ;;  %v2620_v24 = vrot.slane %v2489_v27, 2 }
 0x353   : > { %v3639_v39 = vsel %vm1953_vm8, %v3607_v3, %v7332_v25  ;;  %v2613_v2 = vrot.slane %v10587_v56, 2  ;;  %v3672_v45 = vsel %vm1986_vm9, %v3640_v28, %v7316_v11  ;;  %v2615_v25 = vrot.slane %v2486_v53, 2 }
 0x354   : > { %7529 = vrot.lane.b32.xlu1 %v7518_v6, %s8070_s13  ;;  %v2698_v57 = vrot.slane %v2488_v22, 4  ;;  %v2700_v17 = vrot.slane %v2489_v27, 4  ;;  %v3673_v3 = vsel %vm1986_vm9, %v3641_v16, %v7317_v40  ;;  %v3670_v21 = vsel %vm1986_vm9, %v3638_v50, %v7336_v41 }
 0x355   : > { %v10534_v12 = vpop.permute.xlu1 %7339  ;;  %v2617_v19 = vrot.slane %v2487_v51, 2  ;;  %v3671_v31 = vsel %vm1986_vm9, %v3639_v39, %v7337_v55  ;;  %v7588_v11 = vpack.i.bf16 %v10587_v56, %v2484_v36  ;;  %v2697_v28 = vrot.slane %v2487_v51, 4 }
 0x356   : > { %7554 = vrot.lane.b32.xlu0 %v10532_v46, %s8068_s23  ;;  %v2621_v7 = vsel %vm889_vm4, %v2618_v4, %v2620_v24  ;;  %v2616_v50 = vsel %vm889_vm4, %v2613_v2, %v2615_v25  ;;  %v2701_v16 = vsel %vm444_vm0, %v2698_v57, %v2700_v17  ;;  %v2693_v40 = vrot.slane %v10587_v56, 4 }
 0x357   : > { %v10541_v15 = vpop.permute.xlu0 %7349  ;;  %v2699_v27 = vsel %vm444_vm0, %v2697_v28, %v2698_v57 }
 0x358   : > { %7534 = vrot.lane.b32.xlu1 %v7518_v6, %s8067_s22  ;;  %v7603_v56 = vpack.i.bf16 %v2701_v16, %v2699_v27  ;;  %v7352_v58 = vunpack.i.h.bf16 %v10541_v15  ;;  %v7351_v42 = vunpack.i.l.bf16 %v10541_v15 }
 0x359   : > { %v10546_v30 = vpop.permute.xlu1 %7344 }
 0x35a   : > { %7559 = vrot.lane.b32.xlu0 %v7548_v10, %s8070_s13  ;;  %v7347_v41 = vunpack.i.h.bf16 %v10546_v30 }
 0x35b   : > { %v10555_v14 = vpop.permute.xlu0 %7354 }
 0x35c   : > { %7539 = vrot.lane.b32.xlu1 %v7523_v0, %s8072_s15  ;;  %v7356_v39 = vunpack.i.l.bf16 %v10555_v14 }
 0x35d   : > { %v10561_v6 = vpop.permute.xlu1 %7359 }
 0x35e   : > { %7564 = vrot.lane.b32.xlu0 %v7548_v10, %s8067_s22 }
 0x35f   : > { %v10573_v63 = vpop.permute.xlu0 %7389 }
 0x360   : > { %7544 = vrot.lane.b32.xlu1 %v7523_v0, %s8071_s14  ;;  %v7578_v0 = vpack.i.bf16 %v2488_v22, %v2487_v51  ;;  %v2614_v22 = vsel %vm889_vm4, %v2612_v44, %v2613_v2  ;;  %v7346_v51 = vunpack.i.l.bf16 %v10546_v30  ;;  %v2695_v44 = vrot.slane %v2486_v53, 4 }
 0x361   : > { %v10578_v10 = vpop.permute.xlu1 %7364  ;;  %v7628_v25 = vpack.i.bf16 %v2616_v50, %v2614_v22  ;;  %v3705_v53 = vsel %vm2019_vm10, %v3673_v3, %v7347_v41 }
 0x362   : > { %7569 = vrot.lane.b32.xlu0 %v10532_v46, %s8072_s15 }
 0x363   : > { %v10593_v34 = vpop.permute.xlu0 %7394 }
 0x364   : > { %7579 = vrot.lane.b32.xlu1 %v7578_v0, %s8069_s9 }
 0x365   : > { %v10598_v60 = vpop.permute.xlu1 %7369 }
 0x366   : > { %7574 = vrot.lane.b32.xlu0 %v10532_v46, %s8071_s14  ;;  %v2619_v46 = vsel %vm889_vm4, %v2617_v19, %v2618_v4  ;;  %v7357_v4 = vunpack.i.h.bf16 %v10555_v14  ;;  %v2692_v19 = vrot.slane %v2484_v36, 4  ;;  %v3702_v36 = vsel %vm2019_vm10, %v3670_v21, %v7356_v39 }
 0x367   : > { %v10607_v5 = vpop.permute.xlu0 %7399  ;;  %v7598_v24 = vpack.i.bf16 %v2621_v7, %v2619_v46  ;;  %v3704_v7 = vsel %vm2019_vm10, %v3672_v45, %v7346_v51  ;;  %v7934_v45 = vld [vmem:[#allocation2 + $0x1d0] sm:$0xff]  ;;  %v7935_v51 = vld [vmem:[#allocation2 + $0x1c8] sm:$0xff] }
 0x368   : > { %7584 = vrot.lane.b32.xlu1 %v7578_v0, %s8065_s20  ;;  %v2694_v52 = vsel %vm444_vm0, %v2692_v19, %v2693_v40  ;;  %v3703_v46 = vsel %vm2019_vm10, %v3671_v31, %v7357_v4  ;;  %v2770_v41 = vrot.slane %v7934_v45, 4  ;;  %v2769_v39 = vrot.slane %v7935_v51, 4  ;;  %v7937_v4 = vld [vmem:[#allocation2 + $0x1b0] sm:$0xff] }
 0x369   : > { %v7375_v43 = vpop.permute.xlu1 %7374  ;;  %v2492_v45 = vld [vmem:[#allocation2 + $0x130] sm:$0xf] }
 0x36a   : > { %7589 = vrot.lane.b32.xlu0 %v7588_v11, %s8069_s9  ;;  %v7376_v0 = vunpack.i.l.bf16 %v7375_v43  ;;  %v7377_v2 = vunpack.i.h.bf16 %v7375_v43  ;;  %v2696_v43 = vsel %vm444_vm0, %v2693_v40, %v2695_v44  ;;  %v7936_v44 = vld [vmem:[#allocation2 + $0x1b8] sm:$0xff] }
 0x36b   : > { %v7405_v55 = vpop.permute.xlu0 %7404 }
 0x36c   : > { %v7407_v28 = vunpack.i.h.bf16 %v7405_v55  ;;  %v7406_v20 = vunpack.i.l.bf16 %v7405_v55  ;;  %7599 = vrot.lane.b32.xlu1 %v7598_v24, %s8066_s21  ;;  %v3737_v27 = vsel %vm2052_vm11, %v3705_v53, %v7377_v2  ;;  %v7633_v2 = vpack.i.bf16 %v2696_v43, %v2694_v52 }
 0x36d   : > { %v7380_v57 = vpop.permute.xlu1 %7379 }
 0x36e   : > { %7594 = vrot.lane.b32.xlu0 %v7588_v11, %s8065_s20  ;;  %v7382_v30 = vunpack.i.h.bf16 %v7380_v57  ;;  %v7381_v17 = vunpack.i.l.bf16 %v7380_v57  ;;  %v3736_v11 = vsel %vm2052_vm11, %v3704_v7, %v7376_v0  ;;  %v3734_v16 = vsel %vm2052_vm11, %v3702_v36, %v7406_v20  ;;  %v7938_v57 = vld [vmem:[#allocation2 + $0x1d8] sm:$0xf]  ;;  %v7939_v7 = vld [vmem:[#allocation2 + $0x1c0] sm:$0xf] }
 0x36f   : > { %v7410_v14 = vpop.permute.xlu0 %7409  ;;  %v3735_v55 = vsel %vm2052_vm11, %v3703_v46, %v7407_v28  ;;  %v2765_v20 = vrot.slane %v7936_v44, 4  ;;  %v2764_v0 = vrot.slane %v7937_v4, 4  ;;  %v2767_v36 = vrot.slane %v7939_v7, 4 }
 0x370   : > { %v7412_v22 = vunpack.i.h.bf16 %v7410_v14  ;;  %v7411_v50 = vunpack.i.l.bf16 %v7410_v14  ;;  %v3768_v3 = vsel %vm2085_vm12, %v3736_v11, %v7381_v17  ;;  %7604 = vrot.lane.b32.xlu1 %v7603_v56, %s8068_s23  ;;  %v3769_v31 = vsel %vm2085_vm12, %v3737_v27, %v7382_v30  ;;  %v2494_v11 = vld [vmem:[#allocation2 + $0x140] sm:$0xff] }
 0x371   : > { %v3799_v28 = vpack.c.bf16 %v3769_v31, %v3768_v3  ;;  %v2772_v30 = vrot.slane %v7938_v57, 4  ;;  %v10647_v17 = vsel %vm444_vm0, %v2769_v39, %v2770_v41  ;;  %v10650_v53 = vsel %vm444_vm0, %v2764_v0, %v2765_v20  ;;  %v10680_v7 = vpop.permute.xlu1 %7384 }
 0x372   : > { %7629 = vrot.lane.b32.xlu0 %v7628_v25, %s8066_s21  ;;  %v3766_v21 = vsel %vm2085_vm12, %v3734_v16, %v7411_v50  ;;  %v3767_v40 = vsel %vm2085_vm12, %v3735_v55, %v7412_v22  ;;  %v10658_v14 = vsel %vm444_vm0, %v2765_v20, %v2767_v36  ;;  %v2495_v22 = vld [vmem:[#allocation2 + $0x148] sm:$0xf]  ;;  %v2493_v50 = vld [vmem:[#allocation2 + $0x138] sm:$0xff]  ;;  %v2628_v55 = vrot.slane %v2494_v11, 2 }
 0x373   : > { %v3798_v19 = vpack.c.bf16 %v3767_v40, %v3766_v21  ;;  %v10653_v52 = vsel %vm444_vm0, %v2770_v41, %v2772_v30  ;;  %v7658_v27 = vpack.i.bf16 %v2494_v11, %v2493_v50  ;;  %v2491_v16 = vld [vmem:[#allocation2 + $0x128] sm:$0xff]  ;;  %v2630_v3 = vrot.slane %v2495_v22, 2  ;;  %v2490_v41 = vld [vmem:[#allocation2 + $0x120] sm:$0xff] }
 0x374   : > { %7609 = vrot.lane.b32.xlu1 %v7598_v24, %s8067_s22  ;;  %v2627_v31 = vrot.slane %v2493_v50, 2  ;;  %v7668_v21 = vpack.i.bf16 %v2491_v16, %v2490_v41  ;;  %v2625_v40 = vrot.slane %v2492_v45, 2  ;;  %v2708_v51 = vrot.slane %v2494_v11, 4 }
 0x375   : > { %6521 = vmatprep.mubr.msk.bf16.mxu0 %vm2177_vm13, %v3798_v19  ;;  %v2710_v39 = vrot.slane %v2495_v22, 4  ;;  %v2622_v44 = vrot.slane %v2490_v41, 2  ;;  %v2707_v20 = vrot.slane %v2493_v50, 4  ;;  %v2703_v57 = vrot.slane %v2491_v16, 4 }
 0x376   : > { %7634 = vrot.lane.b32.xlu0 %v7633_v2, %s8068_s23  ;;  %6522 = vmatmul.mubr.msk.bf16.vlgmr.msra.gmra.mxu0 %vm2177_vm13, %v3799_v28  ;;  %v2705_v30 = vrot.slane %v2492_v45, 4  ;;  %v2702_v36 = vrot.slane %v2490_v41, 4 }
 0x377   : > { %v2711_v28 = vsel %vm444_vm0, %v2708_v51, %v2710_v39  ;;  %v7327_v39 = vunpack.i.h.bf16 %v10508_v49 }
 0x378   : > { %7614 = vrot.lane.b32.xlu1 %v7603_v56, %s8072_s15  ;;  %v2704_v50 = vsel %vm444_vm0, %v2702_v36, %v2703_v57 }
 0x37a   : > { %7639 = vrot.lane.b32.xlu0 %v7628_v25, %s8067_s22 }
 0x37c   : > { %7619 = vrot.lane.b32.xlu1 %v7598_v24, %s8070_s13  ;;  %v2623_v24 = vrot.slane %v2491_v16, 2 }
 0x37e   : > { %7644 = vrot.lane.b32.xlu0 %v7633_v2, %s8072_s15  ;;  %v2624_v0 = vsel %vm889_vm4, %v2622_v44, %v2623_v24  ;;  %v2626_v19 = vsel %vm889_vm4, %v2623_v24, %v2625_v40  ;;  %v7322_v40 = vunpack.i.h.bf16 %v10499_v54  ;;  %v7326_v44 = vunpack.i.l.bf16 %v10508_v49  ;;  %v2499_v49 = vld [vmem:[#allocation2 + $0x168] sm:$0xff] }
 0x37f   : > { %v7708_v11 = vpack.i.bf16 %v2626_v19, %v2624_v0  ;;  %v7940_v0 = vld [vmem:[#allocation2 + $0x50] sm:$0xff]  ;;  %v2717_v1 = vrot.slane %v2499_v49, 4 }
 0x380   : > { %7624 = vrot.lane.b32.xlu1 %v7603_v56, %s8071_s14  ;;  %v2631_v56 = vsel %vm889_vm4, %v2628_v55, %v2630_v3 }
 0x382   : > { %7649 = vrot.lane.b32.xlu0 %v7628_v25, %s8070_s13  ;;  %v2629_v25 = vsel %vm889_vm4, %v2627_v31, %v2628_v55  ;;  %v10686_v55 = vpop.permute.xlu0 %7414  ;;  %v7302_v31 = vunpack.i.h.bf16 %v10494_v18 }
 0x383   : > { %v7678_v4 = vpack.i.bf16 %v2631_v56, %v2629_v25  ;;  %v7321_v25 = vunpack.i.l.bf16 %v10499_v54  ;;  %v7306_v56 = vunpack.i.l.bf16 %v10504_v33 }
 0x384   : > { %7659 = vrot.lane.b32.xlu1 %v7658_v27, %s8069_s9  ;;  %v3549_v19 = vsel %vm278_vm1, %v7940_v0, %v7302_v31 }
 0x386   : > { %7654 = vrot.lane.b32.xlu0 %v7633_v2, %s8071_s14  ;;  %v2709_v2 = vsel %vm444_vm0, %v2707_v20, %v2708_v51  ;;  %v7307_v51 = vunpack.i.h.bf16 %v10504_v33 }
 0x387   : > { %v7683_v22 = vpack.i.bf16 %v2711_v28, %v2709_v2  ;;  %v7941_v2 = vld [vmem:[#allocation2 + $0x48] sm:$0xff]  ;;  %v2497_v28 = vld [vmem:[#allocation2 + $0x158] sm:$0xff] }
 0x388   : > { %7664 = vrot.lane.b32.xlu1 %v7658_v27, %s8065_s20  ;;  %v2706_v27 = vsel %vm444_vm0, %v2703_v57, %v2705_v30  ;;  %v7942_v57 = vld [vmem:[#allocation2 + $0x38] sm:$0xff]  ;;  %v3581_v31 = vsel %vm1887_vm6, %v3549_v19, %v7307_v51  ;;  %v2633_v46 = vrot.slane %v2497_v28, 2  ;;  %v2637_v51 = vrot.slane %v2499_v49, 2 }
 0x389   : > { %v7713_v3 = vpack.i.bf16 %v2706_v27, %v2704_v50  ;;  %v3547_v30 = vsel %vm278_vm1, %v7942_v57, %v7322_v40  ;;  %v2501_v50 = vld [vmem:[#allocation2 + $0x178] sm:$0xf]  ;;  %v2498_v27 = vld [vmem:[#allocation2 + $0x160] sm:$0xf]  ;;  %v2496_v57 = vld [vmem:[#allocation2 + $0x150] sm:$0xff] }
 0x38a   : > { %7669 = vrot.lane.b32.xlu0 %v7668_v21, %s8069_s9  ;;  %v3579_v0 = vsel %vm1887_vm6, %v3547_v30, %v7327_v39  ;;  %v2635_v43 = vrot.slane %v2498_v27, 2  ;;  %v2632_v19 = vrot.slane %v2496_v57, 2  ;;  %v2713_v30 = vrot.slane %v2497_v28, 4 }
 0x38c   : > { %7679 = vrot.lane.b32.xlu1 %v7678_v4, %s8066_s21  ;;  %v2634_v26 = vsel %vm889_vm4, %v2632_v19, %v2633_v46 }
 0x38e   : > { %7674 = vrot.lane.b32.xlu0 %v7668_v21, %s8065_s20  ;;  %v7301_v21 = vunpack.i.l.bf16 %v10494_v18  ;;  %v2500_v18 = vld [vmem:[#allocation2 + $0x170] sm:$0xff] }
 0x38f   : > { %v7738_v40 = vpack.i.bf16 %v2500_v18, %v2499_v49  ;;  %v2718_v39 = vrot.slane %v2500_v18, 4 }
 0x390   : > { %7684 = vrot.lane.b32.xlu1 %v7683_v22, %s8068_s23  ;;  %v3548_v54 = vsel %vm278_vm1, %v7941_v2, %v7301_v21 }
 0x391   : > { %v10688_v16 = vpop.permute.xlu1 %7419  ;;  %v3580_v36 = vsel %vm1887_vm6, %v3548_v54, %v7306_v56  ;;  %v2638_v54 = vrot.slane %v2500_v18, 2  ;;  %v2636_v18 = vsel %vm889_vm4, %v2633_v46, %v2635_v43  ;;  %v2719_v15 = vsel %vm444_vm0, %v2717_v1, %v2718_v39 }
 0x392   : > { %7709 = vrot.lane.b32.xlu0 %v7708_v11, %s8066_s21  ;;  %v10756_v1 = vpack.i.bf16 %v2636_v18, %v2634_v26  ;;  %v7386_v26 = vunpack.i.l.bf16 %v10680_v7 }
 0x393   : > { %v10692_v45 = vpop.permute.xlu0 %7429  ;;  %v2639_v13 = vsel %vm889_vm4, %v2637_v51, %v2638_v54 }
 0x394   : > { %7689 = vrot.lane.b32.xlu1 %v7678_v4, %s8067_s22 }
 0x395   : > { %v10694_v41 = vpop.permute.xlu1 %7424 }
 0x396   : > { %7714 = vrot.lane.b32.xlu0 %v7713_v3, %s8068_s23 }
 0x397   : > { %v10700_v24 = vpop.permute.xlu0 %7434 }
 0x398   : > { %7694 = vrot.lane.b32.xlu1 %v7683_v22, %s8072_s15 }
 0x39a   : > { %7719 = vrot.lane.b32.xlu0 %v7708_v11, %s8067_s22  ;;  %v10710_v20 = vpop.permute.xlu1 %7439 }
 0x39c   : > { %7699 = vrot.lane.b32.xlu1 %v7678_v4, %s8070_s13  ;;  %v7943_v4 = vld [vmem:[#allocation2 + $0x30] sm:$0xff] }
 0x39d   : > { %v3546_v33 = vsel %vm278_vm1, %v7943_v4, %v7321_v25  ;;  %v7342_v25 = vunpack.i.h.bf16 %v10534_v12  ;;  %v2640_v4 = vrot.slane %v2501_v50, 2 }
 0x39e   : > { %7724 = vrot.lane.b32.xlu0 %v7713_v3, %s8072_s15  ;;  %v3578_v21 = vsel %vm1887_vm6, %v3546_v33, %v7326_v44  ;;  %v2720_v44 = vrot.slane %v2501_v50, 4  ;;  %v2715_v33 = vrot.slane %v2498_v27, 4  ;;  %v2712_v50 = vrot.slane %v2496_v57, 4 }
 0x39f   : > { %v7371_v27 = vunpack.i.l.bf16 %v10598_v60  ;;  %v3613_v49 = vsel %vm1920_vm7, %v3581_v31, %v7342_v25  ;;  %v3610_v46 = vsel %vm1920_vm7, %v3578_v21, %v7351_v42  ;;  %v7401_v31 = vunpack.i.l.bf16 %v10607_v5 }
 0x3a0   : > { %7704 = vrot.lane.b32.xlu1 %v7683_v22, %s8071_s14  ;;  %v7341_v22 = vunpack.i.l.bf16 %v10534_v12  ;;  %v2721_v51 = vsel %vm444_vm0, %v2718_v39, %v2720_v44  ;;  %v2716_v43 = vsel %vm444_vm0, %v2713_v30, %v2715_v33  ;;  %v7402_v39 = vunpack.i.h.bf16 %v10607_v5 }
 0x3a1   : > { %v10722_v2 = vpop.permute.xlu0 %7469  ;;  %v7387_v42 = vunpack.i.h.bf16 %v10680_v7  ;;  %v7416_v5 = vunpack.i.l.bf16 %v10686_v55  ;;  %v7427_v21 = vunpack.i.h.bf16 %v10694_v41  ;;  %v7437_v44 = vunpack.i.h.bf16 %v10700_v24 }
 0x3a2   : > { %7729 = vrot.lane.b32.xlu0 %v7708_v11, %s8070_s13  ;;  %v10725_v56 = vpop.permute.xlu1 %7444  ;;  %v7748_v11 = vpack.i.bf16 %v2497_v28, %v2496_v57  ;;  %v7372_v28 = vunpack.i.h.bf16 %v10598_v60  ;;  %v3611_v60 = vsel %vm1920_vm7, %v3579_v0, %v7352_v58  ;;  %v7417_v58 = vunpack.i.h.bf16 %v10686_v55 }
 0x3a3   : > { %v7426_v0 = vunpack.i.l.bf16 %v10694_v41  ;;  %v3642_v18 = vsel %vm1953_vm8, %v3610_v46, %v7401_v31 }
 0x3a4   : > { %7739 = vrot.lane.b32.xlu1 %v7738_v40, %s8069_s9  ;;  %v3645_v25 = vsel %vm1953_vm8, %v3613_v49, %v7372_v28 }
 0x3a6   : > { %7734 = vrot.lane.b32.xlu0 %v7713_v3, %s8071_s14  ;;  %v10734_v12 = vpop.permute.xlu1 %7449  ;;  %v2641_v3 = vsel %vm889_vm4, %v2638_v54, %v2640_v4  ;;  %v3612_v54 = vsel %vm1920_vm7, %v3580_v36, %v7341_v22  ;;  %v2714_v4 = vsel %vm444_vm0, %v2712_v50, %v2713_v30  ;;  %v10760_v36 = vpack.i.bf16 %v2721_v51, %v2719_v15 }
 0x3a7   : > { %v10732_v29 = vpop.permute.xlu0 %7474  ;;  %v3644_v22 = vsel %vm1953_vm8, %v3612_v54, %v7371_v27  ;;  %v7436_v30 = vunpack.i.l.bf16 %v10700_v24  ;;  %v3643_v50 = vsel %vm1953_vm8, %v3611_v60, %v7402_v39  ;;  %v3677_v27 = vsel %vm1986_vm9, %v3645_v25, %v7387_v42 }
 0x3a8   : > { %7744 = vrot.lane.b32.xlu1 %v7738_v40, %s8065_s20  ;;  %v10754_v40 = vpack.i.bf16 %v2641_v3, %v2639_v13  ;;  %v10768_v13 = vpack.i.bf16 %v2716_v43, %v2714_v4  ;;  %v3676_v41 = vsel %vm1986_vm9, %v3644_v22, %v7386_v26  ;;  %v3674_v24 = vsel %vm1986_vm9, %v3642_v18, %v7416_v5 }
 0x3a9   : > { %v3675_v49 = vsel %vm1986_vm9, %v3643_v50, %v7417_v58  ;;  %v3709_v54 = vsel %vm2019_vm10, %v3677_v27, %v7427_v21  ;;  %v3708_v4 = vsel %vm2019_vm10, %v3676_v41, %v7426_v0  ;;  %v3706_v43 = vsel %vm2019_vm10, %v3674_v24, %v7436_v30  ;;  %v2506_v24 = vld [vmem:[#allocation2 + $0x1a0] sm:$0xff] }
 0x3aa   : > { %7749 = vrot.lane.b32.xlu0 %v7748_v11, %s8069_s9  ;;  %v7455_v19 = vpop.permute.xlu1 %7454  ;;  %v3707_v46 = vsel %vm2019_vm10, %v3675_v49, %v7437_v44  ;;  %v7362_v50 = vunpack.i.h.bf16 %v10561_v6  ;;  %v7391_v27 = vunpack.i.l.bf16 %v10573_v63  ;;  %v7944_v49 = vld [vmem:[#allocation2 + $0x80] sm:$0xff] }
 0x3ab   : > { %v10752_v57 = vpop.permute.xlu0 %7479  ;;  %v7456_v7 = vunpack.i.l.bf16 %v7455_v19 }
 0x3ac   : > { %7759 = vrot.lane.b32.xlu1 %v10754_v40, %s8066_s21  ;;  %v7481_v59 = vunpack.i.l.bf16 %v10752_v57 }
 0x3ad   : > { %v3740_v31 = vsel %vm2052_vm11, %v3708_v4, %v7456_v7  ;;  %v7361_v7 = vunpack.i.l.bf16 %v10561_v6  ;;  %v2507_v6 = vld [vmem:[#allocation2 + $0x1a8] sm:$0xf] }
 0x3ae   : > { %7754 = vrot.lane.b32.xlu0 %v7748_v11, %s8065_s20  ;;  %v7457_v11 = vunpack.i.h.bf16 %v7455_v19  ;;  %v7460_v3 = vpop.permute.xlu1 %7459 }
 0x3af   : > { %v7462_v15 = vunpack.i.h.bf16 %v7460_v3  ;;  %v7461_v51 = vunpack.i.l.bf16 %v7460_v3 }
 0x3b0   : > { %v7485_v33 = vpop.permute.xlu0 %7484  ;;  %7764 = vrot.lane.b32.xlu1 %v10760_v36, %s8068_s23  ;;  %v3741_v60 = vsel %vm2052_vm11, %v3709_v54, %v7457_v11  ;;  %v3553_v54 = vsel %vm278_vm1, %v7944_v49, %v7362_v50  ;;  %v2744_v50 = vrot.slane %v2506_v24, 4 }
 0x3b1   : > { %v7486_v28 = vunpack.i.l.bf16 %v7485_v33  ;;  %v7487_v55 = vunpack.i.h.bf16 %v7485_v33  ;;  %v3772_v58 = vsel %vm2085_vm12, %v3740_v31, %v7461_v51  ;;  %v3773_v5 = vsel %vm2085_vm12, %v3741_v60, %v7462_v15  ;;  %v2504_v60 = vld [vmem:[#allocation2 + $0x190] sm:$0xf] }
 0x3b2   : > { %7789 = vrot.lane.b32.xlu0 %v10756_v1, %s8066_s21  ;;  %v10792_v39 = vpop.permute.xlu1 %7464  ;;  %v3801_v33 = vpack.c.bf16 %v3773_v5, %v3772_v58  ;;  %v7366_v15 = vunpack.i.l.bf16 %v10578_v10  ;;  %v2734_v58 = vrot.slane %v2506_v24, 2  ;;  %v2736_v5 = vrot.slane %v2507_v6, 2 }
 0x3b3   : > { %v3738_v25 = vsel %vm2052_vm11, %v3706_v43, %v7486_v28  ;;  %v3739_v26 = vsel %vm2052_vm11, %v3707_v46, %v7487_v55  ;;  %v7392_v28 = vunpack.i.h.bf16 %v10573_v63  ;;  %v7367_v55 = vunpack.i.h.bf16 %v10578_v10  ;;  %v7945_v63 = vld [vmem:[#allocation2 + $0x78] sm:$0xff]  ;;  %v7946_v43 = vld [vmem:[#allocation2 + $0x68] sm:$0xff] }
 0x3b4   : > { %v7490_v19 = vpop.permute.xlu0 %7489  ;;  %7769 = vrot.lane.b32.xlu1 %v10754_v40, %s8067_s22  ;;  %v3552_v4 = vsel %vm278_vm1, %v7945_v63, %v7361_v7  ;;  %v2503_v46 = vld [vmem:[#allocation2 + $0x188] sm:$0xff]  ;;  %v2746_v7 = vrot.slane %v2507_v6, 4 }
 0x3b5   : > { %v7492_v22 = vunpack.i.h.bf16 %v7490_v19  ;;  %v7491_v42 = vunpack.i.l.bf16 %v7490_v19  ;;  %v3551_v10 = vsel %vm278_vm1, %v7946_v43, %v7392_v28  ;;  %v7947_v19 = vld [vmem:[#allocation2 + $0x60] sm:$0xff]  ;;  %v3584_v31 = vsel %vm1887_vm6, %v3552_v4, %v7366_v15 }
 0x3b6   : > { %7794 = vrot.lane.b32.xlu0 %v10768_v13, %s8068_s23  ;;  %v10807_v30 = vpop.permute.xlu1 %7499  ;;  %v7396_v28 = vunpack.i.l.bf16 %v10593_v34  ;;  %v2737_v4 = vsel %vm889_vm4, %v2734_v58, %v2736_v5  ;;  %v7432_v5 = vunpack.i.h.bf16 %v10692_v45 }
 0x3b7   : > { %v3770_v21 = vsel %vm2085_vm12, %v3738_v25, %v7491_v42  ;;  %v3771_v0 = vsel %vm2085_vm12, %v3739_v26, %v7492_v22  ;;  %v3585_v25 = vsel %vm1887_vm6, %v3553_v54, %v7367_v55  ;;  %v2505_v22 = vld [vmem:[#allocation2 + $0x198] sm:$0xff]  ;;  %v7397_v42 = vunpack.i.h.bf16 %v10593_v34  ;;  %v2502_v26 = vld [vmem:[#allocation2 + $0x180] sm:$0xff] }
 0x3b8   : > { %v10805_v44 = vpop.permute.xlu0 %7494  ;;  %v3800_v11 = vpack.c.bf16 %v3771_v0, %v3770_v21  ;;  %7774 = vrot.lane.b32.xlu1 %v10760_v36, %s8072_s15  ;;  %v2741_v55 = vrot.slane %v2504_v60, 4  ;;  %v7818_v15 = vpack.i.bf16 %v2506_v24, %v2505_v22  ;;  %v7828_v49 = vpack.i.bf16 %v2503_v46, %v2502_v26 }
 0x3b9   : > { %v2728_v54 = vrot.slane %v2502_v26, 2  ;;  %v2738_v43 = vrot.slane %v2502_v26, 4  ;;  %v2747_v24 = vsel %vm444_vm0, %v2744_v50, %v2746_v7 }
 0x3ba   : > { %7799 = vrot.lane.b32.xlu0 %v10756_v1, %s8067_s22  ;;  %6525 = vmatprep.mubr.msk.bf16.mxu0 %vm2177_vm13, %v3800_v11  ;;  %v10817_v18 = vpop.permute.xlu1 %7504  ;;  %v2729_v11 = vrot.slane %v2503_v46, 2 }
 0x3bb   : > { %6526 = vmatmul.mubr.msk.bf16.gmra.mxu0 %vm2177_vm13, %v3801_v33  ;;  %v2731_v33 = vrot.slane %v2504_v60, 2 }
 0x3bc   : > { %v10815_v3 = vpop.permute.xlu0 %7509  ;;  %7779 = vrot.lane.b32.xlu1 %v10754_v40, %s8070_s13  ;;  %v3550_v40 = vsel %vm278_vm1, %v7947_v19, %v7391_v27  ;;  %v2739_v27 = vrot.slane %v2503_v46, 4  ;;  %v2730_v60 = vsel %vm889_vm4, %v2728_v54, %v2729_v11  ;;  %v7422_v46 = vunpack.i.h.bf16 %v10688_v16 }
 0x3bd   : > { %v2732_v19 = vsel %vm889_vm4, %v2729_v11, %v2731_v33  ;;  %v7452_v54 = vunpack.i.h.bf16 %v10734_v12  ;;  %v7451_v11 = vunpack.i.l.bf16 %v10734_v12  ;;  %v3582_v33 = vsel %vm1887_vm6, %v3550_v40, %v7396_v28 }
 0x3be   : > { %7804 = vrot.lane.b32.xlu0 %v10768_v13, %s8072_s15  ;;  %v10831_v41 = vpop.permute.xlu1 %7519  ;;  %v2740_v26 = vsel %vm444_vm0, %v2738_v43, %v2739_v27  ;;  %v7482_v12 = vunpack.i.h.bf16 %v10752_v57  ;;  %v7507_v57 = vunpack.i.h.bf16 %v10817_v18 }
 0x3c0   : > { %v10829_v51 = vpop.permute.xlu0 %7514  ;;  %7784 = vrot.lane.b32.xlu1 %v10760_v36, %s8071_s14  ;;  %v2743_v36 = vrot.slane %v2505_v22, 4 }
 0x3c2   : > { %7809 = vrot.lane.b32.xlu0 %v10756_v1, %s8070_s13  ;;  %v10846_v0 = vpop.permute.xlu1 %7524  ;;  %v2733_v1 = vrot.slane %v2505_v22, 2  ;;  %v7421_v22 = vunpack.i.l.bf16 %v10688_v16 }
 0x3c4   : > { %v10844_v21 = vpop.permute.xlu0 %7549  ;;  %v2735_v63 = vsel %vm889_vm4, %v2733_v1, %v2734_v58  ;;  %7819 = vrot.lane.b32.xlu1 %v7818_v15, %s8069_s9  ;;  %v2742_v58 = vsel %vm444_vm0, %v2739_v27, %v2741_v55  ;;  %v7431_v1 = vunpack.i.l.bf16 %v10692_v45  ;;  %v7858_v55 = vpack.i.bf16 %v2732_v19, %v2730_v60 }
 0x3c5   : > { %v7838_v7 = vpack.i.bf16 %v2737_v4, %v2735_v63  ;;  %v7863_v43 = vpack.i.bf16 %v2742_v58, %v2740_v26  ;;  %v3617_v45 = vsel %vm1920_vm7, %v3585_v25, %v7422_v46  ;;  %v3616_v48 = vsel %vm1920_vm7, %v3584_v31, %v7421_v22 }
 0x3c6   : > { %7814 = vrot.lane.b32.xlu0 %v10768_v13, %s8071_s14  ;;  %v10856_v34 = vpop.permute.xlu1 %7529  ;;  %v2745_v13 = vsel %vm444_vm0, %v2743_v36, %v2744_v50  ;;  %v3583_v50 = vsel %vm1887_vm6, %v3551_v10, %v7397_v42  ;;  %v3614_v40 = vsel %vm1920_vm7, %v3582_v33, %v7431_v1  ;;  %v3649_v42 = vsel %vm1953_vm8, %v3617_v45, %v7452_v54 }
 0x3c7   : > { %v7843_v36 = vpack.i.bf16 %v2747_v24, %v2745_v13  ;;  %v3615_v10 = vsel %vm1920_vm7, %v3583_v50, %v7432_v5  ;;  %v3648_v28 = vsel %vm1953_vm8, %v3616_v48, %v7451_v11  ;;  %v7466_v25 = vunpack.i.l.bf16 %v10792_v39 }
 0x3c8   : > { %v10854_v6 = vpop.permute.xlu0 %7554  ;;  %7824 = vrot.lane.b32.xlu1 %v7818_v15, %s8065_s20  ;;  %v7467_v15 = vunpack.i.h.bf16 %v10792_v39  ;;  %v7497_v31 = vunpack.i.h.bf16 %v10805_v44  ;;  %v7496_v63 = vunpack.i.l.bf16 %v10805_v44  ;;  %v7506_v4 = vunpack.i.l.bf16 %v10817_v18 }
 0x3c9   : > { %v7517_v60 = vunpack.i.h.bf16 %v10829_v51  ;;  %v7516_v19 = vunpack.i.l.bf16 %v10829_v51  ;;  %v3646_v13 = vsel %vm1953_vm8, %v3614_v40, %v7481_v59  ;;  %v3647_v39 = vsel %vm1953_vm8, %v3615_v10, %v7482_v12 }
 0x3ca   : > { %7829 = vrot.lane.b32.xlu0 %v7828_v49, %s8069_s9  ;;  %v7535_v27 = vpop.permute.xlu1 %7534  ;;  %v3680_v18 = vsel %vm1986_vm9, %v3648_v28, %v7466_v25  ;;  %v3681_v51 = vsel %vm1986_vm9, %v3649_v42, %v7467_v15  ;;  %v3678_v5 = vsel %vm1986_vm9, %v3646_v13, %v7496_v63  ;;  %v3679_v1 = vsel %vm1986_vm9, %v3647_v39, %v7497_v31  ;;  %s269_s9 = sand.u32 1, %s8054_s25  }
 0x3cb   : > { %v7537_v24 = vunpack.i.h.bf16 %v7535_v27  ;;  %v7536_v46 = vunpack.i.l.bf16 %v7535_v27  ;;  %v3713_v59 = vsel %vm2019_vm10, %v3681_v51, %v7507_v57  ;;  %v3712_v54 = vsel %vm2019_vm10, %v3680_v18, %v7506_v4  ;;  %v7948_v51 = vld [vmem:[#allocation2 + $0xb0] sm:$0xff]  ;;  %s13071_s28 = scalar_lea.sflag [#allocation5], %s269_s9 }
 0x3cc   : > { %v10874_v16 = vpop.permute.xlu0 %7559  ;;  %7839 = vrot.lane.b32.xlu1 %v7838_v7, %s8067_s22  ;;  %v3710_v11 = vsel %vm2019_vm10, %v3678_v5, %v7516_v19  ;;  %v3711_v33 = vsel %vm2019_vm10, %v3679_v1, %v7517_v60  ;;  %v13567_v39 = vpack.i.bf16 %v10658_v14, %v10650_v53  ;;  %v7502_v14 = vunpack.i.h.bf16 %v10807_v30 }
 0x3cd   : > { %v3745_v45 = vsel %vm2052_vm11, %v3713_v59, %v7537_v24  ;;  %v3744_v12 = vsel %vm2052_vm11, %v3712_v54, %v7536_v46  ;;  %v7441_v24 = vunpack.i.l.bf16 %v10710_v20  ;;  %v7471_v46 = vunpack.i.l.bf16 %v10722_v2  ;;  %v7950_v59 = vld [vmem:[#allocation2 + $0x98] sm:$0xff] }
 0x3ce   : > { %7834 = vrot.lane.b32.xlu0 %v7828_v49, %s8065_s20  ;;  %v7540_v49 = vpop.permute.xlu1 %7539  ;;  %v7532_v18 = vunpack.i.h.bf16 %v10856_v34  ;;  %s13057_s20 = scalar_lea.hbm %s13119_s7, %s6375_s29 }
 0x3cf   : > { %v7542_v26 = vunpack.i.h.bf16 %v7540_v49  ;;  %v7541_v58 = vunpack.i.l.bf16 %v7540_v49 }
 0x3d0   : > { %v7565_v48 = vpop.permute.xlu0 %7564  ;;  %7844 = vrot.lane.b32.xlu1 %v7843_v36, %s8072_s15 }
 0x3d1   : > { %v7567_v22 = vunpack.i.h.bf16 %v7565_v48  ;;  %v7566_v44 = vunpack.i.l.bf16 %v7565_v48  ;;  %v3776_v15 = vsel %vm2085_vm12, %v3744_v12, %v7541_v58  ;;  %v3777_v25 = vsel %vm2085_vm12, %v3745_v45, %v7542_v26 }
 0x3d2   : > { %7859 = vrot.lane.b32.xlu0 %v7858_v55, %s8067_s22  ;;  %v10906_v27 = vpop.permute.xlu1 %7544  ;;  %v3803_v19 = vpack.c.bf16 %v3777_v25, %v3776_v15  ;;  %v7512_v58 = vunpack.i.h.bf16 %v10815_v3 }
 0x3d3   : > { %v3742_v42 = vsel %vm2052_vm11, %v3710_v11, %v7566_v44  ;;  %v3743_v28 = vsel %vm2052_vm11, %v3711_v33, %v7567_v22  ;;  %v7477_v22 = vunpack.i.h.bf16 %v10732_v29  ;;  %v7476_v44 = vunpack.i.l.bf16 %v10732_v29  ;;  %v7949_v29 = vld [vmem:[#allocation2 + $0xa8] sm:$0xff]  ;;  %v7951_v11 = vld [vmem:[#allocation2 + $0x90] sm:$0xff] }
 0x3d4   : > { %v7570_v50 = vpop.permute.xlu0 %7569  ;;  %7849 = vrot.lane.b32.xlu1 %v7838_v7, %s8070_s13  ;;  %v13566_v7 = vpack.i.bf16 %v10653_v52, %v10647_v17  ;;  %v7447_v17 = vunpack.i.h.bf16 %v10725_v56  ;;  %v7446_v52 = vunpack.i.l.bf16 %v10725_v56  ;;  %v7531_v56 = vunpack.i.l.bf16 %v10856_v34 }
 0x3d5   : > { %v7572_v40 = vunpack.i.h.bf16 %v7570_v50  ;;  %v7571_v10 = vunpack.i.l.bf16 %v7570_v50  ;;  %v3556_v1 = vsel %vm278_vm1, %v7949_v29, %v7441_v24 }
 0x3d6   : > { %7864 = vrot.lane.b32.xlu0 %v7863_v43, %s8072_s15  ;;  %v10920_v4 = vpop.permute.xlu1 %7579  ;;  %v3588_v33 = vsel %vm1887_vm6, %v3556_v1, %v7446_v52 }
 0x3d7   : > { %v3774_v31 = vsel %vm2085_vm12, %v3742_v42, %v7571_v10  ;;  %v3775_v63 = vsel %vm2085_vm12, %v3743_v28, %v7572_v40  ;;  %v7562_v42 = vunpack.i.h.bf16 %v10874_v16  ;;  %v7561_v28 = vunpack.i.l.bf16 %v10874_v16 }
 0x3d8   : > { %v10918_v57 = vpop.permute.xlu0 %7574  ;;  %v3802_v60 = vpack.c.bf16 %v3775_v63, %v3774_v31  ;;  %7854 = vrot.lane.b32.xlu1 %v7843_v36, %s8071_s14  ;;  %v7442_v36 = vunpack.i.h.bf16 %v10710_v20  ;;  %v7501_v20 = vunpack.i.l.bf16 %v10807_v30  ;;  %v3554_v30 = vsel %vm278_vm1, %v7951_v11, %v7471_v46 }
 0x3d9   : > { %v3586_v50 = vsel %vm1887_vm6, %v3554_v30, %v7476_v44 }
 0x3da   : > { %7869 = vrot.lane.b32.xlu0 %v7858_v55, %s8070_s13  ;;  %6529 = vmatprep.mubr.msk.bf16.mxu0 %vm2177_vm13, %v3802_v60  ;;  %v10928_v49 = vpop.permute.xlu1 %7584  ;;  %v3557_v5 = vsel %vm278_vm1, %v7948_v51, %v7442_v36  ;;  %v3620_v10 = vsel %vm1920_vm7, %v3588_v33, %v7501_v20  ;;  %v7547_v60 = vunpack.i.h.bf16 %v10906_v27  ;;  %s6273_s13 = sshll.u32 %s269_s9, 9 }
 0x3db   : > { %6530 = vmatmul.mubr.msk.bf16.gmra.mxu0 %vm2177_vm13, %v3803_v19  ;;  %v3652_v63 = vsel %vm1953_vm8, %v3620_v10, %v7531_v56  ;;  %v7546_v19 = vunpack.i.l.bf16 %v10906_v27  ;;  %v7587_v36 = vunpack.i.h.bf16 %v10928_v49  ;;  %v7586_v16 = vunpack.i.l.bf16 %v10928_v49 }
 0x3dc   : > { %v10926_v48 = vpop.permute.xlu0 %7589  ;;  %7884 = vrot.lane.b32.xlu1 %v13566_v7, %s8072_s15  ;;  %v7577_v7 = vunpack.i.h.bf16 %v10918_v57 }
 0x3de   : > { %7874 = vrot.lane.b32.xlu0 %v7863_v43, %s8071_s14  ;;  %v10937_v55 = vpop.permute.xlu1 %7599  ;;  %v7472_v43 = vunpack.i.h.bf16 %v10722_v2  ;;  %v7511_v2 = vunpack.i.l.bf16 %v10815_v3  ;;  %v3589_v3 = vsel %vm1887_vm6, %v3557_v5, %v7447_v17  ;;  %s11934_s14 = scalar_lea.vmem [#allocation4], %s6273_s13 }
 0x3df   : > { %v3621_v40 = vsel %vm1920_vm7, %v3589_v3, %v7502_v14  ;;  %s6207_s8 = sshll.u32 %s11934_s14, 4  ;;  %s13059_s8 = int_to_ptr.vmem [resolvable:$true] %s6207_s8 }
 0x3e0   : > { %v10935_v13 = vpop.permute.xlu0 %7594  ;;  %v3555_v54 = vsel %vm278_vm1, %v7950_v59, %v7472_v43  ;;  %v3618_v15 = vsel %vm1920_vm7, %v3586_v50, %v7511_v2  ;;  %v3653_v31 = vsel %vm1953_vm8, %v3621_v40, %v7532_v18  ;;  %v3684_v2 = vsel %vm1986_vm9, %v3652_v63, %v7546_v19  ;;  %s8002_s22 = scalar_lea.vmem %s13059_s8, 8192 }
 0x3e1   : > { %v3587_v34 = vsel %vm1887_vm6, %v3555_v54, %v7477_v22  ;;  %v7597_v24 = vunpack.i.h.bf16 %v10935_v13  ;;  %v7596_v43 = vunpack.i.l.bf16 %v10935_v13  ;;  %v3650_v52 = vsel %vm1953_vm8, %v3618_v15, %v7561_v28  ;;  %p8003_p11 = scmp.ne.s32.totalorder %s13059_s8, %s8002_s22 }
 0x3e2   : > { %7879 = vrot.lane.b32.xlu0 %v13567_v39, %s8072_s15  ;;  %v10953_v53 = vpop.permute.xlu1 %7604  ;;  %v3619_v25 = vsel %vm1920_vm7, %v3587_v34, %v7512_v58  ;;  %v7576_v39 = vunpack.i.l.bf16 %v10918_v57  ;;  %v3685_v49 = vsel %vm1986_vm9, %v3653_v31, %v7547_v60  ;;  %v3716_v51 = vsel %vm2019_vm10, %v3684_v2, %v7586_v16  ;;  %v7952_v2 = vld [vmem:[#allocation2 + $0xe0] sm:$0xff] }
 0x3e3   : > { %v3651_v22 = vsel %vm1953_vm8, %v3619_v25, %v7562_v42  ;;  %v3717_v56 = vsel %vm2019_vm10, %v3685_v49, %v7587_v36  ;;  %v7522_v36 = vunpack.i.h.bf16 %v10831_v41  ;;  %v7521_v16 = vunpack.i.l.bf16 %v10831_v41  ;;  %v7953_v49 = vld [vmem:[#allocation2 + $0xd8] sm:$0xff]  ;;  %p8004_p12 = pnand %p8003_p11, %p8153_p5 }
 0x3e4   : > { %v10951_v26 = vpop.permute.xlu0 %7629  ;;  %v3682_v18 = vsel %vm1986_vm9, %v3650_v52, %v7576_v39  ;;  %v3683_v13 = vsel %vm1986_vm9, %v3651_v22, %v7577_v7  ;;  %v7557_v52 = vunpack.i.h.bf16 %v10854_v6  ;;  %v7556_v22 = vunpack.i.l.bf16 %v10854_v6 }
 0x3e5   : > { %v3714_v5 = vsel %vm2019_vm10, %v3682_v18, %v7596_v43  ;;  %v3715_v29 = vsel %vm2019_vm10, %v3683_v13, %v7597_v24  ;;  %v7552_v24 = vunpack.i.h.bf16 %v10844_v21  ;;  %v7551_v43 = vunpack.i.l.bf16 %v10844_v21  ;;  %v7954_v18 = vld [vmem:[#allocation2 + $0xc8] sm:$0xff]  ;;  %p8005_p13 = pneg %p8004_p12 }
 0x3e6   : > { %v7610_v12 = vpop.permute.xlu1 %7609  ;;  %v7581_v41 = vunpack.i.l.bf16 %v10920_v4  ;;  %v7591_v21 = vunpack.i.l.bf16 %v10926_v48  ;;  %v3560_v6 = vsel %vm278_vm1, %v7953_v49, %v7521_v16 }
 0x3e7   : > { %v7612_v44 = vunpack.i.h.bf16 %v7610_v12  ;;  %v7611_v27 = vunpack.i.l.bf16 %v7610_v12  ;;  %v3559_v13 = vsel %vm278_vm1, %v7954_v18, %v7552_v24 }
 0x3e8   : > { %v10969_v45 = vpop.permute.xlu0 %7634 }
 0x3e9   : > { %v3749_v54 = vsel %vm2052_vm11, %v3717_v56, %v7612_v44  ;;  %v3748_v11 = vsel %vm2052_vm11, %v3716_v51, %v7611_v27  ;;  %v7955_v56 = vld [vmem:[#allocation2 + $0xc0] sm:$0xff] }
 0x3ea   : > { %v7615_v17 = vpop.permute.xlu1 %7614  ;;  %v3558_v51 = vsel %vm278_vm1, %v7955_v56, %v7551_v43 }
 0x3eb   : > { %v7617_v58 = vunpack.i.h.bf16 %v7615_v17  ;;  %v7616_v57 = vunpack.i.l.bf16 %v7615_v17  ;;  %v7526_v17 = vunpack.i.l.bf16 %v10846_v0 }
 0x3ec   : > { %v7640_v46 = vpop.permute.xlu0 %7639 }
 0x3ed   : > { %v7642_v14 = vunpack.i.h.bf16 %v7640_v46  ;;  %v7641_v20 = vunpack.i.l.bf16 %v7640_v46  ;;  %v3780_v34 = vsel %vm2085_vm12, %v3748_v11, %v7616_v57  ;;  %v3781_v12 = vsel %vm2085_vm12, %v3749_v54, %v7617_v58 }
 0x3ee   : > { %v7620_v59 = vpop.permute.xlu1 %7619  ;;  %v3805_v25 = vpack.c.bf16 %v3781_v12, %v3780_v34  ;;  %v7527_v46 = vunpack.i.h.bf16 %v10846_v0  ;;  %v3561_v0 = vsel %vm278_vm1, %v7952_v2, %v7522_v36 }
 0x3ef   : > { %v3746_v3 = vsel %vm2052_vm11, %v3714_v5, %v7641_v20  ;;  %v3747_v50 = vsel %vm2052_vm11, %v3715_v29, %v7642_v14  ;;  %v7582_v14 = vunpack.i.h.bf16 %v10920_v4  ;;  %v7592_v20 = vunpack.i.h.bf16 %v10926_v48 }
 0x3f0   : > { %v7645_v1 = vpop.permute.xlu0 %7644  ;;  %v7622_v58 = vunpack.i.h.bf16 %v7620_v59  ;;  %v7621_v57 = vunpack.i.l.bf16 %v7620_v59  ;;  %v3592_v4 = vsel %vm1887_vm6, %v3560_v6, %v7526_v17  ;;  %v3593_v5 = vsel %vm1887_vm6, %v3561_v0, %v7527_v46 }
 0x3f1   : > { %v7647_v30 = vunpack.i.h.bf16 %v7645_v1  ;;  %v7646_v33 = vunpack.i.l.bf16 %v7645_v1  ;;  %v3590_v48 = vsel %vm1887_vm6, %v3558_v51, %v7556_v22  ;;  %v3591_v29 = vsel %vm1887_vm6, %v3559_v13, %v7557_v52 }
 0x3f2   : > { %v11007_v28 = vpop.permute.xlu1 %7624  ;;  %v3625_v54 = vsel %vm1920_vm7, %v3593_v5, %v7582_v14  ;;  %v3624_v11 = vsel %vm1920_vm7, %v3592_v4, %v7581_v41 }
 0x3f3   : > { %v3778_v40 = vsel %vm2085_vm12, %v3746_v3, %v7646_v33  ;;  %v3779_v10 = vsel %vm2085_vm12, %v3747_v50, %v7647_v30  ;;  %v3622_v3 = vsel %vm1920_vm7, %v3590_v48, %v7591_v21  ;;  %v3623_v50 = vsel %vm1920_vm7, %v3591_v29, %v7592_v20 }
 0x3f4   : > { %v11005_v42 = vpop.permute.xlu0 %7649  ;;  %v3804_v15 = vpack.c.bf16 %v3779_v10, %v3778_v40  ;;  %v3657_v34 = vsel %vm1953_vm8, %v3625_v54, %v7622_v58  ;;  %v3656_v12 = vsel %vm1953_vm8, %v3624_v11, %v7621_v57  ;;  %v7627_v40 = vunpack.i.h.bf16 %v11007_v28 }
 0x3f5   : > { %v7652_v30 = vunpack.i.h.bf16 %v11005_v42  ;;  %v7651_v33 = vunpack.i.l.bf16 %v11005_v42  ;;  %v7626_v10 = vunpack.i.l.bf16 %v11007_v28 }
 0x3f6   : > { %6533 = vmatprep.mubr.msk.bf16.mxu0 %vm2177_vm13, %v3804_v15  ;;  %v11013_v63 = vpop.permute.xlu1 %7659 }
 0x3f7   : > { %6534 = vmatmul.mubr.msk.bf16.gmra.mxu0 %vm2177_vm13, %v3805_v25  ;;  %v3654_v17 = vsel %vm1953_vm8, %v3622_v3, %v7651_v33  ;;  %v3655_v52 = vsel %vm1953_vm8, %v3623_v50, %v7652_v30  ;;  %v3688_v21 = vsel %vm1986_vm9, %v3656_v12, %v7626_v10 }
 0x3f8   : > { %v11011_v31 = vpop.permute.xlu0 %7654 }
 0x3f9   : > { %v7657_v15 = vunpack.i.h.bf16 %v11011_v31  ;;  %v7656_v25 = vunpack.i.l.bf16 %v11011_v31 }
 0x3fa   : > { %v11017_v19 = vpop.permute.xlu1 %7664 }
 0x3fb   : > { %v7667_v36 = vunpack.i.h.bf16 %v11017_v19  ;;  %v7666_v42 = vunpack.i.l.bf16 %v11017_v19  ;;  %v3689_v19 = vsel %vm1986_vm9, %v3657_v34, %v7627_v40  ;;  %v3686_v58 = vsel %vm1986_vm9, %v3654_v17, %v7656_v25 }
 0x3fc   : > { %v11015_v60 = vpop.permute.xlu0 %7669  ;;  %v7272_v17 = vunpack.i.h.bf16 %v10403_v9 }
 0x3fd   : > { %v3721_v57 = vsel %vm2019_vm10, %v3689_v19, %v7667_v36  ;;  %v3720_v2 = vsel %vm2019_vm10, %v3688_v21, %v7666_v42  ;;  %v7277_v36 = vunpack.i.h.bf16 %v10389_v38  ;;  %v7276_v42 = vunpack.i.l.bf16 %v10389_v38 }
 0x3fe   : > { %v11021_v39 = vpop.permute.xlu1 %7679  ;;  %v7607_v21 = vunpack.i.h.bf16 %v10953_v53  ;;  %v7606_v19 = vunpack.i.l.bf16 %v10953_v53 }
 0x3ff   : > { %v7682_v53 = vunpack.i.h.bf16 %v11021_v39 }
 0x400   : > { %v11019_v7 = vpop.permute.xlu0 %7674 }
 0x401   : > { %v7677_v16 = vunpack.i.h.bf16 %v11019_v7  ;;  %v7676_v24 = vunpack.i.l.bf16 %v11019_v7  ;;  %v3687_v7 = vsel %vm1986_vm9, %v3655_v52, %v7657_v15  ;;  %v7956_v15 = vld [vmem:[%s8256_s19 + $0x10] sm:$0xff]  ;;  %v7271_v52 = vunpack.i.l.bf16 %v10403_v9 }
 0x402   : > { %v11033_v27 = vpop.permute.xlu1 %7684  ;;  %v11101_v25 = vadd.f32 %v7956_v15, %v10148_v62 }
 0x403   : > { %v3718_v0 = vsel %vm2019_vm10, %v3686_v58, %v7676_v24  ;;  %v3719_v49 = vsel %vm2019_vm10, %v3687_v7, %v7677_v16  ;;  %v7957_v16 = vld [vmem:[%s8256_s19] sm:$0xff]  ;;  %v7637_v58 = vunpack.i.h.bf16 %v10969_v45  ;;  %v7636_v7 = vunpack.i.l.bf16 %v10969_v45  ;;  %v7960_v45 = vld [vmem:[#allocation2 + $0x110] sm:$0xff] }
 0x404   : > { %v11031_v44 = vpop.permute.xlu0 %7709  ;;  %v11107_v24 = vadd.f32 %v7957_v16, %v10155_v32  ;;  %v7602_v32 = vunpack.i.h.bf16 %v10937_v55 }
 0x406   : > { %v7690_v59 = vpop.permute.xlu1 %7689 }
 0x407   : > { %v7692_v22 = vunpack.i.h.bf16 %v7690_v59  ;;  %v7691_v28 = vunpack.i.l.bf16 %v7690_v59 }
 0x408   : > { %v11047_v1 = vpop.permute.xlu0 %7714 }
 0x409   : > { %v3753_v13 = vsel %vm2052_vm11, %v3721_v57, %v7692_v22  ;;  %v3752_v56 = vsel %vm2052_vm11, %v3720_v2, %v7691_v28  ;;  %v7287_v22 = vunpack.i.h.bf16 %v10432_v8  ;;  %v7286_v57 = vunpack.i.l.bf16 %v10432_v8 }
 0x40a   : > { %v7695_v46 = vpop.permute.xlu1 %7694  ;;  %v7662_v2 = vunpack.i.h.bf16 %v11013_v63 }
 0x40b   : > { %v7697_v20 = vunpack.i.h.bf16 %v7695_v46  ;;  %v7696_v31 = vunpack.i.l.bf16 %v7695_v46 }
 0x40c   : > { %v7720_v43 = vpop.permute.xlu0 %7719 }
 0x40d   : > { %v7722_v14 = vunpack.i.h.bf16 %v7720_v43  ;;  %v7721_v41 = vunpack.i.l.bf16 %v7720_v43  ;;  %v3784_v29 = vsel %vm2085_vm12, %v3752_v56, %v7696_v31  ;;  %v3785_v59 = vsel %vm2085_vm12, %v3753_v13, %v7697_v20  ;;  %v7958_v43 = vld [vmem:[%s8256_s19 + $0x18] sm:$0xff] }
 0x40e   : > { %v11075_v18 = vpop.permute.xlu1 %7699  ;;  %v3807_v50 = vpack.c.bf16 %v3785_v59, %v3784_v29  ;;  %v11111_v46 = vadd.f32 %v7958_v43, %v10162_v47  ;;  %v7601_v20 = vunpack.i.l.bf16 %v10937_v55  ;;  %v7632_v47 = vunpack.i.h.bf16 %v10951_v26 }
 0x40f   : > { %v3750_v5 = vsel %vm2052_vm11, %v3718_v0, %v7721_v41  ;;  %v3751_v48 = vsel %vm2052_vm11, %v3719_v49, %v7722_v14  ;;  %v7959_v14 = vld [vmem:[%s8256_s19 + $0x8] sm:$0xff]  ;;  %v7631_v31 = vunpack.i.l.bf16 %v10951_v26  ;;  %v7661_v55 = vunpack.i.l.bf16 %v11013_v63 }
 0x410   : > { %v7725_v6 = vpop.permute.xlu0 %7724  ;;  %v11122_v41 = vadd.f32 %v7959_v14, %v10165_v37  ;;  %v7282_v37 = vunpack.i.h.bf16 %v10443_v35  ;;  %v7281_v0 = vunpack.i.l.bf16 %v10443_v35  ;;  %v7672_v26 = vunpack.i.h.bf16 %v11015_v60 }
 0x411   : > { %v7727_v51 = vunpack.i.h.bf16 %v7725_v6  ;;  %v7726_v4 = vunpack.i.l.bf16 %v7725_v6  ;;  %v7671_v49 = vunpack.i.l.bf16 %v11015_v60  ;;  %v3565_v56 = vsel %vm278_vm1, %v7960_v45, %v7602_v32  ;;  %v7964_v32 = vld [vmem:[#allocation2 + $0x140] sm:$0xff] }
 0x412   : > { %v11087_v33 = vpop.permute.xlu1 %7704  ;;  %v3597_v59 = vsel %vm1887_vm6, %v3565_v56, %v7607_v21  ;;  %v7702_v15 = vunpack.i.h.bf16 %v11075_v18  ;;  %v7701_v16 = vunpack.i.l.bf16 %v11075_v18 }
 0x413   : > { %v3782_v54 = vsel %vm2085_vm12, %v3750_v5, %v7726_v4  ;;  %v3783_v11 = vsel %vm2085_vm12, %v3751_v48, %v7727_v51  ;;  %v7961_v51 = vld [vmem:[#allocation2 + $0x108] sm:$0xff]  ;;  %v7962_v5 = vld [vmem:[#allocation2 + $0xf8] sm:$0xff]  ;;  %v7963_v48 = vld [vmem:[#allocation2 + $0xf0] sm:$0xff] }
 0x414   : > { %v11085_v30 = vpop.permute.xlu0 %7729  ;;  %v3806_v3 = vpack.c.bf16 %v3783_v11, %v3782_v54  ;;  %v3564_v4 = vsel %vm278_vm1, %v7961_v51, %v7601_v20  ;;  %v3563_v63 = vsel %vm278_vm1, %v7962_v5, %v7632_v47  ;;  %v3562_v29 = vsel %vm278_vm1, %v7963_v48, %v7631_v31 }
 0x415   : > { %v3596_v60 = vsel %vm1887_vm6, %v3564_v4, %v7606_v19  ;;  %v3594_v54 = vsel %vm1887_vm6, %v3562_v29, %v7636_v7  ;;  %v3595_v11 = vsel %vm1887_vm6, %v3563_v63, %v7637_v58  ;;  %v11159_v20 = vsel %vm278_vm1, %v7964_v32, %v7682_v53 }
 0x416   : > { %6537 = vmatprep.mubr.msk.bf16.mxu0 %vm2177_vm13, %v3806_v3  ;;  %v11093_v12 = vpop.permute.xlu1 %7739  ;;  %v3629_v3 = vsel %vm1920_vm7, %v3597_v59, %v7662_v2  ;;  %v3626_v43 = vsel %vm1920_vm7, %v3594_v54, %v7671_v49  ;;  %v3627_v14 = vsel %vm1920_vm7, %v3595_v11, %v7672_v26  ;;  %v7681_v47 = vunpack.i.l.bf16 %v11021_v39 }
 0x417   : > { %6538 = vmatmul.mubr.msk.bf16.gmra.mxu0 %vm2177_vm13, %v3807_v50  ;;  %v3628_v50 = vsel %vm1920_vm7, %v3596_v60, %v7661_v55  ;;  %v7712_v19 = vunpack.i.h.bf16 %v11031_v44  ;;  %v7711_v58 = vunpack.i.l.bf16 %v11031_v44  ;;  %v7732_v7 = vunpack.i.h.bf16 %v11085_v30 }
 0x418   : > { %v11091_v34 = vpop.permute.xlu0 %7734  ;;  %v7731_v18 = vunpack.i.l.bf16 %v11085_v30  ;;  %v7687_v2 = vunpack.i.h.bf16 %v11033_v27  ;;  %v7686_v55 = vunpack.i.l.bf16 %v11033_v27  ;;  %v7707_v26 = vunpack.i.h.bf16 %v11087_v33 }
 0x419   : > { %v7706_v49 = vunpack.i.l.bf16 %v11087_v33  ;;  %v3661_v39 = vsel %vm1953_vm8, %v3629_v3, %v7702_v15  ;;  %v3660_v53 = vsel %vm1953_vm8, %v3628_v50, %v7701_v16  ;;  %v7737_v45 = vunpack.i.h.bf16 %v11091_v34 }
 0x41a   : > { %v11097_v10 = vpop.permute.xlu1 %7744  ;;  %v7736_v44 = vunpack.i.l.bf16 %v11091_v34  ;;  %v3658_v63 = vsel %vm1953_vm8, %v3626_v43, %v7731_v18  ;;  %v3659_v33 = vsel %vm1953_vm8, %v3627_v14, %v7732_v7  ;;  %v3693_v59 = vsel %vm1986_vm9, %v3661_v39, %v7707_v26 }
 0x41b   : > { %v7747_v56 = vunpack.i.h.bf16 %v11097_v10  ;;  %v7746_v30 = vunpack.i.l.bf16 %v11097_v10  ;;  %v3692_v60 = vsel %vm1986_vm9, %v3660_v53, %v7706_v49  ;;  %v3691_v3 = vsel %vm1986_vm9, %v3659_v33, %v7737_v45 }
 0x41c   : > { %v11095_v40 = vpop.permute.xlu0 %7749  ;;  %v3690_v10 = vsel %vm1986_vm9, %v3658_v63, %v7736_v44  ;;  %v7741_v63 = vunpack.i.l.bf16 %v11093_v12 }
 0x41d   : > { %v3725_v15 = vsel %vm2019_vm10, %v3693_v59, %v7747_v56  ;;  %v3724_v16 = vsel %vm2019_vm10, %v3692_v60, %v7746_v30  ;;  %v7717_v56 = vunpack.i.h.bf16 %v11047_v1  ;;  %v7716_v30 = vunpack.i.l.bf16 %v11047_v1  ;;  %v7965_v60 = vld [vmem:[#allocation2 + $0x138] sm:$0xff] }
 0x41e   : > { %v11118_v28 = vpop.permute.xlu1 %7759  ;;  %v7751_v33 = vunpack.i.l.bf16 %v11095_v40  ;;  %v3568_v59 = vsel %vm278_vm1, %v7965_v60, %v7681_v47  ;;  %v7752_v1 = vunpack.i.h.bf16 %v11095_v40  ;;  %v3601_v40 = vsel %vm1887_vm6, %v11159_v20, %v7687_v2 }
 0x41f   : > { %v7761_v47 = vunpack.i.l.bf16 %v11118_v28 }
 0x420   : > { %v11116_v62 = vpop.permute.xlu0 %7754 }
 0x421   : > { %v7757_v51 = vunpack.i.h.bf16 %v11116_v62  ;;  %v7756_v4 = vunpack.i.l.bf16 %v11116_v62 }
 0x422   : > { %v11142_v13 = vpop.permute.xlu1 %7764 }
 0x423   : > { %v3722_v43 = vsel %vm2019_vm10, %v3690_v10, %v7756_v4  ;;  %v3723_v14 = vsel %vm2019_vm10, %v3691_v3, %v7757_v51  ;;  %v11213_v10 = vld [vmem:[%s13118_s6] ss:$0 sm:$0xff] }
 0x424   : > { %v11140_v6 = vpop.permute.xlu0 %7789 }
 0x425   : > { %v7791_v2 = vunpack.i.l.bf16 %v11140_v6 }
 0x426   : > { %v7770_v21 = vpop.permute.xlu1 %7769 }
 0x427   : > { %v7772_v48 = vunpack.i.h.bf16 %v7770_v21  ;;  %v7771_v29 = vunpack.i.l.bf16 %v7770_v21 }
 0x428   : > { %v11162_v31 = vpop.permute.xlu0 %7794 }
 0x429   : > { %v3757_v21 = vsel %vm2052_vm11, %v3725_v15, %v7772_v48  ;;  %v3756_v7 = vsel %vm2052_vm11, %v3724_v16, %v7771_v29 }
 0x42a   : > { %v7775_v11 = vpop.permute.xlu1 %7774 }
 0x42b   : > { %v7777_v50 = vunpack.i.h.bf16 %v7775_v11  ;;  %v7776_v62 = vunpack.i.l.bf16 %v7775_v11 }
 0x42c   : > { %v7800_v5 = vpop.permute.xlu0 %7799 }
 0x42d   : > { %v7802_v34 = vunpack.i.h.bf16 %v7800_v5  ;;  %v7801_v54 = vunpack.i.l.bf16 %v7800_v5  ;;  %v3788_v53 = vsel %vm2085_vm12, %v3756_v7, %v7776_v62  ;;  %v3789_v45 = vsel %vm2085_vm12, %v3757_v21, %v7777_v50 }
 0x42e   : > { %v11196_v44 = vpop.permute.xlu1 %7779  ;;  %v7742_v5 = vunpack.i.h.bf16 %v11093_v12  ;;  %v3809_v11 = vpack.c.bf16 %v3789_v45, %v3788_v53  ;;  %v7967_v12 = vld [vmem:[#allocation2 + $0x120] sm:$0xff]  ;;  %v3600_v50 = vsel %vm1887_vm6, %v3568_v59, %v7686_v55  ;;  %v7762_v62 = vunpack.i.h.bf16 %v11118_v28 }
 0x42f   : > { %v3754_v49 = vsel %vm2052_vm11, %v3722_v43, %v7801_v54  ;;  %v3755_v39 = vsel %vm2052_vm11, %v3723_v14, %v7802_v34  ;;  %v7966_v34 = vld [vmem:[#allocation2 + $0x128] sm:$0xff]  ;;  %v3566_v3 = vsel %vm278_vm1, %v7967_v12, %v7711_v58  ;;  %v7792_v58 = vunpack.i.h.bf16 %v11140_v6 }
 0x430   : > { %v7805_v32 = vpop.permute.xlu0 %7804  ;;  %v3567_v54 = vsel %vm278_vm1, %v7966_v34, %v7712_v19  ;;  %v3598_v19 = vsel %vm1887_vm6, %v3566_v3, %v7716_v30  ;;  %v3633_v28 = vsel %vm1920_vm7, %v3601_v40, %v7742_v5  ;;  %v3632_v43 = vsel %vm1920_vm7, %v3600_v50, %v7741_v63 }
 0x431   : > { %v7807_v18 = vunpack.i.h.bf16 %v7805_v32  ;;  %v7806_v26 = vunpack.i.l.bf16 %v7805_v32  ;;  %v3599_v16 = vsel %vm1887_vm6, %v3567_v54, %v7717_v56  ;;  %v3630_v14 = vsel %vm1920_vm7, %v3598_v19, %v7751_v33  ;;  %v7971_v54 = vld [vmem:[#allocation2 + $0x150] sm:$0xff] }
 0x432   : > { %v11219_v15 = vpop.permute.xlu1 %7784  ;;  %v3631_v20 = vsel %vm1920_vm7, %v3599_v16, %v7752_v1  ;;  %v7767_v21 = vunpack.i.h.bf16 %v11142_v13  ;;  %v7766_v7 = vunpack.i.l.bf16 %v11142_v13  ;;  %v7797_v6 = vunpack.i.h.bf16 %v11162_v31 }
 0x433   : > { %v3786_v51 = vsel %vm2085_vm12, %v3754_v49, %v7806_v26  ;;  %v3787_v4 = vsel %vm2085_vm12, %v3755_v39, %v7807_v18  ;;  %v7968_v26 = vld [vmem:[#allocation2 + $0x170] sm:$0xff]  ;;  %v7969_v39 = vld [vmem:[#allocation2 + $0x168] sm:$0xff]  ;;  %v7796_v5 = vunpack.i.l.bf16 %v11162_v31  ;;  %v7782_v13 = vunpack.i.h.bf16 %v11196_v44 }
 0x434   : > { %v3808_v48 = vpack.c.bf16 %v3787_v4, %v3786_v51  ;;  %v11205_v29 = vpop.permute.xlu0 %7809  ;;  %v3573_v49 = vsel %vm278_vm1, %v7968_v26, %v7762_v62  ;;  %v3572_v53 = vsel %vm278_vm1, %v7969_v39, %v7761_v47  ;;  %v7970_v51 = vld [vmem:[#allocation2 + $0x158] sm:$0xff]  ;;  %v7781_v33 = vunpack.i.l.bf16 %v11196_v44 }
 0x435   : > { %v3571_v4 = vsel %vm278_vm1, %v7970_v51, %v7792_v58  ;;  %v3570_v1 = vsel %vm278_vm1, %v7971_v54, %v7791_v2  ;;  %v3605_v31 = vsel %vm1887_vm6, %v3573_v49, %v7767_v21  ;;  %v7812_v12 = vunpack.i.h.bf16 %v11205_v29 }
 0x436   : > { %6541 = vmatprep.mubr.msk.bf16.mxu0 %vm2177_vm13, %v3808_v48  ;;  %v6523_v55 = vpop.f32.mrf.mxu0  ;;  %v11242_v45 = vpop.permute.xlu1 %7819  ;;  %v7811_v50 = vunpack.i.l.bf16 %v11205_v29  ;;  %v3602_v40 = vsel %vm1887_vm6, %v3570_v1, %v7796_v5  ;;  %v3603_v19 = vsel %vm1887_vm6, %v3571_v4, %v7797_v6  ;;  %v7787_v16 = vunpack.i.h.bf16 %v11219_v15 }
 0x437   : > { %6542 = vmatmul.mubr.msk.bf16.gmra.mxu0 %vm2177_vm13, %v3809_v11  ;;  %v3951_v27 = vadd.f32 %v6523_v55, %v11213_v10  ;;  %v3604_v11 = vsel %vm1887_vm6, %v3572_v53, %v7766_v7  ;;  %v7786_v58 = vunpack.i.l.bf16 %v11219_v15  ;;  %v3665_v55 = vsel %vm1953_vm8, %v3633_v28, %v7782_v13 }
 0x438   : > { %v11233_v32 = vpop.permute.xlu0 %7814  ;;  %v3942_v18 = vpop.f32.mrf.mxu0  ;;  %v3664_v29 = vsel %vm1953_vm8, %v3632_v43, %v7781_v33  ;;  %v7821_v15 = vunpack.i.l.bf16 %v11242_v45  ;;  %v3662_v28 = vsel %vm1953_vm8, %v3630_v14, %v7811_v50  ;;  %v3663_v43 = vsel %vm1953_vm8, %v3631_v20, %v7812_v12 }
 0x439   : > { %v4071_v56 = vmax.f32 %v3951_v27, 0.0  ;;  %v3943_v30 = vadd.f32 %v11213_v10, %v3942_v18  ;;  %v7817_v21 = vunpack.i.h.bf16 %v11233_v32  ;;  %v7816_v7 = vunpack.i.l.bf16 %v11233_v32 }
 0x43a   : > { %v6524_v63 = vpop.f32.mrf.mxu0  ;;  %v7825_v44 = vpop.permute.xlu1 %7824  ;;  %v7822_v18 = vunpack.i.h.bf16 %v11242_v45  ;;  %v3696_v39 = vsel %vm1986_vm9, %v3664_v29, %v7786_v58  ;;  %v3697_v53 = vsel %vm1986_vm9, %v3665_v55, %v7787_v16  ;;  %v3636_v5 = vsel %vm1920_vm7, %v3604_v11, %v7821_v15 }
 0x43b   : > { %v4199_v60 = vadd.f32 %v11101_v25, %v4071_v56  ;;  %v4069_v59 = vmax.f32 %v3943_v30, 0.0  ;;  %v3954_v34 = vadd.f32 %v6524_v63, %v11213_v10  ;;  %v7827_v32 = vunpack.i.h.bf16 %v7825_v44 }
 0x43c   : > { %v11250_v48 = vpop.permute.xlu0 %7829  ;;  %v3945_v3 = vpop.f32.mrf.mxu0  ;;  %v7826_v56 = vunpack.i.l.bf16 %v7825_v44  ;;  %v3694_v20 = vsel %vm1986_vm9, %v3662_v28, %v7816_v7  ;;  %v3695_v6 = vsel %vm1986_vm9, %v3663_v43, %v7817_v21 }
 0x43d   : > { %4232 = vst.msk [vmem:[#allocation3 + $0x31] sm:$0xff] %vm278_vm1, %v4199_v60  ;;  %v4197_v25 = vadd.f32 %v11107_v24, %v4069_v59  ;;  %v4072_v62 = vmax.f32 %v3954_v34, 0.0  ;;  %v3946_v47 = vadd.f32 %v11213_v10, %v3945_v3  ;;  %v7831_v26 = vunpack.i.l.bf16 %v11250_v48 }
 0x43e   : > { %v7840_v49 = vpop.permute.xlu1 %7839  ;;  %v7832_v63 = vunpack.i.h.bf16 %v11250_v48  ;;  %v3729_v54 = vsel %vm2019_vm10, %v3697_v53, %v7827_v32  ;;  %v3728_v1 = vsel %vm2019_vm10, %v3696_v39, %v7826_v56 }
 0x43f   : > { %4230 = vst.msk [vmem:[#allocation3 + $0x19] sm:$0xff] %vm278_vm1, %v4197_v25  ;;  %4262 = vst.msk [vmem:[#allocation3 + $0x1] sm:$0xff] %vm278_vm1, %v4197_v25  ;;  %v4200_v24 = vadd.f32 %v11111_v46, %v4072_v62  ;;  %v4070_v2 = vmax.f32 %v3946_v47, 0.0  ;;  %v7842_v45 = vunpack.i.h.bf16 %v7840_v49  ;;  %v7841_v4 = vunpack.i.l.bf16 %v7840_v49 }
 0x440   : > { %v7835_v27 = vpop.permute.xlu0 %7834  ;;  %v3634_v33 = vsel %vm1920_vm7, %v3602_v40, %v7831_v26 }
 0x441   : > { %4233 = vst.msk [vmem:[#allocation3 + $0x39] sm:$0xff] %vm278_vm1, %v4200_v24  ;;  %v4198_v46 = vadd.f32 %v11122_v41, %v4070_v2  ;;  %v7837_v30 = vunpack.i.h.bf16 %v7835_v27  ;;  %v7836_v51 = vunpack.i.l.bf16 %v7835_v27  ;;  %v3637_v41 = vsel %vm1920_vm7, %v3605_v31, %v7822_v18 }
 0x442   : > { %v7845_v34 = vpop.permute.xlu1 %7844  ;;  %v3761_v48 = vsel %vm2052_vm11, %v3729_v54, %v7842_v45  ;;  %v3760_v25 = vsel %vm2052_vm11, %v3728_v1, %v7841_v4  ;;  %v3635_v27 = vsel %vm1920_vm7, %v3603_v19, %v7832_v63 }
 0x443   : > { %4231 = vst.msk [vmem:[#allocation3 + $0x21] sm:$0xff] %vm278_vm1, %v4198_v46  ;;  %4263 = vst.msk [vmem:[#allocation3 + $0x9] sm:$0xff] %vm278_vm1, %v4198_v46  ;;  %v7847_v50 = vunpack.i.h.bf16 %v7845_v34  ;;  %v7846_v31 = vunpack.i.l.bf16 %v7845_v34  ;;  %v3726_v11 = vsel %vm2019_vm10, %v3694_v20, %v7836_v51  ;;  %v3727_v44 = vsel %vm2019_vm10, %v3695_v6, %v7837_v30 }
 0x444   : > { %v7860_v14 = vpop.permute.xlu0 %7859  ;;  %v4269_v13 = vld [vmem:[#allocation3 + $0x31] sm:$0x1] }
 0x445   : > { %4288 = vst.msk [vmem:[#allocation3 + $0x30] sm:$0x1] %vm4285_vm14, %v4269_v13  ;;  %v7862_v60 = vunpack.i.h.bf16 %v7860_v14  ;;  %v7861_v59 = vunpack.i.l.bf16 %v7860_v14  ;;  %v3792_v40 = vsel %vm2085_vm12, %v3760_v25, %v7846_v31  ;;  %v3793_v16 = vsel %vm2085_vm12, %v3761_v48, %v7847_v50 }
 0x446   : > { %v4267_v12 = vld [vmem:[#allocation3 + $0x1] sm:$0x1]  ;;  %v4268_v3 = vld [vmem:[#allocation3 + $0x19] sm:$0x1]  ;;  %v3811_v21 = vpack.c.bf16 %v3793_v16, %v3792_v40  ;;  %v7850_v7 = vpop.permute.xlu1 %7849 }
 0x447   : > { %4286 = vst.msk [vmem:[#allocation3] sm:$0x1] %vm4285_vm14, %v4267_v12  ;;  %4287 = vst.msk [vmem:[#allocation3 + $0x18] sm:$0x1] %vm4285_vm14, %v4268_v3  ;;  %v3758_v24 = vsel %vm2052_vm11, %v3726_v11, %v7861_v59  ;;  %v3759_v2 = vsel %vm2052_vm11, %v3727_v44, %v7862_v60  ;;  %v7852_v26 = vunpack.i.h.bf16 %v7850_v7  ;;  %v7851_v49 = vunpack.i.l.bf16 %v7850_v7 }
 0x448   : > { %v7865_v62 = vpop.permute.xlu0 %7864  ;;  %v4306_v47 = vld [vmem:[#allocation3 + $0x40] sm:$0x1]  ;;  %v4347_v29 = vld [vmem:[#allocation3 + $0x38] sm:$0xff] }
 0x449   : > { %v7867_v58 = vunpack.i.h.bf16 %v7865_v62  ;;  %v7866_v55 = vunpack.i.l.bf16 %v7865_v62  ;;  %4324 = vst.msk [vmem:[#allocation3 + $0x41] sm:$0x1] %vm4285_vm14, %v4306_v47  ;;  %v11309_v56 = vmul.f32 0.75, %v4347_v29  ;;  %v11311_v30 = vmul.f32 0.25, %v4347_v29 }
 0x44a   : > { %v4304_v18 = vld [vmem:[#allocation3 + $0x10] sm:$0x1]  ;;  %v4305_v15 = vld [vmem:[#allocation3 + $0x28] sm:$0x1]  ;;  %v4344_v53 = vld [vmem:[#allocation3 + $0x20] sm:$0xff]  ;;  %v3669_v51 = vsel %vm1953_vm8, %v3637_v41, %v7852_v26  ;;  %v3668_v45 = vsel %vm1953_vm8, %v3636_v5, %v7851_v49  ;;  %v7855_v6 = vpop.permute.xlu1 %7854 }
 0x44b   : > { %v3790_v28 = vsel %vm2085_vm12, %v3758_v24, %v7866_v55  ;;  %v3791_v43 = vsel %vm2085_vm12, %v3759_v2, %v7867_v58  ;;  %v4341_v46 = vld [vmem:[#allocation3 + $0x8] sm:$0xff]  ;;  %4322 = vst.msk [vmem:[#allocation3 + $0x11] sm:$0x1] %vm4285_vm14, %v4304_v18  ;;  %4323 = vst.msk [vmem:[#allocation3 + $0x29] sm:$0x1] %vm4285_vm14, %v4305_v15  ;;  %v11316_v13 = vmul.f32 0.75, %v4344_v53  ;;  %v7857_v41 = vunpack.i.h.bf16 %v7855_v6 }
 0x44c   : > { %v3810_v19 = vpack.c.bf16 %v3791_v43, %v3790_v28  ;;  %v7870_v39 = vpop.permute.xlu0 %7869  ;;  %v4395_v32 = vmul.f32 0.25, %v4341_v46  ;;  %v4346_v20 = vld [vmem:[#allocation3 + $0x30] sm:$0xff]  ;;  %v4398_v63 = vmul.f32 0.25, %v4344_v53  ;;  %v7856_v1 = vunpack.i.l.bf16 %v7855_v6 }
 0x44d   : > { %v7872_v4 = vunpack.i.h.bf16 %v7870_v39  ;;  %v7871_v14 = vunpack.i.l.bf16 %v7870_v39  ;;  %v11318_v60 = vmul.f32 0.75, %v4346_v20  ;;  %v11320_v59 = vmul.f32 0.25, %v4346_v20 }
 0x44e   : > { %6545 = vmatprep.mubr.msk.bf16.mxu0 %vm2177_vm13, %v3810_v19  ;;  %v4340_v5 = vld [vmem:[#allocation3] sm:$0xff]  ;;  %v4343_v12 = vld [vmem:[#allocation3 + $0x18] sm:$0xff]  ;;  %v4491_v50 = vadd.f32 %v11316_v13, %v4395_v32  ;;  %v4494_v44 = vadd.f32 %v11309_v56, %v4398_v63  ;;  %v3700_v48 = vsel %vm1986_vm9, %v3668_v45, %v7856_v1  ;;  %v7885_v16 = vpop.permute.xlu1 %7884 }
 0x44f   : > { %v3666_v34 = vsel %vm1953_vm8, %v3634_v33, %v7871_v14  ;;  %v3667_v54 = vsel %vm1953_vm8, %v3635_v27, %v7872_v4  ;;  %6546 = vmatmul.mubr.msk.bf16.gmra.mxu0 %vm2177_vm13, %v3811_v21  ;;  %v4394_v31 = vmul.f32 0.25, %v4340_v5  ;;  %v11326_v11 = vmul.f32 0.75, %v4343_v12 }
 0x450   : > { %v7875_v3 = vpop.permute.xlu0 %7874  ;;  %v3701_v33 = vsel %vm1986_vm9, %v3669_v51, %v7857_v41  ;;  %v3732_v47 = vsel %vm2019_vm10, %v3700_v48, %v7276_v42  ;;  %v11337_v58 = vmul.f32 0.25, %v4491_v50  ;;  %v11339_v55 = vmul.f32 0.75, %v4491_v50  ;;  %v4348_v49 = vld [vmem:[#allocation3 + $0x40] sm:$0x3] }
 0x451   : > { %v7877_v25 = vunpack.i.h.bf16 %v7875_v3  ;;  %v7876_v62 = vunpack.i.l.bf16 %v7875_v3  ;;  %v3733_v40 = vsel %vm2019_vm10, %v3701_v33, %v7277_v36  ;;  %v7887_v24 = vunpack.i.h.bf16 %v7885_v16 }
 0x452   : > { %v7886_v2 = vunpack.i.l.bf16 %v7885_v16  ;;  %v4342_v21 = vld [vmem:[#allocation3 + $0x10] sm:$0x3]  ;;  %v3764_v36 = vsel %vm2052_vm11, %v3732_v47, %v7286_v57  ;;  %v3765_v7 = vsel %vm2052_vm11, %v3733_v40, %v7287_v22  ;;  %v4345_v15 = vld [vmem:[#allocation3 + $0x28] sm:$0x3]  ;;  %v4929_v39 = vrot.slane %v11337_v58, 1 }
 0x453   : > { %v3698_v29 = vsel %vm1986_vm9, %v3666_v34, %v7876_v62  ;;  %v3699_v27 = vsel %vm1986_vm9, %v3667_v54, %v7877_v25  ;;  %v3797_v43 = vsel %vm2085_vm12, %v3765_v7, %v7887_v24  ;;  %v4396_v57 = vmul.f32 0.25, %v4342_v21 }
 0x454   : > { %v3730_v42 = vsel %vm2019_vm10, %v3698_v29, %v7271_v52  ;;  %v3731_v38 = vsel %vm2019_vm10, %v3699_v27, %v7272_v17  ;;  %v7880_v18 = vpop.permute.xlu0 %7879  ;;  %v3796_v28 = vsel %vm2085_vm12, %v3764_v36, %v7886_v2  ;;  %v4444_v19 = vmul.f32 0.75, %v4345_v15 }
 0x455   : > { %v7882_v26 = vunpack.i.h.bf16 %v7880_v18  ;;  %v7881_v52 = vunpack.i.l.bf16 %v7880_v18  ;;  %v3813_v9 = vpack.c.bf16 %v3797_v43, %v3796_v28  ;;  %v3762_v17 = vsel %vm2052_vm11, %v3730_v42, %v7281_v0 }
 0x456   : > { %v3763_v8 = vsel %vm2052_vm11, %v3731_v38, %v7282_v37  ;;  %v4490_v32 = vadd.f32 %v11326_v11, %v4394_v31  ;;  %v4399_v51 = vmul.f32 0.25, %v4345_v15  ;;  %v11367_v45 = vmul.f32 0.75, %v4348_v49 }
 0x457   : > { %v3794_v22 = vsel %vm2085_vm12, %v3762_v17, %v7881_v52  ;;  %v3795_v46 = vsel %vm2085_vm12, %v3763_v8, %v7882_v26  ;;  %v4492_v4 = vadd.f32 %v4444_v19, %v4396_v57  ;;  %v11369_v0 = vmul.f32 0.25, %v4494_v44 }
 0x458   : > { %v3812_v53 = vpack.c.bf16 %v3795_v46, %v3794_v22  ;;  %v11371_v35 = vmul.f32 0.75, %v4494_v44  ;;  %v4397_v37 = vmul.f32 0.25, %v4343_v12  ;;  %v11374_v14 = vmul.f32 0.25, %v4490_v32 }
 0x459   : > { %v4624_v20 = vmul.f32 0.75, %v4490_v32  ;;  %v4495_v6 = vadd.f32 %v11367_v45, %v4399_v51  ;;  %v11377_v63 = vmul.f32 0.25, %v4348_v49  ;;  %v4626_v34 = vmul.f32 0.75, %v4492_v4 }
 0x45a   : > { %6549 = vmatprep.mubr.msk.bf16.mxu0 %vm2177_vm13, %v3812_v53  ;;  %v4864_v54 = vmul.f32 0.25, %v4492_v4  ;;  %v4934_v41 = vrot.slane %v11369_v0, 1  ;;  %v4493_v1 = vadd.f32 %v11318_v60, %v4397_v37  ;;  %v4928_v5 = vrot.slane %v11374_v14, 1 }
 0x45b   : > { %6550 = vmatmul.mubr.msk.bf16.gmra.mxu0 %vm2177_vm13, %v3813_v9  ;;  %v4629_v12 = vmul.f32 0.75, %v4495_v6  ;;  %v4865_v3 = vmul.f32 0.25, %v4495_v6  ;;  %v4545_v50 = vadd.f32 %v11316_v13, %v11311_v30  ;;  %v4546_v33 = vadd.f32 %v4444_v19, %v11377_v63 }
 0x45c   : > { %v4931_v31 = vrot.slane %v4864_v54, 1  ;;  %v11385_v44 = vmul.f32 0.25, %v4493_v1  ;;  %v4627_v48 = vmul.f32 0.75, %v4493_v1  ;;  %v4930_v25 = vsel %vm776_vm3, %v4928_v5, %v4929_v39 }
 0x45d   : > { %v4936_v62 = vrot.slane %v4865_v3, 1  ;;  %v5105_v47 = vmul.f32 0.25, %v4545_v50  ;;  %v11389_v40 = vmul.f32 0.75, %v4545_v50  ;;  %v5056_v27 = vadd.f32 %v4930_v25, %v4624_v20 }
 0x45e   : > { %v4932_v16 = vsel %vm776_vm3, %v4929_v39, %v4931_v31  ;;  %v5058_v29 = vadd.f32 %v4931_v31, %v4626_v34  ;;  %v4933_v24 = vrot.slane %v11385_v44, 1  ;;  %v5138_v42 = vmul.f32 0.75, %v4546_v33 }
 0x45f   : > { %v5057_v13 = vadd.f32 %v4932_v16, %v11339_v55  ;;  %v4937_v2 = vsel %vm776_vm3, %v4934_v41, %v4936_v62  ;;  %v5061_v21 = vadd.f32 %v4936_v62, %v4629_v12  ;;  %v5664_v36 = vrot.slane %v5056_v27, 1 }
 0x460   : > { %v5667_v38 = vrot.slane %v5058_v29, 1  ;;  %v5060_v7 = vadd.f32 %v4937_v2, %v11371_v35  ;;  %v4935_v18 = vsel %vm776_vm3, %v4933_v24, %v4934_v41  ;;  %v5376_v26 = vmul.f32 0.25, %v4546_v33 }
 0x461   : > { %v5665_v15 = vrot.slane %v5057_v13, 1  ;;  %v5672_v28 = vrot.slane %v5061_v21, 1  ;;  %v5059_v43 = vadd.f32 %v4935_v18, %v4627_v48  ;;  %v5441_v49 = vrot.slane %v5105_v47, 1 }
 0x462   : > { %v5670_v52 = vrot.slane %v5060_v7, 1  ;;  %v4544_v9 = vadd.f32 %v11326_v11, %v11320_v59  ;;  %v4721_v17 = vrot.slane %v11339_v55, 1  ;;  %v5443_v46 = vrot.slane %v5376_v26, 1 }
 0x463   : > { %v5668_v8 = vsel %vm776_vm3, %v5665_v15, %v5667_v38  ;;  %v5666_v57 = vsel %vm776_vm3, %v5664_v36, %v5665_v15  ;;  %v5669_v22 = vrot.slane %v5059_v43, 1  ;;  %v4723_v32 = vrot.slane %v4626_v34, 1  ;;  %v7972_v36 = vld [vmem:[%s8256_s19 + $0x30] sm:$0xff]  ;;  %v7973_v43 = vld [vmem:[%s8256_s19 + $0x20] sm:$0xff] }
 0x464   : > { %5746 = vrot.lane.b32.xlu1 %v5668_v8, %s8066_s21  ;;  %5744 = vrot.lane.b32.xlu0 %v5666_v57, %s8066_s21  ;;  %v5673_v19 = vsel %vm776_vm3, %v5670_v52, %v5672_v28  ;;  %v5104_v39 = vmul.f32 0.25, %v4544_v9  ;;  %v5136_v53 = vmul.f32 0.75, %v4544_v9  ;;  %v5444_v11 = vsel %vm776_vm3, %v5441_v49, %v5443_v46  ;;  %v7974_v8 = vld [vmem:[%s8256_s19 + $0x38] sm:$0xff]  ;;  %v13569_v57 = vld [vmem:[#allocation74_spill] sm:$0xff] }
 0x465   : > { %v5671_v51 = vsel %vm776_vm3, %v5669_v22, %v5670_v52  ;;  %v5570_v55 = vadd.f32 %v5443_v46, %v5138_v42  ;;  %v4720_v4 = vrot.slane %v4624_v20, 1  ;;  %v5569_v37 = vadd.f32 %v5444_v11, %v11389_v40 }
 0x466   : > { %v5440_v6 = vrot.slane %v5104_v39, 1  ;;  %v4724_v54 = vsel %vm776_vm3, %v4721_v17, %v4723_v32  ;;  %v4726_v41 = vrot.slane %v11371_v35, 1  ;;  %v4728_v34 = vrot.slane %v4629_v12, 1 }
 0x467   : > { %v5955_v1 = vrot.slane %v5570_v55, 1  ;;  %v11411_v5 = vadd.f32 %v4724_v54, %v11337_v58  ;;  %v4722_v3 = vsel %vm776_vm3, %v4720_v4, %v4721_v17  ;;  %v5953_v50 = vrot.slane %v5569_v37, 1  ;;  %v7976_v55 = vld [vmem:[%s8256_s19 + $0x50] sm:$0xff]  ;;  %v13571_v4 = vld [vmem:[#allocation70_spill] sm:$0xff] }
 0x468   : > { %5750 = vrot.lane.b32.xlu1 %v5673_v19, %s8066_s21  ;;  %5748 = vrot.lane.b32.xlu0 %v5671_v51, %s8066_s21  ;;  %v5442_v20 = vsel %vm776_vm3, %v5440_v6, %v5441_v49  ;;  %v11418_v31 = vadd.f32 %v4722_v3, %v11374_v14  ;;  %v4725_v33 = vrot.slane %v4627_v48, 1  ;;  %v4729_v35 = vsel %vm776_vm3, %v4726_v41, %v4728_v34  ;;  %v7977_v6 = vld [vmem:[%s8256_s19 + $0x40] sm:$0xff]  ;;  %v13572_v54 = vld [vmem:[#allocation46_spill] sm:$0xff] }
 0x469   : > { %v5568_v25 = vadd.f32 %v5442_v20, %v5136_v53  ;;  %v5233_v58 = vrot.slane %v11389_v40, 1  ;;  %v5235_v62 = vrot.slane %v5138_v42, 1  ;;  %v11423_v16 = vadd.f32 %v4729_v35, %v11369_v0  ;;  %v13573_v3 = vld [vmem:[#allocation45_spill] sm:$0xff]  ;;  %v13574_v20 = vld [vmem:[#allocation72_spill] sm:$0xff] }
 0x46a   : > { %v4727_v12 = vsel %vm776_vm3, %v4725_v33, %v4726_v41  ;;  %v5232_v29 = vrot.slane %v5136_v53, 1  ;;  %v5956_v27 = vsel %vm776_vm3, %v5953_v50, %v5955_v1  ;;  %v4171_v7 = vadd.f32 %v7972_v36, %v10194_v23  ;;  %v7978_v1 = vld [vmem:[%s8256_s19 + $0x58] sm:$0xff]  ;;  %v13579_v36 = vld [vmem:[#allocation33_spill] sm:$0xff] }
 0x46b   : > { %v5952_v24 = vrot.slane %v5568_v25, 1  ;;  %v11428_v14 = vadd.f32 %v4727_v12, %v11385_v44  ;;  %v5236_v48 = vsel %vm776_vm3, %v5233_v58, %v5235_v62  ;;  %v4169_v26 = vadd.f32 %v7973_v43, %v10201_v61  ;;  %v7975_v61 = vld [vmem:[%s8256_s19 + $0x28] sm:$0xff]  ;;  %v7980_v25 = vld [vmem:[%s8256_s19 + $0x70] sm:$0xff]  ;;  %v13575_v35 = vld [vmem:[#allocation32_spill] sm:$0xff] }
 0x46c   : > { %6034 = vrot.lane.b32.xlu1 %v5956_v27, %s8066_s21  ;;  %v11432_v40 = vadd.f32 %v5236_v48, %v5105_v47  ;;  %v5234_v0 = vsel %vm776_vm3, %v5232_v29, %v5233_v58  ;;  %v4172_v23 = vadd.f32 %v7974_v8, %v13569_v57  ;;  %v11458_v37 = vadd.f32 %v7976_v55, %v13571_v4  ;;  %v7981_v62 = vld [vmem:[%s8256_s19 + $0x60] sm:$0xff]  ;;  %v13576_v12 = vld [vmem:[#allocation31_spill] sm:$0xff]  ;;  %v7982_v48 = vld [vmem:[%s8256_s19 + $0x78] sm:$0xff] }
 0x46d   : > { %v5954_v13 = vsel %vm776_vm3, %v5952_v24, %v5953_v50  ;;  %v11436_v2 = vadd.f32 %v5234_v0, %v5104_v39  ;;  %v13570_v39 = vld [vmem:[#allocation69_spill] sm:$0xff]  ;;  %v11462_v41 = vadd.f32 %v7977_v6, %v13572_v54  ;;  %v11467_v34 = vadd.f32 %v7978_v1, %v13573_v3  ;;  %v7979_v50 = vld [vmem:[%s8256_s19 + $0x48] sm:$0xff]  ;;  %v7992_v4 = vld [vmem:[%s8256_s19 + $0xd0] sm:$0xff] }
 0x46e   : > { %6032 = vrot.lane.b32.xlu0 %v5954_v13, %s8066_s21  ;;  %v4170_v53 = vadd.f32 %v7975_v61, %v13570_v39  ;;  %v11471_v33 = vadd.f32 %v7979_v50, %v13574_v20  ;;  %v11475_v58 = vadd.f32 %v7980_v25, %v13575_v35  ;;  %v11479_v29 = vadd.f32 %v7981_v62, %v13576_v12  ;;  %v13577_v0 = vld [vmem:[#allocation73_spill] sm:$0xff]  ;;  %v7990_v39 = vld [vmem:[%s8256_s19 + $0xb8] sm:$0xff]  ;;  %v13592_v6 = vld [vmem:[#allocation51_spill] sm:$0xff] }
 0x46f   : > { %13568 = vst [vmem:[#allocation75_spill] sm:$0xff] %v11436_v2  ;;  %v11483_v13 = vadd.f32 %v7982_v48, %v13577_v0  ;;  %v13581_v43 = vld [vmem:[#allocation49_spill] sm:$0xff]  ;;  %v11524_v54 = vadd.f32 %v7992_v4, %v13592_v6  ;;  %v13594_v3 = vld [vmem:[#allocation50_spill] sm:$0xff]  ;;  %v7994_v62 = vld [vmem:[%s8256_s19 + $0xd8] sm:$0xff] }
 0x470   : > { %v13584_v8 = vld [vmem:[#allocation57_spill] sm:$0xff] }
 0x471   : > { %13593 = vst [vmem:[#allocation55_spill] sm:$0xff] %v11524_v54  ;;  %v7993_v1 = vld [vmem:[%s8256_s19 + $0xc0] sm:$0xff] }
 0x472   : > { %v11528_v50 = vadd.f32 %v7993_v1, %v13594_v3  ;;  %v13596_v12 = vld [vmem:[#allocation65_spill] sm:$0xff] }
 0x474   : > { %13595 = vst [vmem:[#allocation43_spill] sm:$0xff] %v11528_v50 }
 0x47b   : > { %v6527_v21 = vpop.f32.mrf.mxu0 }
 0x47c   : > { %v3967_v42 = vadd.f32 %v6527_v21, %v11213_v10  ;;  %v7983_v21 = vld [vmem:[%s8256_s19 + $0x68] sm:$0xff] }
 0x47d   : > { %v3958_v44 = vpop.f32.mrf.mxu0 }
 0x47e   : > { %v4075_v38 = vmax.f32 %v3967_v42, 0.0  ;;  %v3959_v47 = vadd.f32 %v11213_v10, %v3958_v44  ;;  %v13578_v42 = vld [vmem:[#allocation34_spill] sm:$0xff] }
 0x47f   : > { %v6528_v18 = vpop.f32.mrf.mxu0  ;;  %v11487_v44 = vadd.f32 %v7983_v21, %v13578_v42  ;;  %v7995_v21 = vld [vmem:[%s8256_s19 + $0xc8] sm:$0xff] }
 0x480   : > { %v4203_v15 = vadd.f32 %v4171_v7, %v4075_v38  ;;  %v4073_v28 = vmax.f32 %v3959_v47, 0.0  ;;  %v3970_v52 = vadd.f32 %v6528_v18, %v11213_v10  ;;  %v7984_v38 = vld [vmem:[%s8256_s19 + $0x90] sm:$0xff]  ;;  %v7985_v47 = vld [vmem:[%s8256_s19 + $0x80] sm:$0xff]  ;;  %v13598_v42 = vld [vmem:[#allocation54_spill] sm:$0xff] }
 0x481   : > { %v3961_v49 = vpop.f32.mrf.mxu0  ;;  %v11491_v7 = vadd.f32 %v7984_v38, %v13579_v36  ;;  %v13580_v18 = vld [vmem:[#allocation71_spill] sm:$0xff]  ;;  %v11541_v38 = vadd.f32 %v7995_v21, %v13598_v42 }
 0x482   : > { %4236 = vst.msk [vmem:[#allocation3 + $0x61] sm:$0xff] %vm278_vm1, %v4203_v15  ;;  %v4201_v9 = vadd.f32 %v4169_v26, %v4073_v28  ;;  %v4076_v17 = vmax.f32 %v3970_v52, 0.0  ;;  %v3962_v22 = vadd.f32 %v11213_v10, %v3961_v49  ;;  %v11495_v15 = vadd.f32 %v7985_v47, %v13580_v18  ;;  %v7986_v28 = vld [vmem:[%s8256_s19 + $0x98] sm:$0xff]  ;;  %v7987_v52 = vld [vmem:[%s8256_s19 + $0x88] sm:$0xff]  ;;  %v7996_v36 = vld [vmem:[%s8256_s19 + $0xf0] sm:$0xff] }
 0x483   : > { %v11500_v26 = vadd.f32 %v7986_v28, %v13581_v43  ;;  %v13582_v49 = vld [vmem:[#allocation48_spill] sm:$0xff]  ;;  %13599 = vst [vmem:[#allocation63_spill] sm:$0xff] %v11541_v38  ;;  %v7997_v28 = vld [vmem:[%s8256_s19 + $0xe0] sm:$0xff]  ;;  %v13602_v43 = vld [vmem:[#allocation66_spill] sm:$0xff] }
 0x484   : > { %4234 = vst.msk [vmem:[#allocation3 + $0x49] sm:$0xff] %vm278_vm1, %v4201_v9  ;;  %v4204_v46 = vadd.f32 %v4172_v23, %v4076_v17  ;;  %v4074_v19 = vmax.f32 %v3962_v22, 0.0  ;;  %v11504_v9 = vadd.f32 %v7987_v52, %v13582_v49  ;;  %v7988_v17 = vld [vmem:[%s8256_s19 + $0xb0] sm:$0xff]  ;;  %v7989_v23 = vld [vmem:[%s8256_s19 + $0xa0] sm:$0xff]  ;;  %v13586_v22 = vld [vmem:[#allocation56_spill] sm:$0xff]  ;;  %v11549_v52 = vadd.f32 %v7997_v28, %v13602_v43 }
 0x485   : > { %v11508_v57 = vadd.f32 %v7988_v17, %v13584_v8  ;;  %v13600_v47 = vld [vmem:[#allocation44_spill] sm:$0xff] }
 0x486   : > { %4237 = vst.msk [vmem:[#allocation3 + $0x69] sm:$0xff] %vm278_vm1, %v4204_v46  ;;  %v4202_v32 = vadd.f32 %v4170_v53, %v4074_v19  ;;  %13583 = vst [vmem:[#allocation64_spill] sm:$0xff] %v11504_v9  ;;  %v11512_v46 = vadd.f32 %v7989_v23, %v13586_v22  ;;  %v13588_v53 = vld [vmem:[#allocation59_spill] sm:$0xff]  ;;  %v11545_v18 = vadd.f32 %v7996_v36, %v13600_v47  ;;  %v7998_v8 = vld [vmem:[%s8256_s19 + $0xf8] sm:$0xff] }
 0x487   : > { %13585 = vst [vmem:[#allocation68_spill] sm:$0xff] %v11508_v57  ;;  %13603 = vst [vmem:[#allocation67_spill] sm:$0xff] %v11549_v52  ;;  %v13604_v23 = vld [vmem:[#allocation61_spill] sm:$0xff] }
 0x488   : > { %4235 = vst.msk [vmem:[#allocation3 + $0x51] sm:$0xff] %vm278_vm1, %v4202_v32  ;;  %13587 = vst [vmem:[#allocation60_spill] sm:$0xff] %v11512_v46  ;;  %v11516_v32 = vadd.f32 %v7990_v39, %v13588_v53  ;;  %v11556_v22 = vadd.f32 %v7998_v8, %v13604_v23 }
 0x489   : > { %v4271_v51 = vld [vmem:[#allocation3 + $0x61] sm:$0x1]  ;;  %13601 = vst [vmem:[#allocation78_spill] sm:$0xff] %v11545_v18 }
 0x48a   : > { %4290 = vst.msk [vmem:[#allocation3 + $0x60] sm:$0x1] %vm4285_vm14, %v4271_v51  ;;  %13589 = vst [vmem:[#allocation53_spill] sm:$0xff] %v11516_v32  ;;  %v7991_v51 = vld [vmem:[%s8256_s19 + $0xa8] sm:$0xff] }
 0x48b   : > { %v4270_v11 = vld [vmem:[#allocation3 + $0x49] sm:$0x1]  ;;  %13605 = vst [vmem:[#allocation47_spill] sm:$0xff] %v11556_v22 }
 0x48c   : > { %4289 = vst.msk [vmem:[#allocation3 + $0x48] sm:$0x1] %vm4285_vm14, %v4270_v11  ;;  %v13590_v11 = vld [vmem:[#allocation58_spill] sm:$0xff] }
 0x48d   : > { %v4308_v27 = vld [vmem:[#allocation3 + $0x70] sm:$0x1]  ;;  %v4353_v24 = vld [vmem:[#allocation3 + $0x68] sm:$0xff]  ;;  %v11520_v55 = vadd.f32 %v7991_v51, %v13590_v11  ;;  %v13606_v11 = vld [vmem:[#allocation76_spill] sm:$0xff] }
 0x48e   : > { %4326 = vst.msk [vmem:[#allocation3 + $0x71] sm:$0x1] %vm4285_vm14, %v4308_v27  ;;  %v11531_v35 = vmul.f32 0.75, %v4353_v24  ;;  %v11535_v27 = vadd.f32 %v7994_v62, %v13596_v12  ;;  %v11537_v0 = vmul.f32 0.25, %v4353_v24  ;;  %v7999_v51 = vld [vmem:[%s8256_s19 + $0xe8] sm:$0xff]  ;;  %s8073_s19 = smov [#allocation4]  }
 0x48f   : > { %v4307_v19 = vld [vmem:[#allocation3 + $0x58] sm:$0x1]  ;;  %v4350_v61 = vld [vmem:[#allocation3 + $0x50] sm:$0xff]  ;;  %13591 = vst [vmem:[#allocation62_spill] sm:$0xff] %v11520_v55  ;;  %v11567_v4 = vadd.f32 %v7999_v51, %v13606_v11  ;;  %s8006_s23 = sshll.u32 %s8073_s19, 4  ;;  %s8007_s23 = int_to_ptr.vmem [resolvable:$false] %s8006_s23 }
 0x490   : > { %4325 = vst.msk [vmem:[#allocation3 + $0x59] sm:$0x1] %vm4285_vm14, %v4307_v19  ;;  %v4449_v20 = vmul.f32 0.75, %v4350_v61  ;;  %v4404_v25 = vmul.f32 0.25, %v4350_v61  ;;  %13597 = vst [vmem:[#allocation77_spill] sm:$0xff] %v11535_v27  ;;  %s8008_s13 = scalar_lea.vmem %s8007_s23, 16384  ;;  %p8009_p0 = scmp.lt.s32.totalorder %s13059_s8, %s8007_s23 }
 0x491   : > { %v4352_v48 = vld [vmem:[#allocation3 + $0x60] sm:$0xff]  ;;  %13607 = vst [vmem:[#allocation52_spill] sm:$0xff] %v11567_v4  ;;  %p8010_p1 = scmp.lt.s32.totalorder %s8008_s13, %s8002_s22 }
 0x492   : > { %v4497_v49 = vadd.f32 %v4449_v20, %v11311_v30  ;;  %v4500_v17 = vadd.f32 %v11531_v35, %v4404_v25  ;;  %v4548_v24 = vadd.f32 %v11309_v56, %v4404_v25  ;;  %v11558_v61 = vmul.f32 0.75, %v4352_v48 }
 0x493   : > { %v4349_v19 = vld [vmem:[#allocation3 + $0x48] sm:$0xff]  ;;  %v11561_v39 = vadd.f32 %v4449_v20, %v11537_v0  ;;  %v11563_v53 = vmul.f32 0.25, %v4352_v48  ;;  %p8011_p2 = por %p8010_p1, %p8009_p0 }
 0x494   : > { %v11569_v30 = vmul.f32 0.25, %v4497_v49  ;;  %v11571_v6 = vmul.f32 0.75, %v4497_v49  ;;  %v11573_v56 = vmul.f32 0.75, %v4349_v19  ;;  %v11575_v1 = vmul.f32 0.25, %v4500_v17 }
 0x495   : > { %v4354_v3 = vld [vmem:[#allocation3 + $0x70] sm:$0x3]  ;;  %v11577_v25 = vmul.f32 0.75, %v4500_v17  ;;  %v4403_v62 = vmul.f32 0.25, %v4349_v19  ;;  %v11579_v20 = vmul.f32 0.25, %v4548_v24  ;;  %v11581_v12 = vmul.f32 0.75, %v4548_v24  ;;  %p8012_p3 = pnand %p8011_p2, %p8005_p13 }
 0x496   : > { %v4939_v48 = vrot.slane %v11569_v30, 1  ;;  %v4496_v21 = vadd.f32 %v11573_v56, %v11320_v59  ;;  %v11586_v42 = vmul.f32 0.75, %v4354_v3  ;;  %v4944_v36 = vrot.slane %v11575_v1, 1 }
 0x497   : > { %v4351_v47 = vld [vmem:[#allocation3 + $0x58] sm:$0x3]  ;;  %v4499_v28 = vadd.f32 %v11558_v61, %v4403_v62  ;;  %v4547_v49 = vadd.f32 %v11318_v60, %v4403_v62  ;;  %v11592_v17 = vmul.f32 0.25, %v4354_v3  ;;  %v11614_v52 = vmul.f32 0.25, %v11561_v39 }
 0x498   : > { %v4450_v24 = vmul.f32 0.75, %v4351_v47  ;;  %v11594_v8 = vmul.f32 0.25, %v4496_v21  ;;  %v11596_v23 = vmul.f32 0.75, %v4496_v21  ;;  %v4405_v19 = vmul.f32 0.25, %v4351_v47 }
 0x499   : > { %v11598_v59 = vmul.f32 0.25, %v4499_v28  ;;  %v11600_v51 = vmul.f32 0.75, %v4499_v28  ;;  %v11602_v11 = vmul.f32 0.25, %v4547_v49  ;;  %v11604_v4 = vmul.f32 0.75, %v4547_v49 }
 0x49a   : > { %v4498_v43 = vadd.f32 %v4450_v24, %v11377_v63  ;;  %v4938_v60 = vrot.slane %v11594_v8, 1  ;;  %v4501_v3 = vadd.f32 %v11586_v42, %v4405_v19  ;;  %v4549_v62 = vadd.f32 %v11367_v45, %v4405_v19 }
 0x49b   : > { %13608 = vst [vmem:[#allocation7_spill] sm:$0xff] %v11602_v11  ;;  %v6531_v22 = vpop.f32.mrf.mxu0  ;;  %v4943_v21 = vrot.slane %v11598_v59, 1  ;;  %v5445_v47 = vrot.slane %v11602_v11, 1  ;;  %v4552_v28 = vadd.f32 %v4450_v24, %v11592_v17 }
 0x49c   : > { %v3983_v49 = vadd.f32 %v6531_v22, %v11213_v10  ;;  %v11617_v18 = vmul.f32 0.75, %v4498_v43  ;;  %v4866_v63 = vmul.f32 0.25, %v4498_v43  ;;  %v4940_v38 = vsel %vm776_vm3, %v4938_v60, %v4939_v48 }
 0x49d   : > { %v3974_v27 = vpop.f32.mrf.mxu0  ;;  %v5062_v45 = vadd.f32 %v4940_v38, %v11596_v23  ;;  %v11621_v19 = vmul.f32 0.75, %v4501_v3  ;;  %v4867_v50 = vmul.f32 0.25, %v4501_v3  ;;  %v4945_v54 = vsel %vm776_vm3, %v4943_v21, %v4944_v36 }
 0x49e   : > { %v4079_v55 = vmax.f32 %v3983_v49, 0.0  ;;  %v3975_v24 = vadd.f32 %v11213_v10, %v3974_v27  ;;  %v4941_v32 = vrot.slane %v4866_v63, 1  ;;  %v5065_v46 = vadd.f32 %v4945_v54, %v11600_v51 }
 0x49f   : > { %v6532_v22 = vpop.f32.mrf.mxu0  ;;  %v5674_v57 = vrot.slane %v5062_v45, 1  ;;  %v4946_v11 = vrot.slane %v4867_v50, 1  ;;  %v11626_v43 = vmul.f32 0.75, %v4549_v62  ;;  %v5377_v60 = vmul.f32 0.25, %v4549_v62 }
 0x4a0   : > { %v4207_v2 = vadd.f32 %v11458_v37, %v4079_v55  ;;  %v4077_v38 = vmax.f32 %v3975_v24, 0.0  ;;  %v3986_v9 = vadd.f32 %v6532_v22, %v11213_v10  ;;  %v4942_v3 = vsel %vm776_vm3, %v4939_v48, %v4941_v32 }
 0x4a1   : > { %v3977_v21 = vpop.f32.mrf.mxu0  ;;  %v5063_v49 = vadd.f32 %v4942_v3, %v11571_v6  ;;  %v5064_v27 = vadd.f32 %v4941_v32, %v11617_v18  ;;  %v4947_v54 = vsel %vm776_vm3, %v4944_v36, %v4946_v11  ;;  %v5067_v63 = vadd.f32 %v4946_v11, %v11621_v19 }
 0x4a2   : > { %4240 = vst.msk [vmem:[#allocation3 + $0x91] sm:$0xff] %vm278_vm1, %v4207_v2  ;;  %v4205_v50 = vadd.f32 %v11462_v41, %v4077_v38  ;;  %v4080_v62 = vmax.f32 %v3986_v9, 0.0  ;;  %v3978_v37 = vadd.f32 %v11213_v10, %v3977_v21  ;;  %v5066_v55 = vadd.f32 %v4947_v54, %v11577_v25 }
 0x4a3   : > { %v5675_v45 = vrot.slane %v5063_v49, 1  ;;  %v5677_v48 = vrot.slane %v5064_v27, 1  ;;  %v5682_v24 = vrot.slane %v5067_v63, 1  ;;  %v5679_v22 = vrot.slane %v5065_v46, 1 }
 0x4a4   : > { %4238 = vst.msk [vmem:[#allocation3 + $0x79] sm:$0xff] %vm278_vm1, %v4205_v50  ;;  %v4208_v32 = vadd.f32 %v11467_v34, %v4080_v62  ;;  %v4078_v36 = vmax.f32 %v3978_v37, 0.0  ;;  %v5680_v3 = vrot.slane %v5066_v55, 1  ;;  %v5448_v11 = vrot.slane %v5377_v60, 1 }
 0x4a5   : > { %v5678_v2 = vsel %vm776_vm3, %v5675_v45, %v5677_v48  ;;  %v5676_v41 = vsel %vm776_vm3, %v5674_v57, %v5675_v45  ;;  %v13609_v9 = vrot.slane %v11579_v20, 1  ;;  %v11647_v38 = vmul.f32 0.75, %v11561_v39 }
 0x4a6   : > { %4241 = vst.msk [vmem:[#allocation3 + $0x99] sm:$0xff] %vm278_vm1, %v4208_v32  ;;  %v4206_v46 = vadd.f32 %v11471_v33, %v4078_v36  ;;  %5754 = vrot.lane.b32.xlu1 %v5678_v2, %s8066_s21  ;;  %5752 = vrot.lane.b32.xlu0 %v5676_v41, %s8066_s21  ;;  %v5683_v34 = vsel %vm776_vm3, %v5680_v3, %v5682_v24  ;;  %v11655_v57 = vmul.f32 0.75, %v4552_v28  ;;  %v5378_v27 = vmul.f32 0.25, %v4552_v28 }
 0x4a7   : > { %v5447_v10 = vsel %vm776_vm3, %v5445_v47, %v13609_v9  ;;  %v5681_v60 = vsel %vm776_vm3, %v5679_v22, %v5680_v3  ;;  %v13610_v21 = vmov %v13609_v9  ;;  %v5573_v39 = vadd.f32 %v5448_v11, %v11626_v43 }
 0x4a8   : > { %v5449_v47 = vsel %vm776_vm3, %v13610_v21, %v5448_v11  ;;  %v5571_v49 = vadd.f32 %v5447_v10, %v11604_v4  ;;  %4239 = vst.msk [vmem:[#allocation3 + $0x81] sm:$0xff] %vm278_vm1, %v4206_v46  ;;  %v5451_v54 = vrot.slane %v11614_v52, 1  ;;  %v4550_v63 = vadd.f32 %v11573_v56, %v11563_v53 }
 0x4a9   : > { %v5572_v33 = vadd.f32 %v5449_v47, %v11581_v12  ;;  %v4731_v50 = vrot.slane %v11571_v6, 1  ;;  %v4273_v62 = vld [vmem:[#allocation3 + $0x91] sm:$0x1]  ;;  %v5960_v37 = vrot.slane %v5573_v39, 1  ;;  %v5453_v45 = vrot.slane %v5378_v27, 1 }
 0x4aa   : > { %v5957_v55 = vrot.slane %v5571_v49, 1  ;;  %v4733_v48 = vrot.slane %v11617_v18, 1  ;;  %4292 = vst.msk [vmem:[#allocation3 + $0x90] sm:$0x1] %vm4285_vm14, %v4273_v62  ;;  %5758 = vrot.lane.b32.xlu1 %v5683_v34, %s8066_s21  ;;  %5756 = vrot.lane.b32.xlu0 %v5681_v60, %s8066_s21  ;;  %v11672_v24 = vmul.f32 0.25, %v4550_v63  ;;  %v11674_v22 = vmul.f32 0.75, %v4550_v63 }
 0x4ab   : > { %v5958_v28 = vrot.slane %v5572_v33, 1  ;;  %v4730_v56 = vrot.slane %v11596_v23, 1  ;;  %v4272_v6 = vld [vmem:[#allocation3 + $0x79] sm:$0x1]  ;;  %v5454_v32 = vsel %vm776_vm3, %v5451_v54, %v5453_v45  ;;  %v5576_v36 = vadd.f32 %v5453_v45, %v11655_v57 }
 0x4ac   : > { %v4734_v18 = vsel %vm776_vm3, %v4731_v50, %v4733_v48  ;;  %v4736_v3 = vrot.slane %v11577_v25, 1  ;;  %4291 = vst.msk [vmem:[#allocation3 + $0x78] sm:$0x1] %vm4285_vm14, %v4272_v6  ;;  %v5575_v41 = vadd.f32 %v5454_v32, %v11647_v38  ;;  %v5450_v9 = vrot.slane %v11672_v24, 1 }
 0x4ad   : > { %v5961_v11 = vsel %vm776_vm3, %v5958_v28, %v5960_v37  ;;  %v5959_v2 = vsel %vm776_vm3, %v5957_v55, %v5958_v28  ;;  %v4310_v23 = vld [vmem:[#allocation3 + $0xa0] sm:$0x1]  ;;  %v5965_v10 = vrot.slane %v5576_v36, 1  ;;  %v4359_v46 = vld [vmem:[#allocation3 + $0x98] sm:$0xff]  ;;  %v11687_v34 = vadd.f32 %v4734_v18, %v11569_v30 }
 0x4ae   : > { %v4732_v60 = vsel %vm776_vm3, %v4730_v56, %v4731_v50  ;;  %v4738_v25 = vrot.slane %v11621_v19, 1  ;;  %4328 = vst.msk [vmem:[#allocation3 + $0xa1] sm:$0x1] %vm4285_vm14, %v4310_v23  ;;  %6038 = vrot.lane.b32.xlu1 %v5961_v11, %s8066_s21  ;;  %6036 = vrot.lane.b32.xlu0 %v5959_v2, %s8066_s21  ;;  %v5963_v21 = vrot.slane %v5575_v41, 1  ;;  %v5452_v47 = vsel %vm776_vm3, %v5450_v9, %v5451_v54 }
 0x4af   : > { %13611 = vst [vmem:[#allocation9_spill] sm:$0xff] %v11687_v34  ;;  %v11695_v39 = vmul.f32 0.75, %v4359_v46  ;;  %v11697_v49 = vmul.f32 0.25, %v4359_v46  ;;  %v4309_v27 = vld [vmem:[#allocation3 + $0x88] sm:$0x1]  ;;  %v5574_v30 = vadd.f32 %v5452_v47, %v11674_v22  ;;  %v4356_v33 = vld [vmem:[#allocation3 + $0x80] sm:$0xff]  ;;  %v11701_v63 = vadd.f32 %v4732_v60, %v11594_v8 }
 0x4b0   : > { %v4739_v19 = vsel %vm776_vm3, %v4736_v3, %v4738_v25  ;;  %v4735_v50 = vrot.slane %v11600_v51, 1  ;;  %4327 = vst.msk [vmem:[#allocation3 + $0x89] sm:$0x1] %vm4285_vm14, %v4309_v27  ;;  %v5966_v62 = vsel %vm776_vm3, %v5963_v21, %v5965_v10  ;;  %v4455_v54 = vmul.f32 0.75, %v4356_v33 }
 0x4b1   : > { %13612 = vst [vmem:[#allocation11_spill] sm:$0xff] %v11701_v63  ;;  %v4410_v37 = vmul.f32 0.25, %v4356_v33  ;;  %v11708_v55 = vadd.f32 %v4739_v19, %v11575_v1  ;;  %v5962_v45 = vrot.slane %v5574_v30, 1  ;;  %v4358_v48 = vld [vmem:[#allocation3 + $0x90] sm:$0xff] }
 0x4b2   : > { %v4737_v28 = vsel %vm776_vm3, %v4735_v50, %v4736_v3  ;;  %6042 = vrot.lane.b32.xlu1 %v5966_v62, %s8066_s21  ;;  %v4503_v51 = vadd.f32 %v4455_v54, %v11537_v0  ;;  %v11716_v32 = vmul.f32 0.75, %v4358_v48  ;;  %v11721_v11 = vadd.f32 %v4455_v54, %v11697_v49 }
 0x4b3   : > { %13613 = vst [vmem:[#allocation13_spill] sm:$0xff] %v11708_v55  ;;  %v4506_v6 = vadd.f32 %v11695_v39, %v4410_v37  ;;  %v4554_v36 = vadd.f32 %v11531_v35, %v4410_v37  ;;  %v5964_v1 = vsel %vm776_vm3, %v5962_v45, %v5963_v21  ;;  %v4355_v18 = vld [vmem:[#allocation3 + $0x78] sm:$0xff]  ;;  %v11723_v3 = vmul.f32 0.25, %v4358_v48  ;;  %v11757_v37 = vld [vmem:[%s13118_s6] ss:$0 sm:$0xff] }
 0x4b4   : > { %v11726_v2 = vadd.f32 %v4737_v28, %v11598_v59  ;;  %6040 = vrot.lane.b32.xlu0 %v5964_v1, %s8066_s21  ;;  %v11729_v0 = vmul.f32 0.25, %v4503_v51  ;;  %v11731_v41 = vmul.f32 0.75, %v4503_v51  ;;  %v11733_v9 = vmul.f32 0.75, %v4355_v18 }
 0x4b5   : > { %v11735_v35 = vmul.f32 0.25, %v4506_v6  ;;  %v4360_v23 = vld [vmem:[#allocation3 + $0xa0] sm:$0x3]  ;;  %v11737_v10 = vmul.f32 0.75, %v4506_v6  ;;  %v4409_v46 = vmul.f32 0.25, %v4355_v18  ;;  %v11739_v60 = vmul.f32 0.25, %v4554_v36 }
 0x4b6   : > { %13614 = vst [vmem:[#allocation15_spill] sm:$0xff] %v11726_v2  ;;  %v11741_v25 = vmul.f32 0.75, %v4554_v36  ;;  %v4949_v59 = vrot.slane %v11729_v0, 1  ;;  %v4502_v21 = vadd.f32 %v11733_v9, %v11563_v53  ;;  %v11746_v47 = vmul.f32 0.75, %v4360_v23 }
 0x4b7   : > { %13615 = vst [vmem:[#allocation17_spill] sm:$0xff] %v11735_v35  ;;  %13616 = vst [vmem:[#allocation19_spill] sm:$0xff] %v11739_v60  ;;  %v4954_v27 = vrot.slane %v11735_v35, 1  ;;  %v6535_v30 = vpop.f32.mrf.mxu0  ;;  %v4357_v33 = vld [vmem:[#allocation3 + $0x88] sm:$0x3]  ;;  %v4505_v19 = vadd.f32 %v11716_v32, %v4409_v46  ;;  %v4553_v62 = vadd.f32 %v11558_v61, %v4409_v46  ;;  %v11752_v54 = vmul.f32 0.25, %v4360_v23 }
 0x4b8   : > { %v3999_v53 = vadd.f32 %v11757_v37, %v6535_v30  ;;  %v4456_v45 = vmul.f32 0.75, %v4357_v33  ;;  %v11760_v48 = vmul.f32 0.25, %v4502_v21  ;;  %v11762_v28 = vmul.f32 0.75, %v4502_v21 }
 0x4b9   : > { %v3990_v51 = vpop.f32.mrf.mxu0  ;;  %v4411_v6 = vmul.f32 0.25, %v4357_v33  ;;  %v11764_v36 = vmul.f32 0.25, %v4505_v19  ;;  %v11766_v1 = vmul.f32 0.75, %v4505_v19  ;;  %v11768_v61 = vmul.f32 0.25, %v4553_v62 }
 0x4ba   : > { %v4083_v18 = vmax.f32 %v3999_v53, 0.0  ;;  %v3991_v23 = vadd.f32 %v11757_v37, %v3990_v51  ;;  %v4504_v46 = vadd.f32 %v4456_v45, %v11592_v17  ;;  %v4948_v30 = vrot.slane %v11760_v48, 1 }
 0x4bb   : > { %13617 = vst [vmem:[#allocation20_spill] sm:$0xff] %v11764_v36  ;;  %13618 = vst [vmem:[#allocation23_spill] sm:$0xff] %v11768_v61  ;;  %v6536_v8 = vpop.f32.mrf.mxu0  ;;  %v4507_v56 = vadd.f32 %v11746_v47, %v4411_v6  ;;  %v4953_v21 = vrot.slane %v11764_v36, 1  ;;  %v4555_v33 = vadd.f32 %v11586_v42, %v4411_v6  ;;  %v11776_v50 = vmul.f32 0.75, %v4553_v62 }
 0x4bc   : > { %v4211_v19 = vadd.f32 %v11475_v58, %v4083_v18  ;;  %v4081_v2 = vmax.f32 %v3991_v23, 0.0  ;;  %v4002_v53 = vadd.f32 %v11757_v37, %v6536_v8  ;;  %v11780_v55 = vmul.f32 0.75, %v4504_v46 }
 0x4bd   : > { %13619 = vst [vmem:[#allocation24_spill] sm:$0xff] %v11776_v50  ;;  %v3993_v51 = vpop.f32.mrf.mxu0  ;;  %v4868_v17 = vmul.f32 0.25, %v4504_v46  ;;  %v4950_v63 = vsel %vm776_vm3, %v4948_v30, %v4949_v59  ;;  %v11783_v34 = vmul.f32 0.75, %v4507_v56  ;;  %v4869_v35 = vmul.f32 0.25, %v4507_v56 }
 0x4be   : > { %4244 = vst.msk [vmem:[#allocation3 + $0xc1] sm:$0xff] %vm278_vm1, %v4211_v19  ;;  %v4209_v42 = vadd.f32 %v11479_v29, %v4081_v2  ;;  %v4084_v62 = vmax.f32 %v4002_v53, 0.0  ;;  %v3994_v6 = vadd.f32 %v11757_v37, %v3993_v51  ;;  %v5068_v58 = vadd.f32 %v4950_v63, %v11762_v28 }
 0x4bf   : > { %v4951_v18 = vrot.slane %v4868_v17, 1  ;;  %v4956_v8 = vrot.slane %v4869_v35, 1  ;;  %v4955_v23 = vsel %vm776_vm3, %v4953_v21, %v4954_v27  ;;  %v11790_v36 = vmul.f32 0.75, %v4555_v33 }
 0x4c0   : > { %4242 = vst.msk [vmem:[#allocation3 + $0xa9] sm:$0xff] %vm278_vm1, %v4209_v42  ;;  %v4212_v46 = vadd.f32 %v11483_v13, %v4084_v62  ;;  %v4082_v56 = vmax.f32 %v3994_v6, 0.0  ;;  %v5684_v30 = vrot.slane %v5068_v58, 1  ;;  %v5071_v19 = vadd.f32 %v4955_v23, %v11766_v1 }
 0x4c1   : > { %13620 = vst [vmem:[#allocation25_spill] sm:$0xff] %v11790_v36  ;;  %v4952_v29 = vsel %vm776_vm3, %v4949_v59, %v4951_v18  ;;  %v5070_v2 = vadd.f32 %v4951_v18, %v11780_v55  ;;  %v4957_v63 = vsel %vm776_vm3, %v4954_v27, %v4956_v8  ;;  %v5073_v35 = vadd.f32 %v4956_v8, %v11783_v34 }
 0x4c2   : > { %4245 = vst.msk [vmem:[#allocation3 + $0xc9] sm:$0xff] %vm278_vm1, %v4212_v46  ;;  %v4210_v21 = vadd.f32 %v11487_v44, %v4082_v56  ;;  %v5069_v53 = vadd.f32 %v4952_v29, %v11731_v41  ;;  %v5072_v13 = vadd.f32 %v4957_v63, %v11737_v10  ;;  %v5689_v51 = vrot.slane %v5071_v19, 1 }
 0x4c3   : > { %v5687_v17 = vrot.slane %v5070_v2, 1  ;;  %v5692_v42 = vrot.slane %v5073_v35, 1  ;;  %v5379_v62 = vmul.f32 0.25, %v4555_v33  ;;  %v5455_v59 = vrot.slane %v11768_v61, 1 }
 0x4c4   : > { %4243 = vst.msk [vmem:[#allocation3 + $0xb1] sm:$0xff] %vm278_vm1, %v4210_v21  ;;  %v5685_v6 = vrot.slane %v5069_v53, 1  ;;  %v5690_v27 = vrot.slane %v5072_v13, 1  ;;  %v4558_v58 = vadd.f32 %v4456_v45, %v11752_v54  ;;  %v11807_v18 = vmul.f32 0.25, %v11721_v11 }
 0x4c5   : > { %v4275_v44 = vld [vmem:[#allocation3 + $0xc1] sm:$0x1]  ;;  %v5458_v8 = vrot.slane %v5379_v62, 1  ;;  %v13622_v23 = vrot.slane %v11739_v60, 1  ;;  %v11813_v56 = vmul.f32 0.75, %v11721_v11  ;;  %v4556_v33 = vadd.f32 %v11733_v9, %v11723_v3 }
 0x4c6   : > { %13621 = vst [vmem:[#allocation27_spill] sm:$0xff] %v11807_v18  ;;  %4294 = vst.msk [vmem:[#allocation3 + $0xc0] sm:$0x1] %vm4285_vm14, %v4275_v44  ;;  %v5688_v19 = vsel %vm776_vm3, %v5685_v6, %v5687_v17  ;;  %v5686_v45 = vsel %vm776_vm3, %v5684_v30, %v5685_v6  ;;  %v5693_v29 = vsel %vm776_vm3, %v5690_v27, %v5692_v42  ;;  %v11829_v53 = vmul.f32 0.75, %v4558_v58 }
 0x4c7   : > { %v5457_v46 = vsel %vm776_vm3, %v5455_v59, %v13622_v23  ;;  %13623 = vst [vmem:[#allocation35_spill] sm:$0xff] %v11813_v56  ;;  %v5691_v2 = vsel %vm776_vm3, %v5689_v51, %v5690_v27  ;;  %v4274_v63 = vld [vmem:[#allocation3 + $0xa9] sm:$0x1]  ;;  %5762 = vrot.lane.b32.xlu1 %v5688_v19, %s8066_s21  ;;  %5760 = vrot.lane.b32.xlu0 %v5686_v45, %s8066_s21  ;;  %v13624_v11 = vmov %v13622_v23  ;;  %v5380_v13 = vmul.f32 0.25, %v4558_v58 }
 0x4c8   : > { %v5459_v35 = vsel %vm776_vm3, %v13624_v11, %v5458_v8  ;;  %v5579_v9 = vadd.f32 %v5458_v8, %v11790_v36  ;;  %v5577_v21 = vadd.f32 %v5457_v46, %v11776_v50  ;;  %13625 = vst [vmem:[#allocation36_spill] sm:$0xff] %v11829_v53  ;;  %4293 = vst.msk [vmem:[#allocation3 + $0xa8] sm:$0x1] %vm4285_vm14, %v4274_v63  ;;  %v5461_v51 = vrot.slane %v11807_v18, 1 }
 0x4c9   : > { %v5578_v30 = vadd.f32 %v5459_v35, %v11741_v25  ;;  %v11834_v17 = vmul.f32 0.25, %v4556_v33  ;;  %v4312_v42 = vld [vmem:[#allocation3 + $0xd0] sm:$0x1]  ;;  %v11836_v6 = vmul.f32 0.75, %v4556_v33  ;;  %v4365_v27 = vld [vmem:[#allocation3 + $0xc8] sm:$0xff]  ;;  %v13628_v44 = vrot.slane %v11626_v43, 1 }
 0x4ca   : > { %v5970_v62 = vrot.slane %v5579_v9, 1  ;;  %v5967_v59 = vrot.slane %v5577_v21, 1  ;;  %v13629_v8 = vrot.slane %v11581_v12, 1  ;;  %4330 = vst.msk [vmem:[#allocation3 + $0xd1] sm:$0x1] %vm4285_vm14, %v4312_v42  ;;  %v5463_v58 = vrot.slane %v5380_v13, 1 }
 0x4cb   : > { %13626 = vst [vmem:[#allocation37_spill] sm:$0xff] %v11834_v17  ;;  %13627 = vst [vmem:[#allocation39_spill] sm:$0xff] %v11836_v6  ;;  %v5968_v46 = vrot.slane %v5578_v30, 1  ;;  %v5460_v19 = vrot.slane %v11834_v17, 1  ;;  %v11845_v45 = vmul.f32 0.75, %v4365_v27  ;;  %5766 = vrot.lane.b32.xlu1 %v5693_v29, %s8066_s21  ;;  %5764 = vrot.lane.b32.xlu0 %v5691_v2, %s8066_s21  ;;  %v4362_v33 = vld [vmem:[#allocation3 + $0xb0] sm:$0xff] }
 0x4cc   : > { %v5241_v23 = vsel %vm776_vm3, %v13629_v8, %v13628_v44  ;;  %v4311_v63 = vld [vmem:[#allocation3 + $0xb8] sm:$0x1]  ;;  %v11849_v11 = vmul.f32 0.25, %v4365_v27  ;;  %v5464_v29 = vsel %vm776_vm3, %v5461_v51, %v5463_v58  ;;  %v5582_v2 = vadd.f32 %v5463_v58, %v11829_v53 }
 0x4cd   : > { %v11852_v43 = vadd.f32 %v5241_v23, %v11579_v20  ;;  %4329 = vst.msk [vmem:[#allocation3 + $0xb9] sm:$0x1] %vm4285_vm14, %v4311_v63  ;;  %v5971_v21 = vsel %vm776_vm3, %v5968_v46, %v5970_v62  ;;  %v5969_v30 = vsel %vm776_vm3, %v5967_v59, %v5968_v46  ;;  %v5581_v13 = vadd.f32 %v5464_v29, %v11813_v56  ;;  %v4364_v44 = vld [vmem:[#allocation3 + $0xc0] sm:$0xff] }
 0x4ce   : > { %v5462_v42 = vsel %vm776_vm3, %v5460_v19, %v5461_v51  ;;  %v4461_v20 = vmul.f32 0.75, %v4362_v33  ;;  %v4416_v27 = vmul.f32 0.25, %v4362_v33  ;;  %v5975_v8 = vrot.slane %v5582_v2, 1 }
 0x4cf   : > { %13630 = vst [vmem:[#allocation8_spill] sm:$0xff] %v11852_v43  ;;  %v5580_v23 = vadd.f32 %v5462_v42, %v11836_v6  ;;  %v11864_v63 = vmul.f32 0.75, %v4364_v44  ;;  %v11866_v62 = vmul.f32 0.25, %v4364_v44  ;;  %6046 = vrot.lane.b32.xlu1 %v5971_v21, %s8066_s21  ;;  %6044 = vrot.lane.b32.xlu0 %v5969_v30, %s8066_s21  ;;  %v5973_v59 = vrot.slane %v5581_v13, 1  ;;  %v4361_v58 = vld [vmem:[#allocation3 + $0xa8] sm:$0xff] }
 0x4d0   : > { %v4509_v46 = vadd.f32 %v4461_v20, %v11697_v49  ;;  %v4512_v51 = vadd.f32 %v11845_v45, %v4416_v27  ;;  %v4560_v19 = vadd.f32 %v11695_v39, %v4416_v27  ;;  %v11874_v29 = vmul.f32 0.75, %v4361_v58 }
 0x4d1   : > { %v5972_v33 = vrot.slane %v5580_v23, 1  ;;  %v4415_v2 = vmul.f32 0.25, %v4361_v58  ;;  %v11877_v42 = vadd.f32 %v4461_v20, %v11849_v11  ;;  %v5976_v21 = vsel %vm776_vm3, %v5973_v59, %v5975_v8  ;;  %v4366_v49 = vld [vmem:[#allocation3 + $0xd0] sm:$0x3] }
 0x4d2   : > { %v11880_v30 = vmul.f32 0.25, %v4509_v46  ;;  %v11882_v13 = vmul.f32 0.75, %v4509_v46  ;;  %v11884_v44 = vmul.f32 0.25, %v4512_v51  ;;  %v4508_v27 = vadd.f32 %v11874_v29, %v11723_v3 }
 0x4d3   : > { %v5974_v39 = vsel %vm776_vm3, %v5972_v33, %v5973_v59  ;;  %v11889_v23 = vmul.f32 0.75, %v4366_v49  ;;  %v11891_v58 = vmul.f32 0.75, %v4512_v51  ;;  %6050 = vrot.lane.b32.xlu1 %v5976_v21, %s8066_s21  ;;  %v4511_v59 = vadd.f32 %v11864_v63, %v4415_v2 }
 0x4d4   : > { %13631 = vst [vmem:[#allocation10_spill] sm:$0xff] %v11880_v30  ;;  %6048 = vrot.lane.b32.xlu0 %v5974_v39, %s8066_s21  ;;  %v4363_v20 = vld [vmem:[#allocation3 + $0xb8] sm:$0x3]  ;;  %v4959_v8 = vrot.slane %v11880_v30, 1  ;;  %v11900_v33 = vmul.f32 0.25, %v4560_v19  ;;  %v11904_v9 = vmul.f32 0.25, %v4508_v27 }
 0x4d5   : > { %v11902_v3 = vmul.f32 0.75, %v4363_v20  ;;  %v11906_v51 = vmul.f32 0.75, %v4508_v27  ;;  %v4417_v21 = vmul.f32 0.25, %v4363_v20  ;;  %v11908_v35 = vmul.f32 0.25, %v4511_v59 }
 0x4d6   : > { %13632 = vst [vmem:[#allocation12_spill] sm:$0xff] %v11900_v33  ;;  %13633 = vst [vmem:[#allocation14_spill] sm:$0xff] %v11904_v9  ;;  %v11910_v39 = vmul.f32 0.75, %v4511_v59  ;;  %v11912_v17 = vmul.f32 0.75, %v4560_v19  ;;  %v4958_v18 = vrot.slane %v11904_v9, 1  ;;  %v5747_v56 = vpop.permute.xlu1 %5746  ;;  %v11922_v59 = vadd.f32 %v11716_v32, %v4415_v2  ;;  %v5745_v61 = vpop.permute.xlu0 %5744 }
 0x4d7   : > { %13634 = vst [vmem:[#allocation16_spill] sm:$0xff] %v11908_v35  ;;  %v4510_v46 = vadd.f32 %v11902_v3, %v11752_v54  ;;  %v4513_v6 = vadd.f32 %v11889_v23, %v4417_v21  ;;  %v4561_v53 = vadd.f32 %v11746_v47, %v4417_v21  ;;  %v6539_v27 = vpop.f32.mrf.mxu0  ;;  %v4963_v20 = vrot.slane %v11908_v35, 1 }
 0x4d8   : > { %v11924_v19 = vmul.f32 0.25, %v4366_v49  ;;  %v11927_v30 = vmul.f32 0.25, %v11877_v42  ;;  %v4015_v54 = vadd.f32 %v11757_v37, %v6539_v27  ;;  %v5841_v9 = vsel %vm278_vm1, %v11411_v5, %v5747_v56 }
 0x4d9   : > { %v11932_v50 = vmul.f32 0.75, %v4510_v46  ;;  %v4870_v47 = vmul.f32 0.25, %v4510_v46  ;;  %v4006_v21 = vpop.f32.mrf.mxu0  ;;  %5873 = vst.msk [vmem:[%s11934_s14 + $0x8] sm:$0xff] %vm1887_vm6, %v5841_v9  ;;  %v5840_v32 = vsel %vm278_vm1, %v11418_v31, %v5745_v61  ;;  %v4960_v2 = vsel %vm776_vm3, %v4958_v18, %v4959_v8 }
 0x4da   : > { %13635 = vst [vmem:[#allocation18_spill] sm:$0xff] %v11927_v30  ;;  %v11941_v49 = vmul.f32 0.75, %v4513_v6  ;;  %v4871_v27 = vmul.f32 0.25, %v4513_v6  ;;  %v4087_v5 = vmax.f32 %v4015_v54, 0.0  ;;  %v4007_v56 = vadd.f32 %v11757_v37, %v4006_v21  ;;  %5872 = vst.msk [vmem:[%s11934_s14] sm:$0xff] %vm1887_vm6, %v5840_v32  ;;  %v5751_v43 = vpop.permute.xlu1 %5750  ;;  %v5749_v32 = vpop.permute.xlu0 %5748 }
 0x4db   : > { %v4961_v46 = vrot.slane %v4870_v47, 1  ;;  %v5074_v35 = vadd.f32 %v4960_v2, %v11906_v51  ;;  %v6540_v60 = vpop.f32.mrf.mxu0  ;;  %v13636_v36 = vrot.slane %v11884_v44, 1  ;;  %v11950_v61 = vmul.f32 0.75, %v4561_v53 }
 0x4dc   : > { %v4966_v9 = vrot.slane %v4871_v27, 1  ;;  %v5381_v18 = vmul.f32 0.25, %v4561_v53  ;;  %v4215_v6 = vadd.f32 %v11491_v7, %v4087_v5  ;;  %v4085_v54 = vmax.f32 %v4007_v56, 0.0 }
 0x4dd   : > { %v4965_v31 = vsel %vm776_vm3, %v4963_v20, %v13636_v36  ;;  %13637 = vst [vmem:[#allocation21_spill] sm:$0xff] %v11950_v61  ;;  %v4018_v21 = vadd.f32 %v11757_v37, %v6540_v60  ;;  %v5843_v47 = vsel %vm278_vm1, %v11423_v16, %v5751_v43  ;;  %v4009_v2 = vpop.f32.mrf.mxu0  ;;  %v5842_v27 = vsel %vm278_vm1, %v11428_v14, %v5749_v32 }
 0x4de   : > { %5875 = vst.msk [vmem:[%s11934_s14 + $0x28] sm:$0xff] %vm1887_vm6, %v5843_v47  ;;  %v4962_v36 = vsel %vm776_vm3, %v4959_v8, %v4961_v46  ;;  %v5076_v53 = vadd.f32 %v4961_v46, %v11932_v50  ;;  %v5694_v20 = vrot.slane %v5074_v35, 1  ;;  %v4213_v7 = vadd.f32 %v11495_v15, %v4085_v54  ;;  %5874 = vst.msk [vmem:[%s11934_s14 + $0x20] sm:$0xff] %vm1887_vm6, %v5842_v27  ;;  %v6035_v56 = vpop.permute.xlu1 %6034 }
 0x4df   : > { %4248 = vst.msk [vmem:[#allocation3 + $0xf1] sm:$0xff] %vm278_vm1, %v4215_v6  ;;  %v4088_v60 = vmax.f32 %v4018_v21, 0.0  ;;  %v4010_v16 = vadd.f32 %v11757_v37, %v4009_v2  ;;  %v5075_v43 = vadd.f32 %v4962_v36, %v11882_v13  ;;  %v13638_v14 = vrot.slane %v11884_v44, 1 }
 0x4e0   : > { %v5697_v5 = vrot.slane %v5076_v53, 1  ;;  %v5079_v35 = vadd.f32 %v4966_v9, %v11941_v49  ;;  %v5077_v46 = vadd.f32 %v4965_v31, %v11910_v39  ;;  %4246 = vst.msk [vmem:[#allocation3 + $0xd9] sm:$0xff] %vm278_vm1, %v4213_v7  ;;  %v6129_v21 = vsel %vm278_vm1, %v11432_v40, %v6035_v56  ;;  %v6033_v47 = vpop.permute.xlu0 %6032  ;;  %v13639_v31 = vld [vmem:[#allocation64_spill] sm:$0xff]  ;;  %v13640_v7 = vld [vmem:[#allocation75_spill] sm:$0xff] }
 0x4e1   : > { %v4967_v8 = vsel %vm776_vm3, %v13638_v14, %v4966_v9  ;;  %v4216_v15 = vadd.f32 %v11500_v26, %v4088_v60  ;;  %v4086_v6 = vmax.f32 %v4010_v16, 0.0  ;;  %v5695_v54 = vrot.slane %v5075_v43, 1  ;;  %6338 = vst.msk [vmem:[%s11934_s14 + $0x18] sm:$0xff] %vm1887_vm6, %v6129_v21 }
 0x4e2   : > { %v5078_v32 = vadd.f32 %v4967_v8, %v11891_v58  ;;  %v5702_v2 = vrot.slane %v5079_v35, 1  ;;  %v5699_v27 = vrot.slane %v5077_v46, 1  ;;  %v5468_v9 = vrot.slane %v5381_v18, 1 }
 0x4e3   : > { %4249 = vst.msk [vmem:[#allocation3 + $0xf9] sm:$0xff] %vm278_vm1, %v4216_v15  ;;  %v4214_v36 = vadd.f32 %v13639_v31, %v4086_v6  ;;  %v5698_v26 = vsel %vm776_vm3, %v5695_v54, %v5697_v5  ;;  %v5696_v53 = vsel %vm776_vm3, %v5694_v20, %v5695_v54  ;;  %v6128_v60 = vsel %vm278_vm1, %v13640_v7, %v6033_v47 }
 0x4e4   : > { %5770 = vrot.lane.b32.xlu1 %v5698_v26, %s8066_s21  ;;  %5768 = vrot.lane.b32.xlu0 %v5696_v53, %s8066_s21  ;;  %6337 = vst.msk [vmem:[%s11934_s14 + $0x10] sm:$0xff] %vm1887_vm6, %v6128_v60  ;;  %v5700_v40 = vrot.slane %v5078_v32, 1  ;;  %v13641_v18 = vrot.slane %v11900_v33, 1  ;;  %v5585_v43 = vadd.f32 %v5468_v9, %v11950_v61  ;;  %v11995_v5 = vmul.f32 0.25, %v11922_v59 }
 0x4e5   : > { %4247 = vst.msk [vmem:[#allocation3 + $0xe1] sm:$0xff] %vm278_vm1, %v4214_v36  ;;  %v12000_v56 = vmul.f32 0.75, %v11922_v59  ;;  %v4564_v14 = vadd.f32 %v11902_v3, %v11924_v19  ;;  %v12005_v8 = vmul.f32 0.75, %v11877_v42  ;;  %v5471_v32 = vrot.slane %v11927_v30, 1 }
 0x4e6   : > { %v5469_v16 = vsel %vm776_vm3, %v13641_v18, %v5468_v9  ;;  %13642 = vst [vmem:[#allocation22_spill] sm:$0xff] %v11995_v5  ;;  %v4277_v35 = vld [vmem:[#allocation3 + $0xf1] sm:$0x1]  ;;  %v5703_v46 = vsel %vm776_vm3, %v5700_v40, %v5702_v2  ;;  %v5701_v15 = vsel %vm776_vm3, %v5699_v27, %v5700_v40  ;;  %v5980_v6 = vrot.slane %v5585_v43, 1 }
 0x4e7   : > { %v5584_v20 = vadd.f32 %v5469_v16, %v11912_v17  ;;  %13643 = vst [vmem:[#allocation26_spill] sm:$0xff] %v12000_v56  ;;  %13644 = vst [vmem:[#allocation28_spill] sm:$0xff] %v12005_v8  ;;  %v5465_v54 = vrot.slane %v11995_v5, 1  ;;  %v12011_v47 = vmul.f32 0.75, %v4564_v14  ;;  %v5382_v59 = vmul.f32 0.25, %v4564_v14  ;;  %v13649_v40 = vld [vmem:[#allocation7_spill] sm:$0xff] }
 0x4e8   : > { %4296 = vst.msk [vmem:[#allocation3 + $0xf0] sm:$0x1] %vm4285_vm14, %v4277_v35  ;;  %v4276_v3 = vld [vmem:[#allocation3 + $0xd9] sm:$0x1]  ;;  %5774 = vrot.lane.b32.xlu1 %v5703_v46, %s8066_s21  ;;  %5772 = vrot.lane.b32.xlu0 %v5701_v15, %s8066_s21  ;;  %v13646_v42 = vmov %v13641_v18  ;;  %v4562_v27 = vadd.f32 %v11874_v29, %v11866_v62  ;;  %v13647_v9 = vrot.slane %v11581_v12, 1  ;;  %v13648_v31 = vrot.slane %v11604_v4, 1 }
 0x4e9   : > { %v5978_v21 = vrot.slane %v5584_v20, 1  ;;  %13645 = vst [vmem:[#allocation29_spill] sm:$0xff] %v12011_v47  ;;  %v5467_v2 = vsel %vm776_vm3, %v5465_v54, %v13646_v42  ;;  %v5245_v26 = vrot.slane %v11655_v57, 1  ;;  %4295 = vst.msk [vmem:[#allocation3 + $0xd8] sm:$0x1] %vm4285_vm14, %v4276_v3  ;;  %v5473_v60 = vrot.slane %v5382_v59, 1 }
 0x4ea   : > { %v5239_v36 = vsel %vm776_vm3, %v13648_v31, %v13647_v9  ;;  %v5583_v7 = vadd.f32 %v5467_v2, %v12000_v56  ;;  %v4314_v16 = vld [vmem:[#allocation3 + $0x100] sm:$0x1]  ;;  %v12033_v29 = vmul.f32 0.25, %v4562_v27  ;;  %v12035_v12 = vmul.f32 0.75, %v4562_v27  ;;  %v4371_v4 = vld [vmem:[#allocation3 + $0xf8] sm:$0xff] }
 0x4eb   : > { %v5981_v53 = vsel %vm776_vm3, %v5978_v21, %v5980_v6  ;;  %v12031_v18 = vadd.f32 %v5239_v36, %v13649_v40  ;;  %v13652_v43 = vrot.slane %v11647_v38, 1  ;;  %v5242_v20 = vrot.slane %v11674_v22, 1  ;;  %4332 = vst.msk [vmem:[#allocation3 + $0x101] sm:$0x1] %vm4285_vm14, %v4314_v16  ;;  %v13664_v56 = vld [vmem:[#allocation68_spill] sm:$0xff] }
 0x4ec   : > { %13650 = vst [vmem:[#allocation30_spill] sm:$0xff] %v12033_v29  ;;  %13651 = vst [vmem:[#allocation38_spill] sm:$0xff] %v12035_v12  ;;  %v5977_v14 = vrot.slane %v5583_v7, 1  ;;  %v5474_v35 = vsel %vm776_vm3, %v5471_v32, %v5473_v60  ;;  %v5588_v46 = vadd.f32 %v5473_v60, %v12011_v47  ;;  %v12044_v15 = vmul.f32 0.75, %v4371_v4  ;;  %v4313_v6 = vld [vmem:[#allocation3 + $0xe8] sm:$0x1]  ;;  %6054 = vrot.lane.b32.xlu1 %v5981_v53, %s8066_s21 }
 0x4ed   : > { %v5246_v57 = vsel %vm776_vm3, %v13652_v43, %v5245_v26  ;;  %v5587_v54 = vadd.f32 %v5474_v35, %v12005_v8  ;;  %v5470_v59 = vrot.slane %v12033_v29, 1  ;;  %v4368_v3 = vld [vmem:[#allocation3 + $0xe0] sm:$0xff]  ;;  %v12049_v42 = vmul.f32 0.25, %v4371_v4  ;;  %4331 = vst.msk [vmem:[#allocation3 + $0xe9] sm:$0x1] %vm4285_vm14, %v4313_v6 }
 0x4ee   : > { %v12052_v22 = vadd.f32 %v5246_v57, %v11614_v52  ;;  %v5979_v2 = vsel %vm776_vm3, %v5977_v14, %v5978_v21  ;;  %v5985_v27 = vrot.slane %v5588_v46, 1  ;;  %v4467_v9 = vmul.f32 0.75, %v4368_v3 }
 0x4ef   : > { %v4422_v31 = vmul.f32 0.25, %v4368_v3  ;;  %6052 = vrot.lane.b32.xlu0 %v5979_v2, %s8066_s21  ;;  %v5983_v36 = vrot.slane %v5587_v54, 1  ;;  %v5472_v26 = vsel %vm776_vm3, %v5470_v59, %v5471_v32  ;;  %v4370_v53 = vld [vmem:[#allocation3 + $0xf0] sm:$0xff]  ;;  %v13653_v7 = vmov %v13652_v43 }
 0x4f0   : > { %v12061_v60 = vsel %vm776_vm3, %v5242_v20, %v13653_v7  ;;  %v5586_v40 = vadd.f32 %v5472_v26, %v12035_v12  ;;  %v4515_v21 = vadd.f32 %v4467_v9, %v11849_v11  ;;  %v12067_v4 = vmul.f32 0.75, %v4370_v53  ;;  %v4367_v57 = vld [vmem:[#allocation3 + $0xd8] sm:$0xff] }
 0x4f1   : > { %v4518_v16 = vadd.f32 %v12044_v15, %v4422_v31  ;;  %v5986_v43 = vsel %vm776_vm3, %v5983_v36, %v5985_v27  ;;  %v4566_v32 = vadd.f32 %v11845_v45, %v4422_v31  ;;  %v12072_v38 = vadd.f32 %v4467_v9, %v12049_v42 }
 0x4f2   : > { %v12074_v20 = vmul.f32 0.25, %v4370_v53  ;;  %6058 = vrot.lane.b32.xlu1 %v5986_v43, %s8066_s21  ;;  %v5982_v14 = vrot.slane %v5586_v40, 1  ;;  %v12077_v35 = vmul.f32 0.25, %v4515_v21  ;;  %v12079_v11 = vmul.f32 0.75, %v4515_v21  ;;  %v4372_v6 = vld [vmem:[#allocation3 + $0x100] sm:$0x3] }
 0x4f3   : > { %v12081_v46 = vmul.f32 0.75, %v4367_v57  ;;  %v12083_v54 = vmul.f32 0.25, %v4518_v16  ;;  %v12085_v59 = vmul.f32 0.75, %v4518_v16  ;;  %v4421_v45 = vmul.f32 0.25, %v4367_v57 }
 0x4f4   : > { %13654 = vst [vmem:[#allocation40_spill] sm:$0xff] %v12077_v35  ;;  %v12087_v3 = vmul.f32 0.25, %v4566_v32  ;;  %v5984_v2 = vsel %vm776_vm3, %v5982_v14, %v5983_v36  ;;  %v4969_v27 = vrot.slane %v12077_v35, 1  ;;  %v12093_v31 = vmul.f32 0.75, %v4372_v6  ;;  %v4369_v26 = vld [vmem:[#allocation3 + $0xe8] sm:$0x3] }
 0x4f5   : > { %13655 = vst [vmem:[#allocation41_spill] sm:$0xff] %v12083_v54  ;;  %v4514_v9 = vadd.f32 %v12081_v46, %v11866_v62  ;;  %6056 = vrot.lane.b32.xlu0 %v5984_v2, %s8066_s21  ;;  %v4974_v53 = vrot.slane %v12083_v54, 1  ;;  %v4517_v7 = vadd.f32 %v12067_v4, %v4421_v45  ;;  %v12098_v40 = vmul.f32 0.75, %v4566_v32 }
 0x4f6   : > { %13656 = vst [vmem:[#allocation42_spill] sm:$0xff] %v12087_v3  ;;  %v4468_v16 = vmul.f32 0.75, %v4369_v26  ;;  %v4423_v57 = vmul.f32 0.25, %v4369_v26  ;;  %v4565_v2 = vadd.f32 %v11864_v63, %v4421_v45  ;;  %v12110_v52 = vmul.f32 0.25, %v4372_v6 }
 0x4f7   : > { %v12101_v36 = vmul.f32 0.25, %v4514_v9  ;;  %v12103_v43 = vmul.f32 0.75, %v4514_v9  ;;  %v12105_v62 = vmul.f32 0.25, %v4517_v7  ;;  %v12107_v14 = vmul.f32 0.75, %v4517_v7  ;;  %v6543_v29 = vpop.f32.mrf.mxu0 }
 0x4f8   : > { %v4516_v54 = vadd.f32 %v4468_v16, %v11924_v19  ;;  %v4519_v21 = vadd.f32 %v12093_v31, %v4423_v57  ;;  %v4567_v35 = vadd.f32 %v11889_v23, %v4423_v57  ;;  %v12117_v26 = vmul.f32 0.25, %v4565_v2 }
 0x4f9   : > { %13657 = vst [vmem:[#allocation74_spill] sm:$0xff] %v12101_v36  ;;  %13658 = vst [vmem:[#allocation69_spill] sm:$0xff] %v12103_v43  ;;  %v4968_v32 = vrot.slane %v12101_v36, 1  ;;  %v4973_v9 = vrot.slane %v12105_v62, 1  ;;  %v12119_v30 = vmul.f32 0.75, %v4565_v2  ;;  %v4570_v7 = vadd.f32 %v4468_v16, %v12110_v52  ;;  %v4022_v36 = vpop.f32.mrf.mxu0 }
 0x4fa   : > { %13659 = vst [vmem:[#allocation70_spill] sm:$0xff] %v12105_v62  ;;  %13660 = vst [vmem:[#allocation46_spill] sm:$0xff] %v12107_v14  ;;  %v4031_v63 = vadd.f32 %v11757_v37, %v6543_v29  ;;  %v12123_v6 = vmul.f32 0.75, %v4516_v54  ;;  %v4872_v19 = vmul.f32 0.25, %v4516_v54  ;;  %v12127_v23 = vmul.f32 0.75, %v4519_v21 }
 0x4fb   : > { %13661 = vst [vmem:[#allocation45_spill] sm:$0xff] %v12117_v26  ;;  %13662 = vst [vmem:[#allocation72_spill] sm:$0xff] %v12119_v30  ;;  %v4970_v45 = vsel %vm776_vm3, %v4968_v32, %v4969_v27  ;;  %v4873_v57 = vmul.f32 0.25, %v4519_v21  ;;  %v4975_v62 = vsel %vm776_vm3, %v4973_v9, %v4974_v53  ;;  %v4023_v2 = vadd.f32 %v11757_v37, %v4022_v36  ;;  %v6544_v29 = vpop.f32.mrf.mxu0 }
 0x4fc   : > { %13663 = vst [vmem:[#allocation32_spill] sm:$0xff] %v12123_v6  ;;  %v5080_v5 = vadd.f32 %v4970_v45, %v12103_v43  ;;  %v4091_v33 = vmax.f32 %v4031_v63, 0.0  ;;  %v4971_v12 = vrot.slane %v4872_v19, 1  ;;  %v5083_v16 = vadd.f32 %v4975_v62, %v12107_v14  ;;  %v13665_v19 = vld [vmem:[#allocation60_spill] sm:$0xff] }
 0x4fd   : > { %v4976_v8 = vrot.slane %v4873_v57, 1  ;;  %v12132_v54 = vmul.f32 0.75, %v4567_v35  ;;  %v5383_v32 = vmul.f32 0.25, %v4567_v35  ;;  %v4089_v45 = vmax.f32 %v4023_v2, 0.0  ;;  %v4025_v9 = vpop.f32.mrf.mxu0 }
 0x4fe   : > { %v5704_v47 = vrot.slane %v5080_v5, 1  ;;  %v4219_v61 = vadd.f32 %v13664_v56, %v4091_v33  ;;  %v4034_v43 = vadd.f32 %v11757_v37, %v6544_v29  ;;  %v4972_v21 = vsel %vm776_vm3, %v4969_v27, %v4971_v12 }
 0x4ff   : > { %v5081_v63 = vadd.f32 %v4972_v21, %v12079_v11  ;;  %v5082_v36 = vadd.f32 %v4971_v12, %v12123_v6  ;;  %v4977_v62 = vsel %vm776_vm3, %v4974_v53, %v4976_v8  ;;  %v5085_v5 = vadd.f32 %v4976_v8, %v12127_v23  ;;  %v13666_v12 = vld [vmem:[#allocation53_spill] sm:$0xff] }
 0x500   : > { %4252 = vst.msk [vmem:[#allocation3 + $0x121] sm:$0xff] %vm278_vm1, %v4219_v61  ;;  %v4217_v35 = vadd.f32 %v13665_v19, %v4089_v45  ;;  %v4092_v57 = vmax.f32 %v4034_v43, 0.0  ;;  %v4026_v33 = vadd.f32 %v11757_v37, %v4025_v9  ;;  %v5084_v56 = vadd.f32 %v4977_v62, %v12085_v59 }
 0x501   : > { %v5705_v2 = vrot.slane %v5081_v63, 1  ;;  %v5707_v27 = vrot.slane %v5082_v36, 1  ;;  %v5712_v29 = vrot.slane %v5085_v5, 1  ;;  %v5709_v14 = vrot.slane %v5083_v16, 1  ;;  %v13668_v63 = vld [vmem:[#allocation62_spill] sm:$0xff] }
 0x502   : > { %4250 = vst.msk [vmem:[#allocation3 + $0x109] sm:$0xff] %vm278_vm1, %v4217_v35  ;;  %v4220_v21 = vadd.f32 %v13666_v12, %v4092_v57  ;;  %v4090_v53 = vmax.f32 %v4026_v33, 0.0  ;;  %v5710_v6 = vrot.slane %v5084_v56, 1  ;;  %v5478_v8 = vrot.slane %v5383_v32, 1 }
 0x503   : > { %v5708_v61 = vsel %vm776_vm3, %v5705_v2, %v5707_v27  ;;  %v5706_v45 = vsel %vm776_vm3, %v5704_v47, %v5705_v2  ;;  %v5475_v43 = vrot.slane %v12117_v26, 1  ;;  %v12151_v9 = vmul.f32 0.25, %v12072_v38  ;;  %v13689_v26 = vld [vmem:[#allocation9_spill] sm:$0xff] }
 0x504   : > { %4253 = vst.msk [vmem:[#allocation3 + $0x129] sm:$0xff] %vm278_vm1, %v4220_v21  ;;  %v4218_v16 = vadd.f32 %v13668_v63, %v4090_v53  ;;  %5778 = vrot.lane.b32.xlu1 %v5708_v61, %s8066_s21  ;;  %5776 = vrot.lane.b32.xlu0 %v5706_v45, %s8066_s21  ;;  %v5713_v36 = vsel %vm776_vm3, %v5710_v6, %v5712_v29  ;;  %v12160_v62 = vmul.f32 0.75, %v12072_v38  ;;  %v13670_v47 = vrot.slane %v12087_v3, 1 }
 0x505   : > { %13667 = vst [vmem:[#allocation31_spill] sm:$0xff] %v12151_v9  ;;  %v5711_v32 = vsel %vm776_vm3, %v5709_v14, %v5710_v6  ;;  %v5591_v19 = vadd.f32 %v5478_v8, %v12132_v54  ;;  %v12169_v33 = vmul.f32 0.75, %v4570_v7  ;;  %v5384_v38 = vmul.f32 0.25, %v4570_v7 }
 0x506   : > { %13669 = vst [vmem:[#allocation73_spill] sm:$0xff] %v12160_v62  ;;  %v5479_v5 = vsel %vm776_vm3, %v13670_v47, %v5478_v8  ;;  %v13671_v35 = vmov %v13670_v47  ;;  %4251 = vst.msk [vmem:[#allocation3 + $0x111] sm:$0xff] %vm278_vm1, %v4218_v16  ;;  %v5481_v6 = vrot.slane %v12151_v9, 1  ;;  %v4568_v29 = vadd.f32 %v12081_v46, %v12074_v20  ;;  %v13686_v9 = vld [vmem:[#allocation43_spill] sm:$0xff] }
 0x507   : > { %v5477_v57 = vsel %vm776_vm3, %v5475_v43, %v13671_v35  ;;  %13672 = vst [vmem:[#allocation34_spill] sm:$0xff] %v12169_v33  ;;  %v5590_v56 = vadd.f32 %v5479_v5, %v12098_v40  ;;  %v4279_v2 = vld [vmem:[#allocation3 + $0x121] sm:$0x1]  ;;  %v5990_v27 = vrot.slane %v5591_v19, 1  ;;  %v12179_v12 = vadd.f32 %v12061_v60, %v11672_v24 }
 0x508   : > { %v5589_v14 = vadd.f32 %v5477_v57, %v12119_v30  ;;  %v4743_v21 = vrot.slane %v11780_v55, 1  ;;  %4298 = vst.msk [vmem:[#allocation3 + $0x120] sm:$0x1] %vm4285_vm14, %v4279_v2  ;;  %5782 = vrot.lane.b32.xlu1 %v5713_v36, %s8066_s21  ;;  %5780 = vrot.lane.b32.xlu0 %v5711_v32, %s8066_s21  ;;  %v5483_v8 = vrot.slane %v5384_v38, 1  ;;  %v4740_v61 = vrot.slane %v11762_v28, 1 }
 0x509   : > { %v5988_v7 = vrot.slane %v5590_v56, 1  ;;  %v4278_v45 = vld [vmem:[#allocation3 + $0x109] sm:$0x1]  ;;  %v12186_v43 = vmul.f32 0.25, %v4568_v29  ;;  %v12188_v46 = vmul.f32 0.75, %v4568_v29  ;;  %v13675_v24 = vrot.slane %v11731_v41, 1 }
 0x50a   : > { %v5987_v53 = vrot.slane %v5589_v14, 1  ;;  %v4746_v60 = vrot.slane %v11737_v10, 1  ;;  %4297 = vst.msk [vmem:[#allocation3 + $0x108] sm:$0x1] %vm4285_vm14, %v4278_v45  ;;  %v5484_v36 = vsel %vm776_vm3, %v5481_v6, %v5483_v8  ;;  %v5594_v28 = vadd.f32 %v5483_v8, %v12169_v33 }
 0x50b   : > { %13673 = vst [vmem:[#allocation33_spill] sm:$0xff] %v12186_v43  ;;  %13674 = vst [vmem:[#allocation71_spill] sm:$0xff] %v12188_v46  ;;  %v4744_v55 = vsel %vm776_vm3, %v13675_v24, %v4743_v21  ;;  %v5991_v63 = vsel %vm776_vm3, %v5988_v7, %v5990_v27  ;;  %v4316_v32 = vld [vmem:[#allocation3 + $0x130] sm:$0x1]  ;;  %v5593_v47 = vadd.f32 %v5484_v36, %v12160_v62  ;;  %v5480_v5 = vrot.slane %v12186_v43, 1  ;;  %v4377_v19 = vld [vmem:[#allocation3 + $0x128] sm:$0xff] }
 0x50c   : > { %v5989_v16 = vsel %vm776_vm3, %v5987_v53, %v5988_v7  ;;  %v12202_v35 = vadd.f32 %v4744_v55, %v11729_v0  ;;  %v13676_v10 = vmov %v13675_v24  ;;  %4334 = vst.msk [vmem:[#allocation3 + $0x131] sm:$0x1] %vm4285_vm14, %v4316_v32  ;;  %6062 = vrot.lane.b32.xlu1 %v5991_v63, %s8066_s21  ;;  %v5995_v56 = vrot.slane %v5594_v28, 1  ;;  %v13677_v63 = vld [vmem:[#allocation25_spill] sm:$0xff]  ;;  %v13690_v62 = vld [vmem:[#allocation11_spill] sm:$0xff] }
 0x50d   : > { %v4742_v57 = vsel %vm776_vm3, %v4740_v61, %v13676_v10  ;;  %6060 = vrot.lane.b32.xlu0 %v5989_v16, %s8066_s21  ;;  %v12210_v14 = vmul.f32 0.75, %v4377_v19  ;;  %v12212_v38 = vmul.f32 0.25, %v4377_v19  ;;  %v4315_v0 = vld [vmem:[#allocation3 + $0x118] sm:$0x1]  ;;  %v5993_v27 = vrot.slane %v5593_v47, 1  ;;  %v4374_v29 = vld [vmem:[#allocation3 + $0x110] sm:$0xff] }
 0x50e   : > { %v12215_v2 = vadd.f32 %v4742_v57, %v11760_v48  ;;  %v5482_v41 = vsel %vm776_vm3, %v5480_v5, %v5481_v6  ;;  %v4748_v21 = vrot.slane %v11783_v34, 1  ;;  %v4745_v7 = vrot.slane %v11766_v1, 1  ;;  %4333 = vst.msk [vmem:[#allocation3 + $0x119] sm:$0x1] %vm4285_vm14, %v4315_v0  ;;  %v13678_v10 = vld [vmem:[#allocation17_spill] sm:$0xff] }
 0x50f   : > { %v5592_v53 = vadd.f32 %v5482_v41, %v12188_v46  ;;  %v4473_v8 = vmul.f32 0.75, %v4374_v29  ;;  %v4428_v61 = vmul.f32 0.25, %v4374_v29  ;;  %v5996_v48 = vsel %vm776_vm3, %v5993_v27, %v5995_v56  ;;  %v4376_v24 = vld [vmem:[#allocation3 + $0x120] sm:$0xff]  ;;  %v6547_v32 = vpop.f32.mrf.mxu0 }
 0x510   : > { %v4749_v55 = vsel %vm776_vm3, %v4746_v60, %v4748_v21  ;;  %v12226_v6 = vsel %vm776_vm3, %v4745_v7, %v4746_v60  ;;  %6066 = vrot.lane.b32.xlu1 %v5996_v48, %s8066_s21  ;;  %v12232_v28 = vmul.f32 0.75, %v4376_v24  ;;  %v12240_v60 = vmul.f32 0.25, %v4376_v24 }
 0x511   : > { %v5992_v1 = vrot.slane %v5592_v53, 1  ;;  %v4521_v16 = vadd.f32 %v4473_v8, %v12049_v42  ;;  %v4524_v36 = vadd.f32 %v12210_v14, %v4428_v61  ;;  %v4373_v47 = vld [vmem:[#allocation3 + $0x108] sm:$0xff]  ;;  %v12235_v5 = vadd.f32 %v12044_v15, %v4428_v61  ;;  %v4038_v15 = vpop.f32.mrf.mxu0 }
 0x512   : > { %v12238_v19 = vadd.f32 %v4473_v8, %v12212_v38  ;;  %v12243_v57 = vadd.f32 %v4749_v55, %v13678_v10  ;;  %v4047_v42 = vadd.f32 %v11757_v37, %v6547_v32  ;;  %v12252_v29 = vmul.f32 0.75, %v4373_v47  ;;  %v13682_v10 = vld [vmem:[#allocation55_spill] sm:$0xff] }
 0x513   : > { %v5994_v56 = vsel %vm776_vm3, %v5992_v1, %v5993_v27  ;;  %v12247_v0 = vmul.f32 0.25, %v4521_v16  ;;  %v12249_v41 = vmul.f32 0.75, %v4521_v16  ;;  %v12254_v21 = vld [vmem:[#allocation3 + $0x130] sm:$0x3]  ;;  %v12256_v7 = vmul.f32 0.25, %v4524_v36  ;;  %v6548_v55 = vpop.f32.mrf.mxu0 }
 0x514   : > { %6064 = vrot.lane.b32.xlu0 %v5994_v56, %s8066_s21  ;;  %v12258_v53 = vmul.f32 0.75, %v4524_v36  ;;  %v12260_v8 = vmul.f32 0.25, %v4373_v47  ;;  %v4095_v27 = vmax.f32 %v4047_v42, 0.0  ;;  %v4039_v61 = vadd.f32 %v11757_v37, %v4038_v15 }
 0x515   : > { %13679 = vst [vmem:[#allocation49_spill] sm:$0xff] %v12247_v0  ;;  %13680 = vst [vmem:[#allocation48_spill] sm:$0xff] %v12256_v7  ;;  %v4979_v48 = vrot.slane %v12247_v0, 1  ;;  %v12265_v24 = vmul.f32 0.75, %v12254_v21  ;;  %v4375_v1 = vld [vmem:[#allocation3 + $0x118] sm:$0x3]  ;;  %v4520_v16 = vadd.f32 %v12252_v29, %v12074_v20  ;;  %v4050_v15 = vadd.f32 %v11757_v37, %v6548_v55  ;;  %v4041_v34 = vpop.f32.mrf.mxu0 }
 0x516   : > { %v4523_v36 = vadd.f32 %v12232_v28, %v12260_v8  ;;  %v12273_v47 = vmul.f32 0.25, %v12235_v5  ;;  %v4223_v56 = vadd.f32 %v13682_v10, %v4095_v27  ;;  %v4093_v42 = vmax.f32 %v4039_v61, 0.0 }
 0x517   : > { %v12277_v45 = vmul.f32 0.75, %v4375_v1  ;;  %v12279_v0 = vmul.f32 0.25, %v4520_v16  ;;  %v12281_v43 = vmul.f32 0.75, %v4520_v16  ;;  %v4429_v20 = vmul.f32 0.25, %v4375_v1 }
 0x518   : > { %13681 = vst [vmem:[#allocation57_spill] sm:$0xff] %v12273_v47  ;;  %v12283_v32 = vmul.f32 0.25, %v4523_v36  ;;  %4256 = vst.msk [vmem:[#allocation3 + $0x151] sm:$0xff] %vm278_vm1, %v4223_v56  ;;  %v4221_v46 = vadd.f32 %v13686_v9, %v4093_v42  ;;  %v4096_v33 = vmax.f32 %v4050_v15, 0.0  ;;  %v4042_v27 = vadd.f32 %v11757_v37, %v4041_v34  ;;  %v13688_v56 = vld [vmem:[#allocation77_spill] sm:$0xff]  ;;  %v5755_v15 = vpop.permute.xlu1 %5754  ;;  %v5753_v37 = vpop.permute.xlu0 %5752 }
 0x519   : > { %13683 = vst [vmem:[#allocation56_spill] sm:$0xff] %v12279_v0  ;;  %13684 = vst [vmem:[#allocation59_spill] sm:$0xff] %v12281_v43  ;;  %v4522_v61 = vadd.f32 %v12277_v45, %v12110_v52  ;;  %v4978_v55 = vrot.slane %v12279_v0, 1  ;;  %v4525_v10 = vadd.f32 %v12265_v24, %v4429_v20  ;;  %v12292_v16 = vmul.f32 0.75, %v4523_v36 }
 0x51a   : > { %13685 = vst [vmem:[#allocation58_spill] sm:$0xff] %v12283_v32  ;;  %v4983_v1 = vrot.slane %v12283_v32, 1  ;;  %4254 = vst.msk [vmem:[#allocation3 + $0x139] sm:$0xff] %vm278_vm1, %v4221_v46  ;;  %v4224_v9 = vadd.f32 %v13688_v56, %v4096_v33  ;;  %v4094_v42 = vmax.f32 %v4042_v27, 0.0  ;;  %v5845_v0 = vsel %vm278_vm1, %v13689_v26, %v5755_v15  ;;  %v13691_v46 = vld [vmem:[#allocation63_spill] sm:$0xff] }
 0x51b   : > { %13687 = vst [vmem:[#allocation51_spill] sm:$0xff] %v12292_v16  ;;  %v12297_v34 = vmul.f32 0.75, %v4522_v61  ;;  %v4874_v52 = vmul.f32 0.25, %v4522_v61  ;;  %v5844_v36 = vsel %vm278_vm1, %v13690_v62, %v5753_v37  ;;  %v4980_v3 = vsel %vm776_vm3, %v4978_v55, %v4979_v48  ;;  %5877 = vst.msk [vmem:[%s11934_s14 + $0x48] sm:$0xff] %vm1887_vm6, %v5845_v0  ;;  %v6551_v26 = vpop.f32.mrf.mxu0 }
 0x51c   : > { %v12304_v30 = vmul.f32 0.75, %v4525_v10  ;;  %4257 = vst.msk [vmem:[#allocation3 + $0x159] sm:$0xff] %vm278_vm1, %v4224_v9  ;;  %v4222_v33 = vadd.f32 %v13691_v46, %v4094_v42  ;;  %v5086_v61 = vadd.f32 %v4980_v3, %v12281_v43  ;;  %v4875_v56 = vmul.f32 0.25, %v4525_v10  ;;  %v8001_v3 = vld [vmem:[%s13118_s6] ss:$0 sm:$0xff]  ;;  %v5759_v10 = vpop.permute.xlu1 %5758  ;;  %v5757_v42 = vpop.permute.xlu0 %5756  ;;  %v13695_v46 = vld [vmem:[#allocation15_spill] sm:$0xff] }
 0x51d   : > { %5876 = vst.msk [vmem:[%s11934_s14 + $0x40] sm:$0xff] %vm1887_vm6, %v5844_v36  ;;  %v4981_v27 = vrot.slane %v4874_v52, 1  ;;  %v13692_v15 = vrot.slane %v12256_v7, 1  ;;  %v4573_v55 = vadd.f32 %v12093_v31, %v4429_v20  ;;  %v12318_v37 = vmul.f32 0.75, %v12235_v5  ;;  %v13694_v52 = vld [vmem:[#allocation13_spill] sm:$0xff] }
 0x51e   : > { %4255 = vst.msk [vmem:[#allocation3 + $0x141] sm:$0xff] %vm278_vm1, %v4222_v33  ;;  %v4063_v0 = vadd.f32 %v8001_v3, %v6551_v26  ;;  %v5714_v20 = vrot.slane %v5086_v61, 1  ;;  %v5847_v36 = vsel %vm278_vm1, %v13694_v52, %v5759_v10  ;;  %v5846_v33 = vsel %vm278_vm1, %v13695_v46, %v5757_v42 }
 0x51f   : > { %v4985_v62 = vsel %vm776_vm3, %v4983_v1, %v13692_v15  ;;  %13693 = vst [vmem:[#allocation50_spill] sm:$0xff] %v12318_v37  ;;  %v4982_v1 = vsel %vm776_vm3, %v4979_v48, %v4981_v27  ;;  %v5088_v31 = vadd.f32 %v4981_v27, %v12297_v34  ;;  %v4281_v5 = vld [vmem:[#allocation3 + $0x151] sm:$0x1]  ;;  %v4054_v15 = vpop.f32.mrf.mxu0  ;;  %v4986_v32 = vrot.slane %v4875_v56, 1  ;;  %5879 = vst.msk [vmem:[%s11934_s14 + $0x68] sm:$0xff] %vm1887_vm6, %v5847_v36 }
 0x520   : > { %v5087_v9 = vadd.f32 %v4982_v1, %v12249_v41  ;;  %4300 = vst.msk [vmem:[#allocation3 + $0x150] sm:$0x1] %vm4285_vm14, %v4281_v5  ;;  %v4099_v26 = vmax.f32 %v4063_v0, 0.0  ;;  %v4055_v48 = vadd.f32 %v8001_v3, %v4054_v15  ;;  %v5089_v61 = vadd.f32 %v4985_v62, %v12292_v16  ;;  %v13697_v0 = vld [vmem:[#allocation78_spill] sm:$0xff]  ;;  %v6039_v62 = vpop.permute.xlu1 %6038 }
 0x521   : > { %5878 = vst.msk [vmem:[%s11934_s14 + $0x60] sm:$0xff] %vm1887_vm6, %v5846_v33  ;;  %v5717_v27 = vrot.slane %v5088_v31, 1  ;;  %v4280_v43 = vld [vmem:[#allocation3 + $0x139] sm:$0x1]  ;;  %v6552_v10 = vpop.f32.mrf.mxu0  ;;  %v13696_v42 = vrot.slane %v12256_v7, 1  ;;  %v5091_v56 = vadd.f32 %v4986_v32, %v12304_v30  ;;  %v12342_v1 = vmul.f32 0.75, %v4573_v55  ;;  %v6037_v33 = vpop.permute.xlu0 %6036 }
 0x522   : > { %v5715_v52 = vrot.slane %v5087_v9, 1  ;;  %4299 = vst.msk [vmem:[#allocation3 + $0x138] sm:$0x1] %vm4285_vm14, %v4280_v43  ;;  %v4227_v5 = vadd.f32 %v13697_v0, %v4099_v26  ;;  %v4097_v36 = vmax.f32 %v4055_v48, 0.0  ;;  %v4066_v31 = vadd.f32 %v8001_v3, %v6552_v10  ;;  %v13698_v7 = vld [vmem:[#allocation8_spill] sm:$0xff]  ;;  %v13699_v48 = vld [vmem:[#allocation67_spill] sm:$0xff] }
 0x523   : > { %v4987_v46 = vsel %vm776_vm3, %v13696_v42, %v4986_v32  ;;  %v4318_v15 = vld [vmem:[#allocation3 + $0x160] sm:$0x1]  ;;  %v6131_v42 = vsel %vm278_vm1, %v13698_v7, %v6039_v62  ;;  %v6130_v32 = vsel %vm278_vm1, %v12031_v18, %v6037_v33  ;;  %v4057_v16 = vpop.f32.mrf.mxu0  ;;  %v5385_v0 = vmul.f32 0.25, %v4573_v55 }
 0x524   : > { %v5090_v9 = vadd.f32 %v4987_v46, %v12258_v53  ;;  %v5718_v43 = vsel %vm776_vm3, %v5715_v52, %v5717_v27  ;;  %v5716_v26 = vsel %vm776_vm3, %v5714_v20, %v5715_v52  ;;  %4336 = vst.msk [vmem:[#allocation3 + $0x161] sm:$0x1] %vm4285_vm14, %v4318_v15  ;;  %v4225_v10 = vadd.f32 %v13699_v48, %v4097_v36  ;;  %v13700_v36 = vld [vmem:[#allocation47_spill] sm:$0xff] }
 0x525   : > { %4260 = vst.msk [vmem:[#allocation3 + $0x181] sm:$0xff] %vm278_vm1, %v4227_v5  ;;  %4265 = vst.msk [vmem:[#allocation3 + $0x199] sm:$0xff] %vm278_vm1, %v4227_v5  ;;  %v4100_v46 = vmax.f32 %v4066_v31, 0.0  ;;  %v4058_v7 = vadd.f32 %v8001_v3, %v4057_v16  ;;  %5786 = vrot.lane.b32.xlu1 %v5718_v43, %s8066_s21  ;;  %5784 = vrot.lane.b32.xlu0 %v5716_v26, %s8066_s21  ;;  %v4317_v20 = vld [vmem:[#allocation3 + $0x148] sm:$0x1]  ;;  %v5722_v27 = vrot.slane %v5091_v56, 1  ;;  %v6043_v3 = vpop.permute.xlu1 %6042 }
 0x526   : > { %6340 = vst.msk [vmem:[%s11934_s14 + $0x38] sm:$0xff] %vm1887_vm6, %v6131_v42  ;;  %6339 = vst.msk [vmem:[%s11934_s14 + $0x30] sm:$0xff] %vm1887_vm6, %v6130_v32  ;;  %v5720_v18 = vrot.slane %v5090_v9, 1  ;;  %v5719_v52 = vrot.slane %v5089_v61, 1  ;;  %v4571_v5 = vadd.f32 %v12067_v4, %v12260_v8  ;;  %v4432_v62 = vmul.f32 0.25, %v12254_v21  ;;  %v13702_v56 = vld [vmem:[#allocation52_spill] sm:$0xff]  ;;  %v6041_v21 = vpop.permute.xlu0 %6040 }
 0x527   : > { %4335 = vst.msk [vmem:[#allocation3 + $0x149] sm:$0x1] %vm4285_vm14, %v4317_v20  ;;  %v4228_v31 = vadd.f32 %v13700_v36, %v4100_v46  ;;  %v4098_v16 = vmax.f32 %v4058_v7, 0.0  ;;  %v12370_v33 = vmul.f32 0.25, %v12238_v19  ;;  %v6133_v55 = vsel %vm278_vm1, %v12052_v22, %v6043_v3  ;;  %v4380_v46 = vld [vmem:[#allocation3 + $0x140] sm:$0xff] }
 0x528   : > { %4258 = vst.msk [vmem:[#allocation3 + $0x169] sm:$0xff] %vm278_vm1, %v4225_v10  ;;  %v5723_v61 = vsel %vm776_vm3, %v5720_v18, %v5722_v27  ;;  %v5721_v4 = vsel %vm776_vm3, %v5719_v52, %v5720_v18  ;;  %v5488_v8 = vrot.slane %v5385_v0, 1  ;;  %v12383_v22 = vmul.f32 0.25, %v4571_v5 }
 0x529   : > { %13701 = vst [vmem:[#allocation65_spill] sm:$0xff] %v12370_v33  ;;  %4261 = vst.msk [vmem:[#allocation3 + $0x189] sm:$0xff] %vm278_vm1, %v4228_v31  ;;  %v4226_v9 = vadd.f32 %v13702_v56, %v4098_v16  ;;  %5790 = vrot.lane.b32.xlu1 %v5723_v61, %s8066_s21  ;;  %5788 = vrot.lane.b32.xlu0 %v5721_v4, %s8066_s21  ;;  %v12385_v15 = vmul.f32 0.75, %v4571_v5  ;;  %v4576_v42 = vadd.f32 %v12277_v45, %v4432_v62  ;;  %v13708_v5 = vld [vmem:[#allocation20_spill] sm:$0xff] }
 0x52a   : > { %4266 = vst.msk [vmem:[#allocation3 + $0x1a1] sm:$0xff] %vm278_vm1, %v4228_v31  ;;  %13703 = vst [vmem:[#allocation54_spill] sm:$0xff] %v12383_v22  ;;  %v6132_v32 = vsel %vm278_vm1, %v12179_v12, %v6041_v21  ;;  %v13705_v43 = vrot.slane %v12273_v47, 1  ;;  %v5597_v48 = vadd.f32 %v5488_v8, %v12342_v1  ;;  %v12395_v10 = vmul.f32 0.75, %v12238_v19  ;;  %v4379_v4 = vld [vmem:[#allocation3 + $0x138] sm:$0xff] }
 0x52b   : > { %6342 = vst.msk [vmem:[%s11934_s14 + $0x58] sm:$0xff] %vm1887_vm6, %v6133_v55  ;;  %13704 = vst [vmem:[#allocation44_spill] sm:$0xff] %v12385_v15  ;;  %v5485_v45 = vrot.slane %v12383_v22, 1  ;;  %v12402_v18 = vmul.f32 0.75, %v4576_v42  ;;  %v5386_v12 = vmul.f32 0.25, %v4576_v42  ;;  %v5491_v0 = vrot.slane %v12370_v33, 1 }
 0x52c   : > { %v5489_v26 = vsel %vm776_vm3, %v13705_v43, %v5488_v8  ;;  %13706 = vst [vmem:[#allocation66_spill] sm:$0xff] %v12395_v10  ;;  %4259 = vst.msk [vmem:[#allocation3 + $0x171] sm:$0xff] %vm278_vm1, %v4226_v9  ;;  %v4283_v20 = vld [vmem:[#allocation3 + $0x181] sm:$0x1]  ;;  %v4284_v27 = vld [vmem:[#allocation3 + $0x199] sm:$0x1]  ;;  %v4574_v19 = vadd.f32 %v12252_v29, %v12240_v60  ;;  %v12409_v36 = vadd.f32 %v12226_v6, %v13708_v5  ;;  %v13709_v16 = vmov %v13705_v43 }
 0x52d   : > { %6341 = vst.msk [vmem:[%s11934_s14 + $0x50] sm:$0xff] %vm1887_vm6, %v6132_v32  ;;  %v5596_v7 = vadd.f32 %v5489_v26, %v12318_v37  ;;  %13707 = vst [vmem:[#allocation61_spill] sm:$0xff] %v12402_v18  ;;  %v6000_v52 = vrot.slane %v5597_v48, 1  ;;  %v5487_v3 = vsel %vm776_vm3, %v5485_v45, %v13709_v16  ;;  %v5493_v55 = vrot.slane %v5386_v12, 1 }
 0x52e   : > { %4302 = vst.msk [vmem:[#allocation3 + $0x180] sm:$0x1] %vm4285_vm14, %v4283_v20  ;;  %4303 = vst.msk [vmem:[#allocation3 + $0x198] sm:$0x1] %vm4285_vm14, %v4284_v27  ;;  %v12416_v61 = vmul.f32 0.75, %v4380_v46  ;;  %v5595_v29 = vadd.f32 %v5487_v3, %v12385_v15  ;;  %v12419_v56 = vmul.f32 0.25, %v4574_v19 }
 0x52f   : > { %v5998_v31 = vrot.slane %v5596_v7, 1  ;;  %v4282_v8 = vld [vmem:[#allocation3 + $0x169] sm:$0x1]  ;;  %v12421_v6 = vmul.f32 0.75, %v4574_v19  ;;  %v13712_v21 = vrot.slane %v13677_v63, 1  ;;  %v13713_v42 = vrot.slane %v11741_v25, 1 }
 0x530   : > { %13710 = vst [vmem:[#allocation76_spill] sm:$0xff] %v12419_v56  ;;  %v4381_v9 = vld [vmem:[#allocation3 + $0x148] sm:$0x3]  ;;  %4301 = vst.msk [vmem:[#allocation3 + $0x168] sm:$0x1] %vm4285_vm14, %v4282_v8  ;;  %v5494_v26 = vsel %vm776_vm3, %v5491_v0, %v5493_v55  ;;  %v5600_v48 = vadd.f32 %v5493_v55, %v12402_v18  ;;  %v5997_v20 = vrot.slane %v5595_v29, 1  ;;  %v4527_v19 = vadd.f32 %v12416_v61, %v12212_v38 }
 0x531   : > { %13711 = vst [vmem:[#allocation64_spill] sm:$0xff] %v12421_v6  ;;  %v5251_v32 = vsel %vm776_vm3, %v13713_v42, %v13712_v21  ;;  %v6001_v43 = vsel %vm776_vm3, %v5998_v31, %v6000_v52  ;;  %v12432_v7 = vmul.f32 0.75, %v4381_v9  ;;  %v4320_v45 = vld [vmem:[#allocation3 + $0x190] sm:$0x1]  ;;  %v4321_v12 = vld [vmem:[#allocation3 + $0x1a8] sm:$0x1]  ;;  %v5599_v63 = vadd.f32 %v5494_v26, %v12395_v10 }
 0x532   : > { %6070 = vrot.lane.b32.xlu1 %v6001_v43, %s8066_s21  ;;  %v5490_v27 = vrot.slane %v12419_v56, 1  ;;  %4338 = vst.msk [vmem:[#allocation3 + $0x191] sm:$0x1] %vm4285_vm14, %v4320_v45  ;;  %4339 = vst.msk [vmem:[#allocation3 + $0x1a9] sm:$0x1] %vm4285_vm14, %v4321_v12  ;;  %v6005_v52 = vrot.slane %v5600_v48, 1  ;;  %v5999_v29 = vsel %vm776_vm3, %v5997_v20, %v5998_v31 }
 0x533   : > { %v4528_v5 = vadd.f32 %v12432_v7, %v4432_v62  ;;  %v12442_v16 = vmul.f32 0.75, %v4379_v4  ;;  %v12444_v3 = vld [vmem:[#allocation3 + $0x158] sm:$0xff]  ;;  %v4434_v55 = vmul.f32 0.25, %v4380_v46  ;;  %v6003_v21 = vrot.slane %v5599_v63, 1  ;;  %v12450_v38 = vld [vmem:[#allocation3 + $0x160] sm:$0x3]  ;;  %6068 = vrot.lane.b32.xlu0 %v5999_v29, %s8066_s21 }
 0x534   : > { %v4319_v8 = vld [vmem:[#allocation3 + $0x178] sm:$0x1]  ;;  %v5492_v42 = vsel %vm776_vm3, %v5490_v27, %v5491_v0  ;;  %v12448_v43 = vmul.f32 0.25, %v4527_v19  ;;  %v12455_v26 = vmul.f32 0.75, %v4527_v19  ;;  %v12459_v45 = vld [vmem:[#allocation3 + $0x150] sm:$0xff]  ;;  %v4435_v20 = vmul.f32 0.25, %v4381_v9 }
 0x535   : > { %4337 = vst.msk [vmem:[#allocation3 + $0x179] sm:$0x1] %vm4285_vm14, %v4319_v8  ;;  %v5598_v62 = vadd.f32 %v5492_v42, %v12421_v6  ;;  %v12457_v48 = vmul.f32 0.75, %v4528_v5  ;;  %v4876_v46 = vmul.f32 0.25, %v4528_v5  ;;  %v6006_v31 = vsel %vm776_vm3, %v6003_v21, %v6005_v52 }
 0x536   : > { %13714 = vst [vmem:[#allocation75_spill] sm:$0xff] %v12448_v43  ;;  %13715 = vst [vmem:[#allocation7_spill] sm:$0xff] %v12455_v26  ;;  %v4989_v0 = vrot.slane %v12448_v43, 1  ;;  %v4526_v12 = vadd.f32 %v12442_v16, %v12240_v60  ;;  %6074 = vrot.lane.b32.xlu1 %v6006_v31, %s8066_s21  ;;  %v12467_v19 = vmul.f32 0.75, %v12444_v3  ;;  %v12470_v8 = vmul.f32 0.75, %v12450_v38 }
 0x537   : > { %13716 = vst [vmem:[#allocation68_spill] sm:$0xff] %v12457_v48  ;;  %v6002_v63 = vrot.slane %v5598_v62, 1  ;;  %v4991_v27 = vrot.slane %v4876_v46, 1  ;;  %v4433_v52 = vmul.f32 0.25, %v4379_v4  ;;  %v12477_v42 = vmul.f32 0.75, %v12459_v45 }
 0x538   : > { %v12472_v5 = vmul.f32 0.25, %v4526_v12  ;;  %v12474_v29 = vmul.f32 0.75, %v4526_v12  ;;  %v4530_v46 = vadd.f32 %v12467_v19, %v4434_v55  ;;  %v4531_v12 = vadd.f32 %v12470_v8, %v4435_v20 }
 0x539   : > { %v6004_v60 = vsel %vm776_vm3, %v6002_v63, %v6003_v21  ;;  %v4992_v9 = vsel %vm776_vm3, %v4989_v0, %v4991_v27  ;;  %v5094_v62 = vadd.f32 %v4991_v27, %v12457_v48  ;;  %v4529_v4 = vadd.f32 %v12477_v42, %v4433_v52  ;;  %v13721_v63 = vld [vmem:[#allocation19_spill] sm:$0xff]  ;;  %v5761_v10 = vpop.permute.xlu0 %5760 }
 0x53a   : > { %13717 = vst [vmem:[#allocation60_spill] sm:$0xff] %v12472_v5  ;;  %13718 = vst [vmem:[#allocation53_spill] sm:$0xff] %v12474_v29  ;;  %6072 = vrot.lane.b32.xlu0 %v6004_v60, %s8066_s21  ;;  %v5093_v31 = vadd.f32 %v4992_v9, %v12455_v26  ;;  %v4988_v43 = vrot.slane %v12472_v5, 1  ;;  %v12488_v33 = vmul.f32 0.25, %v4530_v46  ;;  %v12490_v21 = vmul.f32 0.75, %v4530_v46  ;;  %v5763_v46 = vpop.permute.xlu1 %5762 }
 0x53b   : > { %v5727_v56 = vrot.slane %v5094_v62, 1  ;;  %v5351_v22 = vadd.f32 %v5251_v32, %v13721_v63  ;;  %v12494_v6 = vmul.f32 0.75, %v4531_v12  ;;  %v4877_v60 = vmul.f32 0.25, %v4531_v12  ;;  %v13725_v63 = vld [vmem:[#allocation24_spill] sm:$0xff] }
 0x53c   : > { %13719 = vst [vmem:[#allocation62_spill] sm:$0xff] %v12488_v33  ;;  %13720 = vst [vmem:[#allocation25_spill] sm:$0xff] %v12490_v21  ;;  %v5725_v27 = vrot.slane %v5093_v31, 1  ;;  %v4990_v48 = vsel %vm776_vm3, %v4988_v43, %v4989_v0  ;;  %v4994_v5 = vrot.slane %v12488_v33, 1  ;;  %v12498_v26 = vmul.f32 0.25, %v4529_v4 }
 0x53d   : > { %13722 = vst [vmem:[#allocation17_spill] sm:$0xff] %v12494_v6  ;;  %v5092_v9 = vadd.f32 %v4990_v48, %v12474_v29  ;;  %v12500_v62 = vmul.f32 0.75, %v4529_v4  ;;  %v4996_v31 = vrot.slane %v4877_v60, 1  ;;  %v5247_v43 = vrot.slane %v13725_v63, 1 }
 0x53e   : > { %13723 = vst [vmem:[#allocation55_spill] sm:$0xff] %v12498_v26  ;;  %v5728_v32 = vsel %vm776_vm3, %v5725_v27, %v5727_v56  ;;  %v4578_v0 = vadd.f32 %v12210_v14, %v4434_v55  ;;  %v5849_v12 = vsel %vm278_vm1, %v12202_v35, %v5763_v46  ;;  %v5848_v48 = vsel %vm278_vm1, %v12215_v2, %v5761_v10  ;;  %v13727_v46 = vld [vmem:[#allocation23_spill] sm:$0xff]  ;;  %v5767_v63 = vpop.permute.xlu1 %5766 }
 0x53f   : > { %13724 = vst [vmem:[#allocation43_spill] sm:$0xff] %v12500_v62  ;;  %5794 = vrot.lane.b32.xlu1 %v5728_v32, %s8066_s21  ;;  %v5724_v33 = vrot.slane %v5092_v9, 1  ;;  %v4993_v4 = vrot.slane %v12498_v26, 1  ;;  %5881 = vst.msk [vmem:[%s11934_s14 + $0x88] sm:$0xff] %vm1887_vm6, %v5849_v12  ;;  %v4997_v56 = vsel %vm776_vm3, %v4994_v5, %v4996_v31  ;;  %v5097_v60 = vadd.f32 %v4996_v31, %v12494_v6  ;;  %v5765_v31 = vpop.permute.xlu0 %5764 }
 0x540   : > { %5880 = vst.msk [vmem:[%s11934_s14 + $0x80] sm:$0xff] %vm1887_vm6, %v5848_v48  ;;  %v13726_v14 = vrot.slane %v11741_v25, 1  ;;  %v4579_v55 = vadd.f32 %v12265_v24, %v4435_v20  ;;  %v5096_v10 = vadd.f32 %v4997_v56, %v12490_v21  ;;  %v12529_v24 = vmul.f32 0.75, %v4578_v0 }
 0x541   : > { %v5726_v2 = vsel %vm776_vm3, %v5724_v33, %v5725_v27  ;;  %v4995_v9 = vsel %vm776_vm3, %v4993_v4, %v4994_v5  ;;  %v5732_v12 = vrot.slane %v5097_v60, 1  ;;  %v5851_v33 = vsel %vm278_vm1, %v12243_v57, %v5767_v63 }
 0x542   : > { %v5249_v35 = vsel %vm776_vm3, %v5247_v43, %v13726_v14  ;;  %5792 = vrot.lane.b32.xlu0 %v5726_v2, %s8066_s21  ;;  %v5095_v25 = vadd.f32 %v4995_v9, %v12500_v62  ;;  %v12527_v43 = vmul.f32 0.25, %v4578_v0  ;;  %13729 = vst [vmem:[#allocation9_spill] sm:$0xff] %v12529_v24  ;;  %v5850_v20 = vsel %vm278_vm1, %v12409_v36, %v5765_v31  ;;  %v13731_v14 = vld [vmem:[#allocation35_spill] sm:$0xff] }
 0x543   : > { %v5350_v32 = vadd.f32 %v5249_v35, %v13727_v46  ;;  %v5730_v5 = vrot.slane %v5096_v10, 1  ;;  %v12535_v27 = vmul.f32 0.75, %v4579_v55  ;;  %5883 = vst.msk [vmem:[%s11934_s14 + $0xa8] sm:$0xff] %vm1887_vm6, %v5851_v33  ;;  %5882 = vst.msk [vmem:[%s11934_s14 + $0xa0] sm:$0xff] %vm1887_vm6, %v5850_v20  ;;  %v5387_v4 = vmul.f32 0.25, %v4579_v55  ;;  %v13732_v35 = vld [vmem:[#allocation36_spill] sm:$0xff]  ;;  %v6047_v46 = vpop.permute.xlu1 %6046  ;;  %v6045_v55 = vpop.permute.xlu0 %6044 }
 0x544   : > { %13728 = vst [vmem:[#allocation77_spill] sm:$0xff] %v12527_v43  ;;  %v5729_v48 = vrot.slane %v5095_v25, 1  ;;  %v5496_v56 = vrot.slane %v12527_v43, 1  ;;  %v4577_v0 = vadd.f32 %v12232_v28, %v4433_v52  ;;  %v5253_v57 = vrot.slane %v13731_v14, 1  ;;  %v13733_v2 = vld [vmem:[#allocation39_spill] sm:$0xff] }
 0x545   : > { %13730 = vst [vmem:[#allocation11_spill] sm:$0xff] %v12535_v27  ;;  %v5733_v60 = vsel %vm776_vm3, %v5730_v5, %v5732_v12  ;;  %v5255_v36 = vrot.slane %v13732_v35, 1  ;;  %v5252_v10 = vrot.slane %v13733_v2, 1  ;;  %v5498_v63 = vrot.slane %v5387_v4, 1  ;;  %v4386_v20 = vld [vmem:[#allocation3 + $0x170] sm:$0xff] }
 0x546   : > { %5798 = vrot.lane.b32.xlu1 %v5733_v60, %s8066_s21  ;;  %v5731_v9 = vsel %vm776_vm3, %v5729_v48, %v5730_v5  ;;  %v12549_v31 = vmul.f32 0.25, %v4577_v0  ;;  %v12551_v28 = vmul.f32 0.75, %v4577_v0  ;;  %v6135_v52 = vsel %vm278_vm1, %v5351_v22, %v6047_v46  ;;  %v13736_v0 = vld [vmem:[#allocation27_spill] sm:$0xff] }
 0x547   : > { %5796 = vrot.lane.b32.xlu0 %v5731_v9, %s8066_s21  ;;  %v6134_v12 = vsel %vm278_vm1, %v5350_v32, %v6045_v55  ;;  %v5256_v25 = vsel %vm776_vm3, %v5253_v57, %v5255_v36  ;;  %v5254_v33 = vsel %vm776_vm3, %v5252_v10, %v5253_v57  ;;  %6344 = vst.msk [vmem:[%s11934_s14 + $0x78] sm:$0xff] %vm1887_vm6, %v6135_v52  ;;  %v13737_v32 = vld [vmem:[#allocation37_spill] sm:$0xff]  ;;  %v4437_v57 = vmul.f32 0.25, %v12444_v3  ;;  %v4387_v36 = vld [vmem:[#allocation3 + $0x178] sm:$0x3]  ;;  %v6051_v9 = vpop.permute.xlu1 %6050  ;;  %v6049_v46 = vpop.permute.xlu0 %6048  ;;  %v4385_v52 = vld [vmem:[#allocation3 + $0x168] sm:$0xff] }
 0x548   : > { %13734 = vst [vmem:[#allocation63_spill] sm:$0xff] %v12549_v31  ;;  %13735 = vst [vmem:[#allocation13_spill] sm:$0xff] %v12551_v28  ;;  %v5499_v5 = vsel %vm776_vm3, %v5496_v56, %v5498_v63  ;;  %v5603_v48 = vadd.f32 %v5498_v63, %v12535_v27  ;;  %v5495_v4 = vrot.slane %v12549_v31, 1  ;;  %v5353_v60 = vadd.f32 %v5256_v25, %v13736_v0 }
 0x549   : > { %6343 = vst.msk [vmem:[%s11934_s14 + $0x70] sm:$0xff] %vm1887_vm6, %v6134_v12  ;;  %v5602_v22 = vadd.f32 %v5499_v5, %v12529_v24  ;;  %v5352_v14 = vadd.f32 %v5254_v33, %v13737_v32  ;;  %v4438_v35 = vmul.f32 0.25, %v12450_v38  ;;  %v4436_v55 = vmul.f32 0.25, %v12459_v45 }
 0x54a   : > { %v6010_v2 = vrot.slane %v5603_v48, 1  ;;  %v5497_v10 = vsel %vm776_vm3, %v5495_v4, %v5496_v56  ;;  %v12572_v63 = vmul.f32 0.75, %v4386_v20  ;;  %v6137_v33 = vsel %vm278_vm1, %v5353_v60, %v6051_v9 }
 0x54b   : > { %v6008_v12 = vrot.slane %v5602_v22, 1  ;;  %v5601_v25 = vadd.f32 %v5497_v10, %v12551_v28  ;;  %v6136_v3 = vsel %vm278_vm1, %v5352_v14, %v6049_v46  ;;  %6346 = vst.msk [vmem:[%s11934_s14 + $0x98] sm:$0xff] %vm1887_vm6, %v6137_v33  ;;  %v4581_v38 = vadd.f32 %v12416_v61, %v4437_v57 }
 0x54c   : > { %6345 = vst.msk [vmem:[%s11934_s14 + $0x90] sm:$0xff] %vm1887_vm6, %v6136_v3  ;;  %v4582_v56 = vadd.f32 %v12432_v7, %v4438_v35  ;;  %v4580_v45 = vadd.f32 %v12442_v16, %v4436_v55  ;;  %v12584_v5 = vmul.f32 0.75, %v4387_v36  ;;  %v4533_v0 = vadd.f32 %v12572_v63, %v4437_v57 }
 0x54d   : > { %v6011_v48 = vsel %vm776_vm3, %v6008_v12, %v6010_v2  ;;  %v6007_v4 = vrot.slane %v5601_v25, 1  ;;  %v12588_v60 = vmul.f32 0.75, %v4385_v52  ;;  %v12591_v22 = vmul.f32 0.25, %v4581_v38 }
 0x54e   : > { %6078 = vrot.lane.b32.xlu1 %v6011_v48, %s8066_s21  ;;  %v12593_v32 = vmul.f32 0.75, %v4581_v38  ;;  %v12595_v61 = vmul.f32 0.75, %v4582_v56  ;;  %v5388_v7 = vmul.f32 0.25, %v4582_v56  ;;  %v12598_v14 = vmul.f32 0.25, %v4580_v45 }
 0x54f   : > { %13738 = vst [vmem:[#allocation15_spill] sm:$0xff] %v12591_v22  ;;  %v6009_v16 = vsel %vm776_vm3, %v6007_v4, %v6008_v12  ;;  %v12600_v10 = vmul.f32 0.75, %v4580_v45  ;;  %v4534_v2 = vadd.f32 %v12584_v5, %v4438_v35  ;;  %v5501_v57 = vrot.slane %v12591_v22, 1  ;;  %v12622_v22 = vld [vmem:[#allocation3 + $0x190] sm:$0x3] }
 0x550   : > { %13739 = vst [vmem:[#allocation78_spill] sm:$0xff] %v12598_v14  ;;  %6076 = vrot.lane.b32.xlu0 %v6009_v16, %s8066_s21  ;;  %v5503_v9 = vrot.slane %v5388_v7, 1  ;;  %v12605_v46 = vmul.f32 0.25, %v4533_v0  ;;  %v12607_v25 = vmul.f32 0.75, %v4533_v0  ;;  %v5500_v33 = vrot.slane %v12598_v14, 1  ;;  %v12620_v14 = vld [vmem:[#allocation3 + $0x188] sm:$0xff] }
 0x551   : > { %v12610_v3 = vmul.f32 0.75, %v4534_v2  ;;  %v4878_v12 = vmul.f32 0.25, %v4534_v2  ;;  %v4532_v38 = vadd.f32 %v12588_v60, %v4436_v55  ;;  %v4440_v48 = vmul.f32 0.25, %v4386_v20 }
 0x552   : > { %13740 = vst [vmem:[#allocation8_spill] sm:$0xff] %v12605_v46  ;;  %v5504_v56 = vsel %vm776_vm3, %v5501_v57, %v5503_v9  ;;  %v5606_v35 = vadd.f32 %v5503_v9, %v12595_v61  ;;  %v4999_v45 = vrot.slane %v12605_v46, 1  ;;  %v5502_v7 = vsel %vm776_vm3, %v5500_v33, %v5501_v57 }
 0x553   : > { %v5605_v4 = vadd.f32 %v5504_v56, %v12593_v32  ;;  %v5001_v0 = vrot.slane %v4878_v12, 1  ;;  %v12618_v16 = vmul.f32 0.25, %v4532_v38  ;;  %v5604_v55 = vadd.f32 %v5502_v7, %v12600_v10  ;;  %v12637_v7 = vld [vmem:[#allocation3 + $0x180] sm:$0xff] }
 0x554   : > { %v6015_v2 = vrot.slane %v5606_v35, 1  ;;  %v12625_v31 = vmul.f32 0.75, %v4532_v38  ;;  %v4441_v9 = vmul.f32 0.25, %v4387_v36  ;;  %v12632_v46 = vmul.f32 0.75, %v12620_v14 }
 0x555   : > { %v6013_v43 = vrot.slane %v5605_v4, 1  ;;  %v5002_v20 = vsel %vm776_vm3, %v4999_v45, %v5001_v0  ;;  %v5100_v56 = vadd.f32 %v5001_v0, %v12610_v3  ;;  %v4998_v57 = vrot.slane %v12618_v16, 1 }
 0x556   : > { %v6012_v33 = vrot.slane %v5604_v55, 1  ;;  %v5099_v12 = vadd.f32 %v5002_v20, %v12607_v25  ;;  %v12635_v35 = vmul.f32 0.75, %v12622_v22  ;;  %v4439_v28 = vmul.f32 0.25, %v4385_v52  ;;  %v5771_v47 = vpop.permute.xlu1 %5770 }
 0x557   : > { %v6016_v36 = vsel %vm776_vm3, %v6013_v43, %v6015_v2  ;;  %v5737_v38 = vrot.slane %v5100_v56, 1  ;;  %v5000_v4 = vsel %vm776_vm3, %v4998_v57, %v4999_v45  ;;  %v4536_v24 = vadd.f32 %v12632_v46, %v4440_v48 }
 0x558   : > { %6082 = vrot.lane.b32.xlu1 %v6016_v36, %s8066_s21  ;;  %v6014_v0 = vsel %vm776_vm3, %v6012_v33, %v6013_v43  ;;  %v5735_v55 = vrot.slane %v5099_v12, 1  ;;  %v5098_v20 = vadd.f32 %v5000_v4, %v12625_v31  ;;  %v4537_v27 = vadd.f32 %v12635_v35, %v4441_v9 }
 0x559   : > { %6080 = vrot.lane.b32.xlu0 %v6014_v0, %s8066_s21  ;;  %v12648_v26 = vmul.f32 0.75, %v12637_v7  ;;  %v4584_v2 = vadd.f32 %v12467_v19, %v4440_v48  ;;  %v4585_v52 = vadd.f32 %v12470_v8, %v4441_v9  ;;  %v12653_v43 = vmul.f32 0.25, %v4536_v24 }
 0x55a   : > { %v5738_v45 = vsel %vm776_vm3, %v5735_v55, %v5737_v38  ;;  %v5734_v56 = vrot.slane %v5098_v20, 1  ;;  %v12655_v57 = vmul.f32 0.75, %v4536_v24  ;;  %v12657_v33 = vmul.f32 0.75, %v4537_v27 }
 0x55b   : > { %v4879_v12 = vmul.f32 0.25, %v4537_v27  ;;  %v4535_v36 = vadd.f32 %v12648_v26, %v4439_v28  ;;  %v12660_v4 = vmul.f32 0.25, %v4584_v2  ;;  %v5004_v8 = vrot.slane %v12653_v43, 1 }
 0x55c   : > { %5802 = vrot.lane.b32.xlu1 %v5738_v45, %s8066_s21  ;;  %v5736_v19 = vsel %vm776_vm3, %v5734_v56, %v5735_v55  ;;  %v12665_v48 = vmul.f32 0.75, %v4584_v2  ;;  %v12667_v9 = vmul.f32 0.75, %v4585_v52  ;;  %v5389_v0 = vmul.f32 0.25, %v4585_v52 }
 0x55d   : > { %5800 = vrot.lane.b32.xlu0 %v5736_v19, %s8066_s21  ;;  %v5006_v24 = vrot.slane %v4879_v12, 1  ;;  %v12670_v38 = vmul.f32 0.25, %v4535_v36  ;;  %v12672_v27 = vmul.f32 0.75, %v4535_v36  ;;  %v5506_v20 = vrot.slane %v12660_v4, 1 }
 0x55e   : > { %v4583_v45 = vadd.f32 %v12477_v42, %v4439_v28  ;;  %v4751_v55 = vrot.slane %v11882_v13, 1  ;;  %v4753_v56 = vrot.slane %v11932_v50, 1  ;;  %v5508_v12 = vrot.slane %v5389_v0, 1 }
 0x55f   : > { %v5007_v2 = vsel %vm776_vm3, %v5004_v8, %v5006_v24  ;;  %v5103_v21 = vadd.f32 %v5006_v24, %v12657_v33  ;;  %v5003_v19 = vrot.slane %v12670_v38, 1 }
 0x560   : > { %v5102_v62 = vadd.f32 %v5007_v2, %v12655_v57  ;;  %v12682_v36 = vmul.f32 0.25, %v4583_v45  ;;  %v12684_v52 = vmul.f32 0.75, %v4583_v45  ;;  %v4754_v6 = vsel %vm776_vm3, %v4751_v55, %v4753_v56  ;;  %v13741_v45 = vld [vmem:[#allocation10_spill] sm:$0xff]  ;;  %v5769_v56 = vpop.permute.xlu0 %5768 }
 0x561   : > { %v5742_v42 = vrot.slane %v5103_v21, 1  ;;  %v5005_v13 = vsel %vm776_vm3, %v5003_v19, %v5004_v8  ;;  %v5509_v50 = vsel %vm776_vm3, %v5506_v20, %v5508_v12  ;;  %v5609_v28 = vadd.f32 %v5508_v12, %v12667_v9 }
 0x562   : > { %v5740_v29 = vrot.slane %v5102_v62, 1  ;;  %v5101_v24 = vadd.f32 %v5005_v13, %v12672_v27  ;;  %v5608_v0 = vadd.f32 %v5509_v50, %v12665_v48  ;;  %v5505_v2 = vrot.slane %v12682_v36, 1 }
 0x563   : > { %v6020_v18 = vrot.slane %v5609_v28, 1  ;;  %v4845_v15 = vadd.f32 %v4754_v6, %v13741_v45  ;;  %v4750_v21 = vrot.slane %v11906_v51, 1  ;;  %v4539_v8 = vmul.f32 0.25, %v12620_v14  ;;  %v5775_v45 = vpop.permute.xlu1 %5774 }
 0x564   : > { %v5743_v19 = vsel %vm776_vm3, %v5740_v29, %v5742_v42  ;;  %v5739_v12 = vrot.slane %v5101_v24, 1  ;;  %v6018_v62 = vrot.slane %v5608_v0, 1  ;;  %v5507_v13 = vsel %vm776_vm3, %v5505_v2, %v5506_v20  ;;  %v13742_v42 = vld [vmem:[#allocation14_spill] sm:$0xff] }
 0x565   : > { %5806 = vrot.lane.b32.xlu1 %v5743_v19, %s8066_s21  ;;  %v5607_v50 = vadd.f32 %v5507_v13, %v12684_v52  ;;  %v5853_v28 = vsel %vm278_vm1, %v4845_v15, %v5771_v47  ;;  %v4752_v37 = vsel %vm776_vm3, %v4750_v21, %v4751_v55  ;;  %v4540_v6 = vmul.f32 0.25, %v12622_v22  ;;  %v4392_v55 = vld [vmem:[#allocation3 + $0x1a0] sm:$0xff]  ;;  %v5773_v21 = vpop.permute.xlu0 %5772 }
 0x566   : > { %v5741_v51 = vsel %vm776_vm3, %v5739_v12, %v5740_v29  ;;  %v6021_v14 = vsel %vm776_vm3, %v6018_v62, %v6020_v18  ;;  %5885 = vst.msk [vmem:[%s11934_s14 + $0xc8] sm:$0xff] %vm1887_vm6, %v5853_v28  ;;  %v4844_v24 = vadd.f32 %v4752_v37, %v13742_v42  ;;  %v4587_v20 = vadd.f32 %v4539_v8, %v12572_v63  ;;  %v4391_v8 = vld [vmem:[#allocation3 + $0x198] sm:$0xff] }
 0x567   : > { %5804 = vrot.lane.b32.xlu0 %v5741_v51, %s8066_s21  ;;  %v6017_v0 = vrot.slane %v5607_v50, 1  ;;  %v4588_v47 = vadd.f32 %v4540_v6, %v12584_v5  ;;  %v4538_v15 = vmul.f32 0.25, %v12637_v7  ;;  %v4756_v22 = vrot.slane %v11891_v58, 1 }
 0x568   : > { %v5852_v29 = vsel %vm278_vm1, %v4844_v24, %v5769_v56  ;;  %v12714_v18 = vmul.f32 0.25, %v4587_v20  ;;  %v12716_v2 = vmul.f32 0.75, %v4587_v20  ;;  %v4758_v37 = vrot.slane %v11941_v49, 1  ;;  %v4393_v56 = vld [vmem:[#allocation3 + $0x1a8] sm:$0x3] }
 0x569   : > { %6086 = vrot.lane.b32.xlu1 %v6021_v14, %s8066_s21  ;;  %v6019_v63 = vsel %vm776_vm3, %v6017_v0, %v6018_v62  ;;  %5884 = vst.msk [vmem:[%s11934_s14 + $0xc0] sm:$0xff] %vm1887_vm6, %v5852_v29  ;;  %v12723_v5 = vmul.f32 0.75, %v4588_v47  ;;  %v5390_v7 = vmul.f32 0.25, %v4588_v47  ;;  %v4586_v58 = vadd.f32 %v4538_v15, %v12588_v60 }
 0x56a   : > { %v5511_v19 = vrot.slane %v12714_v18, 1  ;;  %v4759_v12 = vsel %vm776_vm3, %v4756_v22, %v4758_v37  ;;  %v4755_v49 = vrot.slane %v11910_v39, 1  ;;  %v4542_v13 = vmul.f32 0.25, %v4392_v55 }
 0x56b   : > { %6084 = vrot.lane.b32.xlu0 %v6019_v63, %s8066_s21  ;;  %v5513_v62 = vrot.slane %v5390_v7, 1  ;;  %v12730_v50 = vmul.f32 0.25, %v4586_v58  ;;  %v12732_v28 = vmul.f32 0.75, %v4586_v58  ;;  %v4847_v60 = vadd.f32 %v4759_v12, %v11884_v44  ;;  %v13743_v44 = vld [vmem:[#allocation16_spill] sm:$0xff]  ;;  %v6055_v7 = vpop.permute.xlu1 %6054  ;;  %v6053_v58 = vpop.permute.xlu0 %6052 }
 0x56c   : > { %v4757_v6 = vsel %vm776_vm3, %v4755_v49, %v4756_v22  ;;  %v4543_v51 = vmul.f32 0.25, %v4393_v56  ;;  %v4590_v14 = vadd.f32 %v4542_v13, %v12632_v46  ;;  %v4541_v42 = vmul.f32 0.25, %v4391_v8 }
 0x56d   : > { %v5514_v24 = vsel %vm776_vm3, %v5511_v19, %v5513_v62  ;;  %v5612_v39 = vadd.f32 %v5513_v62, %v12723_v5  ;;  %v5510_v20 = vrot.slane %v12730_v50, 1  ;;  %v5855_v0 = vsel %vm278_vm1, %v4847_v60, %v5775_v45 }
 0x56e   : > { %v5611_v47 = vadd.f32 %v5514_v24, %v12716_v2  ;;  %5887 = vst.msk [vmem:[%s11934_s14 + $0xe8] sm:$0xff] %vm1887_vm6, %v5855_v0  ;;  %v4846_v15 = vadd.f32 %v4757_v6, %v13743_v44  ;;  %v4591_v22 = vadd.f32 %v4543_v51, %v12635_v35  ;;  %v12746_v55 = vmul.f32 0.25, %v4590_v14  ;;  %v13744_v6 = vld [vmem:[#allocation21_spill] sm:$0xff] }
 0x56f   : > { %v6025_v46 = vrot.slane %v5612_v39, 1  ;;  %v5512_v29 = vsel %vm776_vm3, %v5510_v20, %v5511_v19  ;;  %v12749_v37 = vmul.f32 0.75, %v4590_v14  ;;  %v4589_v63 = vadd.f32 %v4541_v42, %v12648_v26  ;;  %v13745_v42 = vld [vmem:[#allocation26_spill] sm:$0xff]  ;;  %v13746_v39 = vld [vmem:[#allocation28_spill] sm:$0xff]  ;;  %v13747_v44 = vld [vmem:[#allocation29_spill] sm:$0xff] }
 0x570   : > { %v6023_v45 = vrot.slane %v5611_v47, 1  ;;  %v5610_v56 = vadd.f32 %v5512_v29, %v12732_v28  ;;  %v5854_v8 = vsel %vm278_vm1, %v4846_v15, %v5773_v21  ;;  %v12754_v12 = vmul.f32 0.75, %v4591_v22 }
 0x571   : > { %5886 = vst.msk [vmem:[%s11934_s14 + $0xe0] sm:$0xff] %vm1887_vm6, %v5854_v8  ;;  %v5391_v35 = vmul.f32 0.25, %v4591_v22  ;;  %v5516_v49 = vrot.slane %v12746_v55, 1  ;;  %v12759_v13 = vmul.f32 0.25, %v4589_v63  ;;  %v12761_v19 = vmul.f32 0.75, %v4589_v63  ;;  %v13748_v22 = vld [vmem:[#allocation38_spill] sm:$0xff] }
 0x572   : > { %v6026_v26 = vsel %vm776_vm3, %v6023_v45, %v6025_v46  ;;  %v6022_v62 = vrot.slane %v5610_v56, 1  ;;  %v5258_v60 = vrot.slane %v11912_v17, 1  ;;  %v5260_v51 = vrot.slane %v13744_v6, 1  ;;  %v13749_v56 = vld [vmem:[#allocation12_spill] sm:$0xff] }
 0x573   : > { %6090 = vrot.lane.b32.xlu1 %v6026_v26, %s8066_s21  ;;  %v5518_v21 = vrot.slane %v5391_v35, 1  ;;  %v5515_v14 = vrot.slane %v12759_v13, 1  ;;  %v5257_v24 = vrot.slane %v13745_v42, 1  ;;  %v5263_v20 = vrot.slane %v13746_v39, 1  ;;  %v6059_v35 = vpop.permute.xlu1 %6058  ;;  %v6057_v26 = vpop.permute.xlu0 %6056 }
 0x574   : > { %v6024_v0 = vsel %vm776_vm3, %v6022_v62, %v6023_v45  ;;  %v5261_v47 = vsel %vm776_vm3, %v5258_v60, %v5260_v51  ;;  %v5265_v15 = vrot.slane %v13747_v44, 1  ;;  %v5262_v46 = vrot.slane %v13748_v22, 1  ;;  %v13751_v44 = vld [vmem:[#allocation18_spill] sm:$0xff] }
 0x575   : > { %6088 = vrot.lane.b32.xlu0 %v6024_v0, %s8066_s21  ;;  %v5519_v17 = vsel %vm776_vm3, %v5516_v49, %v5518_v21  ;;  %v5615_v29 = vadd.f32 %v5518_v21, %v12754_v12  ;;  %v5517_v63 = vsel %vm776_vm3, %v5515_v14, %v5516_v49  ;;  %v5355_v8 = vadd.f32 %v5261_v47, %v13749_v56  ;;  %v13750_v0 = vld [vmem:[#allocation22_spill] sm:$0xff] }
 0x576   : > { %v5614_v45 = vadd.f32 %v5519_v17, %v12749_v37  ;;  %v5613_v62 = vadd.f32 %v5517_v63, %v12761_v19  ;;  %v5259_v6 = vsel %vm776_vm3, %v5257_v24, %v5258_v60  ;;  %v5266_v51 = vsel %vm776_vm3, %v5263_v20, %v5265_v15  ;;  %v13752_v15 = vld [vmem:[#allocation30_spill] sm:$0xff] }
 0x577   : > { %v6030_v42 = vrot.slane %v5615_v29, 1  ;;  %v6139_v39 = vsel %vm278_vm1, %v5355_v8, %v6055_v7  ;;  %v5354_v21 = vadd.f32 %v5259_v6, %v13750_v0  ;;  %v5357_v49 = vadd.f32 %v5266_v51, %v13751_v44  ;;  %v13753_v29 = vld [vmem:[#allocation32_spill] sm:$0xff]  ;;  %v5779_v56 = vpop.permute.xlu1 %5778  ;;  %v5777_v8 = vpop.permute.xlu0 %5776  ;;  %v13755_v51 = vld [vmem:[#allocation46_spill] sm:$0xff] }
 0x578   : > { %v6028_v14 = vrot.slane %v5614_v45, 1  ;;  %v6027_v47 = vrot.slane %v5613_v62, 1  ;;  %6348 = vst.msk [vmem:[%s11934_s14 + $0xb8] sm:$0xff] %vm1887_vm6, %v6139_v39  ;;  %v5264_v22 = vsel %vm776_vm3, %v5262_v46, %v5263_v20  ;;  %v4761_v17 = vrot.slane %v12079_v11, 1  ;;  %v13754_v11 = vld [vmem:[#allocation69_spill] sm:$0xff]  ;;  %v13756_v39 = vld [vmem:[#allocation40_spill] sm:$0xff] }
 0x579   : > { %v6138_v60 = vsel %vm278_vm1, %v5354_v21, %v6053_v58  ;;  %v6141_v24 = vsel %vm278_vm1, %v5357_v49, %v6059_v35  ;;  %v5356_v7 = vadd.f32 %v5264_v22, %v13752_v15  ;;  %v4763_v63 = vrot.slane %v13753_v29, 1  ;;  %v13757_v49 = vld [vmem:[#allocation74_spill] sm:$0xff] }
 0x57a   : > { %v6031_v45 = vsel %vm776_vm3, %v6028_v14, %v6030_v42  ;;  %v6029_v62 = vsel %vm776_vm3, %v6027_v47, %v6028_v14  ;;  %6347 = vst.msk [vmem:[%s11934_s14 + $0xb0] sm:$0xff] %vm1887_vm6, %v6138_v60  ;;  %6350 = vst.msk [vmem:[%s11934_s14 + $0xd8] sm:$0xff] %vm1887_vm6, %v6141_v24  ;;  %v4760_v20 = vrot.slane %v13754_v11, 1  ;;  %v4766_v58 = vrot.slane %v12085_v59, 1  ;;  %v13758_v60 = vld [vmem:[#allocation72_spill] sm:$0xff] }
 0x57b   : > { %6094 = vrot.lane.b32.xlu1 %v6031_v45, %s8066_s21  ;;  %6092 = vrot.lane.b32.xlu0 %v6029_v62, %s8066_s21  ;;  %v6140_v46 = vsel %vm278_vm1, %v5356_v7, %v6057_v26  ;;  %v4764_v35 = vsel %vm776_vm3, %v4761_v17, %v4763_v63  ;;  %v4768_v6 = vrot.slane %v12127_v23, 1  ;;  %v4765_v42 = vrot.slane %v13755_v51, 1  ;;  %v5783_v47 = vpop.permute.xlu1 %5782  ;;  %v5781_v22 = vpop.permute.xlu0 %5780  ;;  %v13761_v45 = vld [vmem:[#allocation42_spill] sm:$0xff] }
 0x57c   : > { %6349 = vst.msk [vmem:[%s11934_s14 + $0xd0] sm:$0xff] %vm1887_vm6, %v6140_v46  ;;  %v4849_v0 = vadd.f32 %v4764_v35, %v13756_v39  ;;  %v4762_v21 = vsel %vm776_vm3, %v4760_v20, %v4761_v17  ;;  %v5268_v59 = vrot.slane %v12098_v40, 1  ;;  %v5270_v44 = vrot.slane %v12132_v54, 1  ;;  %v13759_v17 = vld [vmem:[#allocation41_spill] sm:$0xff]  ;;  %v13760_v40 = vld [vmem:[#allocation70_spill] sm:$0xff] }
 0x57d   : > { %v4848_v26 = vadd.f32 %v4762_v21, %v13757_v49  ;;  %v4769_v14 = vsel %vm776_vm3, %v4766_v58, %v4768_v6  ;;  %v4767_v23 = vsel %vm776_vm3, %v4765_v42, %v4766_v58  ;;  %v5267_v24 = vrot.slane %v13758_v60, 1  ;;  %v13762_v20 = vld [vmem:[#allocation73_spill] sm:$0xff]  ;;  %v13764_v51 = vld [vmem:[#allocation34_spill] sm:$0xff] }
 0x57e   : > { %v5857_v15 = vsel %vm278_vm1, %v4849_v0, %v5779_v56  ;;  %v4851_v7 = vadd.f32 %v4769_v14, %v13759_v17  ;;  %v4850_v29 = vadd.f32 %v4767_v23, %v13760_v40  ;;  %v5271_v54 = vsel %vm776_vm3, %v5268_v59, %v5270_v44  ;;  %v13763_v35 = vld [vmem:[#allocation45_spill] sm:$0xff]  ;;  %v13765_v0 = vld [vmem:[#allocation71_spill] sm:$0xff] }
 0x57f   : > { %5889 = vst.msk [vmem:[%s11934_s14 + $0x108] sm:$0xff] %vm1887_vm6, %v5857_v15  ;;  %v5856_v63 = vsel %vm278_vm1, %v4848_v26, %v5777_v8  ;;  %v5359_v62 = vadd.f32 %v5271_v54, %v13761_v45  ;;  %v5269_v11 = vsel %vm776_vm3, %v5267_v24, %v5268_v59  ;;  %v5273_v58 = vrot.slane %v13762_v20, 1  ;;  %v6063_v8 = vpop.permute.xlu1 %6062  ;;  %v6061_v39 = vpop.permute.xlu0 %6060  ;;  %v13766_v26 = vld [vmem:[#allocation31_spill] sm:$0xff]  ;;  %v13767_v60 = vld [vmem:[#allocation33_spill] sm:$0xff] }
 0x580   : > { %5888 = vst.msk [vmem:[%s11934_s14 + $0x100] sm:$0xff] %vm1887_vm6, %v5856_v63  ;;  %v5859_v56 = vsel %vm278_vm1, %v4851_v7, %v5783_v47  ;;  %v5858_v46 = vsel %vm278_vm1, %v4850_v29, %v5781_v22  ;;  %v5358_v6 = vadd.f32 %v5269_v11, %v13763_v35  ;;  %v5275_v42 = vrot.slane %v13764_v51, 1  ;;  %v13768_v29 = vld [vmem:[#allocation59_spill] sm:$0xff]  ;;  %v13770_v51 = vld [vmem:[#allocation56_spill] sm:$0xff] }
 0x581   : > { %5891 = vst.msk [vmem:[%s11934_s14 + $0x128] sm:$0xff] %vm1887_vm6, %v5859_v56  ;;  %5890 = vst.msk [vmem:[%s11934_s14 + $0x120] sm:$0xff] %vm1887_vm6, %v5858_v46  ;;  %v5272_v21 = vrot.slane %v13765_v0, 1  ;;  %v6143_v59 = vsel %vm278_vm1, %v5359_v62, %v6063_v8  ;;  %v4773_v7 = vrot.slane %v12297_v34, 1  ;;  %v4771_v40 = vrot.slane %v12249_v41, 1  ;;  %v13769_v56 = vld [vmem:[#allocation49_spill] sm:$0xff] }
 0x582   : > { %v6142_v44 = vsel %vm278_vm1, %v5358_v6, %v6061_v39  ;;  %v5276_v49 = vsel %vm776_vm3, %v5273_v58, %v5275_v42  ;;  %6352 = vst.msk [vmem:[%s11934_s14 + $0xf8] sm:$0xff] %vm1887_vm6, %v6143_v59  ;;  %v4770_v54 = vrot.slane %v13768_v29, 1  ;;  %v4776_v45 = vrot.slane %v12258_v53, 1 }
 0x583   : > { %6351 = vst.msk [vmem:[%s11934_s14 + $0xf0] sm:$0xff] %vm1887_vm6, %v6142_v44  ;;  %v5361_v14 = vadd.f32 %v5276_v49, %v13766_v26  ;;  %v5274_v47 = vsel %vm776_vm3, %v5272_v21, %v5273_v58  ;;  %v6067_v23 = vpop.permute.xlu1 %6066  ;;  %v4774_v63 = vsel %vm776_vm3, %v4771_v40, %v4773_v7  ;;  %v5293_v11 = vrot.slane %v12593_v32, 1  ;;  %v13773_v7 = vld [vmem:[#allocation58_spill] sm:$0xff] }
 0x584   : > { %v5360_v24 = vadd.f32 %v5274_v47, %v13767_v60  ;;  %v4772_v62 = vsel %vm776_vm3, %v4770_v54, %v4771_v40  ;;  %v5295_v20 = vrot.slane %v12595_v61, 1  ;;  %v5292_v58 = vrot.slane %v12600_v10, 1 }
 0x585   : > { %v6145_v22 = vsel %vm278_vm1, %v5361_v14, %v6067_v23  ;;  %v4853_v34 = vadd.f32 %v4774_v63, %v13769_v56  ;;  %v4791_v46 = vrot.slane %v12607_v25, 1  ;;  %v4793_v41 = vrot.slane %v12610_v3, 1  ;;  %v13776_v56 = vld [vmem:[#allocation61_spill] sm:$0xff] }
 0x586   : > { %6354 = vst.msk [vmem:[%s11934_s14 + $0x118] sm:$0xff] %vm1887_vm6, %v6145_v22  ;;  %v6065_v15 = vpop.permute.xlu0 %6064  ;;  %v4790_v35 = vrot.slane %v12625_v31, 1  ;;  %v12869_v6 = vsel %vm776_vm3, %v5293_v11, %v5295_v20  ;;  %v12872_v53 = vsel %vm776_vm3, %v5292_v58, %v5293_v11  ;;  %v4796_v32 = vrot.slane %v12655_v57, 1  ;;  %v13771_v31 = vld [vmem:[#allocation51_spill] sm:$0xff]  ;;  %v13774_v11 = vld [vmem:[#allocation50_spill] sm:$0xff] }
 0x587   : > { %v6144_v17 = vsel %vm278_vm1, %v5360_v24, %v6065_v15  ;;  %v4798_v61 = vrot.slane %v12657_v33, 1  ;;  %v4852_v10 = vadd.f32 %v4772_v62, %v13770_v51  ;;  %v4778_v42 = vrot.slane %v12304_v30, 1  ;;  %v13772_v15 = vld [vmem:[#allocation48_spill] sm:$0xff] }
 0x588   : > { %6353 = vst.msk [vmem:[%s11934_s14 + $0x110] sm:$0xff] %vm1887_vm6, %v6144_v17  ;;  %v12879_v25 = vsel %vm776_vm3, %v4791_v46, %v4793_v41  ;;  %v4792_v3 = vsel %vm776_vm3, %v4790_v35, %v4791_v46  ;;  %v4775_v8 = vrot.slane %v13771_v31, 1  ;;  %v4795_v57 = vrot.slane %v12672_v27, 1  ;;  %v13778_v35 = vld [vmem:[#allocation66_spill] sm:$0xff]  ;;  %v13779_v51 = vld [vmem:[#allocation64_spill] sm:$0xff] }
 0x589   : > { %v12884_v39 = vadd.f32 %v4792_v3, %v12618_v16  ;;  %v4799_v0 = vsel %vm776_vm3, %v4796_v32, %v4798_v61  ;;  %v5298_v21 = vrot.slane %v12665_v48, 1  ;;  %v5300_v30 = vrot.slane %v12667_v9, 1  ;;  %v13780_v31 = vld [vmem:[#allocation54_spill] sm:$0xff] }
 0x58a   : > { %v12889_v33 = vadd.f32 %v4799_v0, %v12653_v43  ;;  %v5297_v59 = vrot.slane %v12684_v52, 1  ;;  %v4797_v44 = vsel %vm776_vm3, %v4795_v57, %v4796_v32  ;;  %v5303_v49 = vrot.slane %v12716_v2, 1 }
 0x58b   : > { %v5305_v16 = vrot.slane %v12723_v5, 1  ;;  %v5302_v26 = vrot.slane %v12732_v28, 1  ;;  %v12899_v14 = vadd.f32 %v4797_v44, %v12670_v38  ;;  %v5301_v43 = vsel %vm776_vm3, %v5298_v21, %v5300_v30 }
 0x58c   : > { %v5299_v27 = vsel %vm776_vm3, %v5297_v59, %v5298_v21  ;;  %v5308_v48 = vrot.slane %v12749_v37, 1  ;;  %v12905_v9 = vadd.f32 %v5301_v43, %v12660_v4  ;;  %v5310_v37 = vrot.slane %v12754_v12, 1  ;;  %v13781_v21 = vld [vmem:[#allocation65_spill] sm:$0xff]  ;;  %v13783_v43 = vld [vmem:[#allocation76_spill] sm:$0xff] }
 0x58d   : > { %v12908_v52 = vadd.f32 %v5299_v27, %v12682_v36  ;;  %v5306_v2 = vsel %vm776_vm3, %v5303_v49, %v5305_v16  ;;  %v5304_v5 = vsel %vm776_vm3, %v5302_v26, %v5303_v49  ;;  %v5307_v4 = vrot.slane %v12761_v19, 1  ;;  %v13782_v49 = vld [vmem:[#allocation68_spill] sm:$0xff] }
 0x58e   : > { %v12913_v38 = vadd.f32 %v5306_v2, %v12714_v18  ;;  %v12916_v28 = vadd.f32 %v5304_v5, %v12730_v50  ;;  %v4779_v36 = vsel %vm776_vm3, %v4776_v45, %v4778_v42  ;;  %v4777_v22 = vsel %vm776_vm3, %v4775_v8, %v4776_v45 }
 0x58f   : > { %v5311_v18 = vsel %vm776_vm3, %v5308_v48, %v5310_v37  ;;  %v5309_v50 = vsel %vm776_vm3, %v5307_v4, %v5308_v48  ;;  %v4855_v17 = vadd.f32 %v4779_v36, %v13772_v15  ;;  %v4854_v40 = vadd.f32 %v4777_v22, %v13773_v7  ;;  %v13784_v48 = vld [vmem:[#allocation7_spill] sm:$0xff]  ;;  %v13785_v37 = vld [vmem:[#allocation53_spill] sm:$0xff] }
 0x590   : > { %v12931_v12 = vadd.f32 %v5311_v18, %v12746_v55  ;;  %v12934_v19 = vadd.f32 %v5309_v50, %v12759_v13  ;;  %v5280_v29 = vrot.slane %v12342_v1, 1  ;;  %v5278_v20 = vrot.slane %v13774_v11, 1  ;;  %v13775_v55 = vld [vmem:[#allocation44_spill] sm:$0xff]  ;;  %v13786_v36 = vld [vmem:[#allocation75_spill] sm:$0xff] }
 0x591   : > { %v5277_v13 = vrot.slane %v13775_v55, 1  ;;  %v5285_v1 = vrot.slane %v13776_v56, 1  ;;  %v5283_v32 = vrot.slane %v13778_v35, 1  ;;  %v4783_v16 = vrot.slane %v13782_v49, 1  ;;  %v13788_v15 = vld [vmem:[#allocation43_spill] sm:$0xff]  ;;  %v13791_v55 = vld [vmem:[#allocation62_spill] sm:$0xff] }
 0x592   : > { %v5281_v58 = vsel %vm776_vm3, %v5278_v20, %v5280_v29  ;;  %v4781_v2 = vrot.slane %v13784_v48, 1  ;;  %v4780_v4 = vrot.slane %v13785_v37, 1  ;;  %v13792_v56 = vld [vmem:[#allocation55_spill] sm:$0xff] }
 0x593   : > { %v5279_v41 = vsel %vm776_vm3, %v5277_v13, %v5278_v20  ;;  %v5286_v3 = vsel %vm776_vm3, %v5283_v32, %v5285_v1 }
 0x594   : > { %v5362_v8 = vadd.f32 %v5279_v41, %v13780_v31  ;;  %v5365_v30 = vadd.f32 %v5286_v3, %v13781_v21 }
 0x597   : > { %v5787_v47 = vpop.permute.xlu1 %5786  ;;  %v5785_v23 = vpop.permute.xlu0 %5784 }
 0x598   : > { %v5861_v60 = vsel %vm278_vm1, %v4853_v34, %v5787_v47  ;;  %v5860_v24 = vsel %vm278_vm1, %v4852_v10, %v5785_v23  ;;  %v13777_v34 = vld [vmem:[#allocation57_spill] sm:$0xff]  ;;  %v5282_v10 = vrot.slane %v13779_v51, 1  ;;  %v4784_v23 = vsel %vm776_vm3, %v4781_v2, %v4783_v16  ;;  %v13798_v16 = vld [vmem:[#allocation15_spill] sm:$0xff] }
 0x599   : > { %5893 = vst.msk [vmem:[%s11934_s14 + $0x148] sm:$0xff] %vm1887_vm6, %v5861_v60  ;;  %5892 = vst.msk [vmem:[%s11934_s14 + $0x140] sm:$0xff] %vm1887_vm6, %v5860_v24  ;;  %v5363_v46 = vadd.f32 %v5281_v58, %v13777_v34  ;;  %v4857_v22 = vadd.f32 %v4784_v23, %v13786_v36  ;;  %v4782_v60 = vsel %vm776_vm3, %v4780_v4, %v4781_v2  ;;  %v13787_v24 = vld [vmem:[#allocation17_spill] sm:$0xff]  ;;  %v13793_v34 = vld [vmem:[#allocation11_spill] sm:$0xff] }
 0x59a   : > { %v5284_v59 = vsel %vm776_vm3, %v5282_v10, %v5283_v32  ;;  %v4788_v18 = vrot.slane %v13787_v24, 1  ;;  %v13795_v10 = vld [vmem:[#allocation13_spill] sm:$0xff]  ;;  %v13800_v4 = vld [vmem:[#allocation8_spill] sm:$0xff] }
 0x59b   : > { %v5791_v54 = vpop.permute.xlu1 %5790  ;;  %v5789_v63 = vpop.permute.xlu0 %5788  ;;  %v5364_v27 = vadd.f32 %v5284_v59, %v13783_v43 }
 0x59c   : > { %v5863_v45 = vsel %vm278_vm1, %v4855_v17, %v5791_v54  ;;  %v5862_v62 = vsel %vm278_vm1, %v4854_v40, %v5789_v63  ;;  %v4785_v17 = vrot.slane %v13788_v15, 1  ;;  %v13789_v40 = vld [vmem:[#allocation25_spill] sm:$0xff]  ;;  %v13790_v54 = vld [vmem:[#allocation60_spill] sm:$0xff] }
 0x59d   : > { %5895 = vst.msk [vmem:[%s11934_s14 + $0x168] sm:$0xff] %vm1887_vm6, %v5863_v45  ;;  %5894 = vst.msk [vmem:[%s11934_s14 + $0x160] sm:$0xff] %vm1887_vm6, %v5862_v62  ;;  %v4786_v29 = vrot.slane %v13789_v40, 1  ;;  %v4856_v63 = vadd.f32 %v4782_v60, %v13790_v54 }
 0x59f   : > { %v4789_v62 = vsel %vm776_vm3, %v4786_v29, %v4788_v18  ;;  %v4787_v20 = vsel %vm776_vm3, %v4785_v17, %v4786_v29 }
 0x5a0   : > { %v4859_v13 = vadd.f32 %v4789_v62, %v13791_v55  ;;  %v4858_v1 = vadd.f32 %v4787_v20, %v13792_v56 }
 0x5a4   : > { %v6071_v61 = vpop.permute.xlu1 %6070 }
 0x5a5   : > { %v6147_v42 = vsel %vm278_vm1, %v5363_v46, %v6071_v61  ;;  %v6069_v0 = vpop.permute.xlu0 %6068  ;;  %v5290_v46 = vrot.slane %v13793_v34, 1  ;;  %v13794_v61 = vld [vmem:[#allocation9_spill] sm:$0xff] }
 0x5a6   : > { %6356 = vst.msk [vmem:[%s11934_s14 + $0x138] sm:$0xff] %vm1887_vm6, %v6147_v42  ;;  %v6146_v57 = vsel %vm278_vm1, %v5362_v8, %v6069_v0  ;;  %v5288_v51 = vrot.slane %v13794_v61, 1  ;;  %v5287_v42 = vrot.slane %v13795_v10, 1  ;;  %v13796_v8 = vld [vmem:[#allocation77_spill] sm:$0xff] }
 0x5a7   : > { %6355 = vst.msk [vmem:[%s11934_s14 + $0x130] sm:$0xff] %vm1887_vm6, %v6146_v57 }
 0x5a8   : > { %v6075_v44 = vpop.permute.xlu1 %6074  ;;  %v5291_v3 = vsel %vm776_vm3, %v5288_v51, %v5290_v46  ;;  %v5289_v31 = vsel %vm776_vm3, %v5287_v42, %v5288_v51 }
 0x5a9   : > { %v6149_v26 = vsel %vm278_vm1, %v5365_v30, %v6075_v44  ;;  %v5367_v0 = vadd.f32 %v5291_v3, %v13796_v8  ;;  %v13797_v30 = vld [vmem:[#allocation63_spill] sm:$0xff] }
 0x5aa   : > { %6358 = vst.msk [vmem:[%s11934_s14 + $0x158] sm:$0xff] %vm1887_vm6, %v6149_v26  ;;  %v5366_v59 = vadd.f32 %v5289_v31, %v13797_v30  ;;  %v5369_v26 = vadd.f32 %v12869_v6, %v13798_v16 }
 0x5ac   : > { %v6073_v5 = vpop.permute.xlu0 %6072 }
 0x5ad   : > { %v6148_v47 = vsel %vm278_vm1, %v5364_v27, %v6073_v5  ;;  %v13799_v27 = vld [vmem:[#allocation78_spill] sm:$0xff] }
 0x5ae   : > { %6357 = vst.msk [vmem:[%s11934_s14 + $0x150] sm:$0xff] %vm1887_vm6, %v6148_v47  ;;  %v5368_v48 = vadd.f32 %v12872_v53, %v13799_v27  ;;  %v4861_v47 = vadd.f32 %v12879_v25, %v13800_v4 }
 0x5b1   : > { %v5795_v50 = vpop.permute.xlu1 %5794 }
 0x5b2   : > { %v5865_v7 = vsel %vm278_vm1, %v4857_v22, %v5795_v50 }
 0x5b3   : > { %5897 = vst.msk [vmem:[%s11934_s14 + $0x188] sm:$0xff] %vm1887_vm6, %v5865_v7 }
 0x5b4   : > { %v5793_v45 = vpop.permute.xlu0 %5792 }
 0x5b5   : > { %v5864_v11 = vsel %vm278_vm1, %v4856_v63, %v5793_v45 }
 0x5b6   : > { %5896 = vst.msk [vmem:[%s11934_s14 + $0x180] sm:$0xff] %vm1887_vm6, %v5864_v11 }
 0x5b8   : > { %v5799_v58 = vpop.permute.xlu1 %5798 }
 0x5b9   : > { %v5867_v41 = vsel %vm278_vm1, %v4859_v13, %v5799_v58  ;;  %v5797_v35 = vpop.permute.xlu0 %5796 }
 0x5ba   : > { %5899 = vst.msk [vmem:[%s11934_s14 + $0x1a8] sm:$0xff] %vm1887_vm6, %v5867_v41  ;;  %v5866_v32 = vsel %vm278_vm1, %v4858_v1, %v5797_v35 }
 0x5bb   : > { %5898 = vst.msk [vmem:[%s11934_s14 + $0x1a0] sm:$0xff] %vm1887_vm6, %v5866_v32 }
 0x5c0   : > { %v6079_v57 = vpop.permute.xlu1 %6078 }
 0x5c1   : > { %v6151_v21 = vsel %vm278_vm1, %v5367_v0, %v6079_v57 }
 0x5c2   : > { %6360 = vst.msk [vmem:[%s11934_s14 + $0x178] sm:$0xff] %vm1887_vm6, %v6151_v21  ;;  %v6077_v44 = vpop.permute.xlu0 %6076 }
 0x5c3   : > { %v6150_v49 = vsel %vm278_vm1, %v5366_v59, %v6077_v44 }
 0x5c4   : > { %6359 = vst.msk [vmem:[%s11934_s14 + $0x170] sm:$0xff] %vm1887_vm6, %v6150_v49 }
 0x5ca   : > { %v6083_v43 = vpop.permute.xlu1 %6082 }
 0x5cb   : > { %v6153_v2 = vsel %vm278_vm1, %v5369_v26, %v6083_v43  ;;  %v6081_v5 = vpop.permute.xlu0 %6080 }
 0x5cc   : > { %6362 = vst.msk [vmem:[%s11934_s14 + $0x198] sm:$0xff] %vm1887_vm6, %v6153_v2  ;;  %v6152_v37 = vsel %vm278_vm1, %v5368_v48, %v6081_v5 }
 0x5cd   : > { %6361 = vst.msk [vmem:[%s11934_s14 + $0x190] sm:$0xff] %vm1887_vm6, %v6152_v37 }
 0x5ce   : > { %v5803_v6 = vpop.permute.xlu1 %5802 }
 0x5cf   : > { %v5869_v23 = vsel %vm278_vm1, %v4861_v47, %v5803_v6  ;;  %v5801_v36 = vpop.permute.xlu0 %5800 }
 0x5d0   : > { %5901 = vst.msk [vmem:[%s11934_s14 + $0x1c8] sm:$0xff] %vm1887_vm6, %v5869_v23  ;;  %v5868_v53 = vsel %vm278_vm1, %v12884_v39, %v5801_v36 }
 0x5d1   : > { %5900 = vst.msk [vmem:[%s11934_s14 + $0x1c0] sm:$0xff] %vm1887_vm6, %v5868_v53 }
 0x5d7   : > { %v5807_v22 = vpop.permute.xlu1 %5806 }
 0x5d8   : > { %v5871_v60 = vsel %vm278_vm1, %v12889_v33, %v5807_v22 }
 0x5d9   : > { %5903 = vst.msk [vmem:[%s11934_s14 + $0x1e8] sm:$0xff] %vm1887_vm6, %v5871_v60  ;;  %v5805_v25 = vpop.permute.xlu0 %5804 }
 0x5da   : > { %v5870_v24 = vsel %vm278_vm1, %v12899_v14, %v5805_v25 }
 0x5db   : > { %5902 = vst.msk [vmem:[%s11934_s14 + $0x1e0] sm:$0xff] %vm1887_vm6, %v5870_v24  ;;  %v6087_v18 = vpop.permute.xlu1 %6086 }
 0x5dc   : > { %v6155_v39 = vsel %vm278_vm1, %v12905_v9, %v6087_v18 }
 0x5dd   : > { %6364 = vst.msk [vmem:[%s11934_s14 + $0x1b8] sm:$0xff] %vm1887_vm6, %v6155_v39  ;;  %v6085_v50 = vpop.permute.xlu0 %6084 }
 0x5de   : > { %v6154_v33 = vsel %vm278_vm1, %v12908_v52, %v6085_v50 }
 0x5df   : > { %6363 = vst.msk [vmem:[%s11934_s14 + $0x1b0] sm:$0xff] %vm1887_vm6, %v6154_v33 }
 0x5e5   : > { %v6091_v15 = vpop.permute.xlu1 %6090 }
 0x5e6   : > { %v6157_v14 = vsel %vm278_vm1, %v12913_v38, %v6091_v15 }
 0x5e7   : > { %6366 = vst.msk [vmem:[%s11934_s14 + $0x1d8] sm:$0xff] %vm1887_vm6, %v6157_v14  ;;  %v6089_v17 = vpop.permute.xlu0 %6088 }
 0x5e8   : > { %v6156_v9 = vsel %vm278_vm1, %v12916_v28, %v6089_v17 }
 0x5e9   : > { %6365 = vst.msk [vmem:[%s11934_s14 + $0x1d0] sm:$0xff] %vm1887_vm6, %v6156_v9 }
 0x5ed   : > { %v6095_v52 = vpop.permute.xlu1 %6094  ;;  %v6093_v7 = vpop.permute.xlu0 %6092 }
 0x5ee   : > { %v6159_v38 = vsel %vm278_vm1, %v12931_v12, %v6095_v52  ;;  %v6158_v28 = vsel %vm278_vm1, %v12934_v19, %v6093_v7 }
 0x5ef   : > { %6368 = vst.msk [vmem:[%s11934_s14 + $0x1f8] sm:$0xff] %vm1887_vm6, %v6159_v38  ;;  %6367 = vst.msk [vmem:[%s11934_s14 + $0x1f0] sm:$0xff] %vm1887_vm6, %v6158_v28 }
 0x5f0   : > { %8015 = shalt.err (!%p8012_p3)
}
 0x5f1   : > { %s8016_s9 = scalar_lea.hbm %s13057_s20, 8192  ;;  %s8020_s18 = scalar_lea.hbm %s13119_s7, 16384 }
 0x5f2   : > { %p8017_p4 = scmp.ne.s32.totalorder %s13057_s20, %s8016_s9  ;;  %p8021_p9 = scmp.lt.s32.totalorder %s13057_s20, %s13119_s7 }
 0x5f3   : > { %p8022_p10 = scmp.lt.s32.totalorder %s8020_s18, %s8016_s9 }
 0x5f4   : > { %p8018_p7 = pnand %p8017_p4, %p8153_p5 }
 0x5f5   : > { %p8023_p11 = por %p8022_p10, %p8021_p9 }
 0x5f6   : > { %p8019_p8 = pneg %p8018_p7 }
 0x5f8   : > { %p8024_p12 = pnand %p8023_p11, %p8019_p8 }
 0x5fa   : > { %8027 = shalt.err (!%p8024_p12)
}
 0x5fb   : > { %s8074_s17 = smov 128  }
 0x5fc   : > { %6559 = dma.vmem_to_hbm [thread:$0]  (%p8153_p5), %s13059_s8, 8192, %s13057_s20, %s13071_s28, %s8074_s17, %s8074_s17, %s8066_s21  }
 0x5fd PF: > { %p6565_p13 = scmp.ge.s32.totalorder %s8062_s27, 2  ;;  %s6222_s22 = sand.u32 1, %s8050_s24  }
 0x5fe   : > { %s6223_s19 = scalar_lea.sflag [#allocation5], %s6222_s22 }
 0x5ff   : > { %p6562_p0 = pnand %p6565_p13, %p8157_p6 }
 0x601   : > { %p6563_p1 = pneg %p6562_p0 }
 0x603   : > { %8045 = dma.done.wait (%p6563_p1), %s6223_s19, 8192  }
 0x604   : > { %8047 = vsyncadd (%p6563_p1), %s6223_s19, 4294959104  ;;  %p17_p2 = scmp.ge.s32.totalorder %s8140_s30, 4   ;;  %s13801_s24 = smov %s8054_s25 }
 0x605   : > { %s13802_s25 = smov %s8058_s26  ;;  %s13803_s26 = smov %s8151_s10 }
 0x606   : > { %s13804_s27 = smov %s8140_s30  ;;  %19 = sbr.rel (!%p17_p2) target bundleno = 3 (0x3), region = 87 }
 0x60b   :  { %6228 = vsyncpa [#allocation5], 1 }
 0x60c   :  { %6230 = vsyncpa [#allocation5 + $0x1], 1 }

</bundles_post_ra>
